<compile_context>
chip_gen: v5e
topology: v5e:2x2
jax: 0.10.0
libtpu: 0.0.40
codegen_flags: <defaults>
</compile_context>

<pallas_src>
import jax
import jax.numpy as jnp
from jax.experimental import pallas as pl
from jax.experimental.pallas import tpu as pltpu

INPUT_DIM = 2
HIDDEN_DIM = 50
OUTPUT_DIM = 1
NUM_LAYERS = 4            # -> (NUM_LAYERS - 1) = 3 hidden 50->50 layers
GEN_HIDDEN = 20
NUM_ACTS = 6


def adaptive_pinn_kernel(x_ref,
                         wg1_ref, bg1_ref, wg2_ref, bg2_ref,
                         win_ref, bin_ref,
                         wh_ref, bh_ref,
                         wout_ref, bout_ref,
                         o_ref):
    xc = x_ref[...]                                    # (INPUT_DIM, TM)
    tm = xc.shape[1]

    # --- ActivationGenerator: softmax(Linear(ReLU(Linear(coords)))) ---
    # 2 -> 20 layer as VPU broadcast-MACs (K=2; not worth MXU push/pop latency).
    h = (wg1_ref[:, 0:1] * xc[0:1, :]
         + wg1_ref[:, 1:2] * xc[1:2, :]
         + bg1_ref[...])                               # (GEN_HIDDEN, TM)
    h = jnp.maximum(h, 0.0)
    logits = (jnp.dot(wg2_ref[...], h, preferred_element_type=jnp.float32)
              + bg2_ref[...])                          # (NUM_ACTS, TM)
    logits = logits - jnp.max(logits, axis=0, keepdims=True)
    e = jnp.exp(logits)
    w = e / jnp.sum(e, axis=0, keepdims=True)          # exact divide, (6, TM)

    # Hoisted sublane-broadcasts of the mixture weights: 6 per tile (JAX does
    # not CSE broadcast_in_dim), combinations folded at (1, TM) width first.
    def bcast(row):                                    # (1, TM) -> (HIDDEN, TM)
        return jnp.broadcast_to(row, (HIDDEN_DIM, tm))

    w_tanh = bcast(w[0:1, :])
    w_sig = bcast(w[2:3, :])
    w_sin = bcast(w[3:4, :])
    w_swish = bcast(w[4:5, :])
    w_pos = bcast(w[1:2, :] + w[5:6, :])               # ReLU + LeakyReLU, x>=0
    w_neg = bcast(0.1 * w[5:6, :])                     # LeakyReLU, x<0

    def adaptive(x):
        # sigmoid(x) = 0.5*(1 + tanh(x/2)) — one EUP op instead of exp+recip.
        sig = 0.5 + 0.5 * jnp.tanh(0.5 * x)
        out = w_tanh * jnp.tanh(x)                     # Tanh
        out = out + w_sin * jnp.sin(x)                 # Sin
        out = out + sig * (w_sig + w_swish * x)        # Sigmoid + Swish
        out = out + x * jnp.where(x >= 0.0, w_pos, w_neg)  # ReLU + LeakyReLU
        return out

    # --- PINN trunk with adaptive activation after every hidden linear ---
    f = (win_ref[:, 0:1] * xc[0:1, :]
         + win_ref[:, 1:2] * xc[1:2, :]
         + bin_ref[...])                               # (HIDDEN_DIM, TM)
    f = adaptive(f)
    for layer in range(NUM_LAYERS - 1):                # static unroll (3)
        f = (jnp.dot(wh_ref[layer], f, preferred_element_type=jnp.float32)
             + bh_ref[layer])
        f = adaptive(f)

    # 50 -> 1 output layer: multiply + sublane reduce; (1, TM) lane-dense store.
    o_ref[...] = (jnp.sum(wout_ref[...] * f, axis=0, keepdims=True)
                  + bout_ref[...]).astype(o_ref.dtype)


def _round_up(a, m):
    return ((a + m - 1) // m) * m


def adaptive_pinn_forward(x, params, *, tm=512):
    """x: (n, INPUT_DIM) -> (n, OUTPUT_DIM)."""
    (wg1, bg1, wg2, bg2, win, bin_, wh, bh, wout, bout) = params
    n = x.shape[0]

    # Batch maps to lanes: pad to a multiple of 128 and of the batch tile.
    n_pad = _round_up(max(n, 128), 128)
    tm = max(128, min(_round_up(tm, 128), n_pad))
    n_pad = _round_up(n_pad, tm)
    grid = (n_pad // tm,)

    x_t = jnp.pad(x.astype(jnp.float32).T, ((0, 0), (0, n_pad - n)))

    def full_spec(arr):
        nd = arr.ndim
        return pl.BlockSpec(arr.shape, lambda i, _nd=nd: (0,) * _nd)

    in_specs = [
        pl.BlockSpec((INPUT_DIM, tm), lambda i: (0, i)),       # coords
        full_spec(wg1), full_spec(bg1), full_spec(wg2), full_spec(bg2),
        full_spec(win), full_spec(bin_),
        full_spec(wh), full_spec(bh),
        full_spec(wout), full_spec(bout),
    ]
    out_spec = pl.BlockSpec((OUTPUT_DIM, tm), lambda i: (0, i))

    # Advisory cost estimate: the kernel is EUP/VALU dominated, not MXU.
    flops_per_col = 2 * (INPUT_DIM * GEN_HIDDEN + GEN_HIDDEN * NUM_ACTS
                         + INPUT_DIM * HIDDEN_DIM
                         + (NUM_LAYERS - 1) * HIDDEN_DIM * HIDDEN_DIM
                         + HIDDEN_DIM * OUTPUT_DIM)
    transc_per_col = NUM_ACTS + NUM_LAYERS * HIDDEN_DIM * 3
    param_bytes = sum(int(p.size) * 4 for p in
                      (wg1, bg1, wg2, bg2, win, bin_, wh, bh, wout, bout))
    cost = pl.CostEstimate(
        flops=n_pad * flops_per_col,
        transcendentals=n_pad * transc_per_col,
        bytes_accessed=n_pad * (INPUT_DIM + OUTPUT_DIM) * 4 + param_bytes,
    )

    out = pl.pallas_call(
        adaptive_pinn_kernel,
        out_shape=jax.ShapeDtypeStruct((OUTPUT_DIM, n_pad), jnp.float32),
        grid_spec=pltpu.PrefetchScalarGridSpec(
            num_scalar_prefetch=0,
            grid=grid,
            in_specs=in_specs,
            out_specs=out_spec,
        ),
        compiler_params=pltpu.CompilerParams(
            dimension_semantics=("parallel",)),
        cost_estimate=cost,
    )(x_t, wg1, bg1, wg2, bg2, win, bin_, wh, bh, wout, bout)

    return out[:, :n].T                                 # (n, OUTPUT_DIM)


def init_params(key):
    """Deterministic xavier-normal weights, zero biases (matches __init__).

    Weights are stored (out_features, in_features) so each layer is W @ f in
    the transposed (features-on-sublanes) kernel layout; biases are (out, 1).
    wout is kept (in, out)=(50, 1) for the multiply+reduce output layer.
    """
    def xavier(k, shape, fan_in, fan_out):
        std = (2.0 / (fan_in + fan_out)) ** 0.5
        return std * jax.random.normal(k, shape, dtype=jnp.float32)

    ks = jax.random.split(key, 8)
    wg1 = xavier(ks[0], (GEN_HIDDEN, INPUT_DIM), INPUT_DIM, GEN_HIDDEN)
    bg1 = jnp.zeros((GEN_HIDDEN, 1), jnp.float32)
    wg2 = xavier(ks[1], (NUM_ACTS, GEN_HIDDEN), GEN_HIDDEN, NUM_ACTS)
    bg2 = jnp.zeros((NUM_ACTS, 1), jnp.float32)
    win = xavier(ks[2], (HIDDEN_DIM, INPUT_DIM), INPUT_DIM, HIDDEN_DIM)
    bin_ = jnp.zeros((HIDDEN_DIM, 1), jnp.float32)
    wh = jnp.stack([xavier(ks[3 + i], (HIDDEN_DIM, HIDDEN_DIM),
                           HIDDEN_DIM, HIDDEN_DIM)
                    for i in range(NUM_LAYERS - 1)], axis=0)   # (3, 50, 50)
    bh = jnp.zeros((NUM_LAYERS - 1, HIDDEN_DIM, 1), jnp.float32)
    wout = xavier(ks[6], (HIDDEN_DIM, OUTPUT_DIM), HIDDEN_DIM, OUTPUT_DIM)
    bout = jnp.zeros((OUTPUT_DIM, 1), jnp.float32)
    return (wg1, bg1, wg2, bg2, win, bin_, wh, bh, wout, bout)


def reference_forward(x, params):
    """Pure-JAX reference mirroring the PyTorch module exactly.

    Uses Precision.HIGHEST so the comparison is against f32-accurate matmuls.
    """
    (wg1, bg1, wg2, bg2, win, bin_, wh, bh, wout, bout) = params
    hp = jax.lax.Precision.HIGHEST

    def gen_weights(c):
        h = jnp.maximum(jnp.dot(c, wg1.T, precision=hp) + bg1.T, 0.0)
        logits = jnp.dot(h, wg2.T, precision=hp) + bg2.T
        return jax.nn.softmax(logits, axis=1)

    def adaptive(f, c):
        w = gen_weights(c)
        sig = jax.nn.sigmoid(f)
        acts = [jnp.tanh(f), jnp.maximum(f, 0.0), sig, jnp.sin(f), f * sig,
                jnp.where(f >= 0.0, f, 0.1 * f)]
        out = jnp.zeros_like(f)
        for i, a in enumerate(acts):
            out = out + w[:, i:i + 1] * a
        return out

    f = jnp.dot(x, win.T, precision=hp) + bin_.T
    f = adaptive(f, x)
    for layer in range(NUM_LAYERS - 1):
        f = jnp.dot(f, wh[layer].T, precision=hp) + bh[layer].T
        f = adaptive(f, x)
    return jnp.dot(f, wout, precision=hp) + bout.T


if __name__ == "__main__":
    key = jax.random.PRNGKey(0)
    pkey, xkey = jax.random.split(key)
    params = init_params(pkey)

    N = 512                    # small demo batch; tm=128 -> 4 grid steps
    x = jax.random.normal(xkey, (N, INPUT_DIM), dtype=jnp.float32)

    out = adaptive_pinn_forward(x, params, tm=128)
    out = jax.block_until_ready(out)

    ref = reference_forward(x, params)
    assert out.shape == (N, OUTPUT_DIM)
    assert jnp.allclose(out, ref, atol=2e-3, rtol=2e-3), "mismatch vs reference"
    print("KERNEL_OK")
</pallas_src>

<mosaic_0001>
module attributes {stable_mosaic.version = 11 : i64} {
  func.func @adaptive_pinn_kernel(%arg0: i32, %arg1: memref<2x128xf32, #tpu.memory_space<vmem>>, %arg2: memref<20x2xf32, #tpu.memory_space<vmem>>, %arg3: memref<20x1xf32, #tpu.memory_space<vmem>>, %arg4: memref<6x20xf32, #tpu.memory_space<vmem>>, %arg5: memref<6x1xf32, #tpu.memory_space<vmem>>, %arg6: memref<50x2xf32, #tpu.memory_space<vmem>>, %arg7: memref<50x1xf32, #tpu.memory_space<vmem>>, %arg8: memref<3x50x50xf32, #tpu.memory_space<vmem>>, %arg9: memref<3x50x1xf32, #tpu.memory_space<vmem>>, %arg10: memref<50x1xf32, #tpu.memory_space<vmem>>, %arg11: memref<1x1xf32, #tpu.memory_space<vmem>>, %arg12: memref<1x128xf32, #tpu.memory_space<vmem>>) attributes {dimension_semantics = [#tpu.dimension_semantics<parallel>], iteration_bounds = array<i64: 4>, scalar_prefetch = 0 : i64, scratch_operands = 0 : i64, tpu.core_type = #tpu.core_type<tc>, window_params = [{transform_indices = @transform_0, window_bounds = array<i64: 2, 128>}, {pipeline_mode = #tpu.pipeline_mode<synchronous>, transform_indices = @transform_1, window_bounds = array<i64: 20, 2>}, {pipeline_mode = #tpu.pipeline_mode<synchronous>, transform_indices = @transform_2, window_bounds = array<i64: 20, 1>}, {pipeline_mode = #tpu.pipeline_mode<synchronous>, transform_indices = @transform_3, window_bounds = array<i64: 6, 20>}, {pipeline_mode = #tpu.pipeline_mode<synchronous>, transform_indices = @transform_4, window_bounds = array<i64: 6, 1>}, {pipeline_mode = #tpu.pipeline_mode<synchronous>, transform_indices = @transform_5, window_bounds = array<i64: 50, 2>}, {pipeline_mode = #tpu.pipeline_mode<synchronous>, transform_indices = @transform_6, window_bounds = array<i64: 50, 1>}, {pipeline_mode = #tpu.pipeline_mode<synchronous>, transform_indices = @transform_7, window_bounds = array<i64: 3, 50, 50>}, {pipeline_mode = #tpu.pipeline_mode<synchronous>, transform_indices = @transform_8, window_bounds = array<i64: 3, 50, 1>}, {pipeline_mode = #tpu.pipeline_mode<synchronous>, transform_indices = @transform_9, window_bounds = array<i64: 50, 1>}, {pipeline_mode = #tpu.pipeline_mode<synchronous>, transform_indices = @transform_10, window_bounds = array<i64: 1, 1>}, {transform_indices = @transform_11, window_bounds = array<i64: 1, 128>}]} {
    %c0 = arith.constant 0 : index
    %c0_0 = arith.constant 0 : index
    %0 = vector.load %arg1[%c0, %c0_0] : memref<2x128xf32, #tpu.memory_space<vmem>>, vector<2x128xf32>
    %c0_1 = arith.constant 0 : index
    %c0_2 = arith.constant 0 : index
    %1 = vector.load %arg2[%c0_1, %c0_2] : memref<20x2xf32, #tpu.memory_space<vmem>>, vector<20x1xf32>
    %2 = vector.extract_strided_slice %0 {offsets = [0, 0], sizes = [1, 128], strides = [1, 1]} : vector<2x128xf32> to vector<1x128xf32>
    %3 = vector.broadcast %1 : vector<20x1xf32> to vector<20x128xf32>
    %4 = vector.broadcast %2 : vector<1x128xf32> to vector<20x128xf32>
    %5 = arith.mulf %3, %4 : vector<20x128xf32>
    %c0_3 = arith.constant 0 : index
    %c1 = arith.constant 1 : index
    %6 = vector.load %arg2[%c0_3, %c1] : memref<20x2xf32, #tpu.memory_space<vmem>>, vector<20x1xf32>
    %7 = vector.extract_strided_slice %0 {offsets = [1, 0], sizes = [1, 128], strides = [1, 1]} : vector<2x128xf32> to vector<1x128xf32>
    %8 = vector.broadcast %6 : vector<20x1xf32> to vector<20x128xf32>
    %9 = vector.broadcast %7 : vector<1x128xf32> to vector<20x128xf32>
    %10 = arith.mulf %8, %9 : vector<20x128xf32>
    %11 = arith.addf %5, %10 : vector<20x128xf32>
    %c0_4 = arith.constant 0 : index
    %c0_5 = arith.constant 0 : index
    %12 = vector.load %arg3[%c0_4, %c0_5] : memref<20x1xf32, #tpu.memory_space<vmem>>, vector<20x1xf32>
    %13 = vector.broadcast %12 : vector<20x1xf32> to vector<20x128xf32>
    %14 = arith.addf %11, %13 : vector<20x128xf32>
    %cst = arith.constant 0.000000e+00 : f32
    %15 = vector.broadcast %cst : f32 to vector<20x128xf32>
    %16 = arith.maximumf %14, %15 : vector<20x128xf32>
    %c0_6 = arith.constant 0 : index
    %c0_7 = arith.constant 0 : index
    %17 = vector.load %arg4[%c0_6, %c0_7] : memref<6x20xf32, #tpu.memory_space<vmem>>, vector<6x20xf32>
    %cst_8 = arith.constant dense<0.000000e+00> : vector<6x128xf32>
    %18 = tpu.matmul %17, %16, %cst_8 {dimension_numbers = #tpu.dot_dimension_numbers<[1], [0], [0], [1], [0, 0, 1, 1], [], []>} : vector<6x20xf32>, vector<20x128xf32>, vector<6x128xf32> -> vector<6x128xf32>
    %c0_9 = arith.constant 0 : index
    %c0_10 = arith.constant 0 : index
    %19 = vector.load %arg5[%c0_9, %c0_10] : memref<6x1xf32, #tpu.memory_space<vmem>>, vector<6x1xf32>
    %20 = vector.broadcast %19 : vector<6x1xf32> to vector<6x128xf32>
    %21 = arith.addf %18, %20 : vector<6x128xf32>
    %cst_11 = arith.constant dense<0xFF800000> : vector<128xf32>
    %22 = vector.multi_reduction <maximumf>, %21, %cst_11 [0] : vector<6x128xf32> to vector<128xf32>
    %23 = vector.shape_cast %22 : vector<128xf32> to vector<1x128xf32>
    %24 = vector.broadcast %23 : vector<1x128xf32> to vector<6x128xf32>
    %25 = arith.subf %21, %24 : vector<6x128xf32>
    %26 = math.exp %25 : vector<6x128xf32>
    %cst_12 = arith.constant dense<0.000000e+00> : vector<128xf32>
    %27 = vector.multi_reduction <add>, %26, %cst_12 [0] : vector<6x128xf32> to vector<128xf32>
    %28 = vector.shape_cast %27 : vector<128xf32> to vector<1x128xf32>
    %29 = vector.broadcast %28 : vector<1x128xf32> to vector<6x128xf32>
    %30 = arith.divf %26, %29 : vector<6x128xf32>
    %31 = vector.extract_strided_slice %30 {offsets = [0, 0], sizes = [1, 128], strides = [1, 1]} : vector<6x128xf32> to vector<1x128xf32>
    %32 = vector.shape_cast %31 : vector<1x128xf32> to vector<1x128xf32>
    %33 = vector.broadcast %32 : vector<1x128xf32> to vector<50x128xf32>
    %34 = vector.extract_strided_slice %30 {offsets = [2, 0], sizes = [1, 128], strides = [1, 1]} : vector<6x128xf32> to vector<1x128xf32>
    %35 = vector.shape_cast %34 : vector<1x128xf32> to vector<1x128xf32>
    %36 = vector.broadcast %35 : vector<1x128xf32> to vector<50x128xf32>
    %37 = vector.extract_strided_slice %30 {offsets = [3, 0], sizes = [1, 128], strides = [1, 1]} : vector<6x128xf32> to vector<1x128xf32>
    %38 = vector.shape_cast %37 : vector<1x128xf32> to vector<1x128xf32>
    %39 = vector.broadcast %38 : vector<1x128xf32> to vector<50x128xf32>
    %40 = vector.extract_strided_slice %30 {offsets = [4, 0], sizes = [1, 128], strides = [1, 1]} : vector<6x128xf32> to vector<1x128xf32>
    %41 = vector.shape_cast %40 : vector<1x128xf32> to vector<1x128xf32>
    %42 = vector.broadcast %41 : vector<1x128xf32> to vector<50x128xf32>
    %43 = vector.extract_strided_slice %30 {offsets = [1, 0], sizes = [1, 128], strides = [1, 1]} : vector<6x128xf32> to vector<1x128xf32>
    %44 = vector.extract_strided_slice %30 {offsets = [5, 0], sizes = [1, 128], strides = [1, 1]} : vector<6x128xf32> to vector<1x128xf32>
    %45 = arith.addf %43, %44 : vector<1x128xf32>
    %46 = vector.shape_cast %45 : vector<1x128xf32> to vector<1x128xf32>
    %47 = vector.broadcast %46 : vector<1x128xf32> to vector<50x128xf32>
    %48 = vector.extract_strided_slice %30 {offsets = [5, 0], sizes = [1, 128], strides = [1, 1]} : vector<6x128xf32> to vector<1x128xf32>
    %cst_13 = arith.constant 1.000000e-01 : f32
    %49 = vector.broadcast %cst_13 : f32 to vector<1x128xf32>
    %50 = arith.mulf %49, %48 : vector<1x128xf32>
    %51 = vector.shape_cast %50 : vector<1x128xf32> to vector<1x128xf32>
    %52 = vector.broadcast %51 : vector<1x128xf32> to vector<50x128xf32>
    %c0_14 = arith.constant 0 : index
    %c0_15 = arith.constant 0 : index
    %53 = vector.load %arg6[%c0_14, %c0_15] : memref<50x2xf32, #tpu.memory_space<vmem>>, vector<50x1xf32>
    %54 = vector.extract_strided_slice %0 {offsets = [0, 0], sizes = [1, 128], strides = [1, 1]} : vector<2x128xf32> to vector<1x128xf32>
    %55 = vector.broadcast %53 : vector<50x1xf32> to vector<50x128xf32>
    %56 = vector.broadcast %54 : vector<1x128xf32> to vector<50x128xf32>
    %57 = arith.mulf %55, %56 : vector<50x128xf32>
    %c0_16 = arith.constant 0 : index
    %c1_17 = arith.constant 1 : index
    %58 = vector.load %arg6[%c0_16, %c1_17] : memref<50x2xf32, #tpu.memory_space<vmem>>, vector<50x1xf32>
    %59 = vector.extract_strided_slice %0 {offsets = [1, 0], sizes = [1, 128], strides = [1, 1]} : vector<2x128xf32> to vector<1x128xf32>
    %60 = vector.broadcast %58 : vector<50x1xf32> to vector<50x128xf32>
    %61 = vector.broadcast %59 : vector<1x128xf32> to vector<50x128xf32>
    %62 = arith.mulf %60, %61 : vector<50x128xf32>
    %63 = arith.addf %57, %62 : vector<50x128xf32>
    %c0_18 = arith.constant 0 : index
    %c0_19 = arith.constant 0 : index
    %64 = vector.load %arg7[%c0_18, %c0_19] : memref<50x1xf32, #tpu.memory_space<vmem>>, vector<50x1xf32>
    %65 = vector.broadcast %64 : vector<50x1xf32> to vector<50x128xf32>
    %66 = arith.addf %63, %65 : vector<50x128xf32>
    %cst_20 = arith.constant 5.000000e-01 : f32
    %67 = vector.broadcast %cst_20 : f32 to vector<50x128xf32>
    %68 = arith.mulf %67, %66 : vector<50x128xf32>
    %69 = math.tanh %68 : vector<50x128xf32>
    %cst_21 = arith.constant 5.000000e-01 : f32
    %70 = vector.broadcast %cst_21 : f32 to vector<50x128xf32>
    %71 = arith.mulf %70, %69 : vector<50x128xf32>
    %cst_22 = arith.constant 5.000000e-01 : f32
    %72 = vector.broadcast %cst_22 : f32 to vector<50x128xf32>
    %73 = arith.addf %72, %71 : vector<50x128xf32>
    %74 = math.tanh %66 : vector<50x128xf32>
    %75 = arith.mulf %33, %74 : vector<50x128xf32>
    %76 = math.sin %66 : vector<50x128xf32>
    %77 = arith.mulf %39, %76 : vector<50x128xf32>
    %78 = arith.addf %75, %77 : vector<50x128xf32>
    %79 = arith.mulf %42, %66 : vector<50x128xf32>
    %80 = arith.addf %36, %79 : vector<50x128xf32>
    %81 = arith.mulf %73, %80 : vector<50x128xf32>
    %82 = arith.addf %78, %81 : vector<50x128xf32>
    %cst_23 = arith.constant 0.000000e+00 : f32
    %83 = vector.broadcast %cst_23 : f32 to vector<50x128xf32>
    %84 = arith.cmpf oge, %66, %83 : vector<50x128xf32>
    %85 = arith.select %84, %47, %52 : vector<50x128xi1>, vector<50x128xf32>
    %86 = arith.mulf %66, %85 : vector<50x128xf32>
    %87 = arith.addf %82, %86 : vector<50x128xf32>
    %c0_24 = arith.constant 0 : index
    %c0_25 = arith.constant 0 : index
    %c0_26 = arith.constant 0 : index
    %88 = vector.load %arg8[%c0_24, %c0_25, %c0_26] : memref<3x50x50xf32, #tpu.memory_space<vmem>>, vector<1x50x50xf32>
    %89 = vector.shape_cast %88 : vector<1x50x50xf32> to vector<50x50xf32>
    %cst_27 = arith.constant dense<0.000000e+00> : vector<50x128xf32>
    %90 = tpu.matmul %89, %87, %cst_27 {dimension_numbers = #tpu.dot_dimension_numbers<[1], [0], [0], [1], [0, 0, 1, 1], [], []>} : vector<50x50xf32>, vector<50x128xf32>, vector<50x128xf32> -> vector<50x128xf32>
    %c0_28 = arith.constant 0 : index
    %c0_29 = arith.constant 0 : index
    %c0_30 = arith.constant 0 : index
    %91 = vector.load %arg9[%c0_28, %c0_29, %c0_30] : memref<3x50x1xf32, #tpu.memory_space<vmem>>, vector<1x50x1xf32>
    %92 = vector.shape_cast %91 : vector<1x50x1xf32> to vector<50x1xf32>
    %93 = vector.broadcast %92 : vector<50x1xf32> to vector<50x128xf32>
    %94 = arith.addf %90, %93 : vector<50x128xf32>
    %cst_31 = arith.constant 5.000000e-01 : f32
    %95 = vector.broadcast %cst_31 : f32 to vector<50x128xf32>
    %96 = arith.mulf %95, %94 : vector<50x128xf32>
    %97 = math.tanh %96 : vector<50x128xf32>
    %cst_32 = arith.constant 5.000000e-01 : f32
    %98 = vector.broadcast %cst_32 : f32 to vector<50x128xf32>
    %99 = arith.mulf %98, %97 : vector<50x128xf32>
    %cst_33 = arith.constant 5.000000e-01 : f32
    %100 = vector.broadcast %cst_33 : f32 to vector<50x128xf32>
    %101 = arith.addf %100, %99 : vector<50x128xf32>
    %102 = math.tanh %94 : vector<50x128xf32>
    %103 = arith.mulf %33, %102 : vector<50x128xf32>
    %104 = math.sin %94 : vector<50x128xf32>
    %105 = arith.mulf %39, %104 : vector<50x128xf32>
    %106 = arith.addf %103, %105 : vector<50x128xf32>
    %107 = arith.mulf %42, %94 : vector<50x128xf32>
    %108 = arith.addf %36, %107 : vector<50x128xf32>
    %109 = arith.mulf %101, %108 : vector<50x128xf32>
    %110 = arith.addf %106, %109 : vector<50x128xf32>
    %cst_34 = arith.constant 0.000000e+00 : f32
    %111 = vector.broadcast %cst_34 : f32 to vector<50x128xf32>
    %112 = arith.cmpf oge, %94, %111 : vector<50x128xf32>
    %113 = arith.select %112, %47, %52 : vector<50x128xi1>, vector<50x128xf32>
    %114 = arith.mulf %94, %113 : vector<50x128xf32>
    %115 = arith.addf %110, %114 : vector<50x128xf32>
    %c1_35 = arith.constant 1 : index
    %c0_36 = arith.constant 0 : index
    %c0_37 = arith.constant 0 : index
    %116 = vector.load %arg8[%c1_35, %c0_36, %c0_37] : memref<3x50x50xf32, #tpu.memory_space<vmem>>, vector<1x50x50xf32>
    %117 = vector.shape_cast %116 : vector<1x50x50xf32> to vector<50x50xf32>
    %cst_38 = arith.constant dense<0.000000e+00> : vector<50x128xf32>
    %118 = tpu.matmul %117, %115, %cst_38 {dimension_numbers = #tpu.dot_dimension_numbers<[1], [0], [0], [1], [0, 0, 1, 1], [], []>} : vector<50x50xf32>, vector<50x128xf32>, vector<50x128xf32> -> vector<50x128xf32>
    %c1_39 = arith.constant 1 : index
    %c0_40 = arith.constant 0 : index
    %c0_41 = arith.constant 0 : index
    %119 = vector.load %arg9[%c1_39, %c0_40, %c0_41] : memref<3x50x1xf32, #tpu.memory_space<vmem>>, vector<1x50x1xf32>
    %120 = vector.shape_cast %119 : vector<1x50x1xf32> to vector<50x1xf32>
    %121 = vector.broadcast %120 : vector<50x1xf32> to vector<50x128xf32>
    %122 = arith.addf %118, %121 : vector<50x128xf32>
    %cst_42 = arith.constant 5.000000e-01 : f32
    %123 = vector.broadcast %cst_42 : f32 to vector<50x128xf32>
    %124 = arith.mulf %123, %122 : vector<50x128xf32>
    %125 = math.tanh %124 : vector<50x128xf32>
    %cst_43 = arith.constant 5.000000e-01 : f32
    %126 = vector.broadcast %cst_43 : f32 to vector<50x128xf32>
    %127 = arith.mulf %126, %125 : vector<50x128xf32>
    %cst_44 = arith.constant 5.000000e-01 : f32
    %128 = vector.broadcast %cst_44 : f32 to vector<50x128xf32>
    %129 = arith.addf %128, %127 : vector<50x128xf32>
    %130 = math.tanh %122 : vector<50x128xf32>
    %131 = arith.mulf %33, %130 : vector<50x128xf32>
    %132 = math.sin %122 : vector<50x128xf32>
    %133 = arith.mulf %39, %132 : vector<50x128xf32>
    %134 = arith.addf %131, %133 : vector<50x128xf32>
    %135 = arith.mulf %42, %122 : vector<50x128xf32>
    %136 = arith.addf %36, %135 : vector<50x128xf32>
    %137 = arith.mulf %129, %136 : vector<50x128xf32>
    %138 = arith.addf %134, %137 : vector<50x128xf32>
    %cst_45 = arith.constant 0.000000e+00 : f32
    %139 = vector.broadcast %cst_45 : f32 to vector<50x128xf32>
    %140 = arith.cmpf oge, %122, %139 : vector<50x128xf32>
    %141 = arith.select %140, %47, %52 : vector<50x128xi1>, vector<50x128xf32>
    %142 = arith.mulf %122, %141 : vector<50x128xf32>
    %143 = arith.addf %138, %142 : vector<50x128xf32>
    %c2 = arith.constant 2 : index
    %c0_46 = arith.constant 0 : index
    %c0_47 = arith.constant 0 : index
    %144 = vector.load %arg8[%c2, %c0_46, %c0_47] : memref<3x50x50xf32, #tpu.memory_space<vmem>>, vector<1x50x50xf32>
    %145 = vector.shape_cast %144 : vector<1x50x50xf32> to vector<50x50xf32>
    %cst_48 = arith.constant dense<0.000000e+00> : vector<50x128xf32>
    %146 = tpu.matmul %145, %143, %cst_48 {dimension_numbers = #tpu.dot_dimension_numbers<[1], [0], [0], [1], [0, 0, 1, 1], [], []>} : vector<50x50xf32>, vector<50x128xf32>, vector<50x128xf32> -> vector<50x128xf32>
    %c2_49 = arith.constant 2 : index
    %c0_50 = arith.constant 0 : index
    %c0_51 = arith.constant 0 : index
    %147 = vector.load %arg9[%c2_49, %c0_50, %c0_51] : memref<3x50x1xf32, #tpu.memory_space<vmem>>, vector<1x50x1xf32>
    %148 = vector.shape_cast %147 : vector<1x50x1xf32> to vector<50x1xf32>
    %149 = vector.broadcast %148 : vector<50x1xf32> to vector<50x128xf32>
    %150 = arith.addf %146, %149 : vector<50x128xf32>
    %cst_52 = arith.constant 5.000000e-01 : f32
    %151 = vector.broadcast %cst_52 : f32 to vector<50x128xf32>
    %152 = arith.mulf %151, %150 : vector<50x128xf32>
    %153 = math.tanh %152 : vector<50x128xf32>
    %cst_53 = arith.constant 5.000000e-01 : f32
    %154 = vector.broadcast %cst_53 : f32 to vector<50x128xf32>
    %155 = arith.mulf %154, %153 : vector<50x128xf32>
    %cst_54 = arith.constant 5.000000e-01 : f32
    %156 = vector.broadcast %cst_54 : f32 to vector<50x128xf32>
    %157 = arith.addf %156, %155 : vector<50x128xf32>
    %158 = math.tanh %150 : vector<50x128xf32>
    %159 = arith.mulf %33, %158 : vector<50x128xf32>
    %160 = math.sin %150 : vector<50x128xf32>
    %161 = arith.mulf %39, %160 : vector<50x128xf32>
    %162 = arith.addf %159, %161 : vector<50x128xf32>
    %163 = arith.mulf %42, %150 : vector<50x128xf32>
    %164 = arith.addf %36, %163 : vector<50x128xf32>
    %165 = arith.mulf %157, %164 : vector<50x128xf32>
    %166 = arith.addf %162, %165 : vector<50x128xf32>
    %cst_55 = arith.constant 0.000000e+00 : f32
    %167 = vector.broadcast %cst_55 : f32 to vector<50x128xf32>
    %168 = arith.cmpf oge, %150, %167 : vector<50x128xf32>
    %169 = arith.select %168, %47, %52 : vector<50x128xi1>, vector<50x128xf32>
    %170 = arith.mulf %150, %169 : vector<50x128xf32>
    %171 = arith.addf %166, %170 : vector<50x128xf32>
    %c0_56 = arith.constant 0 : index
    %c0_57 = arith.constant 0 : index
    %172 = vector.load %arg10[%c0_56, %c0_57] : memref<50x1xf32, #tpu.memory_space<vmem>>, vector<50x1xf32>
    %173 = vector.broadcast %172 : vector<50x1xf32> to vector<50x128xf32>
    %174 = arith.mulf %173, %171 : vector<50x128xf32>
    %cst_58 = arith.constant dense<0.000000e+00> : vector<128xf32>
    %175 = vector.multi_reduction <add>, %174, %cst_58 [0] : vector<50x128xf32> to vector<128xf32>
    %176 = vector.shape_cast %175 : vector<128xf32> to vector<1x128xf32>
    %c0_59 = arith.constant 0 : index
    %c0_60 = arith.constant 0 : index
    %177 = vector.load %arg11[%c0_59, %c0_60] : memref<1x1xf32, #tpu.memory_space<vmem>>, vector<1x1xf32>
    %178 = vector.broadcast %177 : vector<1x1xf32> to vector<1x128xf32>
    %179 = arith.addf %176, %178 : vector<1x128xf32>
    %c0_61 = arith.constant 0 : index
    %c0_62 = arith.constant 0 : index
    %180 = vector.load %arg12[%c0_61, %c0_62] : memref<1x128xf32, #tpu.memory_space<vmem>>, vector<1x128xf32>
    tpu.vector_store %arg12[%c0_61, %c0_62], %179 {strides = array<i32>} : memref<1x128xf32, #tpu.memory_space<vmem>>, vector<1x128xf32>,
    return
  }
  func.func @transform_0(%arg0: i32) -> (i32, i32) {
    %c0_i32 = arith.constant 0 : i32
    %c0_i32_0 = arith.constant 0 : i32
    return %c0_i32, %arg0 : i32, i32
  }
  func.func @transform_1(%arg0: i32) -> (i32, i32) {
    %c0_i32 = arith.constant 0 : i32
    %c0_i32_0 = arith.constant 0 : i32
    %c0_i32_1 = arith.constant 0 : i32
    return %c0_i32, %c0_i32_0 : i32, i32
  }
  func.func @transform_2(%arg0: i32) -> (i32, i32) {
    %c0_i32 = arith.constant 0 : i32
    %c0_i32_0 = arith.constant 0 : i32
    %c0_i32_1 = arith.constant 0 : i32
    return %c0_i32, %c0_i32_0 : i32, i32
  }
  func.func @transform_3(%arg0: i32) -> (i32, i32) {
    %c0_i32 = arith.constant 0 : i32
    %c0_i32_0 = arith.constant 0 : i32
    %c0_i32_1 = arith.constant 0 : i32
    return %c0_i32, %c0_i32_0 : i32, i32
  }
  func.func @transform_4(%arg0: i32) -> (i32, i32) {
    %c0_i32 = arith.constant 0 : i32
    %c0_i32_0 = arith.constant 0 : i32
    %c0_i32_1 = arith.constant 0 : i32
    return %c0_i32, %c0_i32_0 : i32, i32
  }
  func.func @transform_5(%arg0: i32) -> (i32, i32) {
    %c0_i32 = arith.constant 0 : i32
    %c0_i32_0 = arith.constant 0 : i32
    %c0_i32_1 = arith.constant 0 : i32
    return %c0_i32, %c0_i32_0 : i32, i32
  }
  func.func @transform_6(%arg0: i32) -> (i32, i32) {
    %c0_i32 = arith.constant 0 : i32
    %c0_i32_0 = arith.constant 0 : i32
    %c0_i32_1 = arith.constant 0 : i32
    return %c0_i32, %c0_i32_0 : i32, i32
  }
  func.func @transform_7(%arg0: i32) -> (i32, i32, i32) {
    %c0_i32 = arith.constant 0 : i32
    %c0_i32_0 = arith.constant 0 : i32
    %c0_i32_1 = arith.constant 0 : i32
    %c0_i32_2 = arith.constant 0 : i32
    return %c0_i32, %c0_i32_0, %c0_i32_1 : i32, i32, i32
  }
  func.func @transform_8(%arg0: i32) -> (i32, i32, i32) {
    %c0_i32 = arith.constant 0 : i32
    %c0_i32_0 = arith.constant 0 : i32
    %c0_i32_1 = arith.constant 0 : i32
    %c0_i32_2 = arith.constant 0 : i32
    return %c0_i32, %c0_i32_0, %c0_i32_1 : i32, i32, i32
  }
  func.func @transform_9(%arg0: i32) -> (i32, i32) {
    %c0_i32 = arith.constant 0 : i32
    %c0_i32_0 = arith.constant 0 : i32
    %c0_i32_1 = arith.constant 0 : i32
    return %c0_i32, %c0_i32_0 : i32, i32
  }
  func.func @transform_10(%arg0: i32) -> (i32, i32) {
    %c0_i32 = arith.constant 0 : i32
    %c0_i32_0 = arith.constant 0 : i32
    %c0_i32_1 = arith.constant 0 : i32
    return %c0_i32, %c0_i32_0 : i32, i32
  }
  func.func @transform_11(%arg0: i32) -> (i32, i32) {
    %c0_i32 = arith.constant 0 : i32
    %c0_i32_0 = arith.constant 0 : i32
    return %c0_i32, %arg0 : i32, i32
  }
}

</mosaic_0001>

<bundles_post_ra>
// kernel: tpu_custom_call.1
= control target key start
LH: loop header
LB: loop body
LE: loop exit
PB: predicated region body
PF: predicated region fallthrough
CT: control target
= control target key end

     0   :  { %s10788_s0 = inlined_call_operand.vmem [shape: f32[2,512], index: 0, kind: input, shape index: {}]   ;;  %s10789_s1 = inlined_call_operand.vmem [shape: f32[20,2], index: 1, kind: input, shape index: {}]   ;;  %s10790_s2 = inlined_call_operand.vmem [shape: f32[20,1], index: 2, kind: input, shape index: {}]   ;;  %s10791_s3 = inlined_call_operand.vmem [shape: f32[6,20], index: 3, kind: input, shape index: {}]   ;;  %s10792_s4 = inlined_call_operand.vmem [shape: f32[6,1], index: 4, kind: input, shape index: {}]   ;;  %s10793_s5 = inlined_call_operand.vmem [shape: f32[50,2], index: 5, kind: input, shape index: {}]   ;;  %s10794_s6 = inlined_call_operand.vmem [shape: f32[50,1], index: 6, kind: input, shape index: {}]   ;;  %s10795_s7 = inlined_call_operand.vmem [shape: f32[3,50,50], index: 7, kind: input, shape index: {}]   ;;  %s10796_s8 = inlined_call_operand.vmem [shape: f32[3,50,1], index: 8, kind: input, shape index: {}]   ;;  %s10797_s9 = inlined_call_operand.vmem [shape: f32[50,1], index: 9, kind: input, shape index: {}]   ;;  %s10798_s10 = inlined_call_operand.<no memory space> [shape: f32[1,1], index: 10, kind: input, shape index: {}]   ;;  %s10799_s11 = inlined_call_operand.hbm [shape: f32[1,512], index: 11, kind: output, shape index: {}]  }
   0x1   :  { %10848 = sst [smem:[#allocation31_spill]] %s10789_s1  ;;  %v16_v0 = vstv %s10798_s10 }
   0x2   :  { %17 = vst [vmem:[#allocation2] sm:$0x1] %v16_v0 }
   0x3   :  { %18 = vsyncpa [#allocation4], 0 }
   0x4   :  { %20 = vsyncpa [#allocation4 + $0x1], 0  ;;  %s6410_s19 = smov 0   ;;  %s6412_s20 = smov 0  }
   0x5   :  { %s6414_s21 = smov 0   ;;  %s6416_s22 = smov 0  }
   0x6 LB: > { %s6431_s10 = sadd.s32 4294967295, %s6337_s22   ;;  %s5934_s23 = sadd.s32 4294967294, %s6337_s22   ;;  %s6337_s22 = sphi %s6416_s22, %s10981_s22   ;;  %s6333_s21 = sphi %s6414_s21, %s10980_s21   ;;  %s6329_s20 = sphi %s6412_s20, %s10979_s20   ;;  %s6325_s19 = sphi %s6410_s19, %s10978_s19  }
   0x7   : > { %s6435_s24 = sadd.s32 1, %s6337_s22   ;;  %s269_s25 = sadd.s32 1, %s6333_s21 }
   0x8   : > { %s266_s26 = ssub.s32 %s6337_s22, %s6435_s24  ;;  %p279_p0 = scmp.ne.s32.totalorder %s6333_s21, %s6329_s20 }
   0x9   : > { %p267_p1 = scmp.eq.s32.totalorder %s266_s26, 0  ;;  %p280_p2 = scmp.eq.s32.totalorder %s6431_s10, 3 }
   0xa   : > { %p285_p3 = scmp.ne.s32.totalorder %s6329_s20, %s6325_s19  ;;  %p286_p4 = scmp.eq.s32.totalorder %s5934_s23, 3 }
   0xb   : > { %s6446_s27 = scalar_select %p267_p1, %s6333_s21, %s269_s25  }
   0xc   : > { %p6448_p5 = por %p280_p2, %p279_p0  ;;  %p6452_p6 = por %p286_p4, %p285_p3 }
   0xd   : > { %p5937_p7 = scmp.ge.s32.totalorder %s6337_s22, 1  ;;  %p341_p8 = scmp.lt.s32.totalorder %s6337_s22, 5 }
   0xf   : > { %p342_p9 = pnand %p5937_p7, %p341_p8 }
  0x11   : > { %345 = sbr.rel (%p342_p9) target bundleno = 2006 (0x7d6), region = 64 }
  0x16   : > { %s10851_s1 = sld [smem:[#allocation31_spill]]  ;;  %v6339_v4 = vmov 1   ;;  %v10813_v5 = vmov 0   ;;  %v425_v6 = vld [vmem:[%s10790_s2] sm:$0xff]  ;;  %v427_v7 = vld [vmem:[%s10790_s2 + $0x10] sm:$0xf]  ;;  %s5875_s12 = scalar_lea.hbm %s10799_s11, %s6431_s10 }
  0x17   : > { %6147 = vset.pattern.permute.xlu0 %v6339_v4  ;;  %6151 = vset.pattern.permute.xlu2 %v10813_v5  ;;  %v426_v8 = vld [vmem:[%s10790_s2 + $0x8] sm:$0xff]  ;;  %v532_v9 = vld [vmem:[%s10793_s5 + $0x20] sm:$0xff]  ;;  %v534_v10 = vld [vmem:[%s10793_s5 + $0x30] sm:$0x3]  ;;  %p379_p10 = scmp.lt.s32.totalorder %s6431_s10, 3  ;;  %vm460_vm0 = vcmask 1043456  }
  0x18   : > { %6149 = vset.pattern.permute.xlu1 %v10813_v5  ;;  %v531_v11 = vld [vmem:[%s10793_s5 + $0x18] sm:$0xff]  ;;  %v533_v12 = vld [vmem:[%s10793_s5 + $0x28] sm:$0xff]  ;;  %v530_v13 = vld [vmem:[%s10793_s5 + $0x10] sm:$0xff]  ;;  %vm456_vm1 = vcmask 162816   ;;  %s6295_s18 = scalar_lea.hbm %s10799_s11, 4 }
  0x19   : > { %v625_v14 = vld [vmem:[%s10794_s6 + $0x30] sm:$0x3]  ;;  %v529_v15 = vld [vmem:[%s10793_s5 + $0x8] sm:$0xff]  ;;  %v528_v17 = vld [vmem:[%s10793_s5] sm:$0xff]  ;;  %s380_s25 = scalar_select %p379_p10, %s6431_s10, 3 }
  0x1a   : > { %v624_v16 = vld [vmem:[%s10794_s6 + $0x28] sm:$0xff]  ;;  %v623_v18 = vld [vmem:[%s10794_s6 + $0x20] sm:$0xff]  ;;  %v622_v20 = vld [vmem:[%s10794_s6 + $0x18] sm:$0xff] }
  0x1b   : > { %v620_v19 = vld [vmem:[%s10794_s6 + $0x8] sm:$0xff]  ;;  %v1878_v21 = vld [vmem:[%s10796_s8 + $0x30] sm:$0x3]  ;;  %v1875_v23 = vld [vmem:[%s10796_s8 + $0x18] sm:$0xff]  ;;  %s5938_s14 = sshll.u32 %s380_s25, 1 }
  0x1c   : > { %v386_v1 = vld [vmem:[%s10851_s1 + $0x10] sm:$0xf]  ;;  %v385_v2 = vld [vmem:[%s10851_s1 + $0x8] sm:$0xff]  ;;  %v384_v3 = vld [vmem:[%s10851_s1] sm:$0xff]  ;;  %s382_s23 = scalar_lea.vmem %s10788_s0, %s5938_s14  ;;  %s5879_s14 = sshll.u32 %s5875_s12, 4  ;;  %s5880_s14 = int_to_ptr.hbm [resolvable:$true] %s5879_s14 }
  0x1d   : > { %415 = vperm.xlu0 %6147, %v386_v1   ;;  %394 = vperm.xlu1 %6149, %v385_v2   ;;  %v621_v22 = vld [vmem:[%s10794_s6 + $0x10] sm:$0xff]  ;;  %v619_v24 = vld [vmem:[%s10794_s6] sm:$0xff]  ;;  %v1877_v27 = vld [vmem:[%s10796_s8 + $0x28] sm:$0xff]  ;;  %s6289_s1 = sshra.s32 %s5880_s14, 4  ;;  %s6290_s1 = int_to_ptr.hbm [resolvable:$true] %s6289_s1 }
  0x1e   : > { %389 = vperm.xlu2 %6151, %v384_v3   ;;  %v450_v25 = vld [vmem:[%s10792_s4] sm:$0x3f]  ;;  %v6002_v30 = vld [vmem:[%s10796_s8 + $0x58] sm:$0xff]  ;;  %v1874_v31 = vld [vmem:[%s10796_s8 + $0x10] sm:$0xff]  ;;  %s6291_s16 = scalar_lea.hbm %s6290_s1, 1  ;;  %p6296_p0 = scmp.lt.s32.totalorder %s6290_s1, %s10799_s11 }
  0x1f   : > { %v1872_v26 = vld [vmem:[%s10796_s8] sm:$0xff]  ;;  %v1873_v32 = vld [vmem:[%s10796_s8 + $0x8] sm:$0xff]  ;;  %v6042_v37 = vld [vmem:[%s10796_s8 + $0x78] sm:$0xff]  ;;  %p6292_p11 = scmp.ne.s32.totalorder %s6290_s1, %s6291_s16  ;;  %p6297_p1 = scmp.lt.s32.totalorder %s6295_s18, %s6291_s16 }
  0x20   : > { %v1876_v28 = vld [vmem:[%s10796_s8 + $0x20] sm:$0xff]  ;;  %v6004_v35 = vld [vmem:[%s10796_s8 + $0x68] sm:$0x3]  ;;  %v6001_v39 = vld [vmem:[%s10796_s8 + $0x50] sm:$0xff] }
  0x21   : > { %v5999_v33 = vld [vmem:[%s10796_s8 + $0x40] sm:$0xff]  ;;  %v6000_v42 = vld [vmem:[%s10796_s8 + $0x48] sm:$0xff]  ;;  %v6045_v43 = vld [vmem:[%s10796_s8 + $0x90] sm:$0xff]  ;;  %p6293_p12 = pnand %p6292_p11, %p6448_p5  ;;  %p6298_p2 = por %p6297_p1, %p6296_p0 }
  0x22   : > { %v6003_v36 = vld [vmem:[%s10796_s8 + $0x60] sm:$0xff]  ;;  %v5998_v45 = vld [vmem:[%s10796_s8 + $0x38] sm:$0xff]  ;;  %v6041_v46 = vld [vmem:[%s10796_s8 + $0x70] sm:$0xff] }
  0x23   : > { %v383_v44 = vld [vmem:[%s382_s23] sm:$0x3]  ;;  %v6044_v61 = vld [vmem:[%s10796_s8 + $0x88] sm:$0xff]  ;;  %s377_s23 = sand.u32 1, %s6329_s20   ;;  %p6294_p13 = pneg %p6293_p12 }
  0x24   : > { %v6584_v47 = vperm.slane %v383_v44, 0  ;;  %v6586_v48 = vperm.slane %v383_v44, 1  ;;  %v5795_v53 = vld [vmem:[%s10797_s9] sm:$0xff]  ;;  %s378_s25 = scalar_lea.vmem [#allocation3], %s377_s23  ;;  %s5867_s15 = scalar_lea.sflag [#allocation4], %s377_s23 }
  0x25   : > { %6148 = vset.pattern.permute.xlu0 %v10813_v5  ;;  %6150 = vset.pattern.permute.xlu1 %v6339_v4  ;;  %v6043_v60 = vld [vmem:[%s10796_s8 + $0x80] sm:$0xff]  ;;  %s5877_s13 = sshll.u32 %s378_s25, 4  ;;  %p6299_p3 = pnand %p6298_p2, %p6294_p13  ;;  %s5878_s13 = int_to_ptr.vmem [resolvable:$true] %s5877_s13 }
  0x26   : > { %6152 = vset.pattern.permute.xlu2 %v6339_v4  ;;  %399 = vperm.xlu0 %6148, %v386_v1  }
  0x27   : > { %411 = vperm.xlu1 %6150, %v385_v2   ;;  %407 = vperm.xlu2 %6152, %v384_v3  }
  0x2e   : > { %430 = vperm.xlu0 %6148, %v425_v6   ;;  %v5798_v6 = vld [vmem:[%s10797_s9 + $0x18] sm:$0xff] }
  0x2f   : > { %6153 = vset.pattern.permute.xlu1 %v10813_v5  ;;  %6154 = vset.pattern.permute.xlu2 %v10813_v5 }
  0x30   : > { %440 = vperm.xlu1 %6153, %v427_v7   ;;  %435 = vperm.xlu2 %6154, %v426_v8  }
  0x36   : > { %557 = vperm.xlu0 %6148, %v532_v9  }
  0x38   : > { %567 = vperm.xlu1 %6153, %v534_v10   ;;  %6155 = vset.pattern.permute.xlu2 %v6339_v4 }
  0x39   : > { %602 = vperm.xlu2 %6155, %v534_v10   ;;  %v6046_v10 = vld [vmem:[%s10796_s8 + $0x98] sm:$0xff] }
  0x3e   : > { %552 = vperm.xlu0 %6148, %v531_v11  }
  0x40   : > { %562 = vperm.xlu1 %6153, %v533_v12  }
  0x41   : > { %598 = vperm.xlu2 %6155, %v533_v12  }
  0x46   : > { %547 = vperm.xlu0 %6148, %v530_v13  }
  0x48   : > { %6156 = vset.pattern.permute.xlu1 %v6339_v4 }
  0x49   : > { %594 = vperm.xlu1 %6156, %v532_v9   ;;  %6157 = vset.pattern.permute.xlu2 %v10813_v5 }
  0x4a   : > { %658 = vperm.xlu2 %6157, %v625_v14   ;;  %v449_v14 = vld [vmem:[%s10791_s3] sm:$0x3f] }
  0x4e   : > { %542 = vperm.xlu0 %6148, %v529_v15  }
  0x51   : > { %590 = vperm.xlu1 %6156, %v531_v11   ;;  %v6047_v11 = vld [vmem:[%s10796_s8 + $0xa0] sm:$0x3] }
  0x52   : > { %653 = vperm.xlu2 %6157, %v624_v16  }
  0x56   : > { %537 = vperm.xlu0 %6148, %v528_v17  }
  0x59   : > { %586 = vperm.xlu1 %6156, %v530_v13  }
  0x5a   : > { %648 = vperm.xlu2 %6157, %v623_v18  }
  0x5e   : > { %633 = vperm.xlu0 %6148, %v620_v19  }
  0x61   : > { %582 = vperm.xlu1 %6156, %v529_v15  }
  0x62   : > { %643 = vperm.xlu2 %6157, %v622_v20  }
  0x66   : > { %1911 = vperm.xlu0 %6148, %v1878_v21   ;;  %v5796_v21 = vld [vmem:[%s10797_s9 + $0x8] sm:$0xff] }
  0x69   : > { %578 = vperm.xlu1 %6156, %v528_v17   ;;  %v5801_v17 = vld [vmem:[%s10797_s9 + $0x30] sm:$0x3] }
  0x6a   : > { %638 = vperm.xlu2 %6157, %v621_v22   ;;  %v5797_v22 = vld [vmem:[%s10797_s9 + $0x10] sm:$0xff] }
  0x6e   : > { %1896 = vperm.xlu0 %6148, %v1875_v23  }
  0x71   : > { %6158 = vset.pattern.permute.xlu1 %v10813_v5 }
  0x72   : > { %628 = vperm.xlu1 %6158, %v619_v24   ;;  %453 = vperm.xlu2 %6157, %v450_v25  }
  0x76   : > { %1881 = vperm.xlu0 %6148, %v1872_v26  }
  0x78   : > { %v390_v29 = vpop.permute.xlu2 %389 }
  0x79   : > { %v403_v56 = vmul.f32 %v6584_v47, %v390_v29 }
  0x7a   : > { %1906 = vperm.xlu1 %6158, %v1877_v27   ;;  %1901 = vperm.xlu2 %6157, %v1876_v28  }
  0x7e   : > { %3213 = vperm.xlu0 %6148, %v6002_v30   ;;  %v5799_v30 = vld [vmem:[%s10797_s9 + $0x20] sm:$0xff] }
  0x81   : > { %v408_v34 = vpop.permute.xlu2 %407 }
  0x82   : > { %1891 = vperm.xlu1 %6158, %v1874_v31   ;;  %1886 = vperm.xlu2 %6157, %v1873_v32   ;;  %v419_v57 = vmul.f32 %v6586_v48, %v408_v34  ;;  %v5800_v31 = vld [vmem:[%s10797_s9 + $0x28] sm:$0xff] }
  0x84   : > { %v422_v1 = vadd.f32 %v419_v57, %v403_v56  ;;  %v10818_v56 = vmov 920167782  }
  0x86   : > { %3198 = vperm.xlu0 %6148, %v5999_v33  }
  0x8a   : > { %3223 = vperm.xlu1 %6158, %v6004_v35   ;;  %3218 = vperm.xlu2 %6157, %v6003_v36   ;;  %v436_v40 = vpop.permute.xlu2 %435 }
  0x8e   : > { %4508 = vperm.xlu0 %6148, %v6042_v37  }
  0x8f   : > { %v416_v38 = vpop.permute.xlu0 %415  ;;  %v395_v41 = vpop.permute.xlu1 %394 }
  0x90   : > { %v404_v54 = vmul.f32 %v6584_v47, %v395_v41  ;;  %v421_v58 = vmul.f32 %v6586_v48, %v416_v38  ;;  %v5857_v41 = vld [vmem:[#allocation2] sm:$0x1] }
  0x92   : > { %3208 = vperm.xlu1 %6158, %v6001_v39   ;;  %3203 = vperm.xlu2 %6157, %v6000_v42  }
  0x93   : > { %v603_v51 = vpop.permute.xlu2 %602 }
  0x94   : > { %v611_v12 = vmul.f32 %v603_v51, %v6586_v48 }
  0x96   : > { %4523 = vperm.xlu0 %6148, %v6045_v43   ;;  %v10815_v43 = vmov 683565275  }
  0x98   : > { %v400_v49 = vpop.permute.xlu0 %399 }
  0x99   : > { %v412_v50 = vpop.permute.xlu1 %411  ;;  %v405_v55 = vmul.f32 %v6584_v47, %v400_v49 }
  0x9a   : > { %3193 = vperm.xlu1 %6158, %v5998_v45   ;;  %v420_v52 = vmul.f32 %v6586_v48, %v412_v50  ;;  %4503 = vperm.xlu2 %6157, %v6041_v46   ;;  %v10806_v45 = vmov 2475754826   ;;  %v10802_v50 = vmov 2131351028  }
  0x9b   : > { %v424_v62 = vadd.f32 %v421_v58, %v405_v55  ;;  %v599_v4 = vpop.permute.xlu2 %598 }
  0x9c   : > { %v423_v59 = vadd.f32 %v420_v52, %v404_v54  ;;  %v610_v28 = vmul.f32 %v599_v4, %v6586_v48 }
  0x9e   : > { %5804 = vperm.xlu0 %6148, %v5795_v53   ;;  %v444_v3 = vadd.f32 %v436_v40, %v423_v59  ;;  %v10811_v53 = vmov 2102212464   ;;  %v10804_v59 = vmov 1326507024  }
  0xa0   : > { %v431_v63 = vpop.permute.xlu0 %430  ;;  %v447_v9 = vmax.f32 %v444_v3, 0.0 }
  0xa1   : > { %v443_v7 = vadd.f32 %v431_v63, %v422_v1 }
  0xa2   : > { %4513 = vperm.xlu1 %6158, %v6043_v60   ;;  %v441_v0 = vpop.permute.xlu1 %440  ;;  %4518 = vperm.xlu2 %6157, %v6044_v61  }
  0xa3   : > { %v445_v2 = vadd.f32 %v441_v0, %v424_v62  ;;  %v446_v13 = vmax.f32 %v443_v7, 0.0 }
  0xa4   : > { %v659_v19 = vpop.permute.xlu2 %658 }
  0xa5   : > { %v448_v8 = vmax.f32 %v445_v2, 0.0 }
  0xa6   : > { %5819 = vperm.xlu0 %6148, %v5798_v6  }
  0xa7   : > { %5939 = vmatpush.msk.msra.mxu0 %vm460_vm0, %v448_v8 }
  0xa9   : > { %478 = vmatpush.msra.mxu0 %v447_v9 }
  0xaa   : > { %4528 = vperm.xlu1 %6158, %v6046_v10   ;;  %v568_v15 = vpop.permute.xlu1 %567  ;;  %4533 = vperm.xlu2 %6157, %v6047_v11  }
  0xab   : > { %v576_v16 = vmul.f32 %v568_v15, %v6584_v47  ;;  %479 = vmatpush.msra.mxu0 %v446_v13 }
  0xac   : > { %5940 = vmatmul.msk.f32.vlgmr.msra.gmra.mxu0 %vm456_vm1, %v449_v14  ;;  %v654_v37 = vpop.permute.xlu2 %653 }
  0xad   : > { %v618_v18 = vadd.f32 %v611_v12, %v576_v16 }
  0xae   : > { %5834 = vperm.xlu0 %6148, %v5801_v17  }
  0xaf   : > { %v6620_v20 = vadd.f32 %v659_v19, %v618_v18 }
  0xb1   : > { %v1643_v23 = vand.u32 2139095040, %v6620_v20  ;;  %v1640_v26 = vand.u32 2147483647, %v6620_v20 }
  0xb2   : > { %5809 = vperm.xlu1 %6158, %v5796_v21   ;;  %5814 = vperm.xlu2 %6157, %v5797_v22   ;;  %v563_v24 = vpop.permute.xlu1 %562 }
  0xb3   : > { %v1644_v25 = vshrl.u32 %v1643_v23, 23  ;;  %v575_v29 = vmul.f32 %v563_v24, %v6584_v47  ;;  %v1647_v33 = vand.u32 8388607, %v1640_v26 }
  0xb5   : > { %v5959_v27 = vadd.s32 4294967169, %v1644_v25  ;;  %v617_v34 = vadd.f32 %v610_v28, %v575_v29  ;;  %v1648_v38 = vor.u32 8388608, %v1647_v33 }
  0xb7   : > { %v1650_v32 = vadd.s32 1, %v5959_v27  ;;  %v6642_v40 = vadd.f32 %v654_v37, %v617_v34  ;;  %v6661_v63 = vshll.u32 %v1648_v38, 8 }
  0xb9   : > { %vm1651_vm2 = vcmp.gt.s32.totalorder %v1650_v32, 0  ;;  %v1488_v4 = vand.u32 2139095040, %v6642_v40  ;;  %v1689_v13 = vand.u32 65535, %v6661_v63  ;;  %v1690_v14 = vshrl.u32 %v6661_v63, 16 }
  0xba   : > { %5824 = vperm.xlu1 %6158, %v5799_v30   ;;  %5829 = vperm.xlu2 %6157, %v5800_v31   ;;  %v1652_v35 = vsel %vm1651_vm2, %v1650_v32, 0 }
  0xbb   : > { %v1654_v36 = vand.u32 31, %v1652_v35  ;;  %v6644_v42 = vshrl.u32 %v1652_v35, 5  ;;  %v1489_v19 = vshrl.u32 %v1488_v4, 23 }
  0xbd   : > { %v6640_v39 = vsub.s32 32, %v1654_v36  ;;  %v1657_v44 = vshll.u32 %v10815_v43, %v1654_v36  ;;  %v1660_v46 = vshll.u32 %v10806_v45, %v1654_v36  ;;  %v1663_v52 = vshll.u32 %v10802_v50, %v1654_v36 }
  0xbe   : > { %v1666_v54 = vshll.u32 %v10811_v53, %v1654_v36  ;;  %v1669_v58 = vshll.u32 %v10818_v56, %v1654_v36  ;;  %vm1672_vm3 = vcmp.lt.s32.totalorder %v6644_v42, 1  ;;  %vm1675_vm4 = vcmp.lt.s32.totalorder %v6644_v42, 4 }
  0xbf   : > { %v1658_v49 = vshrl.u32 %v10806_v45, %v6640_v39  ;;  %v1661_v51 = vshrl.u32 %v10802_v50, %v6640_v39  ;;  %v1664_v55 = vshrl.u32 %v10811_v53, %v6640_v39  ;;  %v1667_v57 = vshrl.u32 %v10818_v56, %v6640_v39 }
  0xc0   : > { %v1670_v60 = vshrl.u32 %v10804_v59, %v6640_v39  ;;  %vm1674_vm5 = vcmp.lt.s32.totalorder %v6644_v42, 3  ;;  %vm1673_vm6 = vcmp.lt.s32.totalorder %v6644_v42, 2  ;;  %v5956_v31 = vadd.s32 4294967169, %v1489_v19 }
  0xc1   : > { %v1659_v61 = vor.u32 %v1658_v49, %v1657_v44  ;;  %v1662_v62 = vor.u32 %v1661_v51, %v1660_v46  ;;  %v1665_v0 = vor.u32 %v1664_v55, %v1663_v52  ;;  %v1668_v1 = vor.u32 %v1667_v57, %v1666_v54 }
  0xc2   : > { %5860 = vperm.xlu1 %6158, %v5857_v41   ;;  %v1671_v2 = vor.u32 %v1670_v60, %v1669_v58  ;;  %v1656_v46 = vshrl.u32 %v10815_v43, %v6640_v39  ;;  %v1495_v57 = vadd.s32 1, %v5956_v31  ;;  %v1485_v39 = vand.u32 2147483647, %v6642_v40 }
  0xc3   : > { %v1680_v3 = vsel %vm1672_vm3, %v1659_v61, %v1662_v62  ;;  %v1681_v6 = vsel %vm1675_vm4, %v1668_v1, 920167782  ;;  %v1684_v7 = vsel %vm1672_vm3, %v1662_v62, %v1665_v0  ;;  %v1677_v38 = vsel %vm1675_vm4, %v1665_v0, 2102212464 }
  0xc4   : > { %v1685_v8 = vsel %vm1675_vm4, %v1671_v2, 1326507024  ;;  %v1682_v9 = vsel %vm1674_vm5, %v1665_v0, %v1681_v6  ;;  %v1676_v58 = vsel %vm1672_vm3, %v1656_v46, %v1659_v61  ;;  %v1678_v60 = vsel %vm1674_vm5, %v1662_v62, %v1677_v38 }
  0xc5   : > { %v1686_v10 = vsel %vm1674_vm5, %v1668_v1, %v1685_v8  ;;  %v1683_v11 = vsel %vm1673_vm6, %v1680_v3, %v1682_v9  ;;  %vm1496_vm11 = vcmp.gt.s32.totalorder %v1495_v57, 0  ;;  %v1679_v8 = vsel %vm1673_vm6, %v1676_v58, %v1678_v60 }
  0xc6   : > { %v1687_v12 = vsel %vm1673_vm6, %v1684_v7, %v1686_v10  ;;  %v1713_v17 = vand.u32 65535, %v1683_v11  ;;  %v1714_v18 = vshrl.u32 %v1683_v11, 16  ;;  %v1497_v7 = vsel %vm1496_vm11, %v1495_v57, 0 }
  0xc7   : > { %v1691_v15 = vand.u32 65535, %v1687_v12  ;;  %v1692_v16 = vshrl.u32 %v1687_v12, 16  ;;  %v1499_v61 = vand.u32 31, %v1497_v7  ;;  %v1492_v62 = vand.u32 8388607, %v1485_v39 }
  0xc8   : > { %v1716_v23 = vmul.u32 %v1714_v18, %v1689_v13  ;;  %v1717_v24 = vmul.u32 %v1713_v17, %v1690_v14  ;;  %v1715_v29 = vmul.u32 %v1713_v17, %v1689_v13  ;;  %v1718_v34 = vmul.u32 %v1714_v18, %v1690_v14 }
  0xc9   : > { %v1694_v21 = vmul.u32 %v1692_v16, %v1689_v13  ;;  %v1695_v22 = vmul.u32 %v1691_v15, %v1690_v14  ;;  %v1693_v25 = vmul.u32 %v1691_v15, %v1689_v13  ;;  %v1696_v28 = vmul.u32 %v1692_v16, %v1690_v14 }
  0xca   : > { %v1719_v30 = vshll.u32 %v1716_v23, 16  ;;  %v1721_v36 = vshll.u32 %v1717_v24, 16  ;;  %v1720_v0 = vshrl.u32 %v1716_v23, 16  ;;  %v1722_v4 = vshrl.u32 %v1717_v24, 16 }
  0xcb   : > { %v1697_v27 = vshll.u32 %v1694_v21, 16  ;;  %v1699_v32 = vshll.u32 %v1695_v22, 16  ;;  %v1698_v52 = vshrl.u32 %v1694_v21, 16  ;;  %v1700_v2 = vshrl.u32 %v1695_v22, 16  ;;  %v595_v21 = vpop.permute.xlu1 %594 }
  0xcc   : > { %vm1723_vm8 = vc.u32 %v1715_v29, %v1719_v30  ;;  %v1725_v37 = vadd.s32 %v1719_v30, %v1715_v29  ;;  %v6709_v12 = vsub.s32 32, %v1499_v61  ;;  %v1733_v13 = vmul.u32 %v6661_v63, %v1679_v8 }
  0xcd   : > { %vm1701_vm7 = vc.u32 %v1693_v25, %v1697_v27  ;;  %v1703_v33 = vadd.s32 %v1697_v27, %v1693_v25  ;;  %v1724_v44 = vsel %vm1723_vm8, 1, %v10813_v5  ;;  %v6712_v15 = vshrl.u32 %v1497_v7, 5  ;;  %v558_v25 = vpop.permute.xlu0 %557 }
  0xce   : > { %v1702_v35 = vsel %vm1701_vm7, 1, %v10813_v5  ;;  %v1726_v51 = vadd.s32 %v1724_v44, %v1718_v34  ;;  %vm1727_vm10 = vc.u32 %v1725_v37, %v1721_v36  ;;  %v6703_v10 = vadd.s32 %v1725_v37, %v1721_v36 }
  0xcf   : > { %v1704_v41 = vadd.s32 %v1702_v35, %v1696_v28  ;;  %vm1705_vm9 = vc.u32 %v1703_v33, %v1699_v32  ;;  %v1728_v55 = vsel %vm1727_vm10, 1, %v10813_v5  ;;  %v1502_v42 = vshll.u32 %v10815_v43, %v1499_v61 }
  0xd0   : > { %v1706_v49 = vsel %vm1705_vm9, 1, %v10813_v5  ;;  %v1730_v1 = vadd.s32 %v1728_v55, %v1726_v51  ;;  %v1503_v16 = vshrl.u32 %v10806_v45, %v6709_v12  ;;  %v1505_v17 = vshll.u32 %v10806_v45, %v1499_v61 }
  0xd1   : > { %v1708_v54 = vadd.s32 %v1706_v49, %v1704_v41  ;;  %v1506_v18 = vshrl.u32 %v10802_v50, %v6709_v12  ;;  %v1509_v19 = vshrl.u32 %v10811_v53, %v6709_v12  ;;  %v1508_v63 = vshll.u32 %v10802_v50, %v1499_v61 }
  0xd2   : > { %v1731_v6 = vadd.s32 %v1730_v1, %v1720_v0  ;;  %v1511_v23 = vshll.u32 %v10811_v53, %v1499_v61  ;;  %v1512_v24 = vshrl.u32 %v10818_v56, %v6709_v12  ;;  %v1493_v28 = vor.u32 8388608, %v1492_v62 }
  0xd3   : > { %v1709_v3 = vadd.s32 %v1708_v54, %v1698_v52  ;;  %v6726_v29 = vor.u32 %v1503_v16, %v1502_v42  ;;  %v6728_v30 = vor.u32 %v1506_v18, %v1505_v17  ;;  %v6730_v31 = vor.u32 %v1509_v19, %v1508_v63 }
  0xd4   : > { %v1732_v11 = vadd.s32 %v1731_v6, %v1722_v4  ;;  %v1513_v32 = vor.u32 %v1512_v24, %v1511_v23  ;;  %v1514_v33 = vshll.u32 %v10818_v56, %v1499_v61  ;;  %v1515_v34 = vshrl.u32 %v10804_v59, %v6709_v12  ;;  %v649_v6 = vpop.permute.xlu2 %648 }
  0xd5   : > { %v6701_v9 = vadd.s32 %v1709_v3, %v1700_v2  ;;  %v609_v35 = vmul.f32 %v595_v21, %v6586_v48  ;;  %vm1517_vm13 = vcmp.lt.s32.totalorder %v6712_v15, 1  ;;  %v574_v37 = vmul.f32 %v558_v25, %v6584_v47  ;;  %v6777_v42 = vpop.permute.xlu0 %552 }
  0xd6   : > { %v1736_v14 = vadd.s32 1, %v1732_v11  ;;  %v1516_v38 = vor.u32 %v1515_v34, %v1514_v33  ;;  %vm1520_vm14 = vcmp.lt.s32.totalorder %v6712_v15, 4  ;;  %v1525_v41 = vsel %vm1517_vm13, %v6726_v29, %v6728_v30 }
  0xd7   : > { %vm1735_vm12 = vc.u32 %v6701_v9, %v6703_v10  ;;  %vm1519_vm15 = vcmp.lt.s32.totalorder %v6712_v15, 3  ;;  %v1526_v46 = vsel %vm1520_vm14, %v1513_v32, 920167782  ;;  %v6748_v49 = vshll.u32 %v1493_v28, 8 }
  0xd8   : > { %v1737_v22 = vsel %vm1735_vm12, %v1736_v14, %v1732_v11  ;;  %vm1518_vm0 = vcmp.lt.s32.totalorder %v6712_v15, 2  ;;  %v1527_v51 = vsel %vm1519_vm15, %v6730_v31, %v1526_v46  ;;  %v1529_v52 = vsel %vm1517_vm13, %v6728_v30, %v6730_v31 }
  0xd9   : > { %v1738_v27 = vadd.s32 %v1737_v22, %v1733_v13  ;;  %v1530_v54 = vsel %vm1520_vm14, %v1516_v38, 1326507024  ;;  %v616_v55 = vadd.f32 %v609_v35, %v574_v37  ;;  %v1528_v58 = vsel %vm1518_vm0, %v1525_v41, %v1527_v51  ;;  %v591_v51 = vpop.permute.xlu1 %590 }
  0xda   : > { %v674_v60 = vmul.f32 0.5, %v6620_v20  ;;  %v1531_v0 = vsel %vm1519_vm15, %v1513_v32, %v1530_v54  ;;  %v1534_v3 = vand.u32 65535, %v6748_v49  ;;  %v1559_v4 = vshrl.u32 %v1528_v58, 16 }
  0xdb   : > { %v1739_v36 = vadd.s32 536870912, %v1738_v27  ;;  %v1532_v2 = vsel %vm1518_vm0, %v1529_v52, %v1531_v0  ;;  %v1535_v7 = vshrl.u32 %v6748_v49, 16  ;;  %v1558_v11 = vand.u32 65535, %v1528_v58 }
  0xdc   : > { %v1536_v8 = vand.u32 65535, %v1532_v2  ;;  %v1537_v61 = vshrl.u32 %v1532_v2, 16  ;;  %v6772_v62 = vadd.f32 %v649_v6, %v616_v55  ;;  %v673_v14 = vmul.f32 0.5, %v6642_v40 }
  0xdd   : > { %v6743_v44 = vshrl.u32 %v1739_v36, 30  ;;  %6159 = vtanh.f32 %v674_v60  ;;  %v1561_v19 = vmul.u32 %v1559_v4, %v1534_v3  ;;  %v1562_v23 = vmul.u32 %v1558_v11, %v1535_v7  ;;  %v548_v6 = vpop.permute.xlu0 %547 }
  0xde   : > { %v1539_v16 = vmul.u32 %v1537_v61, %v1534_v3  ;;  %v1540_v17 = vmul.u32 %v1536_v8, %v1535_v7  ;;  %v1538_v22 = vmul.u32 %v1536_v8, %v1534_v3  ;;  %v1734_v24 = vadd.s32 %v6703_v10, %v6701_v9 }
  0xdf   : > { %v1741_v57 = vshll.u32 %v6743_v44, 30  ;;  %6161 = vtanh.f32 %v673_v14  ;;  %v1541_v25 = vmul.u32 %v1537_v61, %v1535_v7  ;;  %v1560_v36 = vmul.u32 %v1558_v11, %v1534_v3 }
  0xe0   : > { %v1542_v63 = vshll.u32 %v1539_v16, 16  ;;  %v1544_v32 = vshll.u32 %v1540_v17, 16  ;;  %v1543_v34 = vshrl.u32 %v1539_v16, 16  ;;  %v1564_v37 = vshll.u32 %v1561_v19, 16 }
  0xe1   : > { %v6766_v1 = vsub.s32 %v1738_v27, %v1741_v57  ;;  %v1333_v27 = vand.u32 2139095040, %v6772_v62  ;;  %v1566_v41 = vshll.u32 %v1562_v23, 16  ;;  %v1563_v58 = vmul.u32 %v1559_v4, %v1535_v7 }
  0xe2   : > { %vm1546_vm2 = vc.u32 %v1538_v22, %v1542_v63  ;;  %v1548_v33 = vadd.s32 %v1542_v63, %v1538_v22  ;;  %vm1568_vm5 = vc.u32 %v1560_v36, %v1564_v37  ;;  %v1570_v52 = vadd.s32 %v1564_v37, %v1560_v36  ;;  %v644_v36 = vpop.permute.xlu2 %643  ;;  %v587_v37 = vpop.permute.xlu1 %586 }
  0xe3   : > { %vm1743_vm1 = vcmp.lt.s32.totalorder %v6766_v1, 0  ;;  %v1744_v13 = vsub.s32 0, %v6766_v1  ;;  %v1547_v35 = vsel %vm1546_vm2, 1, %v10813_v5  ;;  %v6160_v46 = vpop.eup %6159  ;;  %v1522_v2 = vsel %vm1520_vm14, %v6730_v31, 2102212464 }
  0xe4   : > { %v1549_v38 = vadd.s32 %v1547_v35, %v1541_v25  ;;  %vm1550_vm4 = vc.u32 %v1548_v33, %v1544_v32  ;;  %v1569_v3 = vsel %vm1568_vm5, 1, %v10813_v5  ;;  %vm1572_vm6 = vc.u32 %v1570_v52, %v1566_v41 }
  0xe5   : > { %v1745_v18 = vsel %vm1743_vm1, %v1744_v13, %v6766_v1  ;;  %v1551_v10 = vsel %vm1550_vm4, 1, %v10813_v5  ;;  %v6162_v60 = vpop.eup %6161  ;;  %v1571_v13 = vadd.s32 %v1569_v3, %v1563_v58  ;;  %v1501_v14 = vshrl.u32 %v10815_v43, %v6709_v12 }
  0xe6   : > { %v1746_v21 = vclz %v1745_v18  ;;  %v1553_v57 = vadd.s32 %v1551_v10, %v1549_v38  ;;  %v1545_v16 = vshrl.u32 %v1540_v17, 16  ;;  %v1573_v4 = vsel %vm1572_vm6, 1, %v10813_v5 }
  0xe7   : > { %v1334_v7 = vshrl.u32 %v1333_v27, 23  ;;  %v1575_v22 = vadd.s32 %v1573_v4, %v1571_v13  ;;  %v1521_v31 = vsel %vm1517_vm13, %v1501_v14, %v6726_v29  ;;  %v1523_v63 = vsel %vm1519_vm15, %v6728_v30, %v1522_v2 }
  0xe8   : > { %v5960_v28 = vadd.s32 4294967294, %v1746_v21  ;;  %v1554_v11 = vadd.s32 %v1553_v57, %v1543_v34  ;;  %v1565_v21 = vshrl.u32 %v1561_v19, 16  ;;  %v1567_v17 = vshrl.u32 %v1562_v23, 16 }
  0xe9   : > { %v5953_v25 = vadd.s32 4294967169, %v1334_v7  ;;  %v608_v27 = vmul.f32 %v591_v51, %v6586_v48  ;;  %v6802_v32 = vadd.s32 %v1570_v52, %v1566_v41  ;;  %v1524_v29 = vsel %vm1518_vm0, %v1521_v31, %v1523_v63 }
  0xea   : > { %vm5961_vm3 = vcmp.lt.s32.totalorder %v5960_v28, 0  ;;  %v573_v30 = vmul.f32 %v6777_v42, %v6584_v47  ;;  %6163 = vtanh.f32 %v6620_v20  ;;  %v1330_v41 = vand.u32 2147483647, %v6772_v62 }
  0xeb   : > { %v1749_v9 = vsel %vm5961_vm3, 0, %v5960_v28  ;;  %v1576_v28 = vadd.s32 %v1575_v22, %v1565_v21  ;;  %v1340_v19 = vadd.s32 1, %v5953_v25  ;;  %v687_v15 = vmul.f32 0.5, %v6162_v60 }
  0xec   : > { %v1750_v54 = vsub.s32 32, %v1749_v9  ;;  %v1754_v55 = vsub.s32 4294967266, %v1749_v9  ;;  %v1751_v0 = vshll.u32 %v6766_v1, %v1749_v9  ;;  %v688_v9 = vmul.f32 0.5, %v6160_v46 }
  0xed   : > { %v1577_v35 = vadd.s32 %v1576_v28, %v1567_v17  ;;  %vm1341_vm8 = vcmp.gt.s32.totalorder %v1340_v19, 0  ;;  %v1578_v10 = vmul.u32 %v6748_v49, %v1524_v29  ;;  %v615_v42 = vadd.f32 %v608_v27, %v573_v30 }
  0xee   : > { %v1752_v8 = vshrl.u32 %v1734_v24, %v1750_v54  ;;  %v1755_v61 = vadd.s32 127, %v1754_v55  ;;  %v6799_v24 = vadd.s32 %v1554_v11, %v1545_v16  ;;  %v1342_v51 = vsel %vm1341_vm8, %v1340_v19, 0  ;;  %v543_v54 = vpop.permute.xlu0 %542 }
  0xef   : > { %v1581_v38 = vadd.s32 1, %v1577_v35  ;;  %v1344_v52 = vand.u32 31, %v1342_v51  ;;  %v607_v55 = vmul.f32 %v587_v37, %v6586_v48  ;;  %vm6816_vm9 = vcmp.le.f32.partialorder %v1640_v26, 0.7853982 }
  0xf0   : > { %v1753_v1 = vor.u32 %v1752_v8, %v1751_v0  ;;  %v1756_v18 = vshll.u32 %v1755_v61, 23  ;;  %vm1580_vm7 = vc.u32 %v6799_v24, %v6802_v32  ;;  %vm1642_vm10 = vcmp.lt.s32.totalorder %v6620_v20, 0  ;;  %v6829_v61 = vpop.eup %6163 }
  0xf1   : > { %v1582_v58 = vsel %vm1580_vm7, %v1581_v38, %v1577_v35  ;;  %v6821_v46 = vsub.s32 32, %v1344_v52  ;;  %v572_v49 = vmul.f32 %v548_v6, %v6584_v47  ;;  %v1764_v3 = vsub.s32 4, %v6743_v44 }
  0xf2   : > { %v1757_v12 = vor.u32 4788187, %v1756_v18  ;;  %v1760_v34 = vcvt.s32.f32 %v1753_v1  ;;  %v1583_v2 = vadd.s32 %v1582_v58, %v1578_v10  ;;  %v1337_v8 = vand.u32 8388607, %v1330_v41 }
  0xf3   : > { %v6832_v26 = vmul.f32 %v543_v54, %v6584_v47  ;;  %v6834_v11 = vadd.f32 0.5, %v688_v9  ;;  %6165 = vtanh.f32 %v6642_v40  ;;  %v6837_v14 = vadd.f32 %v644_v36, %v615_v42 }
  0xf4   : > { %v1758_v33 = vand.u32 2147483647, %v1757_v12  ;;  %v1584_v13 = vadd.s32 536870912, %v1583_v2  ;;  %v614_v6 = vadd.f32 %v607_v55, %v572_v49  ;;  %v6844_v4 = vadd.f32 0.5, %v687_v15  ;;  %v639_v12 = vpop.permute.xlu2 %638 }
  0xf5   : > { %v1348_v1 = vshrl.u32 %v10806_v45, %v6821_v46  ;;  %v1351_v18 = vshrl.u32 %v10802_v50, %v6821_v46  ;;  %v1357_v21 = vshrl.u32 %v10818_v56, %v6821_v46  ;;  %v1765_v22 = vsel %vm1642_vm10, %v1764_v3, %v6743_v44 }
  0xf6   : > { %v1761_v23 = vmul.f32 %v1760_v34, %v1758_v33  ;;  %v6846_v7 = vshrl.u32 %v1584_v13, 30  ;;  %v1338_v31 = vor.u32 8388608, %v1337_v8  ;;  %v1347_v63 = vshll.u32 %v10815_v43, %v1344_v52 }
  0xf7   : > { %v1354_v25 = vshrl.u32 %v10811_v53, %v6821_v46  ;;  %v1350_v27 = vshll.u32 %v10806_v45, %v1344_v52  ;;  %v1356_v19 = vshll.u32 %v10811_v53, %v1344_v52  ;;  %v6867_v33 = vadd.f32 %v639_v12, %v614_v6 }
  0xf8   : > { %v1762_v57 = vxor.u32 2147483648, %v1761_v23  ;;  %v1586_v28 = vshll.u32 %v6846_v7, 30  ;;  %v6869_v44 = vshrl.u32 %v1342_v51, 5  ;;  %v1353_v34 = vshll.u32 %v10802_v50, %v1344_v52 }
  0xf9   : > { %v1360_v29 = vshrl.u32 %v10804_v59, %v6821_v46  ;;  %v6874_v35 = vpop.eup %6165  ;;  %v1349_v36 = vor.u32 %v1348_v1, %v1347_v63  ;;  %v1352_v37 = vor.u32 %v1351_v18, %v1350_v27  ;;  %v1767_v38 = vsel %vm6816_vm9, 0, %v1765_v22 }
  0xfa   : > { %v1763_v60 = vsel %vm1642_vm10, %v1762_v57, %v1761_v23  ;;  %v6876_v30 = vsub.s32 %v1583_v2, %v1586_v28  ;;  %v1358_v23 = vor.u32 %v1357_v21, %v1356_v19  ;;  %v672_v9 = vmul.f32 0.5, %v6772_v62 }
  0xfb   : > { %v6842_v16 = vsel %vm6816_vm9, %v6620_v20, %v1763_v60  ;;  %v1355_v15 = vor.u32 %v1354_v25, %v1353_v34  ;;  %v1359_v51 = vshll.u32 %v10818_v56, %v1344_v52  ;;  %v6885_v42 = vshll.u32 %v1338_v31, 8 }
  0xfc   : > { %v6862_v17 = vmul.f32 %v6842_v16, %v6842_v16  ;;  %vm1588_vm11 = vcmp.lt.s32.totalorder %v6876_v30, 0  ;;  %v1589_v54 = vsub.s32 0, %v6876_v30  ;;  %vm1362_vm12 = vcmp.lt.s32.totalorder %v6869_v44, 1 }
  0xfd   : > { %v1361_v57 = vor.u32 %v1360_v29, %v1359_v51  ;;  %vm1365_vm13 = vcmp.lt.s32.totalorder %v6869_v44, 4  ;;  %vm1364_vm14 = vcmp.lt.s32.totalorder %v6869_v44, 3  ;;  %v1370_v52 = vsel %vm1362_vm12, %v1349_v36, %v1352_v37 }
  0xfe   : > { %v1769_v10 = vmul.f32 -0.001358992, %v6862_v17  ;;  %v1776_v55 = vmul.f32 -0.00019511016, %v6862_v17  ;;  %v1590_v58 = vsel %vm1588_vm11, %v1589_v54, %v6876_v30  ;;  %v1371_v0 = vsel %vm1365_vm13, %v1358_v23, 920167782 }
  0xff   : > { %v1591_v2 = vclz %v1590_v58  ;;  %6167 = vtanh.f32 %v672_v9  ;;  %v1372_v49 = vsel %vm1364_vm14, %v1355_v15, %v1371_v0  ;;  %v10801_v60 = vand.u32 2147483647, %v6837_v14 }
 0x100   : > { %v1770_v3 = vadd.f32 0.041655596, %v1769_v10  ;;  %v6899_v8 = vadd.s32 3, %v1767_v38  ;;  %v1579_v13 = vadd.s32 %v6802_v32, %v6799_v24  ;;  %vm1363_vm15 = vcmp.lt.s32.totalorder %v6869_v44, 2 }
 0x101   : > { %v5957_v6 = vadd.s32 4294967294, %v1591_v2  ;;  %v1373_v1 = vsel %vm1363_vm15, %v1370_v52, %v1372_v49  ;;  %v1374_v18 = vsel %vm1362_vm12, %v1352_v37, %v1355_v15  ;;  %v1379_v21 = vand.u32 65535, %v6885_v42 }
 0x102   : > { %v1777_v22 = vadd.f32 0.008332121, %v1776_v55  ;;  %v1375_v31 = vsel %vm1365_vm13, %v1361_v57, 1326507024  ;;  %v1380_v63 = vshrl.u32 %v6885_v42, 16  ;;  %v1404_v25 = vshrl.u32 %v1373_v1, 16 }
 0x103   : > { %vm5958_vm0 = vcmp.lt.s32.totalorder %v5957_v6, 0  ;;  %v1376_v24 = vsel %vm1364_vm14, %v1358_v23, %v1375_v31  ;;  %v1178_v32 = vand.u32 2139095040, %v6837_v14  ;;  %v6917_v12 = vand.u32 8388607, %v10801_v60 }
 0x104   : > { %v1771_v28 = vmul.f32 %v1770_v3, %v6862_v17  ;;  %v1594_v27 = vsel %vm5958_vm0, 0, %v5957_v6  ;;  %v1346_v19 = vshrl.u32 %v10815_v43, %v6821_v46  ;;  %v1377_v34 = vsel %vm1363_vm15, %v1374_v18, %v1376_v24 }
 0x105   : > { %v6924_v29 = vpop.eup %6167  ;;  %v1595_v38 = vsub.s32 32, %v1594_v27  ;;  %v1367_v23 = vsel %vm1365_vm13, %v1355_v15, 2102212464  ;;  %v1403_v9 = vand.u32 65535, %v1373_v1  ;;  %v1406_v51 = vmul.u32 %v1404_v25, %v1379_v21 }
 0x106   : > { %v1778_v10 = vmul.f32 %v1777_v22, %v6862_v17  ;;  %v1599_v54 = vsub.s32 4294967266, %v1594_v27  ;;  %v1381_v55 = vand.u32 65535, %v1377_v34  ;;  %v1382_v57 = vshrl.u32 %v1377_v34, 16 }
 0x107   : > { %v1596_v58 = vshll.u32 %v6876_v30, %v1594_v27  ;;  %v1597_v52 = vshrl.u32 %v1579_v13, %v1595_v38  ;;  %v1609_v46 = vsub.s32 4, %v6846_v7  ;;  %v1366_v0 = vsel %vm1362_vm12, %v1346_v19, %v1349_v36 }
 0x108   : > { %v1772_v2 = vadd.f32 -0.4999988, %v1771_v28  ;;  %v1600_v49 = vadd.s32 127, %v1599_v54  ;;  %v1368_v15 = vsel %vm1364_vm14, %v1352_v37, %v1367_v23  ;;  %v1384_v3 = vmul.u32 %v1382_v57, %v1379_v21 }
 0x109   : > { %vm1487_vm1 = vcmp.lt.s32.totalorder %v6642_v40, 0  ;;  %v1598_v6 = vor.u32 %v1597_v52, %v1596_v58  ;;  %v1385_v1 = vmul.u32 %v1381_v55, %v1380_v63  ;;  %v1407_v18 = vmul.u32 %v1403_v9, %v1380_v63 }
 0x10a   : > { %v1409_v22 = vshll.u32 %v1406_v51, 16  ;;  %v1779_v31 = vadd.f32 -0.16666654, %v1778_v10  ;;  %v1601_v30 = vshll.u32 %v1600_v49, 23  ;;  %v1383_v13 = vmul.u32 %v1381_v55, %v1379_v21 }
 0x10b   : > { %v1387_v24 = vshll.u32 %v1384_v3, 16  ;;  %v1605_v27 = vcvt.s32.f32 %v1598_v6  ;;  %v1386_v34 = vmul.u32 %v1382_v57, %v1380_v63  ;;  %v1405_v38 = vmul.u32 %v1403_v9, %v1379_v21 }
 0x10c   : > { %v1408_v36 = vmul.u32 %v1404_v25, %v1380_v63  ;;  %vm6938_vm2 = vcmp.le.f32.partialorder %v1485_v39, 0.7853982  ;;  %v1602_v37 = vor.u32 4788187, %v1601_v30  ;;  %v1389_v19 = vshll.u32 %v1385_v1, 16 }
 0x10d   : > { %vm1391_vm3 = vc.u32 %v1383_v13, %v1387_v24  ;;  %v1393_v23 = vadd.s32 %v1387_v24, %v1383_v13  ;;  %v1411_v10 = vshll.u32 %v1407_v18, 16  ;;  %vm1413_vm4 = vc.u32 %v1405_v38, %v1409_v22 }
 0x10e   : > { %v1392_v54 = vsel %vm1391_vm3, 1, %v10813_v5  ;;  %v1415_v55 = vadd.s32 %v1409_v22, %v1405_v38  ;;  %v1603_v58 = vand.u32 2147483647, %v1602_v37  ;;  %v1414_v21 = vsel %vm1413_vm4, 1, %v10813_v5 }
 0x10f   : > { %v1394_v52 = vadd.s32 %v1392_v54, %v1386_v34  ;;  %vm1395_vm5 = vc.u32 %v1393_v23, %v1389_v19  ;;  %v1780_v63 = vmul.f32 %v1779_v31, %v6862_v17  ;;  %v1416_v25 = vadd.s32 %v1414_v21, %v1408_v36 }
 0x110   : > { %v1396_v39 = vsel %vm1395_vm5, 1, %v10813_v5  ;;  %vm1417_vm6 = vc.u32 %v1415_v55, %v1411_v10  ;;  %v1606_v9 = vmul.f32 %v1605_v27, %v1603_v58  ;;  %v1388_v57 = vshrl.u32 %v1384_v3, 16 }
 0x111   : > { %v1398_v49 = vadd.s32 %v1396_v39, %v1394_v52  ;;  %v1418_v6 = vsel %vm1417_vm6, 1, %v10813_v5  ;;  %v1773_v30 = vmul.f32 %v1772_v2, %v6862_v17  ;;  %v1410_v13 = vshrl.u32 %v1406_v51, 16 }
 0x112   : > { %v1420_v22 = vadd.s32 %v1418_v6, %v1416_v25  ;;  %v1179_v24 = vshrl.u32 %v1178_v32, 23  ;;  %v1607_v34 = vxor.u32 2147483648, %v1606_v9  ;;  %v1610_v38 = vsel %vm1487_vm1, %v1609_v46, %v6846_v7 }
 0x113   : > { %v1390_v31 = vshrl.u32 %v1385_v1, 16  ;;  %v1399_v37 = vadd.s32 %v1398_v49, %v1388_v57  ;;  %v1781_v19 = vadd.f32 1.0, %v1780_v63  ;;  %v1412_v36 = vshrl.u32 %v1407_v18, 16  ;;  %v583_v1 = vpop.permute.xlu1 %582 }
 0x114   : > { %v1421_v23 = vadd.s32 %v1420_v22, %v1410_v13  ;;  %v5950_v27 = vadd.s32 4294967169, %v1179_v24  ;;  %v1608_v3 = vsel %vm1487_vm1, %v1607_v34, %v1606_v9  ;;  %v1369_v17 = vsel %vm1363_vm15, %v1366_v0, %v1368_v15 }
 0x115   : > { %v1400_v51 = vadd.s32 %v1399_v37, %v1390_v31  ;;  %v1419_v2 = vadd.s32 %v1415_v55, %v1411_v10  ;;  %v1774_v32 = vadd.f32 1.0, %v1773_v30  ;;  %v6958_v54 = vsel %vm6938_vm2, %v6642_v40, %v1608_v3 }
 0x116   : > { %v1422_v7 = vadd.s32 %v1421_v23, %v1412_v36  ;;  %v1185_v46 = vadd.s32 1, %v5950_v27  ;;  %v6961_v18 = vand.u32 3, %v6899_v8  ;;  %v1612_v58 = vsel %vm6938_vm2, 0, %v1610_v38  ;;  %v454_v36 = vpop.permute.xlu2 %453 }
 0x117   : > { %v1613_v44 = vmul.f32 %v6958_v54, %v6958_v54  ;;  %vm1425_vm7 = vc.u32 %v1400_v51, %v1419_v2  ;;  %v1782_v0 = vmul.f32 %v1781_v19, %v6842_v16  ;;  %v1183_v10 = vor.u32 8388608, %v6917_v12 }
 0x118   : > { %v1426_v15 = vadd.s32 1, %v1422_v7  ;;  %vm1186_vm8 = vcmp.gt.s32.totalorder %v1185_v46, 0  ;;  %v1423_v21 = vmul.u32 %v6885_v42, %v1369_v17  ;;  %v6971_v8 = vmul.f32 %v583_v1, %v6586_v48 }
 0x119   : > { %v1614_v55 = vmul.f32 -0.001358992, %v1613_v44  ;;  %v1621_v52 = vmul.f32 -0.00019511016, %v1613_v44  ;;  %v1187_v63 = vsel %vm1186_vm8, %v1185_v46, 0  ;;  %v1791_v28 = vxor.u32 2147483648, %v1774_v32 }
 0x11a   : > { %v1629_v39 = vadd.s32 3, %v1612_v58  ;;  %v1427_v25 = vsel %vm1425_vm7, %v1426_v15, %v1422_v7  ;;  %v1189_v6 = vand.u32 31, %v1187_v63  ;;  %vm1787_vm9 = vcmp.eq.s32.totalorder %v6961_v18, 0 }
 0x11b   : > { %v1615_v9 = vadd.f32 0.041655596, %v1614_v55  ;;  %v1622_v57 = vadd.f32 0.008332121, %v1621_v52  ;;  %v1428_v49 = vadd.s32 %v1427_v25, %v1423_v21  ;;  %v1788_v16 = vxor.u32 2147483648, %v1782_v0 }
 0x11c   : > { %v6975_v12 = vmul.f32 0.5, %v6924_v29  ;;  %v6977_v30 = vshll.u32 %v1183_v10, 8  ;;  %vm1790_vm10 = vcmp.eq.s32.totalorder %v6961_v18, 2  ;;  %v10800_v22 = vand.u32 2147483647, %v6867_v33 }
 0x11d   : > { %v1623_v42 = vmul.f32 %v1622_v57, %v1613_v44  ;;  %v1429_v13 = vadd.s32 536870912, %v1428_v49  ;;  %vm484_vm11 = vcmask 1045504   ;;  %v1616_v24 = vmul.f32 %v1615_v9, %v1613_v44 }
 0x11e   : > { %v6981_v34 = vand.u32 3, %v1629_v39  ;;  %v1023_v38 = vand.u32 2139095040, %v6867_v33  ;;  %v6984_v31 = vsel %vm1790_vm10, %v1791_v28, %v1782_v0  ;;  %v1190_v29 = vsub.s32 32, %v1189_v6 }
 0x11f   : > { %v1624_v37 = vadd.f32 -0.16666654, %v1623_v42  ;;  %v1430_v19 = vshrl.u32 %v1429_v13, 30  ;;  %v6988_v27 = vsel %vm1787_vm9, %v1774_v32, %v1788_v16  ;;  %v6990_v3 = vadd.s32 %v1419_v2, %v1400_v51 }
 0x120   : > { %v6993_v17 = vand.u32 65535, %v6977_v30  ;;  %v6996_v7 = vshrl.u32 %v6977_v30, 16  ;;  %vm1332_vm12 = vcmp.lt.s32.totalorder %v6772_v62, 0  ;;  %v7001_v58 = vshrl.u32 %v1187_v63, 5 }
 0x121   : > { %v1431_v1 = vshll.u32 %v1430_v19, 30  ;;  %v7005_v0 = vand.u32 8388607, %v10800_v22  ;;  %v1617_v32 = vadd.f32 -0.4999988, %v1616_v24  ;;  %v1192_v51 = vshll.u32 %v10815_v43, %v1189_v6 }
 0x122   : > { %v1195_v2 = vshll.u32 %v10806_v45, %v1189_v6  ;;  %v7009_v15 = vshrl.u32 %v1023_v38, 23  ;;  %v1625_v55 = vmul.f32 %v1624_v37, %v1613_v44  ;;  %v1193_v21 = vshrl.u32 %v10806_v45, %v1190_v29 }
 0x123   : > { %v1432_v52 = vsub.s32 %v1428_v49, %v1431_v1  ;;  %v1196_v28 = vshrl.u32 %v10802_v50, %v1190_v29  ;;  %v1198_v39 = vshll.u32 %v10802_v50, %v1189_v6  ;;  %v1202_v25 = vshrl.u32 %v10818_v56, %v1190_v29 }
 0x124   : > { %v1199_v57 = vshrl.u32 %v10811_v53, %v1190_v29  ;;  %v1205_v16 = vshrl.u32 %v10804_v59, %v1190_v29  ;;  %v1618_v13 = vmul.f32 %v1617_v32, %v1613_v44  ;;  %vm7021_vm14 = vcmp.le.f32.partialorder %v1330_v41, 0.7853982 }
 0x125   : > { %vm1433_vm13 = vcmp.lt.s32.totalorder %v1432_v52, 0  ;;  %v1434_v9 = vsub.s32 0, %v1432_v52  ;;  %v1454_v24 = vsub.s32 4, %v1430_v19  ;;  %v1201_v38 = vshll.u32 %v10811_v53, %v1189_v6 }
 0x126   : > { %v1626_v37 = vadd.f32 1.0, %v1625_v55  ;;  %v1204_v1 = vshll.u32 %v10818_v56, %v1189_v6  ;;  %v1197_v50 = vor.u32 %v1196_v28, %v1195_v2  ;;  %v1191_v44 = vshrl.u32 %v10815_v43, %v1190_v29 }
 0x127   : > { %v1203_v59 = vor.u32 %v1202_v25, %v1201_v38  ;;  %v1200_v32 = vor.u32 %v1199_v57, %v1198_v39  ;;  %vm1207_vm15 = vcmp.lt.s32.totalorder %v7001_v58, 1  ;;  %v7033_v55 = vsel %vm1332_vm12, %v1454_v24, %v1430_v19 }
 0x128   : > { %v7036_v6 = vmul.f32 %v1626_v37, %v6958_v54  ;;  %vm1208_vm0 = vcmp.lt.s32.totalorder %v7001_v58, 2  ;;  %vm1209_vm1 = vcmp.lt.s32.totalorder %v7001_v58, 3  ;;  %vm1210_vm2 = vcmp.lt.s32.totalorder %v7001_v58, 4 }
 0x129   : > { %v481_v23 = vpop.f32.mrf.mxu0  ;;  %v1219_v54 = vsel %vm1207_vm15, %v1197_v50, %v1200_v32  ;;  %v1457_v57 = vsel %vm7021_vm14, 0, %v7033_v55  ;;  %vm1632_vm5 = vcmp.eq.s32.totalorder %v6981_v34, 0  ;;  %vm1786_vm7 = vcmp.lt.s32.totalorder %v6961_v18, 2 }
 0x12a   : > { %v6998_v46 = vadd.f32 %v481_v23, %v454_v36  ;;  %v1435_v36 = vsel %vm1433_vm13, %v1434_v9, %v1432_v52  ;;  %v1194_v23 = vor.u32 %v1193_v21, %v1192_v51  ;;  %vm1635_vm8 = vcmp.eq.s32.totalorder %v6981_v34, 2 }
 0x12b   : > { %v1436_v60 = vclz %v1435_v36  ;;  %vm1631_vm10 = vcmp.lt.s32.totalorder %v6981_v34, 2 }
 0x12c   : > { %v485_v10 = vsel %vm484_vm11, %v6998_v46, -inf }
 0x12d   : > { %v486_v63 = vrot.slane %v485_v10, 4  ;;  %v5954_v45 = vadd.s32 4294967294, %v1436_v60  ;;  %v1216_v60 = vsel %vm1210_vm2, %v1203_v59, 920167782 }
 0x12e   : > { %v1217_v19 = vsel %vm1209_vm1, %v1200_v32, %v1216_v60 }
 0x12f   : > { %v487_v42 = vmax.f32 %v485_v10, %v486_v63  ;;  %v1206_v10 = vor.u32 %v1205_v16, %v1204_v1  ;;  %v7029_v63 = vadd.f32 1.0, %v1618_v13  ;;  %vm5955_vm3 = vcmp.lt.s32.totalorder %v5954_v45, 0 }
 0x130   : > { %v1439_v51 = vsel %vm5955_vm3, 0, %v5954_v45 }
 0x131   : > { %v488_v22 = vrot.slane %v487_v42, 2  ;;  %v1220_v2 = vsel %vm1210_vm2, %v1206_v10, 1326507024  ;;  %v1636_v28 = vxor.u32 2147483648, %v7029_v63  ;;  %v1440_v39 = vsub.s32 32, %v1439_v51 }
 0x132   : > { %v1444_v25 = vsub.s32 4294967266, %v1439_v51  ;;  %v1441_v9 = vshll.u32 %v1432_v52, %v1439_v51  ;;  %v1221_v16 = vsel %vm1209_vm1, %v1203_v59, %v1220_v2  ;;  %v1212_v52 = vsel %vm1210_vm2, %v1200_v32, 2102212464 }
 0x133   : > { %v489_v41 = vmax.f32 %v487_v42, %v488_v22  ;;  %v1215_v22 = vsel %vm1207_vm15, %v1194_v23, %v1197_v50  ;;  %v1442_v13 = vshrl.u32 %v6990_v3, %v1440_v39  ;;  %v1222_v38 = vsel %vm1208_vm0, %v1219_v54, %v1221_v16 }
 0x134   : > { %v1218_v45 = vsel %vm1208_vm0, %v1215_v22, %v1217_v19  ;;  %v1445_v24 = vadd.s32 127, %v1444_v25  ;;  %v1226_v37 = vand.u32 65535, %v1222_v38  ;;  %v1227_v36 = vshrl.u32 %v1222_v38, 16 }
 0x135   : > { %v490_v29 = vrot.slane %v489_v41, 1  ;;  %v1248_v1 = vand.u32 65535, %v1218_v45  ;;  %v1249_v22 = vshrl.u32 %v1218_v45, 16  ;;  %v1633_v59 = vxor.u32 2147483648, %v7036_v6 }
 0x136   : > { %v1229_v3 = vmul.u32 %v1227_v36, %v6993_v17  ;;  %v1230_v60 = vmul.u32 %v1226_v37, %v6996_v7  ;;  %v1213_v32 = vsel %vm1209_vm1, %v1197_v50, %v1212_v52  ;;  %v1228_v19 = vmul.u32 %v1226_v37, %v6993_v17 }
 0x137   : > { %v491_v21 = vmax.f32 %v489_v41, %v490_v29  ;;  %v1443_v41 = vor.u32 %v1442_v13, %v1441_v9  ;;  %v1446_v29 = vshll.u32 %v1445_v24, 23  ;;  %v1231_v2 = vmul.u32 %v1227_v36, %v6996_v7 }
 0x138   : > { %v1250_v39 = vmul.u32 %v1248_v1, %v6993_v17  ;;  %v1252_v9 = vmul.u32 %v1248_v1, %v6996_v7  ;;  %v1234_v45 = vshll.u32 %v1230_v60, 16  ;;  %v1235_v13 = vshrl.u32 %v1230_v60, 16 }
 0x139   : > { %v492_v42 = vsub.f32 %v6998_v46, %v491_v21  ;;  %v7068_v46 = vsel %vm1207_vm15, %v1191_v44, %v1194_v23  ;;  %v1447_v51 = vor.u32 4788187, %v1446_v29  ;;  %v1450_v54 = vcvt.s32.f32 %v1443_v41 }
 0x13a   : > { %v1232_v21 = vshll.u32 %v1229_v3, 16  ;;  %v1233_v23 = vshrl.u32 %v1229_v3, 16  ;;  %v1251_v44 = vmul.u32 %v1249_v22, %v6993_v17  ;;  %v1253_v37 = vmul.u32 %v1249_v22, %v6996_v7 }
 0x13b   : > { %v493_v10 = vmul.f32 1.442695, %v492_v42  ;;  %v1448_v25 = vand.u32 2147483647, %v1447_v51  ;;  %v5947_v42 = vadd.s32 4294967169, %v7009_v15  ;;  %v1256_v36 = vshll.u32 %v1252_v9, 16 }
 0x13c   : > { %vm1236_vm4 = vc.u32 %v1228_v19, %v1232_v21  ;;  %v1238_v16 = vadd.s32 %v1232_v21, %v1228_v19  ;;  %v1254_v38 = vshll.u32 %v1251_v44, 16  ;;  %vm1783_vm15 = vweird.f32 %v6620_v20 }
 0x13d   : > { %6169 = vpow2.f32 %v493_v10  ;;  %v1451_v50 = vmul.f32 %v1450_v54, %v1448_v25  ;;  %v1237_v24 = vsel %vm1236_vm4, 1, %v10813_v5  ;;  %v1030_v60 = vadd.s32 1, %v5947_v42 }
 0x13e   : > { %v1239_v52 = vadd.s32 %v1237_v24, %v1231_v2  ;;  %vm1240_vm6 = vc.u32 %v1238_v16, %v1234_v45  ;;  %vm1258_vm9 = vc.u32 %v1250_v39, %v1254_v38  ;;  %v1260_v10 = vadd.s32 %v1254_v38, %v1250_v39 }
 0x13f   : > { %v1452_v1 = vxor.u32 2147483648, %v1451_v50  ;;  %v1241_v15 = vsel %vm1240_vm6, 1, %v10813_v5  ;;  %v1259_v3 = vsel %vm1258_vm9, 1, %v10813_v5  ;;  %v1255_v2 = vshrl.u32 %v1251_v44, 16 }
 0x140   : > { %v1243_v29 = vadd.s32 %v1241_v15, %v1239_v52  ;;  %v1261_v51 = vadd.s32 %v1259_v3, %v1253_v37  ;;  %vm1262_vm13 = vc.u32 %v1260_v10, %v1256_v36  ;;  %v1474_v16 = vadd.s32 3, %v1457_v57 }
 0x141   : > { %v1453_v22 = vsel %vm1332_vm12, %v1452_v1, %v1451_v50  ;;  %v1263_v21 = vsel %vm1262_vm13, 1, %v10813_v5  ;;  %vm1628_vm12 = vweird.f32 %v6642_v40  ;;  %v1634_v37 = vsel %vm1632_vm5, %v7029_v63, %v1633_v59 }
 0x142   : > { %v7097_v19 = vsel %vm7021_vm14, %v6772_v62, %v1453_v22  ;;  %v1244_v54 = vadd.s32 %v1243_v29, %v1233_v23  ;;  %v1265_v45 = vadd.s32 %v1263_v21, %v1261_v51  ;;  %v1257_v23 = vshrl.u32 %v1252_v9, 16 }
 0x143   : > { %v7083_v17 = vpop.eup %6169  ;;  %v1458_v25 = vmul.f32 %v7097_v19, %v7097_v19  ;;  %v1214_v49 = vsel %vm1208_vm0, %v7068_v46, %v1213_v32  ;;  %v7118_v55 = vadd.s32 %v1260_v10, %v1256_v36  ;;  %v1637_v59 = vsel %vm1635_vm8, %v1636_v28, %v7036_v6  ;;  %v538_v46 = vpop.permute.xlu0 %537 }
 0x144   : > { %v495_v41 = vsel %vm484_vm11, %v7083_v17, 0.0  ;;  %vm1031_vm11 = vcmp.gt.s32.totalorder %v1030_v60, 0  ;;  %v7108_v42 = vadd.s32 %v1244_v54, %v1235_v13  ;;  %v1266_v52 = vadd.s32 %v1265_v45, %v1255_v2 }
 0x145   : > { %v496_v7 = vrot.slane %v495_v41, 4  ;;  %v1032_v44 = vsel %vm1031_vm11, %v1030_v60, 0  ;;  %v1459_v24 = vmul.f32 -0.001358992, %v1458_v25  ;;  %v1466_v38 = vmul.f32 -0.00019511016, %v1458_v25 }
 0x146   : > { %v1034_v57 = vand.u32 31, %v1032_v44  ;;  %v1267_v15 = vadd.s32 %v1266_v52, %v1257_v23  ;;  %v7129_v58 = vand.u32 3, %v1474_v16  ;;  %vm1270_vm14 = vc.u32 %v7108_v42, %v7118_v55 }
 0x147   : > { %v497_v39 = vadd.f32 %v496_v7, %v495_v41  ;;  %v1460_v9 = vadd.f32 0.041655596, %v1459_v24  ;;  %v1467_v1 = vadd.f32 0.008332121, %v1466_v38  ;;  %v1793_v41 = vsel %vm1786_vm7, %v6988_v27, %v6984_v31 }
 0x148   : > { %v1271_v29 = vadd.s32 1, %v1267_v15  ;;  %v1638_v18 = vsel %vm1631_vm10, %v1634_v37, %v1637_v59  ;;  %v1268_v31 = vmul.u32 %v6977_v30, %v1214_v49  ;;  %v1028_v27 = vor.u32 8388608, %v7005_v0 }
 0x149   : > { %v498_v50 = vrot.slane %v497_v39, 2  ;;  %v1461_v36 = vmul.f32 %v1460_v9, %v1458_v25  ;;  %v1468_v10 = vmul.f32 %v1467_v1, %v1458_v25  ;;  %v7137_v63 = vsub.s32 32, %v1034_v57 }
 0x14a   : > { %v1272_v60 = vsel %vm1270_vm14, %v1271_v29, %v1267_v15  ;;  %v7142_v7 = vmul.f32 %v538_v46, %v6584_v47  ;;  %v7146_v22 = vadd.f32 %v6971_v8, %v6832_v26  ;;  %6171 = vtanh.f32 %v6772_v62 }
 0x14b   : > { %v499_v13 = vadd.f32 %v498_v50, %v497_v39  ;;  %v1462_v28 = vadd.f32 -0.4999988, %v1461_v36  ;;  %v1469_v3 = vadd.f32 -0.16666654, %v1468_v10  ;;  %v1273_v34 = vadd.s32 %v1272_v60, %v1268_v31 }
 0x14c   : > { %v7152_v30 = vsel %vm1783_vm15, nan, %v1793_v41  ;;  %v7156_v0 = vsel %vm1628_vm12, nan, %v1638_v18  ;;  %v7159_v47 = vadd.f32 0.5, %v6975_v12  ;;  %vm1477_vm0 = vcmp.eq.s32.totalorder %v7129_v58, 0 }
 0x14d   : > { %v500_v32 = vrot.slane %v499_v13, 1  ;;  %v1463_v51 = vmul.f32 %v1462_v28, %v1458_v25  ;;  %v1470_v54 = vmul.f32 %v1469_v3, %v1458_v25  ;;  %v1274_v26 = vadd.s32 536870912, %v1273_v34 }
 0x14e   : > { %vm1480_vm1 = vcmp.eq.s32.totalorder %v7129_v58, 2  ;;  %v7163_v8 = vshrl.u32 %v1032_v44, 5  ;;  %v10858_v2 = vmov 2475754826   ;;  %v10859_v39 = vmov 2131351028  }
 0x14f   : > { %v7139_v6 = vadd.f32 %v500_v32, %v499_v13  ;;  %v1038_v21 = vshrl.u32 %v10858_v2, %v7137_v63  ;;  %v1041_v45 = vshrl.u32 %v10859_v39, %v7137_v63  ;;  %v7169_v16 = vshll.u32 %v1028_v27, 8 }
 0x150   : > { %v1464_v23 = vadd.f32 1.0, %v1463_v51  ;;  %v1471_v12 = vadd.f32 1.0, %v1470_v54  ;;  %v7171_v50 = vshrl.u32 %v1274_v26, 30  ;;  %v1047_v25 = vshrl.u32 %v10818_v56, %v7137_v63  ;;  %v7181_v37 = vpop.eup %6171 }
 0x151   : > { %6173 = vrcp.f32 %v7139_v6  ;;  %vm1476_vm2 = vcmp.lt.s32.totalorder %v7129_v58, 2  ;;  %v1037_v44 = vshll.u32 %v10815_v43, %v1034_v57  ;;  %v1040_v24 = vshll.u32 %v10858_v2, %v1034_v57 }
 0x152   : > { %v1043_v38 = vshll.u32 %v10859_v39, %v1034_v57  ;;  %v1044_v52 = vshrl.u32 %v10811_v53, %v7137_v63  ;;  %v1472_v49 = vmul.f32 %v1471_v12, %v7097_v19  ;;  %v1276_v13 = vshll.u32 %v7171_v50, 30 }
 0x153   : > { %v1046_v9 = vshll.u32 %v10811_v53, %v1034_v57  ;;  %v10860_v1 = vmov 1326507024   ;;  %vm507_vm3 = vweird.f32 %v7139_v6  ;;  %v7189_v59 = vor.u32 %v1038_v21, %v1037_v44 }
 0x154   : > { %v1050_v15 = vshrl.u32 %v10860_v1, %v7137_v63  ;;  %v7191_v46 = vor.u32 %v1041_v45, %v1040_v24  ;;  %v1049_v32 = vshll.u32 %v10818_v56, %v1034_v57  ;;  %vm1473_vm4 = vweird.f32 %v6772_v62 }
 0x155   : > { %v1478_v19 = vxor.u32 2147483648, %v1472_v49  ;;  %v1481_v10 = vxor.u32 2147483648, %v1464_v23  ;;  %v1048_v29 = vor.u32 %v1047_v25, %v1046_v9  ;;  %v511_v18 = vand.u32 2147483647, %v7139_v6 }
 0x156   : > { %v513_v31 = vand.u32 2147483648, %v7139_v6  ;;  %v7198_v27 = vsub.s32 %v1273_v34, %v1276_v13  ;;  %v7200_v28 = vor.u32 %v1044_v52, %v1043_v38  ;;  %v1051_v60 = vor.u32 %v1050_v15, %v1049_v32 }
 0x157   : > { %v6174_v41 = vpop.eup %6173  ;;  %vm1052_vm5 = vcmp.lt.s32.totalorder %v7163_v8, 1  ;;  %vm1054_vm6 = vcmp.lt.s32.totalorder %v7163_v8, 3  ;;  %v1479_v57 = vsel %vm1477_vm0, %v1464_v23, %v1478_v19  ;;  %vm1055_vm8 = vcmp.lt.s32.totalorder %v7163_v8, 4 }
 0x158   : > { %v503_v36 = vmul.f32 %v6174_v41, %v7139_v6  ;;  %vm1278_vm7 = vcmp.lt.s32.totalorder %v7198_v27, 0  ;;  %v1279_v51 = vsub.s32 0, %v7198_v27  ;;  %vm508_vm9 = vweird.f32 %v6174_v41 }
 0x159   : > { %v1482_v34 = vsel %vm1480_vm1, %v1481_v10, %v1472_v49  ;;  %v1061_v26 = vsel %vm1055_vm8, %v1048_v29, 920167782  ;;  %v1060_v45 = vsel %vm1052_vm5, %v7189_v59, %v7191_v46  ;;  %v1064_v12 = vsel %vm1052_vm5, %v7191_v46, %v7200_v28  ;;  %vm509_vm10 = vmor %vm507_vm3, %vm508_vm9 }
 0x15a   : > { %v504_v3 = vsub.f32 1.0, %v503_v36  ;;  %v1280_v21 = vsel %vm1278_vm7, %v1279_v51, %v7198_v27  ;;  %v1062_v23 = vsel %vm1054_vm6, %v7200_v28, %v1061_v26  ;;  %v1483_v44 = vsel %vm1476_vm2, %v1479_v57, %v1482_v34 }
 0x15b   : > { %v1281_v24 = vclz %v1280_v21  ;;  %v1065_v38 = vsel %vm1055_vm8, %v1051_v60, 1326507024  ;;  %vm512_vm13 = vcmp.eq.f32.partialorder %v511_v18, 8.507059e+37  ;;  %v514_v52 = vor.u32 1.1754944e-38, %v513_v31 }
 0x15c   : > { %v505_v54 = vmul.f32 %v6174_v41, %v504_v3  ;;  %vm1053_vm11 = vcmp.lt.s32.totalorder %v7163_v8, 2  ;;  %v1066_v49 = vsel %vm1054_vm6, %v1048_v29, %v1065_v38  ;;  %v1484_v6 = vsel %vm1473_vm4, nan, %v1483_v44 }
 0x15d   : > { %v5951_v9 = vadd.s32 4294967294, %v1281_v24  ;;  %v7236_v58 = vsel %vm1053_vm11, %v1060_v45, %v1062_v23  ;;  %v7240_v15 = vsel %vm1053_vm11, %v1064_v12, %v1066_v49  ;;  %v1269_v36 = vadd.s32 %v7118_v55, %v7108_v42 }
 0x15e   : > { %v506_v25 = vadd.f32 %v6174_v41, %v505_v54  ;;  %v1072_v19 = vshrl.u32 %v7240_v15, 16  ;;  %vm1843_vm15 = vcmp.ge.f32.partialorder %v6620_v20, 0.0  ;;  %vm1842_vm12 = vcmp.ge.f32.partialorder %v6642_v40, 0.0 }
 0x15f   : > { %vm5952_vm14 = vcmp.lt.s32.totalorder %v5951_v9, 0  ;;  %v7251_v10 = vand.u32 65535, %v7169_v16  ;;  %v7254_v29 = vshrl.u32 %v7169_v16, 16  ;;  %vm1841_vm0 = vcmp.ge.f32.partialorder %v6772_v62, 0.0 }
 0x160   : > { %v510_v13 = vsel %vm509_vm10, %v6174_v41, %v506_v25  ;;  %v1284_v18 = vsel %vm5952_vm14, 0, %v5951_v9  ;;  %v1071_v42 = vand.u32 65535, %v7240_v15  ;;  %v1093_v55 = vand.u32 65535, %v7236_v58 }
 0x161   : > { %v515_v32 = vsel %vm512_vm13, %v514_v52, %v510_v13  ;;  %v7269_v57 = vmul.u32 %v1072_v19, %v7251_v10  ;;  %vm1936_vm1 = vcmask 1041408   ;;  %v1285_v26 = vsub.s32 32, %v1284_v18 }
 0x162   : > { %v516_v41 = vmul.f32 %v7083_v17, %v515_v32  ;;  %v1094_v17 = vshrl.u32 %v7236_v58, 16  ;;  %v7286_v38 = vmul.u32 %v1071_v42, %v7254_v29  ;;  %v1286_v49 = vshll.u32 %v7198_v27, %v1284_v18 }
 0x163   : > { %v1097_v15 = vmul.u32 %v1093_v55, %v7254_v29  ;;  %vm1177_vm7 = vcmp.lt.s32.totalorder %v6837_v14, 0  ;;  %vm1022_vm14 = vcmp.lt.s32.totalorder %v6867_v33, 0 }
 0x164   : > { %v7260_v31 = vperm.slane %v516_v41, 0  ;;  %v7262_v3 = vperm.slane %v516_v41, 3  ;;  %v7264_v60 = vperm.slane %v516_v41, 4  ;;  %v7271_v51 = vperm.slane %v516_v41, 2 }
 0x165   : > { %v522_v54 = vrot.slane %v516_v41, 4  ;;  %v526_v34 = vmul.f32 0.1, %v516_v41 }
 0x166   : > { %10861 = vst [vmem:[#allocation6_spill] sm:$0xff] %v7260_v31  ;;  %v709_v21 = vmul.f32 %v6829_v61, %v7260_v31  ;;  %v1801_v45 = vmul.f32 %v7152_v30, %v7262_v3  ;;  %v1815_v23 = vmul.f32 %v6620_v20, %v7264_v60  ;;  %v708_v12 = vmul.f32 %v6874_v35, %v7260_v31 }
 0x167   : > { %10862 = vst [vmem:[#allocation7_spill] sm:$0xff] %v7262_v3  ;;  %v524_v25 = vadd.f32 %v522_v54, %v516_v41  ;;  %v1800_v44 = vmul.f32 %v7156_v0, %v7262_v3  ;;  %v1814_v24 = vmul.f32 %v6642_v40, %v7264_v60  ;;  %v7288_v61 = vperm.slane %v526_v34, 5 }
 0x168   : > { %10863 = vst [vmem:[#allocation8_spill] sm:$0xff] %v7264_v60  ;;  %v1822_v30 = vadd.f32 %v1815_v23, %v7271_v51  ;;  %v707_v52 = vmul.f32 %v7181_v37, %v7260_v31  ;;  %v1799_v0 = vmul.f32 %v1484_v6, %v7262_v3  ;;  %v1813_v9 = vmul.f32 %v6772_v62, %v7264_v60 }
 0x169   : > { %10864 = vst [vmem:[#allocation9_spill] sm:$0xff] %v7271_v51  ;;  %v7294_v35 = vperm.slane %v524_v25, 1  ;;  %v1821_v13 = vadd.f32 %v1814_v24, %v7271_v51  ;;  %v1808_v32 = vadd.f32 %v1801_v45, %v709_v21  ;;  %v1807_v54 = vadd.f32 %v1800_v44, %v708_v12  ;;  %v634_v44 = vpop.permute.xlu0 %633 }
 0x16a   : > { %10865 = vst [vmem:[#allocation10_spill] sm:$0xff] %v7288_v61  ;;  %v1829_v41 = vmul.f32 %v1822_v30, %v6834_v11  ;;  %v1287_v34 = vshrl.u32 %v1269_v36, %v1285_v26  ;;  %v1820_v23 = vadd.f32 %v1813_v9, %v7271_v51  ;;  %v1806_v45 = vadd.f32 %v1799_v0, %v707_v52 }
 0x16b   : > { %10866 = vst [vmem:[#allocation11_spill] sm:$0xff] %v7294_v35  ;;  %v1850_v37 = vsel %vm1843_vm15, %v7294_v35, %v7288_v61  ;;  %v1828_v27 = vmul.f32 %v1821_v13, %v6844_v4  ;;  %v1849_v6 = vsel %vm1842_vm12, %v7294_v35, %v7288_v61  ;;  %v1848_v36 = vsel %vm1841_vm0, %v7294_v35, %v7288_v61 }
 0x16c   : > { %v1836_v25 = vadd.f32 %v1829_v41, %v1808_v32  ;;  %v1857_v21 = vmul.f32 %v1850_v37, %v6620_v20  ;;  %v1856_v11 = vmul.f32 %v1849_v6, %v6642_v40  ;;  %v1827_v4 = vmul.f32 %v1820_v23, %v7159_v47 }
 0x16d   : > { %v1835_v26 = vadd.f32 %v1828_v27, %v1807_v54  ;;  %v1855_v12 = vmul.f32 %v1848_v36, %v6772_v62  ;;  %v1289_v30 = vsub.s32 4294967266, %v1284_v18  ;;  %v1073_v13 = vmul.u32 %v1071_v42, %v7251_v10  ;;  %v579_v54 = vpop.permute.xlu1 %578 }
 0x16e   : > { %v1864_v24 = vadd.f32 %v1857_v21, %v1836_v25  ;;  %v1077_v20 = vshll.u32 %v7269_v57, 16  ;;  %v7322_v40 = vadd.f32 %v634_v44, %v7146_v22  ;;  %v1834_v9 = vadd.f32 %v1827_v4, %v1806_v45 }
 0x16f   : > { %v671_v32 = vmul.f32 0.5, %v6837_v14  ;;  %v1288_v41 = vor.u32 %v1287_v34, %v1286_v49  ;;  %v1863_v62 = vadd.f32 %v1856_v11, %v1835_v26  ;;  %v1290_v47 = vadd.s32 127, %v1289_v30 }
 0x170   : > { %5962 = vmatpush.msk.msrb.mxu0 %vm1936_vm1, %v1864_v24  ;;  %6079 = vmatpush.msk.msra.mxu1 %vm1936_vm1, %v1864_v24  ;;  %v1076_v18 = vmul.u32 %v1072_v19, %v7254_v29  ;;  %vm1081_vm2 = vc.u32 %v1073_v13, %v1077_v20  ;;  %v1862_v42 = vadd.f32 %v1855_v12, %v1834_v9  ;;  %v1079_v22 = vshll.u32 %v7286_v38, 16 }
 0x171   : > { %v1082_v52 = vsel %vm1081_vm2, 1, %v10813_v5  ;;  %v1083_v0 = vadd.s32 %v1077_v20, %v1073_v13  ;;  %v1291_v49 = vshll.u32 %v1290_v47, 23  ;;  %v1096_v37 = vmul.u32 %v1094_v17, %v7251_v10 }
 0x172   : > { %1950 = vmatpush.msrb.mxu0 %v1863_v62  ;;  %6080 = vmatpush.msra.mxu1 %v1863_v62  ;;  %v1084_v34 = vadd.s32 %v1082_v52, %v1076_v18  ;;  %v605_v19 = vmul.f32 %v579_v54, %v6586_v48  ;;  %6175 = vtanh.f32 %v671_v32  ;;  %v1299_v27 = vsub.s32 4, %v7171_v50 }
 0x173   : > { %vm1085_vm3 = vc.u32 %v1083_v0, %v1079_v22  ;;  %v1292_v6 = vor.u32 4788187, %v1291_v49  ;;  %v1095_v25 = vmul.u32 %v1093_v55, %v7251_v10  ;;  %v1099_v21 = vshll.u32 %v1096_v37, 16 }
 0x174   : > { %1951 = vmatpush.msrb.mxu0 %v1862_v42  ;;  %6081 = vmatpush.msra.mxu1 %v1862_v42  ;;  %v1086_v23 = vsel %vm1085_vm3, 1, %v10813_v5  ;;  %v1295_v11 = vcvt.s32.f32 %v1288_v41  ;;  %v1078_v36 = vshrl.u32 %v7269_v57, 16  ;;  %v1098_v48 = vmul.u32 %v1094_v17, %v7254_v29 }
 0x175   : > { %v1088_v26 = vadd.s32 %v1086_v23, %v1084_v34  ;;  %v1293_v45 = vand.u32 2147483647, %v1292_v6  ;;  %v1101_v4 = vshll.u32 %v1097_v15, 16  ;;  %vm1103_vm4 = vc.u32 %v1095_v25, %v1099_v21  ;;  %v629_v0 = vpop.permute.xlu1 %628 }
 0x176   : > { %v1105_v12 = vadd.s32 %v1099_v21, %v1095_v25  ;;  %v670_v44 = vmul.f32 0.5, %v6867_v33  ;;  %v1104_v10 = vsel %vm1103_vm4, 1, %v10813_v5  ;;  %v1057_v57 = vsel %vm1055_vm8, %v7200_v28, 2102212464 }
 0x177   : > { %v1089_v24 = vadd.s32 %v1088_v26, %v1078_v36  ;;  %v1296_v55 = vmul.f32 %v1295_v11, %v1293_v45  ;;  %v1106_v30 = vadd.s32 %v1104_v10, %v1098_v48  ;;  %v10867_v29 = vand.u32 2147483647, %v6837_v14 }
 0x178   : > { %vm1107_vm9 = vc.u32 %v1105_v12, %v1101_v4  ;;  %v6176_v58 = vpop.eup %6175  ;;  %v1036_v13 = vshrl.u32 %v10815_v43, %v7137_v63  ;;  %v1080_v20 = vshrl.u32 %v7286_v38, 16  ;;  %v1300_v28 = vsel %vm1177_vm7, %v1299_v27, %v7171_v50 }
 0x179   : > { %vm7356_vm10 = vcmp.le.f32.partialorder %v10867_v29, 0.7853982  ;;  %v1108_v9 = vsel %vm1107_vm9, 1, %v10813_v5  ;;  %v1297_v32 = vxor.u32 2147483648, %v1296_v55  ;;  %v1100_v41 = vshrl.u32 %v1096_v37, 16 }
 0x17a   : > { %v1110_v54 = vadd.s32 %v1108_v9, %v1106_v30  ;;  %v1056_v62 = vsel %vm1052_vm5, %v1036_v13, %v7189_v59  ;;  %v1058_v47 = vsel %vm1054_vm6, %v7191_v46, %v1057_v57  ;;  %v7373_v63 = vadd.s32 %v1089_v24, %v1080_v20 }
 0x17b   : > { %v865_v38 = vand.u32 2147483647, %v7322_v40  ;;  %v1298_v18 = vsel %vm1177_vm7, %v1297_v32, %v1296_v55  ;;  %6177 = vtanh.f32 %v670_v44  ;;  %v1102_v42 = vshrl.u32 %v1097_v15, 16 }
 0x17c   : > { %v1111_v50 = vadd.s32 %v1110_v54, %v1100_v41  ;;  %v7381_v22 = vsel %vm7356_vm10, %v6837_v14, %v1298_v18  ;;  %v1302_v59 = vsel %vm7356_vm10, 0, %v1300_v28  ;;  %v1109_v52 = vadd.s32 %v1105_v12, %v1101_v4 }
 0x17d   : > { %v868_v46 = vand.u32 2139095040, %v7322_v40  ;;  %v612_v49 = vadd.f32 %v605_v19, %v7142_v7  ;;  %v1303_v34 = vmul.f32 %v7381_v22, %v7381_v22  ;;  %v1059_v37 = vsel %vm1053_vm11, %v1056_v62, %v1058_v47 }
 0x17e   : > { %v1112_v15 = vadd.s32 %v1111_v50, %v1102_v42  ;;  %v685_v27 = vmul.f32 0.5, %v6176_v58  ;;  %vm1115_vm5 = vc.u32 %v7373_v63, %v1109_v52  ;;  %v872_v23 = vand.u32 8388607, %v865_v38 }
 0x17f   : > { %v869_v6 = vshrl.u32 %v868_v46, 23  ;;  %v1304_v25 = vmul.f32 -0.001358992, %v1303_v34  ;;  %v1311_v21 = vmul.f32 -0.00019511016, %v1303_v34  ;;  %v1319_v11 = vadd.s32 3, %v1302_v59 }
 0x180   : > { %v1116_v36 = vadd.s32 1, %v1112_v15  ;;  %v7394_v26 = vadd.f32 %v629_v0, %v612_v49  ;;  %6179 = vtanh.f32 %v6837_v14  ;;  %v1113_v7 = vmul.u32 %v7169_v16, %v1059_v37 }
 0x181   : > { %v5944_v8 = vadd.s32 4294967169, %v869_v6  ;;  %v6178_v19 = vpop.eup %6177  ;;  %v1305_v48 = vadd.f32 0.041655596, %v1304_v25  ;;  %v1312_v45 = vadd.f32 0.008332121, %v1311_v21  ;;  %v1812_v4 = vmul.f32 %v6837_v14, %v7264_v60 }
 0x182   : > { %v1117_v12 = vsel %vm1115_vm5, %v1116_v36, %v1112_v15  ;;  %v692_v44 = vadd.f32 0.5, %v685_v27  ;;  %v873_v10 = vor.u32 8388608, %v872_v23  ;;  %v1320_v58 = vand.u32 3, %v1319_v11 }
 0x183   : > { %v1118_v24 = vadd.s32 %v1117_v12, %v1113_v7  ;;  %v875_v55 = vadd.s32 1, %v5944_v8  ;;  %v1306_v57 = vmul.f32 %v1305_v48, %v1303_v34  ;;  %v1313_v30 = vmul.f32 %v1312_v45, %v1303_v34 }
 0x184   : > { %vm1840_vm6 = vcmp.ge.f32.partialorder %v6837_v14, 0.0  ;;  %v7401_v29 = vmul.f32 0.5, %v6178_v19  ;;  %6181 = vtanh.f32 %v6867_v33  ;;  %v1819_v20 = vadd.f32 %v1812_v4, %v7271_v51 }
 0x185   : > { %v1119_v16 = vadd.s32 536870912, %v1118_v24  ;;  %vm876_vm8 = vcmp.gt.s32.totalorder %v875_v55, 0  ;;  %v1307_v17 = vadd.f32 -0.4999988, %v1306_v57  ;;  %v1314_v13 = vadd.f32 -0.16666654, %v1313_v30 }
 0x186   : > { %v877_v9 = vsel %vm876_vm8, %v875_v55, 0  ;;  %v6180_v32 = vpop.eup %6179  ;;  %v1847_v28 = vsel %vm1840_vm6, %v7294_v35, %v7288_v61  ;;  %v7407_v62 = vshll.u32 %v873_v10, 8  ;;  %vm1321_vm13 = vcmp.lt.s32.totalorder %v1320_v58, 2 }
 0x187   : > { %v1120_v41 = vshrl.u32 %v1119_v16, 30  ;;  %v879_v54 = vand.u32 31, %v877_v9  ;;  %v1308_v47 = vmul.f32 %v1307_v17, %v1303_v34  ;;  %v1315_v18 = vmul.f32 %v1314_v13, %v1303_v34 }
 0x188   : > { %vm1322_vm11 = vcmp.eq.s32.totalorder %v1320_v58, 0  ;;  %v706_v42 = vmul.f32 %v6180_v32, %v7260_v31  ;;  %vm1318_vm15 = vweird.f32 %v6837_v14  ;;  %vm1325_vm12 = vcmp.eq.s32.totalorder %v1320_v58, 2 }
 0x189   : > { %v1121_v50 = vshll.u32 %v1120_v41, 30  ;;  %v7411_v59 = vsub.s32 32, %v879_v54  ;;  %v1309_v46 = vadd.f32 1.0, %v1308_v47  ;;  %v1316_v0 = vadd.f32 1.0, %v1315_v18 }
 0x18a   : > { %v1826_v49 = vmul.f32 %v1819_v20, %v692_v44  ;;  %v1854_v37 = vmul.f32 %v1847_v28, %v6837_v14  ;;  %v7414_v15 = vpop.eup %6181  ;;  %v1114_v34 = vadd.s32 %v1109_v52, %v7373_v63  ;;  %v7419_v6 = vand.u32 65535, %v7407_v62 }
 0x18b   : > { %v1122_v27 = vsub.s32 %v1118_v24, %v1121_v50  ;;  %v710_v23 = vand.u32 2147483647, %v7394_v26  ;;  %v1317_v25 = vmul.f32 %v1316_v0, %v7381_v22  ;;  %v1326_v21 = vxor.u32 2147483648, %v1309_v46 }
 0x18c   : > { %v7424_v11 = vshrl.u32 %v7407_v62, 16  ;;  %v713_v36 = vand.u32 2139095040, %v7394_v26  ;;  %v883_v8 = vshrl.u32 %v10858_v2, %v7411_v59  ;;  %v886_v63 = vshrl.u32 %v10859_v39, %v7411_v59 }
 0x18d   : > { %vm1123_vm0 = vcmp.lt.s32.totalorder %v1122_v27, 0  ;;  %v1124_v7 = vsub.s32 0, %v1122_v27  ;;  %v1323_v52 = vxor.u32 2147483648, %v1317_v25  ;;  %v1144_v19 = vsub.s32 4, %v1120_v41 }
 0x18e   : > { %v7431_v48 = vshrl.u32 %v877_v9, 5  ;;  %v882_v22 = vshll.u32 %v10815_v43, %v879_v54  ;;  %v885_v4 = vshll.u32 %v10858_v2, %v879_v54  ;;  %v889_v12 = vshrl.u32 %v10811_v53, %v7411_v59 }
 0x18f   : > { %v1125_v45 = vsel %vm1123_vm0, %v1124_v7, %v1122_v27  ;;  %v892_v44 = vshrl.u32 %v10818_v56, %v7411_v59  ;;  %v1324_v24 = vsel %vm1322_vm11, %v1309_v46, %v1323_v52  ;;  %v1327_v10 = vsel %vm1325_vm12, %v1326_v21, %v1317_v25 }
 0x190   : > { %v1126_v55 = vclz %v1125_v45  ;;  %v888_v57 = vshll.u32 %v10859_v39, %v879_v54  ;;  %v1328_v30 = vsel %vm1321_vm13, %v1324_v24, %v1327_v10  ;;  %v884_v16 = vor.u32 %v883_v8, %v882_v22 }
 0x191   : > { %v887_v17 = vor.u32 %v886_v63, %v885_v4  ;;  %v891_v13 = vshll.u32 %v10811_v53, %v879_v54  ;;  %v1329_v20 = vsel %vm1318_vm15, nan, %v1328_v30  ;;  %v894_v32 = vshll.u32 %v10818_v56, %v879_v54 }
 0x192   : > { %v5948_v9 = vadd.s32 4294967294, %v1126_v55  ;;  %v895_v28 = vshrl.u32 %v10860_v1, %v7411_v59  ;;  %v1798_v47 = vmul.f32 %v1329_v20, %v7262_v3  ;;  %v10870_v18 = vand.u32 2147483647, %v6867_v33 }
 0x193   : > { %v890_v50 = vor.u32 %v889_v12, %v888_v57  ;;  %v893_v46 = vor.u32 %v892_v44, %v891_v13  ;;  %v714_v0 = vshrl.u32 %v713_v36, 23  ;;  %v1145_v14 = vsel %vm1022_vm14, %v1144_v19, %v1120_v41 }
 0x194   : > { %vm7452_vm2 = vcmp.le.f32.partialorder %v10870_v18, 0.7853982  ;;  %vm5949_vm3 = vcmp.lt.s32.totalorder %v5948_v9, 0  ;;  %v896_v25 = vor.u32 %v895_v28, %v894_v32  ;;  %vm897_vm4 = vcmp.lt.s32.totalorder %v7431_v48, 1 }
 0x195   : > { %v1805_v54 = vadd.f32 %v1798_v47, %v706_v42  ;;  %v1129_v21 = vsel %vm5949_vm3, 0, %v5948_v9  ;;  %vm898_vm7 = vcmp.lt.s32.totalorder %v7431_v48, 2  ;;  %vm899_vm9 = vcmp.lt.s32.totalorder %v7431_v48, 3 }
 0x196   : > { %v1130_v7 = vsub.s32 32, %v1129_v21  ;;  %v1134_v8 = vsub.s32 4294967266, %v1129_v21  ;;  %vm900_vm10 = vcmp.lt.s32.totalorder %v7431_v48, 4  ;;  %v905_v36 = vsel %vm897_vm4, %v884_v16, %v887_v17 }
 0x197   : > { %v1833_v63 = vadd.f32 %v1826_v49, %v1805_v54  ;;  %v1131_v52 = vshll.u32 %v1122_v27, %v1129_v21  ;;  %v906_v41 = vsel %vm900_vm10, %v893_v46, 920167782  ;;  %v909_v42 = vsel %vm897_vm4, %v887_v17, %v890_v50 }
 0x198   : > { %v1132_v19 = vshrl.u32 %v1114_v34, %v1130_v7  ;;  %v1135_v22 = vadd.s32 127, %v1134_v8  ;;  %v907_v45 = vsel %vm899_vm9, %v890_v50, %v906_v41  ;;  %v910_v4 = vsel %vm900_vm10, %v896_v25, 1326507024 }
 0x199   : > { %v1861_v12 = vadd.f32 %v1854_v37, %v1833_v63  ;;  %v881_v44 = vshrl.u32 %v10815_v43, %v7411_v59  ;;  %v908_v49 = vsel %vm898_vm7, %v905_v36, %v907_v45  ;;  %v911_v27 = vsel %vm899_vm9, %v893_v46, %v910_v4 }
 0x19a   : > { %v1133_v24 = vor.u32 %v1132_v19, %v1131_v52  ;;  %v1136_v10 = vshll.u32 %v1135_v22, 23  ;;  %v902_v34 = vsel %vm900_vm10, %v890_v50, 2102212464  ;;  %v912_v55 = vsel %vm898_vm7, %v909_v42, %v911_v27 }
 0x19b   : > { %1952 = vmatpush.msrb.mxu0 %v1861_v12  ;;  %6082 = vmatpush.msra.mxu1 %v1861_v12  ;;  %v916_v37 = vand.u32 65535, %v912_v55  ;;  %v917_v57 = vshrl.u32 %v912_v55, 16  ;;  %v938_v30 = vand.u32 65535, %v908_v49  ;;  %v939_v59 = vshrl.u32 %v908_v49, 16 }
 0x19c   : > { %v7483_v13 = vadd.f32 0.5, %v7401_v29  ;;  %v7487_v20 = vmul.f32 %v7414_v15, %v7260_v31  ;;  %v1137_v9 = vor.u32 4788187, %v1136_v10  ;;  %v1147_v32 = vsel %vm7452_vm2, 0, %v1145_v14 }
 0x19d   : > { %v901_v28 = vsel %vm897_vm4, %v881_v44, %v884_v16  ;;  %v903_v47 = vsel %vm899_vm9, %v887_v17, %v902_v34  ;;  %v919_v18 = vmul.u32 %v917_v57, %v7419_v6  ;;  %v920_v50 = vmul.u32 %v916_v37, %v7424_v11 }
 0x19e   : > { %v1138_v29 = vand.u32 2147483647, %v1137_v9  ;;  %v1140_v46 = vcvt.s32.f32 %v1133_v24  ;;  %v941_v25 = vmul.u32 %v939_v59, %v7419_v6  ;;  %v7500_v15 = vand.u32 8388607, %v710_v23 }
 0x19f   : > { %v918_v14 = vmul.u32 %v916_v37, %v7419_v6  ;;  %v922_v54 = vshll.u32 %v919_v18, 16  ;;  %v942_v16 = vmul.u32 %v938_v30, %v7424_v11  ;;  %v5941_v21 = vadd.s32 4294967169, %v714_v0 }
 0x1a0   : > { %v1141_v7 = vmul.f32 %v1140_v46, %v1138_v29  ;;  %v1164_v17 = vadd.s32 3, %v1147_v32  ;;  %v7506_v8 = vsel %vm898_vm7, %v901_v28, %v903_v47  ;;  %v921_v36 = vmul.u32 %v917_v57, %v7424_v11 }
 0x1a1   : > { %v924_v63 = vshll.u32 %v920_v50, 16  ;;  %vm926_vm5 = vc.u32 %v918_v14, %v922_v54  ;;  %v928_v52 = vadd.s32 %v922_v54, %v918_v14  ;;  %v944_v41 = vshll.u32 %v941_v25, 16 }
 0x1a2   : > { %v1142_v42 = vxor.u32 2147483648, %v1141_v7  ;;  %v927_v19 = vsel %vm926_vm5, 1, %v10813_v5  ;;  %v940_v22 = vmul.u32 %v938_v30, %v7419_v6  ;;  %v943_v45 = vmul.u32 %v939_v59, %v7424_v11 }
 0x1a3   : > { %v923_v0 = vshrl.u32 %v919_v18, 16  ;;  %v929_v4 = vadd.s32 %v927_v19, %v921_v36  ;;  %vm930_vm6 = vc.u32 %v928_v52, %v924_v63  ;;  %v946_v12 = vshll.u32 %v942_v16, 16 }
 0x1a4   : > { %v1143_v48 = vsel %vm1022_vm14, %v1142_v42, %v1141_v7  ;;  %v931_v44 = vsel %vm930_vm6, 1, %v10813_v5  ;;  %vm948_vm8 = vc.u32 %v940_v22, %v944_v41  ;;  %v950_v49 = vadd.s32 %v944_v41, %v940_v22 }
 0x1a5   : > { %v7518_v27 = vsel %vm7452_vm2, %v6867_v33, %v1143_v48  ;;  %v933_v24 = vadd.s32 %v931_v44, %v929_v4  ;;  %v949_v6 = vsel %vm948_vm8, 1, %v10813_v5  ;;  %v720_v11 = vadd.s32 1, %v5941_v21 }
 0x1a6   : > { %v1148_v10 = vmul.f32 %v7518_v27, %v7518_v27  ;;  %v925_v34 = vshrl.u32 %v920_v50, 16  ;;  %v951_v55 = vadd.s32 %v949_v6, %v943_v45  ;;  %vm952_vm13 = vc.u32 %v950_v49, %v946_v12 }
 0x1a7   : > { %v934_v37 = vadd.s32 %v933_v24, %v923_v0  ;;  %v945_v57 = vshrl.u32 %v941_v25, 16  ;;  %v953_v30 = vsel %vm952_vm13, 1, %v10813_v5  ;;  %vm721_vm11 = vcmp.gt.s32.totalorder %v720_v11, 0 }
 0x1a8   : > { %v1149_v59 = vmul.f32 -0.001358992, %v1148_v10  ;;  %v1156_v9 = vmul.f32 -0.00019511016, %v1148_v10  ;;  %v955_v58 = vadd.s32 %v953_v30, %v951_v55  ;;  %v722_v32 = vsel %vm721_vm11, %v720_v11, 0 }
 0x1a9   : > { %v7524_v28 = vand.u32 3, %v1164_v17  ;;  %v7526_v47 = vadd.s32 %v934_v37, %v925_v34  ;;  %v718_v18 = vor.u32 8388608, %v7500_v15  ;;  %v724_v29 = vand.u32 31, %v722_v32 }
 0x1aa   : > { %v1150_v46 = vadd.f32 0.041655596, %v1149_v59  ;;  %v1157_v50 = vadd.f32 0.008332121, %v1156_v9  ;;  %v947_v14 = vshrl.u32 %v942_v16, 16  ;;  %v956_v54 = vadd.s32 %v955_v58, %v945_v57 }
 0x1ab   : > { %v1811_v25 = vmul.f32 %v6867_v33, %v7264_v60  ;;  %v7531_v21 = vadd.s32 %v950_v49, %v946_v12  ;;  %v958_v7 = vmul.u32 %v7407_v62, %v7506_v8  ;;  %v7535_v36 = vsub.s32 32, %v724_v29 }
 0x1ac   : > { %v1151_v17 = vmul.f32 %v1150_v46, %v1148_v10  ;;  %v1158_v63 = vmul.f32 %v1157_v50, %v1148_v10  ;;  %v957_v52 = vadd.s32 %v956_v54, %v947_v14  ;;  %v7537_v41 = vshrl.u32 %v722_v32, 5 }
 0x1ad   : > { %vm960_vm15 = vc.u32 %v7526_v47, %v7531_v21  ;;  %v727_v15 = vshll.u32 %v10815_v43, %v724_v29  ;;  %v728_v16 = vshrl.u32 %v10858_v2, %v7535_v36  ;;  %v731_v42 = vshrl.u32 %v10859_v39, %v7535_v36 }
 0x1ae   : > { %v1152_v19 = vadd.f32 -0.4999988, %v1151_v17  ;;  %v1159_v62 = vadd.f32 -0.16666654, %v1158_v63  ;;  %v961_v8 = vadd.s32 1, %v957_v52  ;;  %v734_v22 = vshrl.u32 %v10811_v53, %v7535_v36 }
 0x1af   : > { %vm1839_vm12 = vcmp.ge.f32.partialorder %v6867_v33, 0.0  ;;  %v730_v45 = vshll.u32 %v10858_v2, %v724_v29  ;;  %v733_v0 = vshll.u32 %v10859_v39, %v724_v29  ;;  %v736_v4 = vshll.u32 %v10811_v53, %v724_v29 }
 0x1b0   : > { %v737_v12 = vshrl.u32 %v10818_v56, %v7535_v36  ;;  %v1153_v48 = vmul.f32 %v1152_v19, %v1148_v10  ;;  %v1160_v44 = vmul.f32 %v1159_v62, %v1148_v10  ;;  %vm1166_vm14 = vcmp.lt.s32.totalorder %v7524_v28, 2 }
 0x1b1   : > { %v962_v49 = vsel %vm960_vm15, %v961_v8, %v957_v52  ;;  %v7558_v24 = vor.u32 %v728_v16, %v727_v15  ;;  %vm1163_vm0 = vweird.f32 %v6867_v33  ;;  %v7561_v11 = vor.u32 %v731_v42, %v730_v45 }
 0x1b2   : > { %v963_v6 = vadd.s32 %v962_v49, %v958_v7  ;;  %v738_v34 = vor.u32 %v737_v12, %v736_v4  ;;  %v740_v55 = vshrl.u32 %v10860_v1, %v7535_v36  ;;  %v1154_v37 = vadd.f32 1.0, %v1153_v48 }
 0x1b3   : > { %v1161_v57 = vadd.f32 1.0, %v1160_v44  ;;  %v735_v10 = vor.u32 %v734_v22, %v733_v0  ;;  %v739_v30 = vshll.u32 %v10818_v56, %v724_v29  ;;  %vm1167_vm2 = vcmp.eq.s32.totalorder %v7524_v28, 0 }
 0x1b4   : > { %vm1170_vm3 = vcmp.eq.s32.totalorder %v7524_v28, 2  ;;  %v964_v59 = vadd.s32 536870912, %v963_v6  ;;  %vm742_vm4 = vcmp.lt.s32.totalorder %v7537_v41, 1  ;;  %v1171_v58 = vxor.u32 2147483648, %v1154_v37 }
 0x1b5   : > { %v1162_v9 = vmul.f32 %v1161_v57, %v7518_v27  ;;  %v741_v32 = vor.u32 %v740_v55, %v739_v30  ;;  %vm745_vm7 = vcmp.lt.s32.totalorder %v7537_v41, 4  ;;  %vm744_vm9 = vcmp.lt.s32.totalorder %v7537_v41, 3 }
 0x1b6   : > { %v7571_v46 = vshrl.u32 %v964_v59, 30  ;;  %v750_v29 = vsel %vm742_vm4, %v7558_v24, %v7561_v11  ;;  %v751_v50 = vsel %vm745_vm7, %v738_v34, 920167782  ;;  %v1818_v54 = vadd.f32 %v1811_v25, %v7271_v51 }
 0x1b7   : > { %v1168_v14 = vxor.u32 2147483648, %v1162_v9  ;;  %vm743_vm10 = vcmp.lt.s32.totalorder %v7537_v41, 2  ;;  %v752_v27 = vsel %vm744_vm9, %v735_v10, %v751_v50  ;;  %v754_v63 = vsel %vm742_vm4, %v7561_v11, %v735_v10 }
 0x1b8   : > { %v966_v7 = vshll.u32 %v7571_v46, 30  ;;  %v753_v17 = vsel %vm743_vm10, %v750_v29, %v752_v27  ;;  %v7590_v52 = vshll.u32 %v718_v18, 8  ;;  %v1172_v25 = vsel %vm1170_vm3, %v1171_v58, %v1162_v9 }
 0x1b9   : > { %v1169_v15 = vsel %vm1167_vm2, %v1154_v37, %v1168_v14  ;;  %v1846_v16 = vsel %vm1839_vm12, %v7294_v35, %v7288_v61  ;;  %v755_v42 = vsel %vm745_vm7, %v741_v32, 1326507024  ;;  %v784_v8 = vshrl.u32 %v753_v17, 16 }
 0x1ba   : > { %v1173_v19 = vsel %vm1166_vm14, %v1169_v15, %v1172_v25  ;;  %v967_v62 = vsub.s32 %v963_v6, %v966_v7  ;;  %v756_v18 = vsel %vm744_vm9, %v738_v34, %v755_v42  ;;  %v1825_v45 = vmul.f32 %v1818_v54, %v7483_v13 }
 0x1bb   : > { %v1174_v22 = vsel %vm1163_vm0, nan, %v1173_v19  ;;  %v757_v0 = vsel %vm743_vm10, %v754_v63, %v756_v18  ;;  %v759_v28 = vand.u32 65535, %v7590_v52  ;;  %v1853_v48 = vmul.f32 %v1846_v16, %v6867_v33 }
 0x1bc   : > { %v1797_v4 = vmul.f32 %v1174_v22, %v7262_v3  ;;  %vm968_vm5 = vcmp.lt.s32.totalorder %v967_v62, 0  ;;  %v969_v12 = vsub.s32 0, %v967_v62  ;;  %v761_v44 = vand.u32 65535, %v757_v0 }
 0x1bd   : > { %v762_v49 = vshrl.u32 %v757_v0, 16  ;;  %v783_v6 = vand.u32 65535, %v753_v17  ;;  %v760_v37 = vshrl.u32 %v7590_v52, 16  ;;  %v786_v13 = vmul.u32 %v784_v8, %v759_v28 }
 0x1be   : > { %v1804_v34 = vadd.f32 %v1797_v4, %v7487_v20  ;;  %v970_v55 = vsel %vm968_vm5, %v969_v12, %v967_v62  ;;  %v959_v9 = vadd.s32 %v7531_v21, %v7526_v47  ;;  %v763_v29 = vmul.u32 %v761_v44, %v759_v28 }
 0x1bf   : > { %v971_v57 = vclz %v970_v55  ;;  %v764_v30 = vmul.u32 %v762_v49, %v759_v28  ;;  %v765_v58 = vmul.u32 %v761_v44, %v760_v37  ;;  %v787_v33 = vmul.u32 %v783_v6, %v760_v37 }
 0x1c0   : > { %v1832_v59 = vadd.f32 %v1825_v45, %v1804_v34  ;;  %v747_v54 = vsel %vm745_vm7, %v735_v10, 2102212464  ;;  %v785_v20 = vmul.u32 %v783_v6, %v759_v28  ;;  %v789_v27 = vshll.u32 %v786_v13, 16 }
 0x1c1   : > { %v5945_v32 = vadd.s32 4294967294, %v971_v57  ;;  %v767_v50 = vshll.u32 %v764_v30, 16  ;;  %v766_v7 = vmul.u32 %v762_v49, %v760_v37  ;;  %v769_v15 = vshll.u32 %v765_v58, 16 }
 0x1c2   : > { %v1860_v14 = vadd.f32 %v1853_v48, %v1832_v59  ;;  %v788_v21 = vmul.u32 %v784_v8, %v760_v37  ;;  %v791_v19 = vshll.u32 %v787_v33, 16  ;;  %vm793_vm11 = vc.u32 %v785_v20, %v789_v27 }
 0x1c3   : > { %vm5946_vm6 = vcmp.lt.s32.totalorder %v5945_v32, 0  ;;  %vm771_vm8 = vc.u32 %v763_v29, %v767_v50  ;;  %v773_v17 = vadd.s32 %v767_v50, %v763_v29  ;;  %v795_v10 = vadd.s32 %v789_v27, %v785_v20 }
 0x1c4   : > { %1953 = vmatpush.msrb.mxu0 %v1860_v14  ;;  %6083 = vmatpush.msra.mxu1 %v1860_v14  ;;  %v974_v63 = vsel %vm5946_vm6, 0, %v5945_v32  ;;  %v772_v47 = vsel %vm771_vm8, 1, %v10813_v5  ;;  %v794_v4 = vsel %vm793_vm11, 1, %v10813_v5  ;;  %v768_v12 = vshrl.u32 %v764_v30, 16 }
 0x1c5   : > { %v975_v25 = vsub.s32 32, %v974_v63  ;;  %v979_v16 = vsub.s32 4294967266, %v974_v63  ;;  %v774_v42 = vadd.s32 %v772_v47, %v766_v7  ;;  %v976_v18 = vshll.u32 %v967_v62, %v974_v63 }
 0x1c6   : > { %vm775_vm13 = vc.u32 %v773_v17, %v769_v15  ;;  %v796_v48 = vadd.s32 %v794_v4, %v788_v21  ;;  %vm797_vm15 = vc.u32 %v795_v10, %v791_v19  ;;  %v726_v49 = vshrl.u32 %v10815_v43, %v7535_v36 }
 0x1c7   : > { %v977_v22 = vshrl.u32 %v959_v9, %v975_v25  ;;  %v980_v45 = vadd.s32 127, %v979_v16  ;;  %v776_v0 = vsel %vm775_vm13, 1, %v10813_v5  ;;  %v798_v62 = vsel %vm797_vm15, 1, %v10813_v5 }
 0x1c8   : > { %v778_v28 = vadd.s32 %v776_v0, %v774_v42  ;;  %v770_v6 = vshrl.u32 %v765_v58, 16  ;;  %v790_v55 = vshrl.u32 %v786_v13, 16  ;;  %v800_v37 = vadd.s32 %v798_v62, %v796_v48 }
 0x1c9   : > { %v978_v44 = vor.u32 %v977_v22, %v976_v18  ;;  %v981_v8 = vshll.u32 %v980_v45, 23  ;;  %v746_v59 = vsel %vm742_vm4, %v726_v49, %v7558_v24  ;;  %v748_v30 = vsel %vm744_vm9, %v7561_v11, %v747_v54 }
 0x1ca   : > { %v779_v34 = vadd.s32 %v778_v28, %v768_v12  ;;  %v792_v32 = vshrl.u32 %v787_v33, 16  ;;  %v801_v29 = vadd.s32 %v800_v37, %v790_v55  ;;  %v799_v14 = vadd.s32 %v795_v10, %v791_v19 }
 0x1cb   : > { %v982_v57 = vor.u32 4788187, %v981_v8  ;;  %v985_v50 = vcvt.s32.f32 %v978_v44  ;;  %v749_v13 = vsel %vm743_vm10, %v746_v59, %v748_v30  ;;  %vm867_vm14 = vcmp.lt.s32.totalorder %v7322_v40, 0 }
 0x1cc   : > { %v7632_v9 = vadd.s32 %v779_v34, %v770_v6  ;;  %v802_v58 = vadd.s32 %v801_v29, %v792_v32  ;;  %v803_v7 = vmul.u32 %v7590_v52, %v749_v13  ;;  %v989_v11 = vsub.s32 4, %v7571_v46 }
 0x1cd   : > { %v983_v36 = vand.u32 2147483647, %v982_v57  ;;  %v669_v54 = vmul.f32 0.5, %v7322_v40  ;;  %vm7643_vm0 = vcmp.le.f32.partialorder %v865_v38, 0.7853982  ;;  %v1810_v57 = vmul.f32 %v7322_v40, %v7264_v60 }
 0x1ce   : > { %vm805_vm12 = vc.u32 %v7632_v9, %v799_v14  ;;  %v806_v27 = vadd.s32 1, %v802_v58  ;;  %v990_v21 = vsel %vm867_vm14, %v989_v11, %v7571_v46  ;;  %vm1008_vm3 = vweird.f32 %v7322_v40 }
 0x1cf   : > { %v986_v20 = vmul.f32 %v985_v50, %v983_v36  ;;  %6183 = vtanh.f32 %v669_v54  ;;  %v992_v38 = vsel %vm7643_vm0, 0, %v990_v21  ;;  %vm1838_vm4 = vcmp.ge.f32.partialorder %v7322_v40, 0.0 }
 0x1d0   : > { %v807_v33 = vsel %vm805_vm12, %v806_v27, %v802_v58  ;;  %v1009_v4 = vadd.s32 3, %v992_v38  ;;  %6185 = vtanh.f32 %v7322_v40  ;;  %v1817_v58 = vadd.f32 %v1810_v57, %v7271_v51 }
 0x1d1   : > { %v987_v24 = vxor.u32 2147483648, %v986_v20  ;;  %v808_v63 = vadd.s32 %v807_v33, %v803_v7  ;;  %vm712_vm6 = vcmp.lt.s32.totalorder %v7394_v26, 0  ;;  %vm7675_vm8 = vcmp.le.f32.partialorder %v710_v23, 0.7853982 }
 0x1d2   : > { %v1010_v37 = vand.u32 3, %v1009_v4  ;;  %vm853_vm12 = vweird.f32 %v7394_v26 }
 0x1d3   : > { %v988_v17 = vsel %vm867_vm14, %v987_v24, %v986_v20  ;;  %v809_v47 = vadd.s32 536870912, %v808_v63  ;;  %v804_v20 = vadd.s32 %v799_v14, %v7632_v9  ;;  %vm1837_vm14 = vcmp.ge.f32.partialorder %v7394_v26, 0.0 }
 0x1d4   : > { %v991_v15 = vsel %vm7643_vm0, %v7322_v40, %v988_v17  ;;  %vm1012_vm9 = vcmp.eq.s32.totalorder %v1010_v37, 0  ;;  %vm1015_vm10 = vcmp.eq.s32.totalorder %v1010_v37, 2  ;;  %vm1011_vm5 = vcmp.lt.s32.totalorder %v1010_v37, 2 }
 0x1d5   : > { %v993_v52 = vmul.f32 %v991_v15, %v991_v15  ;;  %v7651_v42 = vshrl.u32 %v809_v47, 30  ;;  %v6184_v12 = vpop.eup %6183  ;;  %vm1914_vm0 = vcmask 408576  }
 0x1d6   : > { %v683_v62 = vmul.f32 0.5, %v6184_v12  ;;  %v6186_v13 = vpop.eup %6185 }
 0x1d7   : > { %v994_v25 = vmul.f32 -0.001358992, %v993_v52  ;;  %v1001_v16 = vmul.f32 -0.00019511016, %v993_v52  ;;  %v811_v10 = vshll.u32 %v7651_v42, 30  ;;  %v704_v7 = vmul.f32 %v6186_v13, %v7260_v31 }
 0x1d8   : > { %v690_v29 = vadd.f32 0.5, %v683_v62 }
 0x1d9   : > { %v995_v19 = vadd.f32 0.041655596, %v994_v25  ;;  %v1002_v18 = vadd.f32 0.008332121, %v1001_v16  ;;  %v812_v0 = vsub.s32 %v808_v63, %v811_v10 }
 0x1da   : > { %v1824_v14 = vmul.f32 %v1817_v58, %v690_v29 }
 0x1db   : > { %v996_v22 = vmul.f32 %v995_v19, %v993_v52  ;;  %v1003_v45 = vmul.f32 %v1002_v18, %v993_v52  ;;  %vm813_vm2 = vcmp.lt.s32.totalorder %v812_v0, 0  ;;  %v814_v46 = vsub.s32 0, %v812_v0 }
 0x1dd   : > { %v997_v28 = vadd.f32 -0.4999988, %v996_v22  ;;  %v1004_v48 = vadd.f32 -0.16666654, %v1003_v45  ;;  %v815_v49 = vsel %vm813_vm2, %v814_v46, %v812_v0  ;;  %v668_v46 = vmul.f32 0.5, %v7394_v26 }
 0x1de   : > { %v816_v6 = vclz %v815_v49 }
 0x1df   : > { %v998_v44 = vmul.f32 %v997_v28, %v993_v52  ;;  %v1005_v8 = vmul.f32 %v1004_v48, %v993_v52  ;;  %v1845_v52 = vsel %vm1838_vm4, %v7294_v35, %v7288_v61  ;;  %6187 = vtanh.f32 %v668_v46 }
 0x1e0   : > { %v5942_v59 = vadd.s32 4294967294, %v816_v6  ;;  %v1852_v16 = vmul.f32 %v1845_v52, %v7322_v40  ;;  %v834_v40 = vsub.s32 4, %v7651_v42  ;;  %6189 = vtanh.f32 %v7394_v26 }
 0x1e1   : > { %v999_v34 = vadd.f32 1.0, %v998_v44  ;;  %v1006_v55 = vadd.f32 1.0, %v1005_v8  ;;  %v1844_v52 = vsel %vm1837_vm14, %v7294_v35, %v7288_v61 }
 0x1e2   : > { %vm5943_vm7 = vcmp.lt.s32.totalorder %v5942_v59, 0  ;;  %v835_v49 = vsel %vm712_vm6, %v834_v40, %v7651_v42  ;;  %v1809_v42 = vmul.f32 %v7394_v26, %v7264_v60 }
 0x1e3   : > { %v1007_v30 = vmul.f32 %v1006_v55, %v991_v15  ;;  %v1016_v32 = vxor.u32 2147483648, %v999_v34  ;;  %v819_v50 = vsel %vm5943_vm7, 0, %v5942_v59  ;;  %v837_v23 = vsel %vm7675_vm8, 0, %v835_v49 }
 0x1e4   : > { %v820_v27 = vsub.s32 32, %v819_v50  ;;  %v824_v24 = vsub.s32 4294967266, %v819_v50  ;;  %v821_v41 = vshll.u32 %v812_v0, %v819_v50  ;;  %v854_v59 = vadd.s32 3, %v837_v23 }
 0x1e5   : > { %v1013_v36 = vxor.u32 2147483648, %v1007_v30  ;;  %v1017_v33 = vsel %vm1015_vm10, %v1016_v32, %v1007_v30  ;;  %v6188_v29 = vpop.eup %6187 }
 0x1e6   : > { %v822_v17 = vshrl.u32 %v804_v20, %v820_v27  ;;  %v825_v63 = vadd.s32 127, %v824_v24  ;;  %v855_v13 = vand.u32 3, %v854_v59  ;;  %v682_v58 = vmul.f32 0.5, %v6188_v29 }
 0x1e7   : > { %v1014_v11 = vsel %vm1012_vm9, %v999_v34, %v1013_v36 }
 0x1e8   : > { %v1018_v54 = vsel %vm1011_vm5, %v1014_v11, %v1017_v33  ;;  %v823_v47 = vor.u32 %v822_v17, %v821_v41  ;;  %v826_v21 = vshll.u32 %v825_v63, 23  ;;  %vm857_vm13 = vcmp.eq.s32.totalorder %v855_v13, 0  ;;  %v6190_v11 = vpop.eup %6189 }
 0x1e9   : > { %v1019_v15 = vsel %vm1008_vm3, nan, %v1018_v54  ;;  %vm860_vm11 = vcmp.eq.s32.totalorder %v855_v13, 2  ;;  %v689_v33 = vadd.f32 0.5, %v682_v58  ;;  %vm856_vm15 = vcmp.lt.s32.totalorder %v855_v13, 2 }
 0x1ea   : > { %v1796_v9 = vmul.f32 %v1019_v15, %v7262_v3  ;;  %v827_v38 = vor.u32 4788187, %v826_v21  ;;  %v830_v10 = vcvt.s32.f32 %v823_v47  ;;  %v703_v17 = vmul.f32 %v6190_v11, %v7260_v31 }
 0x1eb   : > { %v1851_v21 = vmul.f32 %v1844_v52, %v7394_v26 }
 0x1ec   : > { %v1803_v25 = vadd.f32 %v1796_v9, %v704_v7  ;;  %v828_v18 = vand.u32 2147483647, %v827_v38  ;;  %v1816_v7 = vadd.f32 %v1809_v42, %v7271_v51  ;;  %v1865_v38 = vld [vmem:[%s10795_s7] sm:$0xff] }
 0x1ee   : > { %v1831_v19 = vadd.f32 %v1824_v14, %v1803_v25  ;;  %v831_v45 = vmul.f32 %v830_v10, %v828_v18  ;;  %v1823_v14 = vmul.f32 %v1816_v7, %v689_v33  ;;  %v1868_v18 = vld [vmem:[%s10795_s7 + $0x18] sm:$0xff]  ;;  %v1869_v10 = vld [vmem:[%s10795_s7 + $0x20] sm:$0xff] }
 0x1f0   : > { %v1859_v22 = vadd.f32 %v1852_v16, %v1831_v19  ;;  %v832_v0 = vxor.u32 2147483648, %v831_v45  ;;  %v1866_v19 = vld [vmem:[%s10795_s7 + $0x8] sm:$0xff] }
 0x1f2   : > { %1954 = vmatpush.msrb.mxu0 %v1859_v22  ;;  %6084 = vmatpush.msra.mxu1 %v1859_v22  ;;  %v833_v12 = vsel %vm712_vm6, %v832_v0, %v831_v45  ;;  %v1870_v22 = vld [vmem:[%s10795_s7 + $0x28] sm:$0xff]  ;;  %v1871_v45 = vld [vmem:[%s10795_s7 + $0x30] sm:$0x3] }
 0x1f3   : > { %v836_v28 = vsel %vm7675_vm8, %v7394_v26, %v833_v12  ;;  %v1867_v26 = vld [vmem:[%s10795_s7 + $0x10] sm:$0xff] }
 0x1f4   : > { %v838_v48 = vmul.f32 %v836_v28, %v836_v28 }
 0x1f6   : > { %v839_v44 = vmul.f32 -0.001358992, %v838_v48  ;;  %v846_v8 = vmul.f32 -0.00019511016, %v838_v48 }
 0x1f8   : > { %v840_v62 = vadd.f32 0.041655596, %v839_v44  ;;  %v847_v6 = vadd.f32 0.008332121, %v846_v8 }
 0x1fa   : > { %v841_v34 = vmul.f32 %v840_v62, %v838_v48  ;;  %v848_v55 = vmul.f32 %v847_v6, %v838_v48 }
 0x1fc   : > { %v842_v37 = vadd.f32 -0.4999988, %v841_v34  ;;  %v849_v57 = vadd.f32 -0.16666654, %v848_v55 }
 0x1fe   : > { %v843_v30 = vmul.f32 %v842_v37, %v838_v48  ;;  %v850_v32 = vmul.f32 %v849_v57, %v838_v48  ;;  %v1912_v48 = vpop.permute.xlu0 %1911 }
 0x200   : > { %v844_v36 = vadd.f32 1.0, %v843_v30  ;;  %v851_v50 = vadd.f32 1.0, %v850_v32 }
 0x202   : > { %v852_v20 = vmul.f32 %v851_v50, %v836_v28  ;;  %v861_v27 = vxor.u32 2147483648, %v844_v36 }
 0x204   : > { %v858_v24 = vxor.u32 2147483648, %v852_v20  ;;  %v862_v41 = vsel %vm860_vm11, %v861_v27, %v852_v20 }
 0x206   : > { %v859_v54 = vsel %vm857_vm13, %v844_v36, %v858_v24 }
 0x207   : > { %v863_v63 = vsel %vm856_vm15, %v859_v54, %v862_v41 }
 0x208   : > { %v864_v15 = vsel %vm853_vm12, nan, %v863_v63 }
 0x209   : > { %v1795_v9 = vmul.f32 %v864_v15, %v7262_v3 }
 0x20b   : > { %v1802_v47 = vadd.f32 %v1795_v9, %v703_v17 }
 0x20d   : > { %v1830_v25 = vadd.f32 %v1823_v14, %v1802_v47 }
 0x20f   : > { %v1858_v16 = vadd.f32 %v1851_v21, %v1830_v25 }
 0x211   : > { %1955 = vmatpush.msrb.mxu0 %v1858_v16  ;;  %6085 = vmatpush.msra.mxu1 %v1858_v16 }
 0x212   : > { %5963 = vmatmul.msk.f32.vlgmr.msrb.gmra.mxu0 %vm1914_vm0, %v1865_v38  ;;  %5964 = vmatmul.msk.f32.vlgmr.msra.gmra.mxu1 %vm1914_vm0, %v1866_v19 }
 0x21a   : > { %5965 = vmatmul.msk.f32.gmra.mxu1 %vm1914_vm0, %v1867_v26 }
 0x222   : > { %5966 = vmatmul.msk.f32.gmra.mxu1 %vm1914_vm0, %v1868_v18 }
 0x22a   : > { %5967 = vmatmul.msk.f32.gmra.mxu1 %vm1914_vm0, %v1869_v10 }
 0x232   : > { %5968 = vmatmul.msk.f32.gmra.mxu1 %vm1914_vm0, %v1870_v22 }
 0x23a   : > { %5969 = vmatmul.msk.f32.gmra.mxu1 %vm1914_vm0, %v1871_v45 }
 0x28f   : > { %v7726_v0 = vpop.f32.mrf.mxu1 }
 0x297   : > { %v7728_v4 = vpop.f32.mrf.mxu1 }
 0x29f   : > { %v7730_v12 = vpop.f32.mrf.mxu1 }
 0x2a7   : > { %v7732_v40 = vpop.f32.mrf.mxu1 }
 0x2af   : > { %v7734_v28 = vpop.f32.mrf.mxu1 }
 0x2b7   : > { %v1975_v46 = vpop.f32.mrf.mxu1 }
 0x2b8   : > { %v7736_v44 = vadd.f32 %v1975_v46, %v1912_v48 }
 0x2ba   : > { %v2953_v8 = vand.u32 2139095040, %v7736_v44  ;;  %v2950_v6 = vand.u32 2147483647, %v7736_v44 }
 0x2bc   : > { %v2954_v49 = vshrl.u32 %v2953_v8, 23  ;;  %v2957_v34 = vand.u32 8388607, %v2950_v6 }
 0x2be   : > { %v5988_v62 = vadd.s32 4294967169, %v2954_v49  ;;  %v2958_v59 = vor.u32 8388608, %v2957_v34 }
 0x2c0   : > { %v2960_v23 = vadd.s32 1, %v5988_v62  ;;  %v7762_v17 = vshll.u32 %v2958_v59, 8 }
 0x2c2   : > { %vm2961_vm2 = vcmp.gt.s32.totalorder %v2960_v23, 0  ;;  %v2999_v16 = vand.u32 65535, %v7762_v17  ;;  %v3000_v38 = vshrl.u32 %v7762_v17, 16 }
 0x2c3   : > { %v2962_v55 = vsel %vm2961_vm2, %v2960_v23, 0 }
 0x2c4   : > { %v2964_v37 = vand.u32 31, %v2962_v55  ;;  %v7744_v30 = vshrl.u32 %v2962_v55, 5 }
 0x2c6   : > { %v7742_v57 = vsub.s32 32, %v2964_v37  ;;  %v2967_v32 = vshll.u32 %v10815_v43, %v2964_v37  ;;  %v2970_v29 = vshll.u32 %v10858_v2, %v2964_v37  ;;  %v2973_v13 = vshll.u32 %v10859_v39, %v2964_v37 }
 0x2c7   : > { %v2976_v58 = vshll.u32 %v10811_v53, %v2964_v37  ;;  %v2979_v27 = vshll.u32 %v10818_v56, %v2964_v37  ;;  %vm2982_vm3 = vcmp.lt.s32.totalorder %v7744_v30, 1  ;;  %vm2985_vm4 = vcmp.lt.s32.totalorder %v7744_v30, 4 }
 0x2c8   : > { %v2968_v36 = vshrl.u32 %v10858_v2, %v7742_v57  ;;  %v2971_v50 = vshrl.u32 %v10859_v39, %v7742_v57  ;;  %v2974_v42 = vshrl.u32 %v10811_v53, %v7742_v57  ;;  %v2977_v20 = vshrl.u32 %v10818_v56, %v7742_v57 }
 0x2c9   : > { %v2980_v24 = vshrl.u32 %v10860_v1, %v7742_v57  ;;  %vm2984_vm7 = vcmp.lt.s32.totalorder %v7744_v30, 3  ;;  %vm2983_vm9 = vcmp.lt.s32.totalorder %v7744_v30, 2 }
 0x2ca   : > { %v2969_v7 = vor.u32 %v2968_v36, %v2967_v32  ;;  %v2972_v11 = vor.u32 %v2971_v50, %v2970_v29  ;;  %v2975_v33 = vor.u32 %v2974_v42, %v2973_v13  ;;  %v2978_v54 = vor.u32 %v2977_v20, %v2976_v58 }
 0x2cb   : > { %v2981_v41 = vor.u32 %v2980_v24, %v2979_v27  ;;  %v1984_v50 = vmul.f32 0.5, %v7736_v44  ;;  %v1907_v24 = vpop.permute.xlu1 %1906 }
 0x2cc   : > { %v2990_v63 = vsel %vm2982_vm3, %v2969_v7, %v2972_v11  ;;  %v2994_v15 = vsel %vm2982_vm3, %v2972_v11, %v2975_v33  ;;  %v2991_v52 = vsel %vm2985_vm4, %v2978_v54, 920167782  ;;  %v2987_v58 = vsel %vm2985_vm4, %v2975_v33, 2102212464 }
 0x2cd   : > { %v2995_v9 = vsel %vm2985_vm4, %v2981_v41, 1326507024  ;;  %v2992_v14 = vsel %vm2984_vm7, %v2975_v33, %v2991_v52  ;;  %v7795_v52 = vadd.f32 %v7734_v28, %v1907_v24  ;;  %6191 = vtanh.f32 %v1984_v50 }
 0x2ce   : > { %v2996_v47 = vsel %vm2984_vm7, %v2978_v54, %v2995_v9  ;;  %v2993_v21 = vsel %vm2983_vm9, %v2990_v63, %v2992_v14  ;;  %v2966_v54 = vshrl.u32 %v10815_v43, %v7742_v57  ;;  %6193 = vtanh.f32 %v7736_v44 }
 0x2cf   : > { %v2997_v25 = vsel %vm2983_vm9, %v2994_v15, %v2996_v47  ;;  %v3023_v18 = vand.u32 65535, %v2993_v21  ;;  %v3024_v10 = vshrl.u32 %v2993_v21, 16  ;;  %v2988_v47 = vsel %vm2984_vm7, %v2972_v11, %v2987_v58 }
 0x2d0   : > { %v3001_v19 = vand.u32 65535, %v2997_v25  ;;  %v3002_v26 = vshrl.u32 %v2997_v25, 16  ;;  %v2986_v33 = vsel %vm2982_vm3, %v2966_v54, %v2969_v7  ;;  %v2795_v30 = vand.u32 2147483647, %v7795_v52 }
 0x2d1   : > { %v3026_v48 = vmul.u32 %v3024_v10, %v2999_v16  ;;  %v3027_v46 = vmul.u32 %v3023_v18, %v3000_v38  ;;  %v3025_v23 = vmul.u32 %v3023_v18, %v2999_v16  ;;  %v3028_v59 = vmul.u32 %v3024_v10, %v3000_v38  ;;  %v1902_v10 = vpop.permute.xlu2 %1901 }
 0x2d2   : > { %v3004_v22 = vmul.u32 %v3002_v26, %v2999_v16  ;;  %v3005_v45 = vmul.u32 %v3001_v19, %v3000_v38  ;;  %v3003_v8 = vmul.u32 %v3001_v19, %v2999_v16  ;;  %v3006_v62 = vmul.u32 %v3002_v26, %v3000_v38 }
 0x2d3   : > { %v3029_v34 = vshll.u32 %v3026_v48, 16  ;;  %v3031_v29 = vshll.u32 %v3027_v46, 16  ;;  %v3030_v9 = vshrl.u32 %v3026_v48, 16  ;;  %v3032_v16 = vshrl.u32 %v3027_v46, 16 }
 0x2d4   : > { %v3007_v49 = vshll.u32 %v3004_v22, 16  ;;  %v3009_v55 = vshll.u32 %v3005_v45, 16  ;;  %v3008_v41 = vshrl.u32 %v3004_v22, 16  ;;  %v3010_v21 = vshrl.u32 %v3005_v45, 16  ;;  %v6192_v45 = vpop.eup %6191 }
 0x2d5   : > { %vm3033_vm5 = vc.u32 %v3025_v23, %v3029_v34  ;;  %v3035_v36 = vadd.s32 %v3029_v34, %v3025_v23  ;;  %v2989_v28 = vsel %vm2983_vm9, %v2986_v33, %v2988_v47  ;;  %v2798_v18 = vand.u32 2139095040, %v7795_v52 }
 0x2d6   : > { %vm3011_vm10 = vc.u32 %v3003_v8, %v3007_v49  ;;  %v3013_v37 = vadd.s32 %v3007_v49, %v3003_v8  ;;  %v3034_v42 = vsel %vm3033_vm5, 1, %v10813_v5  ;;  %v3043_v22 = vmul.u32 %v7762_v17, %v2989_v28 }
 0x2d7   : > { %v3012_v32 = vsel %vm3011_vm10, 1, %v10813_v5  ;;  %v3036_v27 = vadd.s32 %v3034_v42, %v3028_v59  ;;  %vm3037_vm8 = vc.u32 %v3035_v36, %v3031_v29  ;;  %v7803_v19 = vadd.s32 %v3035_v36, %v3031_v29 }
 0x2d8   : > { %v3014_v13 = vadd.s32 %v3012_v32, %v3006_v62  ;;  %vm3015_vm6 = vc.u32 %v3013_v37, %v3009_v55  ;;  %v3038_v15 = vsel %vm3037_vm8, 1, %v10813_v5  ;;  %v2799_v11 = vshrl.u32 %v2798_v18, 23  ;;  %v6194_v55 = vpop.eup %6193  ;;  %v1897_v32 = vpop.permute.xlu0 %1896 }
 0x2d9   : > { %v3016_v20 = vsel %vm3015_vm6, 1, %v10813_v5  ;;  %v3040_v14 = vadd.s32 %v3038_v15, %v3036_v27  ;;  %v7813_v48 = vadd.f32 %v7732_v40, %v1902_v10  ;;  %v1998_v23 = vmul.f32 0.5, %v6192_v45 }
 0x2da   : > { %v3018_v63 = vadd.s32 %v3016_v20, %v3014_v13  ;;  %v5985_v8 = vadd.s32 4294967169, %v2799_v11  ;;  %v2802_v37 = vand.u32 8388607, %v2795_v30  ;;  %v7823_v36 = vadd.f32 %v7730_v12, %v1897_v32 }
 0x2db   : > { %v3041_v57 = vadd.s32 %v3040_v14, %v3030_v9  ;;  %v2640_v59 = vand.u32 2147483647, %v7813_v48  ;;  %v2643_v17 = vand.u32 2139095040, %v7813_v48  ;;  %v7825_v13 = vadd.f32 0.5, %v1998_v23 }
 0x2dc   : > { %v3019_v25 = vadd.s32 %v3018_v63, %v3008_v41  ;;  %v2805_v62 = vadd.s32 1, %v5985_v8  ;;  %v7828_v42 = vmul.f32 %v6194_v55, %v7260_v31  ;;  %v7832_v20 = vmul.f32 0.5, %v7813_v48 }
 0x2dd   : > { %v3042_v26 = vadd.s32 %v3041_v57, %v3032_v16  ;;  %v2803_v27 = vor.u32 8388608, %v2802_v37  ;;  %v2644_v54 = vshrl.u32 %v2643_v17, 23  ;;  %v7836_v41 = vand.u32 8388607, %v2640_v59 }
 0x2de   : > { %v7801_v38 = vadd.s32 %v3019_v25, %v3010_v21  ;;  %vm2806_vm11 = vcmp.gt.s32.totalorder %v2805_v62, 0  ;;  %v7864_v17 = vmul.f32 0.5, %v7795_v52  ;;  %vm2952_vm7 = vcmp.lt.s32.totalorder %v7736_v44, 0 }
 0x2df   : > { %v3046_v7 = vadd.s32 1, %v3042_v26  ;;  %v2807_v29 = vsel %vm2806_vm11, %v2805_v62, 0  ;;  %v5982_v45 = vadd.s32 4294967169, %v2644_v54  ;;  %v7857_v23 = vshll.u32 %v2803_v27, 8 }
 0x2e0   : > { %vm3045_vm13 = vc.u32 %v7801_v38, %v7803_v19  ;;  %v2809_v50 = vand.u32 31, %v2807_v29  ;;  %v7838_v63 = vshrl.u32 %v2807_v29, 5  ;;  %v2648_v37 = vor.u32 8388608, %v7836_v41 }
 0x2e1   : > { %v3047_v46 = vsel %vm3045_vm13, %v3046_v7, %v3042_v26  ;;  %v2650_v54 = vadd.s32 1, %v5982_v45  ;;  %vm7889_vm10 = vcmp.le.f32.partialorder %v2950_v6, 0.7853982  ;;  %6195 = vtanh.f32 %v7864_v17 }
 0x2e2   : > { %v3048_v49 = vadd.s32 %v3047_v46, %v3043_v22  ;;  %v2810_v24 = vsub.s32 32, %v2809_v50  ;;  %v2812_v15 = vshll.u32 %v10815_v43, %v2809_v50  ;;  %v2815_v9 = vshll.u32 %v10858_v2, %v2809_v50 }
 0x2e3   : > { %v2818_v47 = vshll.u32 %v10859_v39, %v2809_v50  ;;  %v2821_v21 = vshll.u32 %v10811_v53, %v2809_v50  ;;  %v2824_v18 = vshll.u32 %v10818_v56, %v2809_v50  ;;  %vm2827_vm12 = vcmp.lt.s32.totalorder %v7838_v63, 1 }
 0x2e4   : > { %v3049_v34 = vadd.s32 536870912, %v3048_v49  ;;  %v2813_v14 = vshrl.u32 %v10858_v2, %v2810_v24  ;;  %v2816_v33 = vshrl.u32 %v10859_v39, %v2810_v24  ;;  %v2819_v16 = vshrl.u32 %v10811_v53, %v2810_v24 }
 0x2e5   : > { %v2822_v57 = vshrl.u32 %v10818_v56, %v2810_v24  ;;  %v2825_v7 = vshrl.u32 %v10860_v1, %v2810_v24  ;;  %vm2830_vm14 = vcmp.lt.s32.totalorder %v7838_v63, 4  ;;  %vm2829_vm2 = vcmp.lt.s32.totalorder %v7838_v63, 3 }
 0x2e6   : > { %v7820_v40 = vshrl.u32 %v3049_v34, 30  ;;  %v2814_v28 = vor.u32 %v2813_v14, %v2812_v15  ;;  %v2817_v26 = vor.u32 %v2816_v33, %v2815_v9  ;;  %v2820_v10 = vor.u32 %v2819_v16, %v2818_v47 }
 0x2e7   : > { %v2823_v22 = vor.u32 %v2822_v57, %v2821_v21  ;;  %v2826_v8 = vor.u32 %v2825_v7, %v2824_v18  ;;  %vm2828_vm3 = vcmp.lt.s32.totalorder %v7838_v63, 2  ;;  %v2844_v14 = vand.u32 65535, %v7857_v23 }
 0x2e8   : > { %v3051_v58 = vshll.u32 %v7820_v40, 30  ;;  %v2839_v29 = vsel %vm2827_vm12, %v2817_v26, %v2820_v10  ;;  %vm2651_vm9 = vcmp.gt.s32.totalorder %v2650_v54, 0  ;;  %6197 = vtanh.f32 %v7832_v20 }
 0x2e9   : > { %v2836_v62 = vsel %vm2830_vm14, %v2823_v22, 920167782  ;;  %v2840_v50 = vsel %vm2830_vm14, %v2826_v8, 1326507024  ;;  %6199 = vtanh.f32 %v7795_v52 }
 0x2ea   : > { %v3052_v12 = vsub.s32 %v3048_v49, %v3051_v58  ;;  %v2835_v49 = vsel %vm2827_vm12, %v2814_v28, %v2817_v26  ;;  %v2837_v55 = vsel %vm2829_vm2, %v2820_v10, %v2836_v62  ;;  %v3044_v58 = vadd.s32 %v7803_v19, %v7801_v38 }
 0x2eb   : > { %v2838_v32 = vsel %vm2828_vm3, %v2835_v49, %v2837_v55  ;;  %v2841_v27 = vsel %vm2829_vm2, %v2823_v22, %v2840_v50  ;;  %v2811_v38 = vshrl.u32 %v10815_v43, %v2810_v24  ;;  %v2832_v19 = vsel %vm2830_vm14, %v2820_v10, 2102212464 }
 0x2ec   : > { %vm3053_vm15 = vcmp.lt.s32.totalorder %v3052_v12, 0  ;;  %v3054_v25 = vsub.s32 0, %v3052_v12  ;;  %v2842_v9 = vsel %vm2828_vm3, %v2839_v29, %v2841_v27  ;;  %v2869_v33 = vshrl.u32 %v2838_v32, 16 }
 0x2ed   : > { %v2868_v16 = vand.u32 65535, %v2838_v32  ;;  %v2846_v57 = vand.u32 65535, %v2842_v9  ;;  %v2847_v18 = vshrl.u32 %v2842_v9, 16  ;;  %v2831_v55 = vsel %vm2827_vm12, %v2811_v38, %v2814_v28 }
 0x2ee   : > { %v3055_v11 = vsel %vm3053_vm15, %v3054_v25, %v3052_v12  ;;  %v2845_v25 = vshrl.u32 %v7857_v23, 16  ;;  %v2871_v45 = vmul.u32 %v2869_v33, %v2844_v14  ;;  %vm3153_vm15 = vcmp.ge.f32.partialorder %v7736_v44, 0.0 }
 0x2ef   : > { %v3056_v46 = vclz %v3055_v11  ;;  %v2849_v8 = vmul.u32 %v2847_v18, %v2844_v14  ;;  %v2848_v32 = vmul.u32 %v2846_v57, %v2844_v14  ;;  %v2870_v50 = vmul.u32 %v2868_v16, %v2844_v14 }
 0x2f0   : > { %v2850_v49 = vmul.u32 %v2846_v57, %v2845_v25  ;;  %v2872_v24 = vmul.u32 %v2868_v16, %v2845_v25  ;;  %v2851_v27 = vmul.u32 %v2847_v18, %v2845_v25  ;;  %v2874_v9 = vshll.u32 %v2871_v45, 16 }
 0x2f1   : > { %v5989_v34 = vadd.s32 4294967294, %v3056_v46  ;;  %v3074_v46 = vsub.s32 4, %v7820_v40  ;;  %v2852_v29 = vshll.u32 %v2849_v8, 16  ;;  %6201 = vtanh.f32 %v7813_v48 }
 0x2f2   : > { %vm2878_vm6 = vc.u32 %v2870_v50, %v2874_v9 }
 0x2f3   : > { %vm5990_vm4 = vcmp.lt.s32.totalorder %v5989_v34, 0  ;;  %vm2856_vm5 = vc.u32 %v2848_v32, %v2852_v29  ;;  %v2858_v28 = vadd.s32 %v2852_v29, %v2848_v32  ;;  %v3075_v14 = vsel %vm2952_vm7, %v3074_v46, %v7820_v40 }
 0x2f4   : > { %v3059_v15 = vsel %vm5990_vm4, 0, %v5989_v34  ;;  %v2857_v6 = vsel %vm2856_vm5, 1, %v10813_v5  ;;  %v3077_v46 = vsel %vm7889_vm10, 0, %v3075_v14 }
 0x2f5   : > { %v3060_v47 = vsub.s32 32, %v3059_v15  ;;  %v3064_v21 = vsub.s32 4294967266, %v3059_v15  ;;  %v3061_v7 = vshll.u32 %v3052_v12, %v3059_v15  ;;  %v2833_v12 = vsel %vm2829_vm2, %v2817_v26, %v2832_v19 }
 0x2f6   : > { %v2854_v15 = vshll.u32 %v2850_v49, 16  ;;  %v2879_v26 = vsel %vm2878_vm6, 1, %v10813_v5  ;;  %v2880_v19 = vadd.s32 %v2874_v9, %v2870_v50  ;;  %v2855_v50 = vshrl.u32 %v2850_v49, 16 }
 0x2f7   : > { %v3062_v11 = vshrl.u32 %v3044_v58, %v3060_v47  ;;  %v3065_v22 = vadd.s32 127, %v3064_v21  ;;  %v2873_v21 = vmul.u32 %v2869_v33, %v2845_v25  ;;  %v2652_v25 = vsel %vm2651_vm9, %v2650_v54, 0 }
 0x2f8   : > { %vm2860_vm8 = vc.u32 %v2858_v28, %v2854_v15  ;;  %v2654_v29 = vand.u32 31, %v2652_v25  ;;  %v7911_v54 = vmul.f32 %v7736_v44, %v7264_v60  ;;  %v7923_v28 = vshrl.u32 %v2652_v25, 5 }
 0x2f9   : > { %v3063_v62 = vor.u32 %v3062_v11, %v3061_v7  ;;  %v3066_v34 = vshll.u32 %v3065_v22, 23  ;;  %v2876_v7 = vshll.u32 %v2872_v24, 16  ;;  %v2859_v11 = vadd.s32 %v2857_v6, %v2851_v27 }
 0x2fa   : > { %v2861_v16 = vsel %vm2860_vm8, 1, %v10813_v5  ;;  %v2881_v18 = vadd.s32 %v2879_v26, %v2873_v21  ;;  %v2853_v22 = vshrl.u32 %v2849_v8, 16  ;;  %v2875_v27 = vshrl.u32 %v2871_v45, 16 }
 0x2fb   : > { %v3067_v58 = vor.u32 4788187, %v3066_v34  ;;  %v3070_v47 = vcvt.s32.f32 %v3063_v62  ;;  %v2863_v33 = vadd.s32 %v2861_v16, %v2859_v11  ;;  %vm2882_vm13 = vc.u32 %v2880_v19, %v2876_v7 }
 0x2fc   : > { %v2834_v34 = vsel %vm2828_vm3, %v2831_v55, %v2833_v12  ;;  %v2883_v32 = vsel %vm2882_vm13, 1, %v10813_v5  ;;  %v7913_v8 = vsub.s32 32, %v2654_v29  ;;  %v2877_v45 = vshrl.u32 %v2872_v24, 16 }
 0x2fd   : > { %v3068_v38 = vand.u32 2147483647, %v3067_v58  ;;  %v2864_v58 = vadd.s32 %v2863_v33, %v2853_v22  ;;  %v2885_v15 = vadd.s32 %v2883_v32, %v2881_v18  ;;  %v7920_v9 = vadd.s32 %v2880_v19, %v2876_v7 }
 0x2fe   : > { %v2661_v6 = vshrl.u32 %v10859_v39, %v7913_v8  ;;  %v2664_v10 = vshrl.u32 %v10811_v53, %v7913_v8  ;;  %v2663_v24 = vshll.u32 %v10859_v39, %v2654_v29  ;;  %v2666_v19 = vshll.u32 %v10811_v53, %v2654_v29 }
 0x2ff   : > { %v3071_v57 = vmul.f32 %v3070_v47, %v3068_v38  ;;  %v7918_v49 = vadd.s32 %v2864_v58, %v2855_v50  ;;  %v2886_v55 = vadd.s32 %v2885_v15, %v2875_v27  ;;  %v2888_v47 = vmul.u32 %v7857_v23, %v2834_v34 }
 0x300   : > { %v2660_v38 = vshll.u32 %v10858_v2, %v2654_v29  ;;  %v2658_v23 = vshrl.u32 %v10858_v2, %v7913_v8  ;;  %v2669_v18 = vshll.u32 %v10818_v56, %v2654_v29  ;;  %v2670_v22 = vshrl.u32 %v10860_v1, %v7913_v8 }
 0x301   : > { %v3072_v62 = vxor.u32 2147483648, %v3071_v57  ;;  %v2887_v21 = vadd.s32 %v2886_v55, %v2877_v45  ;;  %vm2890_vm11 = vc.u32 %v7918_v49, %v7920_v9  ;;  %v3094_v15 = vadd.s32 3, %v3077_v46 }
 0x302   : > { %v7941_v25 = vor.u32 %v2661_v6, %v2660_v38  ;;  %v2671_v27 = vor.u32 %v2670_v22, %v2669_v18  ;;  %vm2672_vm12 = vcmp.lt.s32.totalorder %v7923_v28, 1  ;;  %vm2675_vm14 = vcmp.lt.s32.totalorder %v7923_v28, 4 }
 0x303   : > { %v3073_v40 = vsel %vm2952_vm7, %v3072_v62, %v3071_v57  ;;  %v2891_v7 = vadd.s32 1, %v2887_v21  ;;  %v2667_v57 = vshrl.u32 %v10818_v56, %v7913_v8  ;;  %v7943_v62 = vor.u32 %v2664_v10, %v2663_v24 }
 0x304   : > { %v3076_v63 = vsel %vm7889_vm10, %v7736_v44, %v3073_v40  ;;  %v2657_v40 = vshll.u32 %v10815_v43, %v2654_v29  ;;  %vm2674_vm2 = vcmp.lt.s32.totalorder %v7923_v28, 3  ;;  %vm3093_vm3 = vweird.f32 %v7736_v44 }
 0x305   : > { %v3078_v12 = vmul.f32 %v3076_v63, %v3076_v63  ;;  %v2892_v33 = vsel %vm2890_vm11, %v2891_v7, %v2887_v21  ;;  %v2668_v34 = vor.u32 %v2667_v57, %v2666_v19  ;;  %v2684_v46 = vsel %vm2672_vm12, %v7941_v25, %v7943_v62 }
 0x306   : > { %v2893_v58 = vadd.s32 %v2892_v33, %v2888_v47  ;;  %v7949_v21 = vor.u32 %v2658_v23, %v2657_v40  ;;  %v2685_v47 = vsel %vm2675_vm14, %v2671_v27, 1326507024  ;;  %v7971_v7 = vshll.u32 %v2648_v37, 8 }
 0x307   : > { %v3079_v11 = vmul.f32 -0.001358992, %v3078_v12  ;;  %v3086_v26 = vmul.f32 -0.00019511016, %v3078_v12  ;;  %v2681_v10 = vsel %vm2675_vm14, %v2668_v34, 920167782  ;;  %v2686_v24 = vsel %vm2674_vm2, %v2668_v34, %v2685_v47 }
 0x308   : > { %vm2673_vm4 = vcmp.lt.s32.totalorder %v7923_v28, 2  ;;  %v3095_v57 = vand.u32 3, %v3094_v15  ;;  %v3132_v22 = vadd.f32 %v7911_v54, %v7271_v51  ;;  %v2689_v34 = vand.u32 65535, %v7971_v7 }
 0x309   : > { %v3080_v14 = vadd.f32 0.041655596, %v3079_v11  ;;  %v3087_v16 = vadd.f32 0.008332121, %v3086_v26  ;;  %v2894_v11 = vadd.s32 536870912, %v2893_v58  ;;  %v3160_v26 = vsel %vm3153_vm15, %v7294_v35, %v7288_v61 }
 0x30a   : > { %v2687_v41 = vsel %vm2673_vm4, %v2684_v46, %v2686_v24  ;;  %vm3096_vm9 = vcmp.lt.s32.totalorder %v3095_v57, 2  ;;  %vm3097_vm10 = vcmp.eq.s32.totalorder %v3095_v57, 0  ;;  %vm3100_vm5 = vcmp.eq.s32.totalorder %v3095_v57, 2 }
 0x30b   : > { %v3081_v32 = vmul.f32 %v3080_v14, %v3078_v12  ;;  %v3088_v50 = vmul.f32 %v3087_v16, %v3078_v12  ;;  %v7958_v6 = vshrl.u32 %v2894_v11, 30  ;;  %v2680_v14 = vsel %vm2672_vm12, %v7949_v21, %v7941_v25 }
 0x30c   : > { %v2682_v16 = vsel %vm2674_vm2, %v7943_v62, %v2681_v10  ;;  %v2692_v27 = vshrl.u32 %v2687_v41, 16  ;;  %v3167_v24 = vmul.f32 %v3160_v26, %v7736_v44  ;;  %v3139_v57 = vmul.f32 %v3132_v22, %v7825_v13 }
 0x30d   : > { %v3082_v45 = vadd.f32 -0.4999988, %v3081_v32  ;;  %v3089_v55 = vadd.f32 -0.16666654, %v3088_v50  ;;  %v2896_v19 = vshll.u32 %v7958_v6, 30  ;;  %v2690_v32 = vshrl.u32 %v7971_v7, 16 }
 0x30e   : > { %v2691_v50 = vand.u32 65535, %v2687_v41 }
 0x30f   : > { %v3083_v29 = vmul.f32 %v3082_v45, %v3078_v12  ;;  %v3090_v38 = vmul.f32 %v3089_v55, %v3078_v12  ;;  %v2897_v33 = vsub.s32 %v2893_v58, %v2896_v19  ;;  %v2683_v45 = vsel %vm2673_vm4, %v2680_v14, %v2682_v16 }
 0x310   : > { %v7990_v58 = vmul.u32 %v2691_v50, %v2690_v32  ;;  %v2713_v19 = vand.u32 65535, %v2683_v45  ;;  %v2696_v41 = vmul.u32 %v2692_v27, %v2690_v32 }
 0x311   : > { %v3084_v12 = vadd.f32 1.0, %v3083_v29  ;;  %v3091_v23 = vadd.f32 1.0, %v3090_v38  ;;  %vm2898_vm7 = vcmp.lt.s32.totalorder %v2897_v33, 0  ;;  %v2899_v40 = vsub.s32 0, %v2897_v33 }
 0x312   : > { %v2714_v38 = vshrl.u32 %v2683_v45, 16  ;;  %v2717_v45 = vmul.u32 %v2713_v19, %v2690_v32 }
 0x313   : > { %v3092_v37 = vmul.f32 %v3091_v23, %v3076_v63  ;;  %v3101_v18 = vxor.u32 2147483648, %v3084_v12  ;;  %v2694_v63 = vmul.u32 %v2692_v27, %v2689_v34  ;;  %v2900_v54 = vsel %vm2898_vm7, %v2899_v40, %v2897_v33 }
 0x314   : > { %v2901_v47 = vclz %v2900_v54  ;;  %v2693_v23 = vmul.u32 %v2691_v50, %v2689_v34  ;;  %v2716_v26 = vmul.u32 %v2714_v38, %v2689_v34 }
 0x315   : > { %v3098_v15 = vxor.u32 2147483648, %v3092_v37  ;;  %v3102_v11 = vsel %vm3100_vm5, %v3101_v18, %v3092_v37  ;;  %v2697_v29 = vshll.u32 %v2694_v63, 16  ;;  %v2699_v37 = vshll.u32 %v7990_v58, 16 }
 0x316   : > { %v5986_v16 = vadd.s32 4294967294, %v2901_v47  ;;  %v2719_v54 = vshll.u32 %v2716_v26, 16 }
 0x317   : > { %v3099_v55 = vsel %vm3097_vm10, %v3084_v12, %v3098_v15  ;;  %v2889_v12 = vadd.s32 %v7920_v9, %v7918_v49  ;;  %vm2701_vm6 = vc.u32 %v2693_v23, %v2697_v29  ;;  %v2703_v18 = vadd.s32 %v2697_v29, %v2693_v23 }
 0x318   : > { %v3103_v46 = vsel %vm3096_vm9, %v3099_v55, %v3102_v11  ;;  %vm5987_vm8 = vcmp.lt.s32.totalorder %v5986_v16, 0  ;;  %v2702_v44 = vsel %vm2701_vm6, 1, %v10813_v5  ;;  %v2698_v49 = vshrl.u32 %v2694_v63, 16 }
 0x319   : > { %v3104_v10 = vsel %vm3093_vm3, nan, %v3103_v46  ;;  %v2904_v50 = vsel %vm5987_vm8, 0, %v5986_v16  ;;  %v2704_v40 = vadd.s32 %v2702_v44, %v2696_v41  ;;  %vm2705_vm13 = vc.u32 %v2703_v18, %v2699_v37 }
 0x31a   : > { %v3111_v14 = vmul.f32 %v3104_v10, %v7262_v3  ;;  %v2905_v22 = vsub.s32 32, %v2904_v50  ;;  %v2909_v55 = vsub.s32 4294967266, %v2904_v50  ;;  %v2906_v9 = vshll.u32 %v2897_v33, %v2904_v50 }
 0x31b   : > { %v2706_v27 = vsel %vm2705_vm13, 1, %v10813_v5  ;;  %v2715_v11 = vmul.u32 %v2713_v19, %v2689_v34  ;;  %v2718_v10 = vmul.u32 %v2714_v38, %v2690_v32  ;;  %v2721_v23 = vshll.u32 %v2717_v45, 16 }
 0x31c   : > { %v3118_v15 = vadd.f32 %v3111_v14, %v7828_v42  ;;  %v2907_v47 = vshrl.u32 %v2889_v12, %v2905_v22  ;;  %v2910_v42 = vadd.s32 127, %v2909_v55  ;;  %v2708_v29 = vadd.s32 %v2706_v27, %v2704_v40 }
 0x31d   : > { %vm2723_vm11 = vc.u32 %v2715_v11, %v2719_v54  ;;  %v2725_v14 = vadd.s32 %v2719_v54, %v2715_v11  ;;  %v2656_v34 = vshrl.u32 %v10815_v43, %v7913_v8  ;;  %v2700_v19 = vshrl.u32 %v7990_v58, 16 }
 0x31e   : > { %v3146_v13 = vadd.f32 %v3139_v57, %v3118_v15  ;;  %v2908_v57 = vor.u32 %v2907_v47, %v2906_v9  ;;  %v2911_v16 = vshll.u32 %v2910_v42, 23  ;;  %v2709_v63 = vadd.s32 %v2708_v29, %v2698_v49  ;;  %v6196_v49 = vpop.eup %6195 }
 0x31f   : > { %v2724_v33 = vsel %vm2723_vm11, 1, %v10813_v5  ;;  %vm2727_vm15 = vc.u32 %v2725_v14, %v2721_v23  ;;  %v2919_v41 = vsub.s32 4, %v7958_v6  ;;  %v2676_v37 = vsel %vm2672_vm12, %v2656_v34, %v7949_v21 }
 0x320   : > { %v3174_v46 = vadd.f32 %v3167_v24, %v3146_v13  ;;  %v2677_v24 = vsel %vm2675_vm14, %v7943_v62, 2102212464  ;;  %v2726_v32 = vadd.s32 %v2724_v33, %v2718_v10  ;;  %v2912_v38 = vor.u32 4788187, %v2911_v16  ;;  %v1892_v16 = vpop.permute.xlu1 %1891 }
 0x321   : > { %v2728_v12 = vsel %vm2727_vm15, 1, %v10813_v5  ;;  %v2720_v8 = vshrl.u32 %v2716_v26, 16  ;;  %v2915_v44 = vcvt.s32.f32 %v2908_v57  ;;  %v2678_v62 = vsel %vm2674_vm2, %v7941_v25, %v2677_v24  ;;  %v6198_v57 = vpop.eup %6197 }
 0x322   : > { %6005 = vmatpush.msk.msra.mxu0 %vm1936_vm1, %v3174_v46  ;;  %6086 = vmatpush.msk.msra.mxu2 %vm1936_vm1, %v3174_v46  ;;  %v2730_v18 = vadd.s32 %v2728_v12, %v2726_v32  ;;  %v2913_v15 = vand.u32 2147483647, %v2912_v38  ;;  %v8021_v17 = vadd.s32 %v2709_v63, %v2700_v19  ;;  %v2722_v50 = vshrl.u32 %v2717_v45, 16  ;;  %v6200_v24 = vpop.eup %6199 }
 0x323   : > { %v2485_v40 = vand.u32 2147483647, %v7823_v36  ;;  %vm2797_vm14 = vcmp.lt.s32.totalorder %v7795_v52, 0  ;;  %v2729_v22 = vadd.s32 %v2725_v14, %v2721_v23  ;;  %v2488_v21 = vand.u32 2139095040, %v7823_v36 }
 0x324   : > { %v2731_v58 = vadd.s32 %v2730_v18, %v2720_v8  ;;  %v2916_v13 = vmul.f32 %v2915_v44, %v2913_v15  ;;  %v2920_v26 = vsel %vm2797_vm14, %v2919_v41, %v7958_v6  ;;  %v2679_v55 = vsel %vm2673_vm4, %v2676_v37, %v2678_v62 }
 0x325   : > { %vm2735_vm12 = vc.u32 %v8021_v17, %v2729_v22  ;;  %v2489_v45 = vshrl.u32 %v2488_v21, 23  ;;  %vm2796_vm2 = vcmp.le.f32.partialorder %v2795_v30, 0.7853982  ;;  %v2492_v6 = vand.u32 8388607, %v2485_v40 }
 0x326   : > { %v2732_v25 = vadd.s32 %v2731_v58, %v2722_v50  ;;  %v2917_v9 = vxor.u32 2147483648, %v2916_v13  ;;  %v2922_v11 = vsel %vm2796_vm2, 0, %v2920_v26  ;;  %v2733_v54 = vmul.u32 %v7971_v7, %v2679_v55 }
 0x327   : > { %v5979_v46 = vadd.s32 4294967169, %v2489_v45  ;;  %v1997_v20 = vmul.f32 0.5, %v6196_v49  ;;  %vm3152_vm3 = vcmp.ge.f32.partialorder %v7795_v52, 0.0  ;;  %v2939_v23 = vadd.s32 3, %v2922_v11 }
 0x328   : > { %v2736_v27 = vadd.s32 1, %v2732_v25  ;;  %v2918_v28 = vsel %vm2797_vm14, %v2917_v9, %v2916_v13  ;;  %v2493_v14 = vor.u32 8388608, %v2492_v6  ;;  %v3124_v34 = vmul.f32 %v7795_v52, %v7264_v60 }
 0x329   : > { %v2921_v47 = vsel %vm2796_vm2, %v7795_v52, %v2918_v28  ;;  %v2495_v30 = vadd.s32 1, %v5979_v46  ;;  %v8046_v32 = vadd.f32 %v7728_v4, %v1892_v16  ;;  %v2004_v38 = vadd.f32 0.5, %v1997_v20  ;;  %v8077_v46 = vpop.eup %6201 }
 0x32a   : > { %v2737_v42 = vsel %vm2735_vm12, %v2736_v27, %v2732_v25  ;;  %v2923_v29 = vmul.f32 %v2921_v47, %v2921_v47  ;;  %v3159_v19 = vsel %vm3152_vm3, %v7294_v35, %v7288_v61  ;;  %v2940_v18 = vand.u32 3, %v2939_v23 }
 0x32b   : > { %v2738_v10 = vadd.s32 %v2737_v42, %v2733_v54  ;;  %vm2496_vm4 = vcmp.gt.s32.totalorder %v2495_v30, 0  ;;  %v8053_v44 = vshll.u32 %v2493_v14, 8  ;;  %v3131_v4 = vadd.f32 %v3124_v34, %v7271_v51 }
 0x32c   : > { %v2924_v63 = vmul.f32 -0.001358992, %v2923_v29  ;;  %v2931_v33 = vmul.f32 -0.00019511016, %v2923_v29  ;;  %v2497_v8 = vsel %vm2496_vm4, %v2495_v30, 0  ;;  %v8058_v13 = vmul.f32 %v6200_v24, %v7260_v31 }
 0x32d   : > { %v2739_v7 = vadd.s32 536870912, %v2738_v10  ;;  %v2499_v15 = vand.u32 31, %v2497_v8  ;;  %v8061_v21 = vmul.f32 %v3159_v19, %v7795_v52  ;;  %v8063_v26 = vmul.f32 0.5, %v6198_v57 }
 0x32e   : > { %v2925_v12 = vadd.f32 0.041655596, %v2924_v63  ;;  %v2932_v41 = vadd.f32 0.008332121, %v2931_v33  ;;  %v8067_v9 = vmul.f32 %v3131_v4, %v2004_v38  ;;  %vm2942_vm7 = vcmp.eq.s32.totalorder %v2940_v18, 0 }
 0x32f   : > { %v8050_v37 = vshrl.u32 %v2739_v7, 30  ;;  %v8065_v55 = vsub.s32 32, %v2499_v15  ;;  %vm2945_vm9 = vcmp.eq.s32.totalorder %v2940_v18, 2  ;;  %v2734_v27 = vadd.s32 %v2729_v22, %v8021_v17 }
 0x330   : > { %v2926_v62 = vmul.f32 %v2925_v12, %v2923_v29  ;;  %v2933_v50 = vmul.f32 %v2932_v41, %v2923_v29  ;;  %v8073_v6 = vand.u32 65535, %v8053_v44  ;;  %vm2941_vm10 = vcmp.lt.s32.totalorder %v2940_v18, 2 }
 0x331   : > { %v2741_v58 = vshll.u32 %v8050_v37, 30  ;;  %vm2938_vm6 = vweird.f32 %v7795_v52  ;;  %v8080_v20 = vshrl.u32 %v2497_v8, 5  ;;  %v2502_v42 = vshll.u32 %v10815_v43, %v2499_v15 }
 0x332   : > { %v2927_v25 = vadd.f32 -0.4999988, %v2926_v62  ;;  %v2934_v49 = vadd.f32 -0.16666654, %v2933_v50  ;;  %v2503_v17 = vshrl.u32 %v10858_v2, %v8065_v55  ;;  %v8086_v22 = vshrl.u32 %v8053_v44, 16 }
 0x333   : > { %v8069_v45 = vsub.s32 %v2738_v10, %v2741_v58  ;;  %v2506_v23 = vshrl.u32 %v10859_v39, %v8065_v55  ;;  %v2505_v57 = vshll.u32 %v10858_v2, %v2499_v15  ;;  %v2509_v16 = vshrl.u32 %v10811_v53, %v8065_v55 }
 0x334   : > { %v2928_v28 = vmul.f32 %v2927_v25, %v2923_v29  ;;  %v2935_v11 = vmul.f32 %v2934_v49, %v2923_v29  ;;  %v2512_v63 = vshrl.u32 %v10818_v56, %v8065_v55  ;;  %v2511_v7 = vshll.u32 %v10811_v53, %v2499_v15 }
 0x335   : > { %vm2743_vm5 = vcmp.lt.s32.totalorder %v8069_v45, 0  ;;  %v2744_v54 = vsub.s32 0, %v8069_v45  ;;  %v2515_v24 = vshrl.u32 %v10860_v1, %v8065_v55  ;;  %v2504_v19 = vor.u32 %v2503_v17, %v2502_v42 }
 0x336   : > { %v2929_v29 = vadd.f32 1.0, %v2928_v28  ;;  %v2936_v10 = vadd.f32 1.0, %v2935_v11  ;;  %v2508_v12 = vshll.u32 %v10859_v39, %v2499_v15  ;;  %v2333_v41 = vand.u32 2139095040, %v8046_v32 }
 0x337   : > { %v2745_v30 = vsel %vm2743_vm5, %v2744_v54, %v8069_v45  ;;  %vm2642_vm8 = vcmp.lt.s32.totalorder %v7813_v48, 0  ;;  %v8102_v62 = vor.u32 %v2506_v23, %v2505_v57  ;;  %v2513_v50 = vor.u32 %v2512_v63, %v2511_v7 }
 0x338   : > { %v2746_v14 = vclz %v2745_v30  ;;  %v2937_v33 = vmul.f32 %v2936_v10, %v2921_v47  ;;  %v2946_v34 = vxor.u32 2147483648, %v2929_v29  ;;  %v2514_v47 = vshll.u32 %v10818_v56, %v2499_v15 }
 0x339   : > { %v2764_v58 = vsub.s32 4, %v8050_v37  ;;  %v2510_v25 = vor.u32 %v2509_v16, %v2508_v12  ;;  %vm2517_vm11 = vcmp.lt.s32.totalorder %v8080_v20, 1  ;;  %vm8112_vm15 = vcmp.le.f32.partialorder %v2640_v59, 0.7853982 }
 0x33a   : > { %v5983_v38 = vadd.s32 4294967294, %v2746_v14  ;;  %v2943_v8 = vxor.u32 2147483648, %v2937_v33  ;;  %v2947_v4 = vsel %vm2945_vm9, %v2946_v34, %v2937_v33  ;;  %v2516_v11 = vor.u32 %v2515_v24, %v2514_v47 }
 0x33b   : > { %vm2520_vm14 = vcmp.lt.s32.totalorder %v8080_v20, 4  ;;  %vm2519_vm12 = vcmp.lt.s32.totalorder %v8080_v20, 3  ;;  %v2525_v18 = vsel %vm2517_vm11, %v2504_v19, %v8102_v62  ;;  %vm2518_vm2 = vcmp.lt.s32.totalorder %v8080_v20, 2 }
 0x33c   : > { %vm5984_vm13 = vcmp.lt.s32.totalorder %v5983_v38, 0  ;;  %v2944_v49 = vsel %vm2942_vm7, %v2929_v29, %v2943_v8  ;;  %v2526_v29 = vsel %vm2520_vm14, %v2513_v50, 920167782  ;;  %v2529_v57 = vsel %vm2517_vm11, %v8102_v62, %v2510_v25 }
 0x33d   : > { %v2749_v28 = vsel %vm5984_vm13, 0, %v5983_v38  ;;  %v2948_v54 = vsel %vm2941_vm10, %v2944_v49, %v2947_v4  ;;  %v2527_v52 = vsel %vm2519_vm12, %v2510_v25, %v2526_v29  ;;  %v2530_v16 = vsel %vm2520_vm14, %v2516_v11, 1326507024 }
 0x33e   : > { %v2750_v15 = vsub.s32 32, %v2749_v28  ;;  %v2754_v17 = vsub.s32 4294967266, %v2749_v28  ;;  %v2949_v10 = vsel %vm2938_vm6, nan, %v2948_v54  ;;  %v2751_v30 = vshll.u32 %v8069_v45, %v2749_v28 }
 0x33f   : > { %v3110_v59 = vmul.f32 %v2949_v10, %v7262_v3  ;;  %v2528_v45 = vsel %vm2518_vm2, %v2525_v18, %v2527_v52  ;;  %v2334_v38 = vshrl.u32 %v2333_v41, 23  ;;  %v2765_v47 = vsel %vm2642_vm8, %v2764_v58, %v8050_v37 }
 0x340   : > { %v2752_v23 = vshrl.u32 %v2734_v27, %v2750_v15  ;;  %v2755_v14 = vadd.s32 127, %v2754_v17  ;;  %v2531_v27 = vsel %vm2519_vm12, %v2513_v50, %v2530_v16  ;;  %v2558_v7 = vand.u32 65535, %v2528_v45 }
 0x341   : > { %v3117_v63 = vadd.f32 %v3110_v59, %v8058_v13  ;;  %v2559_v24 = vshrl.u32 %v2528_v45, 16  ;;  %v2532_v13 = vsel %vm2518_vm2, %v2529_v57, %v2531_v27  ;;  %v2501_v4 = vshrl.u32 %v10815_v43, %v8065_v55 }
 0x342   : > { %v2753_v33 = vor.u32 %v2752_v23, %v2751_v30  ;;  %v2756_v34 = vshll.u32 %v2755_v14, 23  ;;  %v2536_v49 = vand.u32 65535, %v2532_v13  ;;  %v2537_v28 = vshrl.u32 %v2532_v13, 16 }
 0x343   : > { %v3145_v12 = vadd.f32 %v8067_v9, %v3117_v63  ;;  %v2561_v50 = vmul.u32 %v2559_v24, %v8073_v6  ;;  %v2562_v9 = vmul.u32 %v2558_v7, %v8086_v22  ;;  %v2767_v15 = vsel %vm8112_vm15, 0, %v2765_v47 }
 0x344   : > { %v2757_v8 = vor.u32 4788187, %v2756_v34  ;;  %v2760_v54 = vcvt.s32.f32 %v2753_v33  ;;  %v2521_v37 = vsel %vm2517_vm11, %v2501_v4, %v2504_v19  ;;  %v2539_v58 = vmul.u32 %v2537_v28, %v8073_v6 }
 0x345   : > { %v3173_v11 = vadd.f32 %v8061_v21, %v3145_v12  ;;  %v2540_v55 = vmul.u32 %v2536_v49, %v8086_v22  ;;  %v2522_v21 = vsel %vm2520_vm14, %v2510_v25, 2102212464  ;;  %v2560_v10 = vmul.u32 %v2558_v7, %v8073_v6 }
 0x346   : > { %v2758_v41 = vand.u32 2147483647, %v2757_v8  ;;  %v2564_v18 = vshll.u32 %v2561_v50, 16  ;;  %v2538_v29 = vmul.u32 %v2536_v49, %v8073_v6  ;;  %v2541_v59 = vmul.u32 %v2537_v28, %v8086_v22 }
 0x347   : > { %3260 = vmatpush.msra.mxu0 %v3173_v11  ;;  %6087 = vmatpush.msra.mxu2 %v3173_v11  ;;  %v2542_v30 = vshll.u32 %v2539_v58, 16  ;;  %v2563_v19 = vmul.u32 %v2559_v24, %v8086_v22  ;;  %v2566_v14 = vshll.u32 %v2562_v9, 16  ;;  %v2544_v57 = vshll.u32 %v2540_v55, 16 }
 0x348   : > { %v2761_v17 = vmul.f32 %v2760_v54, %v2758_v41  ;;  %vm2568_vm3 = vc.u32 %v2560_v10, %v2564_v18  ;;  %v2570_v52 = vadd.s32 %v2564_v18, %v2560_v10  ;;  %v2565_v24 = vshrl.u32 %v2561_v50, 16 }
 0x349   : > { %vm2546_vm4 = vc.u32 %v2538_v29, %v2542_v30  ;;  %v2548_v16 = vadd.s32 %v2542_v30, %v2538_v29  ;;  %v2569_v63 = vsel %vm2568_vm3, 1, %v10813_v5  ;;  %v2523_v8 = vsel %vm2519_vm12, %v8102_v62, %v2522_v21 }
 0x34a   : > { %v2762_v23 = vxor.u32 2147483648, %v2761_v17  ;;  %v2547_v33 = vsel %vm2546_vm4, 1, %v10813_v5  ;;  %v2571_v6 = vadd.s32 %v2569_v63, %v2563_v19  ;;  %vm2572_vm7 = vc.u32 %v2570_v52, %v2566_v14 }
 0x34b   : > { %v2549_v34 = vadd.s32 %v2547_v33, %v2541_v59  ;;  %vm2550_vm9 = vc.u32 %v2548_v16, %v2544_v57  ;;  %v2573_v45 = vsel %vm2572_vm7, 1, %v10813_v5  ;;  %v2543_v47 = vshrl.u32 %v2539_v58, 16 }
 0x34c   : > { %v2763_v25 = vsel %vm2642_vm8, %v2762_v23, %v2761_v17  ;;  %v2551_v7 = vsel %vm2550_vm9, 1, %v10813_v5  ;;  %v2575_v12 = vadd.s32 %v2573_v45, %v2571_v6  ;;  %v5976_v4 = vadd.s32 4294967169, %v2334_v38 }
 0x34d   : > { %v2766_v22 = vsel %vm8112_vm15, %v7813_v48, %v2763_v25  ;;  %v2553_v13 = vadd.s32 %v2551_v7, %v2549_v34  ;;  %v2567_v42 = vshrl.u32 %v2562_v9, 16  ;;  %v2784_v41 = vadd.s32 3, %v2767_v15 }
 0x34e   : > { %v2768_v27 = vmul.f32 %v2766_v22, %v2766_v22  ;;  %v2576_v11 = vadd.s32 %v2575_v12, %v2565_v24  ;;  %v2545_v54 = vshrl.u32 %v2540_v55, 16  ;;  %v2340_v10 = vadd.s32 1, %v5976_v4 }
 0x34f   : > { %v2554_v17 = vadd.s32 %v2553_v13, %v2543_v47  ;;  %v2524_v50 = vsel %vm2518_vm2, %v2521_v37, %v2523_v8  ;;  %v3123_v62 = vmul.f32 %v7813_v48, %v7264_v60  ;;  %v8181_v38 = vadd.s32 %v2570_v52, %v2566_v14 }
 0x350   : > { %v2769_v49 = vmul.f32 -0.001358992, %v2768_v27  ;;  %v2776_v28 = vmul.f32 -0.00019511016, %v2768_v27  ;;  %v2577_v59 = vadd.s32 %v2576_v11, %v2567_v42  ;;  %vm2341_vm10 = vcmp.gt.s32.totalorder %v2340_v10, 0 }
 0x351   : > { %v8179_v58 = vadd.s32 %v2554_v17, %v2545_v54  ;;  %v2342_v55 = vsel %vm2341_vm10, %v2340_v10, 0  ;;  %v2785_v30 = vand.u32 3, %v2784_v41  ;;  %v2578_v19 = vmul.u32 %v8053_v44, %v2524_v50 }
 0x352   : > { %v2770_v18 = vadd.f32 0.041655596, %v2769_v49  ;;  %v2777_v29 = vadd.f32 0.008332121, %v2776_v28  ;;  %v2581_v15 = vadd.s32 1, %v2577_v59  ;;  %v2344_v20 = vand.u32 31, %v2342_v55 }
 0x353   : > { %vm2580_vm5 = vc.u32 %v8179_v58, %v8181_v38  ;;  %v2330_v16 = vand.u32 2147483647, %v8046_v32  ;;  %v2003_v14 = vadd.f32 0.5, %v8063_v26  ;;  %v2017_v52 = vmul.f32 %v8077_v46, %v7260_v31 }
 0x354   : > { %v2771_v9 = vmul.f32 %v2770_v18, %v2768_v27  ;;  %v2778_v21 = vmul.f32 %v2777_v29, %v2768_v27  ;;  %v2582_v57 = vsel %vm2580_vm5, %v2581_v15, %v2577_v59  ;;  %v8190_v25 = vsub.s32 32, %v2344_v20 }
 0x355   : > { %v2583_v63 = vadd.s32 %v2582_v57, %v2578_v19  ;;  %v3130_v44 = vadd.f32 %v3123_v62, %v7271_v51  ;;  %vm3151_vm6 = vcmp.ge.f32.partialorder %v7813_v48, 0.0  ;;  %vm2783_vm8 = vweird.f32 %v7813_v48 }
 0x356   : > { %v2772_v37 = vadd.f32 -0.4999988, %v2771_v9  ;;  %v2779_v23 = vadd.f32 -0.16666654, %v2778_v21  ;;  %vm2786_vm13 = vcmp.lt.s32.totalorder %v2785_v30, 2  ;;  %vm2787_vm11 = vcmp.eq.s32.totalorder %v2785_v30, 0 }
 0x357   : > { %vm2790_vm15 = vcmp.eq.s32.totalorder %v2785_v30, 2  ;;  %v2584_v34 = vadd.s32 536870912, %v2583_v63  ;;  %v2337_v46 = vand.u32 8388607, %v2330_v16  ;;  %v2357_v7 = vshrl.u32 %v10818_v56, %v8190_v25 }
 0x358   : > { %v2773_v33 = vmul.f32 %v2772_v37, %v2768_v27  ;;  %v2780_v6 = vmul.f32 %v2779_v23, %v2768_v27  ;;  %v8201_v27 = vshrl.u32 %v2342_v55, 5  ;;  %v2348_v12 = vshrl.u32 %v10858_v2, %v8190_v25 }
 0x359   : > { %v8199_v24 = vshrl.u32 %v2584_v34, 30  ;;  %v2351_v8 = vshrl.u32 %v10859_v39, %v8190_v25  ;;  %v2354_v4 = vshrl.u32 %v10811_v53, %v8190_v25  ;;  %v2356_v49 = vshll.u32 %v10811_v53, %v2344_v20 }
 0x35a   : > { %v2774_v45 = vadd.f32 1.0, %v2773_v33  ;;  %v2781_v26 = vadd.f32 1.0, %v2780_v6  ;;  %v2347_v42 = vshll.u32 %v10815_v43, %v2344_v20  ;;  %v2350_v11 = vshll.u32 %v10858_v2, %v2344_v20 }
 0x35b   : > { %v2586_v28 = vshll.u32 %v8199_v24, 30  ;;  %v2360_v41 = vshrl.u32 %v10860_v1, %v8190_v25  ;;  %v2353_v17 = vshll.u32 %v10859_v39, %v2344_v20  ;;  %v2358_v10 = vor.u32 %v2357_v7, %v2356_v49 }
 0x35c   : > { %v2782_v47 = vmul.f32 %v2781_v26, %v2766_v22  ;;  %v2791_v13 = vxor.u32 2147483648, %v2774_v45  ;;  %v2359_v22 = vshll.u32 %v10818_v56, %v2344_v20  ;;  %v2338_v29 = vor.u32 8388608, %v2337_v46 }
 0x35d   : > { %v8217_v18 = vsub.s32 %v2583_v63, %v2586_v28  ;;  %v8219_v50 = vor.u32 %v2348_v12, %v2347_v42  ;;  %v8221_v59 = vor.u32 %v2351_v8, %v2350_v11  ;;  %v8225_v21 = vor.u32 %v2354_v4, %v2353_v17  ;;  %v1887_v11 = vpop.permute.xlu2 %1886 }
 0x35e   : > { %v2788_v54 = vxor.u32 2147483648, %v2782_v47  ;;  %v2792_v9 = vsel %vm2790_vm15, %v2791_v13, %v2782_v47  ;;  %v2361_v15 = vor.u32 %v2360_v41, %v2359_v22  ;;  %vm2365_vm12 = vcmp.lt.s32.totalorder %v8201_v27, 4 }
 0x35f   : > { %vm2588_vm14 = vcmp.lt.s32.totalorder %v8217_v18, 0  ;;  %v2589_v19 = vsub.s32 0, %v8217_v18  ;;  %v3158_v37 = vsel %vm3151_vm6, %v7294_v35, %v7288_v61  ;;  %vm2362_vm2 = vcmp.lt.s32.totalorder %v8201_v27, 1 }
 0x360   : > { %v2789_v62 = vsel %vm2787_vm11, %v2774_v45, %v2788_v54  ;;  %v2371_v30 = vsel %vm2365_vm12, %v2358_v10, 920167782  ;;  %vm2364_vm3 = vcmp.lt.s32.totalorder %v8201_v27, 3  ;;  %v2370_v63 = vsel %vm2362_vm2, %v8219_v50, %v8221_v59 }
 0x361   : > { %v2793_v55 = vsel %vm2786_vm13, %v2789_v62, %v2792_v9  ;;  %v2590_v57 = vsel %vm2588_vm14, %v2589_v19, %v8217_v18  ;;  %v2372_v6 = vsel %vm2364_vm3, %v8225_v21, %v2371_v30  ;;  %v2374_v34 = vsel %vm2362_vm2, %v8221_v59, %v8225_v21 }
 0x362   : > { %v2794_v20 = vsel %vm2783_vm8, nan, %v2793_v55  ;;  %v2591_v33 = vclz %v2590_v57  ;;  %v2375_v45 = vsel %vm2365_vm12, %v2361_v15, 1326507024  ;;  %v3137_v46 = vmul.f32 %v3130_v44, %v2003_v14 }
 0x363   : > { %v3109_v23 = vmul.f32 %v2794_v20, %v7262_v3  ;;  %vm2363_vm4 = vcmp.lt.s32.totalorder %v8201_v27, 2  ;;  %v8257_v7 = vshll.u32 %v2338_v29, 8  ;;  %v1981_v12 = vmul.f32 0.5, %v7823_v36 }
 0x364   : > { %v5980_v8 = vadd.s32 4294967294, %v2591_v33  ;;  %v2373_v47 = vsel %vm2363_vm4, %v2370_v63, %v2372_v6  ;;  %v2376_v13 = vsel %vm2364_vm3, %v2358_v10, %v2375_v45  ;;  %v3165_v49 = vmul.f32 %v3158_v37, %v7813_v48 }
 0x365   : > { %v3116_v26 = vadd.f32 %v3109_v23, %v2017_v52  ;;  %v2377_v52 = vsel %vm2363_vm4, %v2374_v34, %v2376_v13  ;;  %v2403_v14 = vand.u32 65535, %v2373_v47  ;;  %v2404_v42 = vshrl.u32 %v2373_v47, 16 }
 0x366   : > { %vm5981_vm7 = vcmp.lt.s32.totalorder %v5980_v8, 0  ;;  %v2381_v44 = vand.u32 65535, %v2377_v52  ;;  %v2382_v28 = vshrl.u32 %v2377_v52, 16  ;;  %v2379_v17 = vand.u32 65535, %v8257_v7 }
 0x367   : > { %v3144_v4 = vadd.f32 %v3137_v46, %v3116_v26  ;;  %v2594_v54 = vsel %vm5981_vm7, 0, %v5980_v8  ;;  %v2380_v22 = vshrl.u32 %v8257_v7, 16  ;;  %v8270_v10 = vadd.f32 %v7726_v0, %v1887_v11 }
 0x368   : > { %v2579_v48 = vadd.s32 %v8181_v38, %v8179_v58  ;;  %v2595_v29 = vsub.s32 32, %v2594_v54  ;;  %v2599_v62 = vsub.s32 4294967266, %v2594_v54  ;;  %6203 = vtanh.f32 %v1981_v12 }
 0x369   : > { %v3172_v41 = vadd.f32 %v3165_v49, %v3144_v4  ;;  %v2384_v9 = vmul.u32 %v2382_v28, %v2379_v17  ;;  %v2385_v15 = vmul.u32 %v2381_v44, %v2380_v22  ;;  %v2407_v55 = vmul.u32 %v2403_v14, %v2380_v22 }
 0x36a   : > { %v2596_v19 = vshll.u32 %v8217_v18, %v2594_v54  ;;  %v2597_v20 = vshrl.u32 %v2579_v48, %v2595_v29  ;;  %v2600_v37 = vadd.s32 127, %v2599_v62  ;;  %v2406_v30 = vmul.u32 %v2404_v42, %v2379_v17 }
 0x36b   : > { %3261 = vmatpush.msra.mxu0 %v3172_v41  ;;  %6088 = vmatpush.msra.mxu2 %v3172_v41  ;;  %v2609_v23 = vsub.s32 4, %v8199_v24  ;;  %v2383_v0 = vmul.u32 %v2381_v44, %v2379_v17  ;;  %v2387_v57 = vshll.u32 %v2384_v9, 16  ;;  %v2405_v63 = vmul.u32 %v2403_v14, %v2379_v17 }
 0x36c   : > { %v2598_v33 = vor.u32 %v2597_v20, %v2596_v19  ;;  %v2601_v58 = vshll.u32 %v2600_v37, 23  ;;  %v2386_v38 = vmul.u32 %v2382_v28, %v2380_v22  ;;  %v2409_v6 = vshll.u32 %v2406_v30, 16 }
 0x36d   : > { %v2389_v34 = vshll.u32 %v2385_v15, 16  ;;  %vm2391_vm9 = vc.u32 %v2383_v0, %v2387_v57  ;;  %v2393_v45 = vadd.s32 %v2387_v57, %v2383_v0  ;;  %v2411_v26 = vshll.u32 %v2407_v55, 16 }
 0x36e   : > { %v2602_v46 = vor.u32 4788187, %v2601_v58  ;;  %v2392_v12 = vsel %vm2391_vm9, 1, %v10813_v5  ;;  %v2408_v18 = vmul.u32 %v2404_v42, %v2380_v22  ;;  %vm2413_vm10 = vc.u32 %v2405_v63, %v2409_v6  ;;  %v6204_v8 = vpop.eup %6203 }
 0x36f   : > { %v2394_v47 = vadd.s32 %v2392_v12, %v2386_v38  ;;  %vm2395_vm5 = vc.u32 %v2393_v45, %v2389_v34  ;;  %v2414_v13 = vsel %vm2413_vm10, 1, %v10813_v5  ;;  %v2415_v4 = vadd.s32 %v2409_v6, %v2405_v63 }
 0x370   : > { %v2603_v49 = vand.u32 2147483647, %v2602_v46  ;;  %v2605_v52 = vcvt.s32.f32 %v2598_v33  ;;  %v2396_v14 = vsel %vm2395_vm5, 1, %v10813_v5  ;;  %v2416_v44 = vadd.s32 %v2414_v13, %v2408_v18 }
 0x371   : > { %v2367_v28 = vsel %vm2365_vm12, %v8225_v21, 2102212464  ;;  %v2388_v11 = vshrl.u32 %v2384_v9, 16  ;;  %v2398_v41 = vadd.s32 %v2396_v14, %v2394_v47  ;;  %vm2417_vm6 = vc.u32 %v2415_v4, %v2411_v26  ;;  %v1957_v47 = vpop.f32.mrf.mxu0 }
 0x372   : > { %vm2487_vm8 = vcmp.lt.s32.totalorder %v7823_v36, 0  ;;  %v2606_v42 = vmul.f32 %v2605_v52, %v2603_v49  ;;  %v2346_v54 = vshrl.u32 %v10815_v43, %v8190_v25  ;;  %v2418_v17 = vsel %vm2417_vm6, 1, %v10813_v5 }
 0x373   : > { %v2390_v22 = vshrl.u32 %v2385_v15, 16  ;;  %v2399_v48 = vadd.s32 %v2398_v41, %v2388_v11  ;;  %v2410_v29 = vshrl.u32 %v2406_v30, 16  ;;  %v2420_v62 = vadd.s32 %v2418_v17, %v2416_v44  ;;  %v1882_v11 = vpop.permute.xlu0 %1881 }
 0x374   : > { %v2607_v19 = vxor.u32 2147483648, %v2606_v42  ;;  %v2366_v21 = vsel %vm2362_vm2, %v2346_v54, %v8219_v50  ;;  %v2368_v9 = vsel %vm2364_vm3, %v8221_v59, %v2367_v28  ;;  %v2178_v20 = vand.u32 2139095040, %v8270_v10 }
 0x375   : > { %v2610_v25 = vsel %vm2487_vm8, %v2609_v23, %v8199_v24  ;;  %v8296_v37 = vadd.s32 %v2399_v48, %v2390_v22  ;;  %v2412_v15 = vshrl.u32 %v2407_v55, 16  ;;  %v2421_v30 = vadd.s32 %v2420_v62, %v2410_v29 }
 0x376   : > { %vm8300_vm13 = vcmp.le.f32.partialorder %v2485_v40, 0.7853982  ;;  %v2608_v50 = vsel %vm2487_vm8, %v2607_v19, %v2606_v42  ;;  %v8306_v59 = vadd.s32 %v2415_v4, %v2411_v26  ;;  %v2179_v57 = vshrl.u32 %v2178_v20, 23 }
 0x377   : > { %6205 = vtanh.f32 %v7823_v36  ;;  %v2611_v24 = vsel %vm8300_vm13, %v7823_v36, %v2608_v50  ;;  %v2369_v55 = vsel %vm2363_vm4, %v2366_v21, %v2368_v9  ;;  %v2422_v23 = vadd.s32 %v2421_v30, %v2412_v15 }
 0x378   : > { %v2612_v40 = vsel %vm8300_vm13, 0, %v2610_v25  ;;  %v2613_v63 = vmul.f32 %v2611_v24, %v2611_v24  ;;  %vm2425_vm11 = vc.u32 %v8296_v37, %v8306_v59  ;;  %v5973_v33 = vadd.s32 4294967169, %v2179_v57 }
 0x379   : > { %v3122_v58 = vmul.f32 %v7823_v36, %v7264_v60  ;;  %v2426_v38 = vadd.s32 1, %v2422_v23  ;;  %v2175_v6 = vand.u32 2147483647, %v8270_v10  ;;  %v2423_v27 = vmul.u32 %v8257_v7, %v2369_v55 }
 0x37a   : > { %v2614_v34 = vmul.f32 -0.001358992, %v2613_v63  ;;  %v2621_v45 = vmul.f32 -0.00019511016, %v2613_v63  ;;  %v2185_v26 = vadd.s32 1, %v5973_v33  ;;  %v1995_v46 = vmul.f32 0.5, %v6204_v8 }
 0x37b   : > { %v2629_v12 = vadd.s32 3, %v2612_v40  ;;  %vm3150_vm15 = vcmp.ge.f32.partialorder %v7823_v36, 0.0  ;;  %v2427_v18 = vsel %vm2425_vm11, %v2426_v38, %v2422_v23  ;;  %v1980_v14 = vmul.f32 0.5, %v8046_v32 }
 0x37c   : > { %v2615_v13 = vadd.f32 0.041655596, %v2614_v34  ;;  %v2622_v4 = vadd.f32 0.008332121, %v2621_v45  ;;  %v2428_v49 = vadd.s32 %v2427_v18, %v2423_v27  ;;  %vm2186_vm14 = vcmp.gt.s32.totalorder %v2185_v26, 0 }
 0x37d   : > { %v6206_v52 = vpop.eup %6205  ;;  %v2182_v44 = vand.u32 8388607, %v2175_v6  ;;  %v2187_v28 = vsel %vm2186_vm14, %v2185_v26, 0  ;;  %v3157_v8 = vsel %vm3150_vm15, %v7294_v35, %v7288_v61  ;;  %v8328_v54 = vadd.f32 %v1957_v47, %v1882_v11 }
 0x37e   : > { %v2616_v7 = vmul.f32 %v2615_v13, %v2613_v63  ;;  %v2623_v41 = vmul.f32 %v2622_v4, %v2613_v63  ;;  %v2429_v42 = vadd.s32 536870912, %v2428_v49  ;;  %v2002_v17 = vadd.f32 0.5, %v1995_v46 }
 0x37f   : > { %v2630_v22 = vand.u32 3, %v2629_v12  ;;  %v2189_v48 = vand.u32 31, %v2187_v28  ;;  %v3129_v19 = vadd.f32 %v3122_v58, %v7271_v51  ;;  %v2016_v9 = vmul.f32 %v6206_v52, %v7260_v31 }
 0x380   : > { %v2617_v29 = vadd.f32 -0.4999988, %v2616_v7  ;;  %v2624_v62 = vadd.f32 -0.16666654, %v2623_v41  ;;  %v8331_v21 = vshrl.u32 %v2429_v42, 30  ;;  %v8335_v20 = vmul.f32 %v3157_v8, %v7823_v36 }
 0x381   : > { %v2183_v25 = vor.u32 8388608, %v2182_v44  ;;  %v8337_v15 = vsub.s32 32, %v2189_v48  ;;  %6207 = vtanh.f32 %v1980_v14  ;;  %vm2628_vm12 = vweird.f32 %v7823_v36 }
 0x382   : > { %v2618_v30 = vmul.f32 %v2617_v29, %v2613_v63  ;;  %v2625_v0 = vmul.f32 %v2624_v62, %v2613_v63  ;;  %v2431_v50 = vshll.u32 %v8331_v21, 30  ;;  %vm2631_vm2 = vcmp.lt.s32.totalorder %v2630_v22, 2 }
 0x383   : > { %vm2632_vm3 = vcmp.eq.s32.totalorder %v2630_v22, 0  ;;  %v3136_v57 = vmul.f32 %v3129_v19, %v2002_v17  ;;  %6209 = vtanh.f32 %v8046_v32  ;;  %vm2635_vm4 = vcmp.eq.s32.totalorder %v2630_v22, 2 }
 0x384   : > { %v2619_v55 = vadd.f32 1.0, %v2618_v30  ;;  %v2626_v23 = vadd.f32 1.0, %v2625_v0  ;;  %v2432_v40 = vsub.s32 %v2428_v49, %v2431_v50  ;;  %v8342_v33 = vshrl.u32 %v2187_v28, 5 }
 0x385   : > { %v2193_v58 = vshrl.u32 %v10858_v2, %v8337_v15  ;;  %v2196_v63 = vshrl.u32 %v10859_v39, %v8337_v15  ;;  %v8348_v38 = vshll.u32 %v2183_v25, 8  ;;  %v2192_v26 = vshll.u32 %v10815_v43, %v2189_v48 }
 0x386   : > { %v2627_v34 = vmul.f32 %v2626_v23, %v2611_v24  ;;  %v2636_v45 = vxor.u32 2147483648, %v2619_v55  ;;  %vm2433_vm7 = vcmp.lt.s32.totalorder %v2432_v40, 0  ;;  %v2434_v27 = vsub.s32 0, %v2432_v40 }
 0x387   : > { %v2195_v46 = vshll.u32 %v10858_v2, %v2189_v48  ;;  %v2199_v12 = vshrl.u32 %v10811_v53, %v8337_v15  ;;  %v2202_v18 = vshrl.u32 %v10818_v56, %v8337_v15  ;;  %v8356_v47 = vpop.eup %6207  ;;  %v2201_v49 = vshll.u32 %v10811_v53, %v2189_v48 }
 0x388   : > { %v2633_v13 = vxor.u32 2147483648, %v2627_v34  ;;  %v2435_v4 = vsel %vm2433_vm7, %v2434_v27, %v2432_v40  ;;  %v2205_v24 = vshrl.u32 %v10860_v1, %v8337_v15  ;;  %v2194_v44 = vor.u32 %v2193_v58, %v2192_v26 }
 0x389   : > { %v8361_v52 = vpop.eup %6209  ;;  %v2436_v14 = vclz %v2435_v4  ;;  %v8363_v28 = vor.u32 %v2196_v63, %v2195_v46  ;;  %v2198_v11 = vshll.u32 %v10859_v39, %v2189_v48  ;;  %v2637_v41 = vsel %vm2635_vm4, %v2636_v45, %v2627_v34 }
 0x38a   : > { %v2634_v7 = vsel %vm2632_vm3, %v2619_v55, %v2633_v13  ;;  %v2203_v8 = vor.u32 %v2202_v18, %v2201_v49  ;;  %v2204_v42 = vshll.u32 %v10818_v56, %v2189_v48  ;;  %v2424_v29 = vadd.s32 %v8306_v59, %v8296_v37 }
 0x38b   : > { %v2638_v17 = vsel %vm2631_vm2, %v2634_v7, %v2637_v41  ;;  %v5977_v62 = vadd.s32 4294967294, %v2436_v14  ;;  %v2224_v19 = vand.u32 65535, %v8348_v38  ;;  %vm2332_vm9 = vcmp.lt.s32.totalorder %v8046_v32, 0 }
 0x38c   : > { %v2639_v25 = vsel %vm2628_vm12, nan, %v2638_v17  ;;  %v2200_v30 = vor.u32 %v2199_v12, %v2198_v11  ;;  %v2206_v0 = vor.u32 %v2205_v24, %v2204_v42  ;;  %vm2207_vm10 = vcmp.lt.s32.totalorder %v8342_v33, 1 }
 0x38d   : > { %v3108_v50 = vmul.f32 %v2639_v25, %v7262_v3  ;;  %vm5978_vm5 = vcmp.lt.s32.totalorder %v5977_v62, 0  ;;  %v2454_v22 = vsub.s32 4, %v8331_v21  ;;  %vm2210_vm6 = vcmp.lt.s32.totalorder %v8342_v33, 4 }
 0x38e   : > { %v2439_v37 = vsel %vm5978_vm5, 0, %v5977_v62  ;;  %vm2208_vm8 = vcmp.lt.s32.totalorder %v8342_v33, 2  ;;  %v2215_v36 = vsel %vm2207_vm10, %v2194_v44, %v8363_v28  ;;  %v2216_v59 = vsel %vm2210_vm6, %v2203_v8, 920167782 }
 0x38f   : > { %v3115_v48 = vadd.f32 %v3108_v50, %v2016_v9  ;;  %v2440_v55 = vsub.s32 32, %v2439_v37  ;;  %v2444_v23 = vsub.s32 4294967266, %v2439_v37  ;;  %vm2209_vm13 = vcmp.lt.s32.totalorder %v8342_v33, 3 }
 0x390   : > { %v2441_v58 = vshll.u32 %v2432_v40, %v2439_v37  ;;  %v2217_v63 = vsel %vm2209_vm13, %v2200_v30, %v2216_v59  ;;  %v2219_v34 = vsel %vm2207_vm10, %v8363_v28, %v2200_v30  ;;  %v2220_v45 = vsel %vm2210_vm6, %v2206_v0, 1326507024 }
 0x391   : > { %v3143_v27 = vadd.f32 %v3136_v57, %v3115_v48  ;;  %v2442_v26 = vshrl.u32 %v2424_v29, %v2440_v55  ;;  %v2445_v46 = vadd.s32 127, %v2444_v23  ;;  %v2218_v9 = vsel %vm2208_vm8, %v2215_v36, %v2217_v63 }
 0x392   : > { %v2221_v12 = vsel %vm2209_vm13, %v2203_v8, %v2220_v45  ;;  %v2225_v40 = vshrl.u32 %v8348_v38, 16  ;;  %v2248_v18 = vand.u32 65535, %v2218_v9  ;;  %v2249_v13 = vshrl.u32 %v2218_v9, 16 }
 0x393   : > { %v3171_v4 = vadd.f32 %v8335_v20, %v3143_v27  ;;  %v2443_v49 = vor.u32 %v2442_v26, %v2441_v58  ;;  %v2446_v24 = vshll.u32 %v2445_v46, 23  ;;  %v2222_v14 = vsel %vm2208_vm8, %v2219_v34, %v2221_v12 }
 0x394   : > { %v2191_v57 = vshrl.u32 %v10815_v43, %v8337_v15  ;;  %v2226_v11 = vand.u32 65535, %v2222_v14  ;;  %v2227_v7 = vshrl.u32 %v2222_v14, 16  ;;  %v2251_v41 = vmul.u32 %v2249_v13, %v2224_v19 }
 0x395   : > { %3262 = vmatpush.msra.mxu0 %v3171_v4  ;;  %6089 = vmatpush.msra.mxu2 %v3171_v4  ;;  %vm8406_vm11 = vcmp.le.f32.partialorder %v2330_v16, 0.7853982  ;;  %v2447_v20 = vor.u32 4788187, %v2446_v24  ;;  %v2455_v42 = vsel %vm2332_vm9, %v2454_v22, %v8331_v21  ;;  %v2252_v17 = vmul.u32 %v2248_v18, %v2225_v40 }
 0x396   : > { %v2211_v15 = vsel %vm2207_vm10, %v2191_v57, %v2194_v44  ;;  %v2212_v29 = vsel %vm2210_vm6, %v2200_v30, 2102212464  ;;  %v2229_v62 = vmul.u32 %v2227_v7, %v2224_v19  ;;  %v2230_v25 = vmul.u32 %v2226_v11, %v2225_v40 }
 0x397   : > { %v2448_v0 = vand.u32 2147483647, %v2447_v20  ;;  %v2450_v50 = vcvt.s32.f32 %v2443_v49  ;;  %v2250_v16 = vmul.u32 %v2248_v18, %v2224_v19  ;;  %v2254_v37 = vshll.u32 %v2251_v41, 16 }
 0x398   : > { %v2228_v36 = vmul.u32 %v2226_v11, %v2224_v19  ;;  %v2231_v59 = vmul.u32 %v2227_v7, %v2225_v40  ;;  %v2232_v48 = vshll.u32 %v2229_v62, 16  ;;  %v2253_v55 = vmul.u32 %v2249_v13, %v2225_v40 }
 0x399   : > { %v2451_v23 = vmul.f32 %v2450_v50, %v2448_v0  ;;  %v2256_v58 = vshll.u32 %v2252_v17, 16  ;;  %vm2258_vm15 = vc.u32 %v2250_v16, %v2254_v37  ;;  %v2260_v21 = vadd.s32 %v2254_v37, %v2250_v16 }
 0x39a   : > { %v2234_v22 = vshll.u32 %v2230_v25, 16  ;;  %vm2236_vm14 = vc.u32 %v2228_v36, %v2232_v48  ;;  %v2238_v44 = vadd.s32 %v2232_v48, %v2228_v36  ;;  %v2259_v63 = vsel %vm2258_vm15, 1, %v10813_v5 }
 0x39b   : > { %v2452_v30 = vxor.u32 2147483648, %v2451_v23  ;;  %v2237_v34 = vsel %vm2236_vm14, 1, %v10813_v5  ;;  %v2261_v45 = vadd.s32 %v2259_v63, %v2253_v55  ;;  %vm2262_vm12 = vc.u32 %v2260_v21, %v2256_v58 }
 0x39c   : > { %v2213_v19 = vsel %vm2209_vm13, %v8363_v28, %v2212_v29  ;;  %v2239_v27 = vadd.s32 %v2237_v34, %v2231_v59  ;;  %vm2240_vm2 = vc.u32 %v2238_v44, %v2234_v22  ;;  %v2263_v26 = vsel %vm2262_vm12, 1, %v10813_v5 }
 0x39d   : > { %v2453_v46 = vsel %vm2332_vm9, %v2452_v30, %v2451_v23  ;;  %v2241_v9 = vsel %vm2240_vm2, 1, %v10813_v5  ;;  %v2255_v12 = vshrl.u32 %v2251_v41, 16  ;;  %v2265_v40 = vadd.s32 %v2263_v26, %v2261_v45 }
 0x39e   : > { %v2456_v18 = vsel %vm8406_vm11, %v8046_v32, %v2453_v46  ;;  %v2233_v13 = vshrl.u32 %v2229_v62, 16  ;;  %v2243_v4 = vadd.s32 %v2241_v9, %v2239_v27  ;;  %v2023_v49 = vand.u32 2139095040, %v8328_v54 }
 0x39f   : > { %v2457_v28 = vsel %vm8406_vm11, 0, %v2455_v42  ;;  %v2458_v24 = vmul.f32 %v2456_v18, %v2456_v18  ;;  %v2257_v14 = vshrl.u32 %v2252_v17, 16  ;;  %v2266_v57 = vadd.s32 %v2265_v40, %v2255_v12 }
 0x3a0   : > { %v2214_v11 = vsel %vm2208_vm8, %v2211_v15, %v2213_v19  ;;  %v2235_v7 = vshrl.u32 %v2230_v25, 16  ;;  %v2244_v41 = vadd.s32 %v2243_v4, %v2233_v13  ;;  %v2024_v20 = vshrl.u32 %v2023_v49, 23 }
 0x3a1   : > { %v2459_v29 = vmul.f32 -0.001358992, %v2458_v24  ;;  %v2466_v0 = vmul.f32 -0.00019511016, %v2458_v24  ;;  %v2267_v50 = vadd.s32 %v2266_v57, %v2257_v14  ;;  %v2020_v62 = vand.u32 2147483647, %v8328_v54 }
 0x3a2   : > { %v8435_v16 = vadd.s32 %v2244_v41, %v2235_v7  ;;  %v8437_v37 = vadd.s32 %v2260_v21, %v2256_v58  ;;  %v5970_v8 = vadd.s32 4294967169, %v2024_v20  ;;  %v1994_v42 = vmul.f32 0.5, %v8356_v47 }
 0x3a3   : > { %v2460_v17 = vadd.f32 0.041655596, %v2459_v29  ;;  %v2467_v36 = vadd.f32 0.008332121, %v2466_v0  ;;  %v2271_v59 = vadd.s32 1, %v2267_v50  ;;  %v2474_v33 = vadd.s32 3, %v2457_v28 }
 0x3a4   : > { %v2268_v15 = vmul.u32 %v8348_v38, %v2214_v11  ;;  %vm2270_vm3 = vc.u32 %v8435_v16, %v8437_v37  ;;  %v2030_v25 = vadd.s32 1, %v5970_v8  ;;  %v2027_v58 = vand.u32 8388607, %v2020_v62 }
 0x3a5   : > { %v2461_v48 = vmul.f32 %v2460_v17, %v2458_v24  ;;  %v2468_v55 = vmul.f32 %v2467_v36, %v2458_v24  ;;  %v2272_v23 = vsel %vm2270_vm3, %v2271_v59, %v2267_v50  ;;  %v3121_v44 = vmul.f32 %v8046_v32, %v7264_v60 }
 0x3a6   : > { %v2273_v21 = vadd.s32 %v2272_v23, %v2268_v15  ;;  %vm2031_vm4 = vcmp.gt.s32.totalorder %v2030_v25, 0  ;;  %v2475_v30 = vand.u32 3, %v2474_v33  ;;  %vm3149_vm7 = vcmp.ge.f32.partialorder %v8046_v32, 0.0 }
 0x3a7   : > { %v2462_v22 = vadd.f32 -0.4999988, %v2461_v48  ;;  %v2469_v47 = vadd.f32 -0.16666654, %v2468_v55  ;;  %v2032_v63 = vsel %vm2031_vm4, %v2030_v25, 0  ;;  %v2001_v45 = vadd.f32 0.5, %v1994_v42 }
 0x3a8   : > { %v2274_v38 = vadd.s32 536870912, %v2273_v21  ;;  %v2034_v34 = vand.u32 31, %v2032_v63  ;;  %v2028_v26 = vor.u32 8388608, %v2027_v58  ;;  %v2015_v46 = vmul.f32 %v8361_v52, %v7260_v31 }
 0x3a9   : > { %v2463_v19 = vmul.f32 %v2462_v22, %v2458_v24  ;;  %v2470_v27 = vmul.f32 %v2469_v47, %v2458_v24  ;;  %vm2473_vm9 = vweird.f32 %v8046_v32  ;;  %v3128_v4 = vadd.f32 %v3121_v44, %v7271_v51 }
 0x3aa   : > { %v8451_v9 = vshrl.u32 %v2274_v38, 30  ;;  %v8453_v12 = vsub.s32 32, %v2034_v34  ;;  %v3156_v49 = vsel %vm3149_vm7, %v7294_v35, %v7288_v61  ;;  %vm2476_vm10 = vcmp.lt.s32.totalorder %v2475_v30, 2 }
 0x3ab   : > { %v2464_v40 = vadd.f32 1.0, %v2463_v19  ;;  %v2471_v13 = vadd.f32 1.0, %v2470_v27  ;;  %vm2477_vm5 = vcmp.eq.s32.totalorder %v2475_v30, 0  ;;  %vm2480_vm6 = vcmp.eq.s32.totalorder %v2475_v30, 2 }
 0x3ac   : > { %v2276_v28 = vshll.u32 %v8451_v9, 30  ;;  %v2038_v14 = vshrl.u32 %v10858_v2, %v8453_v12  ;;  %v8461_v57 = vshll.u32 %v2028_v26, 8  ;;  %v8463_v7 = vshrl.u32 %v2032_v63, 5 }
 0x3ad   : > { %v2472_v24 = vmul.f32 %v2471_v13, %v2456_v18  ;;  %v2481_v52 = vxor.u32 2147483648, %v2464_v40  ;;  %v2041_v41 = vshrl.u32 %v10859_v39, %v8453_v12  ;;  %v2047_v20 = vshrl.u32 %v10818_v56, %v8453_v12 }
 0x3ae   : > { %v2277_v11 = vsub.s32 %v2273_v21, %v2276_v28  ;;  %v2037_v0 = vshll.u32 %v10815_v43, %v2034_v34  ;;  %v2040_v18 = vshll.u32 %v10858_v2, %v2034_v34  ;;  %v2044_v50 = vshrl.u32 %v10811_v53, %v8453_v12 }
 0x3af   : > { %v2478_v29 = vxor.u32 2147483648, %v2472_v24  ;;  %v2043_v42 = vshll.u32 %v10859_v39, %v2034_v34  ;;  %v2046_v17 = vshll.u32 %v10811_v53, %v2034_v34  ;;  %v2482_v59 = vsel %vm2480_vm6, %v2481_v52, %v2472_v24 }
 0x3b0   : > { %vm2278_vm8 = vcmp.lt.s32.totalorder %v2277_v11, 0  ;;  %v2279_v8 = vsub.s32 0, %v2277_v11  ;;  %v8477_v33 = vor.u32 %v2038_v14, %v2037_v0  ;;  %v2050_v15 = vshrl.u32 %v10860_v1, %v8453_v12 }
 0x3b1   : > { %v2479_v36 = vsel %vm2477_vm5, %v2464_v40, %v2478_v29  ;;  %v8482_v55 = vor.u32 %v2041_v41, %v2040_v18  ;;  %v2048_v23 = vor.u32 %v2047_v20, %v2046_v17  ;;  %v8486_v22 = vor.u32 %v2044_v50, %v2043_v42 }
 0x3b2   : > { %v2483_v25 = vsel %vm2476_vm10, %v2479_v36, %v2482_v59  ;;  %v2280_v48 = vsel %vm2278_vm8, %v2279_v8, %v2277_v11  ;;  %v2049_v47 = vshll.u32 %v10818_v56, %v2034_v34  ;;  %v3135_v63 = vmul.f32 %v3128_v4, %v2001_v45 }
 0x3b3   : > { %v2484_v58 = vsel %vm2473_vm9, nan, %v2483_v25  ;;  %v2281_v21 = vclz %v2280_v48  ;;  %v3163_v38 = vmul.f32 %v3156_v49, %v8046_v32  ;;  %v2269_v30 = vadd.s32 %v8437_v37, %v8435_v16 }
 0x3b4   : > { %v3107_v44 = vmul.f32 %v2484_v58, %v7262_v3  ;;  %v2051_v27 = vor.u32 %v2050_v15, %v2049_v47  ;;  %vm2052_vm13 = vcmp.lt.s32.totalorder %v8463_v7, 1  ;;  %vm2055_vm11 = vcmp.lt.s32.totalorder %v8463_v7, 4 }
 0x3b5   : > { %v5974_v19 = vadd.s32 4294967294, %v2281_v21  ;;  %vm2054_vm15 = vcmp.lt.s32.totalorder %v8463_v7, 3  ;;  %v2060_v34 = vsel %vm2052_vm13, %v8477_v33, %v8482_v55  ;;  %v2061_v32 = vsel %vm2055_vm11, %v2048_v23, 920167782 }
 0x3b6   : > { %v3114_v26 = vadd.f32 %v3107_v44, %v2015_v46  ;;  %vm2053_vm12 = vcmp.lt.s32.totalorder %v8463_v7, 2  ;;  %v2062_v16 = vsel %vm2054_vm15, %v8486_v22, %v2061_v32  ;;  %v2069_v37 = vand.u32 65535, %v8461_v57 }
 0x3b7   : > { %vm5975_vm14 = vcmp.lt.s32.totalorder %v5974_v19, 0  ;;  %v2063_v40 = vsel %vm2053_vm12, %v2060_v34, %v2062_v16  ;;  %v2064_v13 = vsel %vm2052_vm13, %v8482_v55, %v8486_v22  ;;  %v2065_v28 = vsel %vm2055_vm11, %v2051_v27, 1326507024 }
 0x3b8   : > { %v3142_v45 = vadd.f32 %v3135_v63, %v3114_v26  ;;  %v2284_v46 = vsel %vm5975_vm14, 0, %v5974_v19  ;;  %v2070_v24 = vshrl.u32 %v8461_v57, 16  ;;  %v2066_v14 = vsel %vm2054_vm15, %v2048_v23, %v2065_v28 }
 0x3b9   : > { %v2285_v4 = vsub.s32 32, %v2284_v46  ;;  %v2289_v49 = vsub.s32 4294967266, %v2284_v46  ;;  %v2093_v41 = vand.u32 65535, %v2063_v40  ;;  %v2094_v20 = vshrl.u32 %v2063_v40, 16 }
 0x3ba   : > { %v3170_v52 = vadd.f32 %v3163_v38, %v3142_v45  ;;  %v2286_v29 = vshll.u32 %v2277_v11, %v2284_v46  ;;  %v2067_v50 = vsel %vm2053_vm12, %v2064_v13, %v2066_v14  ;;  %vm2177_vm2 = vcmp.lt.s32.totalorder %v8270_v10, 0 }
 0x3bb   : > { %v2287_v0 = vshrl.u32 %v2269_v30, %v2285_v4  ;;  %v2290_v18 = vadd.s32 127, %v2289_v49  ;;  %v2071_v8 = vand.u32 65535, %v2067_v50  ;;  %v2072_v42 = vshrl.u32 %v2067_v50, 16 }
 0x3bc   : > { %3263 = vmatpush.msra.mxu0 %v3170_v52  ;;  %6090 = vmatpush.msra.mxu2 %v3170_v52  ;;  %v2096_v17 = vmul.u32 %v2094_v20, %v2069_v37  ;;  %v2097_v15 = vmul.u32 %v2093_v41, %v2070_v24  ;;  %vm8523_vm3 = vcmp.le.f32.partialorder %v2175_v6, 0.7853982  ;;  %v2095_v58 = vmul.u32 %v2093_v41, %v2069_v37 }
 0x3bd   : > { %v2288_v36 = vor.u32 %v2287_v0, %v2286_v29  ;;  %v2291_v59 = vshll.u32 %v2290_v18, 23  ;;  %v2074_v25 = vmul.u32 %v2072_v42, %v2069_v37  ;;  %v2075_v48 = vmul.u32 %v2071_v8, %v2070_v24 }
 0x3be   : > { %v2098_v21 = vmul.u32 %v2094_v20, %v2070_v24  ;;  %v2099_v47 = vshll.u32 %v2096_v17, 16  ;;  %v2073_v63 = vmul.u32 %v2071_v8, %v2069_v37  ;;  %v2076_v38 = vmul.u32 %v2072_v42, %v2070_v24 }
 0x3bf   : > { %v2292_v23 = vor.u32 4788187, %v2291_v59  ;;  %v2295_v44 = vcvt.s32.f32 %v2288_v36  ;;  %v2077_v30 = vshll.u32 %v2074_v25, 16  ;;  %v2079_v27 = vshll.u32 %v2075_v48, 16 }
 0x3c0   : > { %v2101_v26 = vshll.u32 %v2097_v15, 16  ;;  %vm2103_vm4 = vc.u32 %v2095_v58, %v2099_v47  ;;  %v2105_v6 = vadd.s32 %v2099_v47, %v2095_v58  ;;  %v2299_v45 = vsub.s32 4, %v8451_v9 }
 0x3c1   : > { %v2293_v19 = vand.u32 2147483647, %v2292_v23  ;;  %vm2081_vm7 = vc.u32 %v2073_v63, %v2077_v30  ;;  %v2083_v34 = vadd.s32 %v2077_v30, %v2073_v63  ;;  %v2104_v32 = vsel %vm2103_vm4, 1, %v10813_v5 }
 0x3c2   : > { %v2082_v46 = vsel %vm2081_vm7, 1, %v10813_v5  ;;  %v2106_v40 = vadd.s32 %v2104_v32, %v2098_v21  ;;  %v2057_v37 = vsel %vm2055_vm11, %v8486_v22, 2102212464  ;;  %vm2107_vm10 = vc.u32 %v2105_v6, %v2101_v26 }
 0x3c3   : > { %v2296_v16 = vmul.f32 %v2295_v44, %v2293_v19  ;;  %v2084_v13 = vadd.s32 %v2082_v46, %v2076_v38  ;;  %vm2085_vm9 = vc.u32 %v2083_v34, %v2079_v27  ;;  %v2036_v49 = vshrl.u32 %v10815_v43, %v8453_v12 }
 0x3c4   : > { %v2086_v28 = vsel %vm2085_vm9, 1, %v10813_v5  ;;  %v2108_v24 = vsel %vm2107_vm10, 1, %v10813_v5  ;;  %v2078_v52 = vshrl.u32 %v2074_v25, 16  ;;  %v2100_v41 = vshrl.u32 %v2096_v17, 16 }
 0x3c5   : > { %v2297_v4 = vxor.u32 2147483648, %v2296_v16  ;;  %v2088_v14 = vadd.s32 %v2086_v28, %v2084_v13  ;;  %v2110_v20 = vadd.s32 %v2108_v24, %v2106_v40  ;;  %v2056_v22 = vsel %vm2052_vm13, %v2036_v49, %v8477_v33 }
 0x3c6   : > { %v2058_v0 = vsel %vm2054_vm15, %v8482_v55, %v2057_v37  ;;  %v2080_v12 = vshrl.u32 %v2075_v48, 16  ;;  %v2102_v8 = vshrl.u32 %v2097_v15, 16  ;;  %v1979_v17 = vmul.f32 0.5, %v8270_v10 }
 0x3c7   : > { %v2298_v29 = vsel %vm2177_vm2, %v2297_v4, %v2296_v16  ;;  %v2089_v50 = vadd.s32 %v2088_v14, %v2078_v52  ;;  %v2111_v42 = vadd.s32 %v2110_v20, %v2100_v41  ;;  %v2059_v59 = vsel %vm2053_vm12, %v2056_v22, %v2058_v0 }
 0x3c8   : > { %v2301_v18 = vsel %vm8523_vm3, %v8270_v10, %v2298_v29  ;;  %v2109_v33 = vadd.s32 %v2105_v6, %v2101_v26  ;;  %v2300_v55 = vsel %vm2177_vm2, %v2299_v45, %v8451_v9  ;;  %v2113_v44 = vmul.u32 %v8461_v57, %v2059_v59 }
 0x3c9   : > { %v2303_v36 = vmul.f32 %v2301_v18, %v2301_v18  ;;  %v2090_v25 = vadd.s32 %v2089_v50, %v2080_v12  ;;  %v2112_v23 = vadd.s32 %v2111_v42, %v2102_v8  ;;  %6211 = vtanh.f32 %v1979_v17 }
 0x3ca   : > { %v2302_v7 = vsel %vm8523_vm3, 0, %v2300_v55  ;;  %6213 = vtanh.f32 %v8270_v10  ;;  %v3120_v24 = vmul.f32 %v8270_v10, %v7264_v60  ;;  %vm3148_vm11 = vcmp.ge.f32.partialorder %v8270_v10, 0.0 }
 0x3cb   : > { %v2304_v58 = vmul.f32 -0.001358992, %v2303_v36  ;;  %v2311_v21 = vmul.f32 -0.00019511016, %v2303_v36  ;;  %vm2115_vm5 = vc.u32 %v2090_v25, %v2109_v33  ;;  %v2116_v48 = vadd.s32 1, %v2112_v23 }
 0x3cc   : > { %v2319_v32 = vadd.s32 3, %v2302_v7  ;;  %vm2318_vm14 = vweird.f32 %v8270_v10  ;;  %v3127_v50 = vadd.f32 %v3120_v24, %v7271_v51  ;;  %v3155_v17 = vsel %vm3148_vm11, %v7294_v35, %v7288_v61 }
 0x3cd   : > { %v2305_v47 = vadd.f32 0.041655596, %v2304_v58  ;;  %v2312_v15 = vadd.f32 0.008332121, %v2311_v21  ;;  %v2117_v63 = vsel %vm2115_vm5, %v2116_v48, %v2112_v23  ;;  %v3162_v58 = vmul.f32 %v3155_v17, %v8270_v10 }
 0x3ce   : > { %v2118_v19 = vadd.s32 %v2117_v63, %v2113_v44  ;;  %v2320_v11 = vand.u32 3, %v2319_v32  ;;  %v2114_v48 = vadd.s32 %v2109_v33, %v2090_v25  ;;  %vm2022_vm2 = vcmp.lt.s32.totalorder %v8328_v54, 0 }
 0x3cf   : > { %v2306_v38 = vmul.f32 %v2305_v47, %v2303_v36  ;;  %v2313_v30 = vmul.f32 %v2312_v15, %v2303_v36  ;;  %v6212_v45 = vpop.eup %6211  ;;  %vm8574_vm3 = vcmp.le.f32.partialorder %v2020_v62, 0.7853982  ;;  %vm2163_vm10 = vweird.f32 %v8328_v54 }
 0x3d0   : > { %v2119_v34 = vadd.s32 536870912, %v2118_v19  ;;  %v1993_v49 = vmul.f32 0.5, %v6212_v45  ;;  %vm2322_vm8 = vcmp.eq.s32.totalorder %v2320_v11, 0  ;;  %vm2325_vm13 = vcmp.eq.s32.totalorder %v2320_v11, 2  ;;  %v6214_v14 = vpop.eup %6213 }
 0x3d1   : > { %v2307_v27 = vadd.f32 -0.4999988, %v2306_v38  ;;  %v2314_v26 = vadd.f32 -0.16666654, %v2313_v30  ;;  %vm2321_vm15 = vcmp.lt.s32.totalorder %v2320_v11, 2  ;;  %v2014_v8 = vmul.f32 %v6214_v14, %v7260_v31 }
 0x3d2   : > { %v8557_v16 = vshrl.u32 %v2119_v34, 30  ;;  %v2000_v22 = vadd.f32 0.5, %v1993_v49  ;;  %vm3147_vm5 = vcmp.ge.f32.partialorder %v8328_v54, 0.0 }
 0x3d3   : > { %v2308_v6 = vmul.f32 %v2307_v27, %v2303_v36  ;;  %v2315_v9 = vmul.f32 %v2314_v26, %v2303_v36 }
 0x3d4   : > { %v2121_v40 = vshll.u32 %v8557_v16, 30  ;;  %v3134_v23 = vmul.f32 %v3127_v50, %v2000_v22  ;;  %v2144_v33 = vsub.s32 4, %v8557_v16 }
 0x3d5   : > { %v2309_v57 = vadd.f32 1.0, %v2308_v6  ;;  %v2316_v46 = vadd.f32 1.0, %v2315_v9 }
 0x3d6   : > { %v2122_v4 = vsub.s32 %v2118_v19, %v2121_v40  ;;  %v2145_v11 = vsel %vm2022_vm2, %v2144_v33, %v8557_v16 }
 0x3d7   : > { %v2317_v37 = vmul.f32 %v2316_v46, %v2301_v18  ;;  %v2326_v13 = vxor.u32 2147483648, %v2309_v57  ;;  %v2147_v62 = vsel %vm8574_vm3, 0, %v2145_v11 }
 0x3d8   : > { %vm2123_vm6 = vcmp.lt.s32.totalorder %v2122_v4, 0  ;;  %v2124_v52 = vsub.s32 0, %v2122_v4 }
 0x3d9   : > { %v2323_v28 = vxor.u32 2147483648, %v2317_v37  ;;  %v2327_v20 = vsel %vm2325_vm13, %v2326_v13, %v2317_v37 }
 0x3da   : > { %v2125_v29 = vsel %vm2123_vm6, %v2124_v52, %v2122_v4  ;;  %v2164_v52 = vadd.s32 3, %v2147_v62 }
 0x3db   : > { %v2324_v41 = vsel %vm2322_vm8, %v2309_v57, %v2323_v28  ;;  %v2126_v12 = vclz %v2125_v29  ;;  %v1978_v57 = vmul.f32 0.5, %v8328_v54 }
 0x3dc   : > { %v2328_v0 = vsel %vm2321_vm15, %v2324_v41, %v2327_v20 }
 0x3dd   : > { %v2329_v18 = vsel %vm2318_vm14, nan, %v2328_v0  ;;  %v5971_v36 = vadd.s32 4294967294, %v2126_v12  ;;  %6215 = vtanh.f32 %v1978_v57  ;;  %v2165_v0 = vand.u32 3, %v2164_v52 }
 0x3de   : > { %v3106_v42 = vmul.f32 %v2329_v18, %v7262_v3  ;;  %6217 = vtanh.f32 %v8328_v54 }
 0x3df   : > { %vm5972_vm12 = vcmp.lt.s32.totalorder %v5971_v36, 0  ;;  %vm2167_vm4 = vcmp.eq.s32.totalorder %v2165_v0, 0  ;;  %vm2170_vm7 = vcmp.eq.s32.totalorder %v2165_v0, 2  ;;  %vm2166_vm9 = vcmp.lt.s32.totalorder %v2165_v0, 2 }
 0x3e0   : > { %v3113_v59 = vadd.f32 %v3106_v42, %v2014_v8  ;;  %v2129_v21 = vsel %vm5972_vm12, 0, %v5971_v36  ;;  %v3119_v8 = vmul.f32 %v8328_v54, %v7264_v60 }
 0x3e1   : > { %v2130_v47 = vsub.s32 32, %v2129_v21  ;;  %v2134_v15 = vsub.s32 4294967266, %v2129_v21  ;;  %v2131_v63 = vshll.u32 %v2122_v4, %v2129_v21 }
 0x3e2   : > { %v3141_v55 = vadd.f32 %v3134_v23, %v3113_v59 }
 0x3e3   : > { %v2132_v7 = vshrl.u32 %v2114_v48, %v2130_v47  ;;  %v2135_v38 = vadd.s32 127, %v2134_v15  ;;  %v6216_v20 = vpop.eup %6215  ;;  %v3126_v48 = vadd.f32 %v3119_v8, %v7271_v51  ;;  %v3154_v47 = vsel %vm3147_vm5, %v7294_v35, %v7288_v61 }
 0x3e4   : > { %v3169_v44 = vadd.f32 %v3162_v58, %v3141_v55  ;;  %v1992_v18 = vmul.f32 0.5, %v6216_v20  ;;  %v6218_v42 = vpop.eup %6217 }
 0x3e5   : > { %v2133_v30 = vor.u32 %v2132_v7, %v2131_v63  ;;  %v2136_v19 = vshll.u32 %v2135_v38, 23  ;;  %v2013_v21 = vmul.f32 %v6218_v42, %v7260_v31  ;;  %v3161_v7 = vmul.f32 %v3154_v47, %v8328_v54 }
 0x3e6   : > { %3264 = vmatpush.msra.mxu0 %v3169_v44  ;;  %6091 = vmatpush.msra.mxu2 %v3169_v44  ;;  %v1999_v59 = vadd.f32 0.5, %v1992_v18 }
 0x3e7   : > { %v2137_v27 = vor.u32 4788187, %v2136_v19  ;;  %v2140_v34 = vcvt.s32.f32 %v2133_v30  ;;  %v5991_v30 = vld [vmem:[%s10795_s7 + $0x38] sm:$0xff]  ;;  %v5992_v19 = vld [vmem:[%s10795_s7 + $0x40] sm:$0xff] }
 0x3e8   : > { %v3133_v44 = vmul.f32 %v3126_v48, %v1999_v59 }
 0x3e9   : > { %v2138_v26 = vand.u32 2147483647, %v2137_v27  ;;  %v5993_v27 = vld [vmem:[%s10795_s7 + $0x48] sm:$0xff] }
 0x3eb   : > { %v2141_v32 = vmul.f32 %v2140_v34, %v2138_v26  ;;  %v5995_v26 = vld [vmem:[%s10795_s7 + $0x58] sm:$0xff]  ;;  %v5996_v34 = vld [vmem:[%s10795_s7 + $0x60] sm:$0xff] }
 0x3ed   : > { %v2142_v6 = vxor.u32 2147483648, %v2141_v32 }
 0x3ef   : > { %v2143_v25 = vsel %vm2022_vm2, %v2142_v6, %v2141_v32  ;;  %v5997_v32 = vld [vmem:[%s10795_s7 + $0x68] sm:$0x3] }
 0x3f0   : > { %v2146_v9 = vsel %vm8574_vm3, %v8328_v54, %v2143_v25  ;;  %v5994_v54 = vld [vmem:[%s10795_s7 + $0x50] sm:$0xff] }
 0x3f1   : > { %v2148_v45 = vmul.f32 %v2146_v9, %v2146_v9 }
 0x3f3   : > { %v2149_v46 = vmul.f32 -0.001358992, %v2148_v45  ;;  %v2156_v40 = vmul.f32 -0.00019511016, %v2148_v45 }
 0x3f5   : > { %v2150_v37 = vadd.f32 0.041655596, %v2149_v46  ;;  %v2157_v13 = vadd.f32 0.008332121, %v2156_v40 }
 0x3f7   : > { %v2151_v4 = vmul.f32 %v2150_v37, %v2148_v45  ;;  %v2158_v49 = vmul.f32 %v2157_v13, %v2148_v45 }
 0x3f9   : > { %v2152_v28 = vadd.f32 -0.4999988, %v2151_v4  ;;  %v2159_v24 = vadd.f32 -0.16666654, %v2158_v49 }
 0x3fb   : > { %v2153_v14 = vmul.f32 %v2152_v28, %v2148_v45  ;;  %v2160_v41 = vmul.f32 %v2159_v24, %v2148_v45  ;;  %v3224_v45 = vpop.permute.xlu1 %3223 }
 0x3fd   : > { %v2154_v29 = vadd.f32 1.0, %v2153_v14  ;;  %v2161_v22 = vadd.f32 1.0, %v2160_v41 }
 0x3ff   : > { %v2162_v16 = vmul.f32 %v2161_v22, %v2146_v9  ;;  %v2171_v12 = vxor.u32 2147483648, %v2154_v29 }
 0x401   : > { %v2168_v50 = vxor.u32 2147483648, %v2162_v16  ;;  %v2172_v36 = vsel %vm2170_vm7, %v2171_v12, %v2162_v16 }
 0x403   : > { %v2169_v17 = vsel %vm2167_vm4, %v2154_v29, %v2168_v50 }
 0x404   : > { %v2173_v23 = vsel %vm2166_vm9, %v2169_v17, %v2172_v36 }
 0x405   : > { %v2174_v58 = vsel %vm2163_vm10, nan, %v2173_v23 }
 0x406   : > { %v3105_v55 = vmul.f32 %v2174_v58, %v7262_v3 }
 0x408   : > { %v3112_v15 = vadd.f32 %v3105_v55, %v2013_v21 }
 0x40a   : > { %v3140_v63 = vadd.f32 %v3133_v44, %v3112_v15 }
 0x40c   : > { %v3168_v38 = vadd.f32 %v3161_v7, %v3140_v63 }
 0x40e   : > { %3265 = vmatpush.msra.mxu0 %v3168_v38  ;;  %6092 = vmatpush.msra.mxu2 %v3168_v38 }
 0x40f   : > { %6006 = vmatmul.msk.f32.vlgmr.msra.gmra.mxu0 %vm1914_vm0, %v5991_v30  ;;  %6007 = vmatmul.msk.f32.vlgmr.msra.gmra.mxu2 %vm1914_vm0, %v5992_v19 }
 0x417   : > { %6008 = vmatmul.msk.f32.gmra.mxu2 %vm1914_vm0, %v5993_v27  ;;  %v3219_v27 = vpop.permute.xlu2 %3218 }
 0x41f   : > { %6009 = vmatmul.msk.f32.gmra.mxu2 %vm1914_vm0, %v5994_v54 }
 0x427   : > { %6010 = vmatmul.msk.f32.gmra.mxu2 %vm1914_vm0, %v5995_v26 }
 0x42f   : > { %6011 = vmatmul.msk.f32.gmra.mxu2 %vm1914_vm0, %v5996_v34 }
 0x437   : > { %6012 = vmatmul.msk.f32.gmra.mxu2 %vm1914_vm0, %v5997_v32 }
 0x492   : > { %v8625_v6 = vpop.f32.mrf.mxu2 }
 0x49a   : > { %v8627_v10 = vpop.f32.mrf.mxu2 }
 0x4a2   : > { %v8629_v25 = vpop.f32.mrf.mxu2 }
 0x4aa   : > { %v3279_v33 = vpop.f32.mrf.mxu2 }
 0x4b2   : > { %v3282_v9 = vpop.f32.mrf.mxu2 }
 0x4ba   : > { %v3285_v57 = vpop.f32.mrf.mxu2 }
 0x4bb   : > { %v8631_v46 = vadd.f32 %v3285_v57, %v3224_v45  ;;  %v8688_v45 = vadd.f32 %v3282_v9, %v3219_v27 }
 0x4bd   : > { %v4263_v40 = vand.u32 2139095040, %v8631_v46  ;;  %v4260_v13 = vand.u32 2147483647, %v8631_v46  ;;  %v3294_v15 = vmul.f32 0.5, %v8631_v46  ;;  %6219 = vtanh.f32 %v8631_v46 }
 0x4be   : > { %vm4262_vm10 = vcmp.lt.s32.totalorder %v8631_v46, 0 }
 0x4bf   : > { %v4264_v11 = vshrl.u32 %v4263_v40, 23  ;;  %v4267_v4 = vand.u32 8388607, %v4260_v13  ;;  %6221 = vtanh.f32 %v3294_v15 }
 0x4c1   : > { %v6031_v37 = vadd.s32 4294967169, %v4264_v11  ;;  %v4268_v52 = vor.u32 8388608, %v4267_v4  ;;  %v3214_v11 = vpop.permute.xlu0 %3213 }
 0x4c2   : > { %v8691_v4 = vadd.f32 %v3279_v33, %v3214_v11 }
 0x4c3   : > { %v4270_v62 = vadd.s32 1, %v6031_v37  ;;  %v8661_v58 = vshll.u32 %v4268_v52, 8 }
 0x4c5   : > { %vm4271_vm6 = vcmp.gt.s32.totalorder %v4270_v62, 0  ;;  %v4309_v30 = vand.u32 65535, %v8661_v58  ;;  %v4310_v19 = vshrl.u32 %v8661_v58, 16 }
 0x4c6   : > { %v4272_v49 = vsel %vm4271_vm6, %v4270_v62, 0 }
 0x4c7   : > { %v4274_v28 = vand.u32 31, %v4272_v49  ;;  %v8639_v14 = vshrl.u32 %v4272_v49, 5 }
 0x4c9   : > { %v8637_v24 = vsub.s32 32, %v4274_v28  ;;  %v4277_v41 = vshll.u32 %v10815_v43, %v4274_v28  ;;  %v4280_v20 = vshll.u32 %v10858_v2, %v4274_v28  ;;  %v4283_v0 = vshll.u32 %v10859_v39, %v4274_v28 }
 0x4ca   : > { %v4286_v12 = vshll.u32 %v10811_v53, %v4274_v28  ;;  %v4289_v50 = vshll.u32 %v10818_v56, %v4274_v28  ;;  %vm4292_vm8 = vcmp.lt.s32.totalorder %v8639_v14, 1  ;;  %vm4295_vm13 = vcmp.lt.s32.totalorder %v8639_v14, 4 }
 0x4cb   : > { %v4278_v29 = vshrl.u32 %v10858_v2, %v8637_v24  ;;  %v4281_v22 = vshrl.u32 %v10859_v39, %v8637_v24  ;;  %v4284_v16 = vshrl.u32 %v10811_v53, %v8637_v24  ;;  %v4287_v18 = vshrl.u32 %v10818_v56, %v8637_v24 }
 0x4cc   : > { %v4290_v8 = vshrl.u32 %v10860_v1, %v8637_v24  ;;  %vm4294_vm11 = vcmp.lt.s32.totalorder %v8639_v14, 3  ;;  %vm4293_vm15 = vcmp.lt.s32.totalorder %v8639_v14, 2 }
 0x4cd   : > { %v8656_v42 = vor.u32 %v4278_v29, %v4277_v41  ;;  %v8658_v17 = vor.u32 %v4281_v22, %v4280_v20  ;;  %v4285_v36 = vor.u32 %v4284_v16, %v4283_v0  ;;  %v4288_v59 = vor.u32 %v4287_v18, %v4286_v12 }
 0x4ce   : > { %v4291_v23 = vor.u32 %v4290_v8, %v4289_v50  ;;  %v4108_v29 = vand.u32 2139095040, %v8688_v45  ;;  %v4105_v8 = vand.u32 2147483647, %v8688_v45 }
 0x4cf   : > { %v4300_v21 = vsel %vm4292_vm8, %v8656_v42, %v8658_v17  ;;  %v4304_v55 = vsel %vm4292_vm8, %v8658_v17, %v4285_v36  ;;  %v4301_v48 = vsel %vm4295_vm13, %v4288_v59, 920167782 }
 0x4d0   : > { %v4305_v47 = vsel %vm4295_vm13, %v4291_v23, 1326507024  ;;  %v4302_v44 = vsel %vm4294_vm11, %v4285_v36, %v4301_v48  ;;  %v4297_v23 = vsel %vm4295_vm13, %v4285_v36, 2102212464 }
 0x4d1   : > { %v4306_v63 = vsel %vm4294_vm11, %v4288_v59, %v4305_v47  ;;  %v4303_v7 = vsel %vm4293_vm15, %v4300_v21, %v4302_v44  ;;  %v6220_v59 = vpop.eup %6219  ;;  %v4276_v47 = vshrl.u32 %v10815_v43, %v8637_v24  ;;  %v4298_v27 = vsel %vm4294_vm11, %v8658_v17, %v4297_v23 }
 0x4d2   : > { %v4307_v38 = vsel %vm4293_vm15, %v4304_v55, %v4306_v63  ;;  %v4333_v34 = vand.u32 65535, %v4303_v7  ;;  %v4334_v32 = vshrl.u32 %v4303_v7, 16  ;;  %v6222_v48 = vpop.eup %6221  ;;  %v10808_v17 = vand.u32 2147483647, %v8691_v4 }
 0x4d3   : > { %v4311_v54 = vand.u32 65535, %v4307_v38  ;;  %v4312_v26 = vshrl.u32 %v4307_v38, 16  ;;  %v4296_v36 = vsel %vm4292_vm8, %v4276_v47, %v8656_v42 }
 0x4d4   : > { %v4336_v37 = vmul.u32 %v4334_v32, %v4309_v30  ;;  %v4337_v62 = vmul.u32 %v4333_v34, %v4310_v19  ;;  %v4335_v41 = vmul.u32 %v4333_v34, %v4309_v30  ;;  %v4338_v0 = vmul.u32 %v4334_v32, %v4310_v19 }
 0x4d5   : > { %v4314_v57 = vmul.u32 %v4312_v26, %v4309_v30  ;;  %v4315_v40 = vmul.u32 %v4311_v54, %v4310_v19  ;;  %v4313_v49 = vmul.u32 %v4311_v54, %v4309_v30  ;;  %v4316_v52 = vmul.u32 %v4312_v26, %v4310_v19 }
 0x4d6   : > { %v4339_v20 = vshll.u32 %v4336_v37, 16  ;;  %v4341_v12 = vshll.u32 %v4337_v62, 16  ;;  %v4340_v7 = vshrl.u32 %v4336_v37, 16  ;;  %v4109_v30 = vshrl.u32 %v4108_v29, 23 }
 0x4d7   : > { %v4317_v28 = vshll.u32 %v4314_v57, 16  ;;  %v4319_v22 = vshll.u32 %v4315_v40, 16  ;;  %v4318_v15 = vshrl.u32 %v4314_v57, 16  ;;  %v3953_v19 = vand.u32 2139095040, %v8691_v4 }
 0x4d8   : > { %vm4343_vm12 = vc.u32 %v4335_v41, %v4339_v20  ;;  %v4345_v18 = vadd.s32 %v4339_v20, %v4335_v41  ;;  %v4320_v54 = vshrl.u32 %v4315_v40, 16  ;;  %v4342_v24 = vshrl.u32 %v4337_v62, 16  ;;  %v3209_v41 = vpop.permute.xlu1 %3208 }
 0x4d9   : > { %vm4321_vm14 = vc.u32 %v4313_v49, %v4317_v28  ;;  %v4323_v9 = vadd.s32 %v4317_v28, %v4313_v49  ;;  %v4344_v33 = vsel %vm4343_vm12, 1, %v10813_v5  ;;  %v6028_v32 = vadd.s32 4294967169, %v4109_v30 }
 0x4da   : > { %v4322_v16 = vsel %vm4321_vm14, 1, %v10813_v5  ;;  %v4346_v55 = vadd.s32 %v4344_v33, %v4338_v0  ;;  %vm4347_vm3 = vc.u32 %v4345_v18, %v4341_v12  ;;  %v4112_v57 = vand.u32 8388607, %v4105_v8 }
 0x4db   : > { %v4324_v50 = vadd.s32 %v4322_v16, %v4316_v52  ;;  %vm4325_vm2 = vc.u32 %v4323_v9, %v4319_v22  ;;  %v4348_v63 = vsel %vm4347_vm3, 1, %v10813_v5  ;;  %v8714_v37 = vadd.s32 %v4345_v18, %v4341_v12 }
 0x4dc   : > { %v4326_v21 = vsel %vm4325_vm2, 1, %v10813_v5  ;;  %v4350_v38 = vadd.s32 %v4348_v63, %v4346_v55  ;;  %v4299_v49 = vsel %vm4293_vm15, %v4296_v36, %v4298_v27  ;;  %v4115_v28 = vadd.s32 1, %v6028_v32 }
 0x4dd   : > { %v4328_v44 = vadd.s32 %v4326_v21, %v4324_v50  ;;  %v4113_v62 = vor.u32 8388608, %v4112_v57  ;;  %v3954_v52 = vshrl.u32 %v3953_v19, 23  ;;  %v4353_v20 = vmul.u32 %v8661_v58, %v4299_v49 }
 0x4de   : > { %v4351_v34 = vadd.s32 %v4350_v38, %v4340_v7  ;;  %vm4116_vm7 = vcmp.gt.s32.totalorder %v4115_v28, 0  ;;  %v8723_v22 = vadd.f32 %v8629_v25, %v3209_v41  ;;  %v8726_v0 = vmul.f32 0.5, %v8691_v4 }
 0x4df   : > { %v4329_v26 = vadd.s32 %v4328_v44, %v4318_v15  ;;  %v4117_v29 = vsel %vm4116_vm7, %v4115_v28, 0  ;;  %v3308_v16 = vmul.f32 0.5, %v6222_v48  ;;  %v8729_v12 = vmul.f32 %v6220_v59, %v7260_v31 }
 0x4e0   : > { %v4352_v42 = vadd.s32 %v4351_v34, %v4342_v24  ;;  %v4119_v9 = vand.u32 31, %v4117_v29  ;;  %v8733_v50 = vand.u32 8388607, %v10808_v17  ;;  %v8735_v33 = vshrl.u32 %v4117_v29, 5 }
 0x4e1   : > { %v8712_v11 = vadd.s32 %v4329_v26, %v4320_v54  ;;  %v8737_v23 = vshll.u32 %v4113_v62, 8  ;;  %v6025_v25 = vadd.s32 4294967169, %v3954_v52  ;;  %v8749_v36 = vadd.f32 0.5, %v3308_v16 }
 0x4e2   : > { %v4356_v40 = vadd.s32 1, %v4352_v42  ;;  %v4120_v58 = vsub.s32 32, %v4119_v9  ;;  %v4122_v55 = vshll.u32 %v10815_v43, %v4119_v9  ;;  %v4125_v47 = vshll.u32 %v10858_v2, %v4119_v9 }
 0x4e3   : > { %vm4355_vm4 = vc.u32 %v8712_v11, %v8714_v37  ;;  %v4128_v48 = vshll.u32 %v10859_v39, %v4119_v9  ;;  %v4131_v63 = vshll.u32 %v10811_v53, %v4119_v9  ;;  %v4134_v30 = vshll.u32 %v10818_v56, %v4119_v9 }
 0x4e4   : > { %v4357_v14 = vsel %vm4355_vm4, %v4356_v40, %v4352_v42  ;;  %v4123_v59 = vshrl.u32 %v10858_v2, %v4120_v58  ;;  %v4126_v15 = vshrl.u32 %v10859_v39, %v4120_v58  ;;  %v4129_v44 = vshrl.u32 %v10811_v53, %v4120_v58 }
 0x4e5   : > { %v4358_v18 = vadd.s32 %v4357_v14, %v4353_v20  ;;  %v4132_v38 = vshrl.u32 %v10818_v56, %v4120_v58  ;;  %v4135_v19 = vshrl.u32 %v10860_v1, %v4120_v58  ;;  %vm4137_vm9 = vcmp.lt.s32.totalorder %v8735_v33, 1 }
 0x4e6   : > { %v4124_v27 = vor.u32 %v4123_v59, %v4122_v55  ;;  %v4127_v54 = vor.u32 %v4126_v15, %v4125_v47  ;;  %v4130_v26 = vor.u32 %v4129_v44, %v4128_v48  ;;  %vm4140_vm5 = vcmp.lt.s32.totalorder %v8735_v33, 4 }
 0x4e7   : > { %v4359_v21 = vadd.s32 536870912, %v4358_v18  ;;  %v4133_v34 = vor.u32 %v4132_v38, %v4131_v63  ;;  %v4136_v32 = vor.u32 %v4135_v19, %v4134_v30  ;;  %v4154_v49 = vand.u32 65535, %v8737_v23 }
 0x4e8   : > { %v4145_v57 = vsel %vm4137_vm9, %v4124_v27, %v4127_v54  ;;  %v3960_v42 = vadd.s32 1, %v6025_v25  ;;  %vm4138_vm6 = vcmp.lt.s32.totalorder %v8735_v33, 2  ;;  %vm4139_vm8 = vcmp.lt.s32.totalorder %v8735_v33, 3 }
 0x4e9   : > { %v4360_v7 = vshrl.u32 %v4359_v21, 30  ;;  %v4146_v40 = vsel %vm4140_vm5, %v4133_v34, 920167782  ;;  %v4142_v62 = vsel %vm4140_vm5, %v4130_v26, 2102212464  ;;  %v4149_v41 = vsel %vm4137_vm9, %v4127_v54, %v4130_v26 }
 0x4ea   : > { %v4147_v52 = vsel %vm4139_vm8, %v4130_v26, %v4146_v40  ;;  %v4150_v20 = vsel %vm4140_vm5, %v4136_v32, 1326507024  ;;  %v4121_v14 = vshrl.u32 %v10815_v43, %v4120_v58  ;;  %v4155_v25 = vshrl.u32 %v8737_v23, 16 }
 0x4eb   : > { %v4361_v24 = vshll.u32 %v4360_v7, 30  ;;  %v4148_v9 = vsel %vm4138_vm6, %v4145_v57, %v4147_v52  ;;  %v4384_v16 = vsub.s32 4, %v4360_v7  ;;  %v4143_v48 = vsel %vm4139_vm8, %v4127_v54, %v4142_v62 }
 0x4ec   : > { %v4179_v21 = vshrl.u32 %v4148_v9, 16  ;;  %v4141_v47 = vsel %vm4137_vm9, %v4121_v14, %v4124_v27  ;;  %v4178_v63 = vand.u32 65535, %v4148_v9  ;;  %v8777_v38 = vmul.f32 %v8631_v46, %v7264_v60 }
 0x4ed   : > { %v4362_v28 = vsub.s32 %v4358_v18, %v4361_v24  ;;  %v4151_v18 = vsel %vm4139_vm8, %v4133_v34, %v4150_v20  ;;  %v8780_v30 = vmul.f32 0.5, %v8688_v45  ;;  %vm3961_vm11 = vcmp.gt.s32.totalorder %v3960_v42, 0 }
 0x4ee   : > { %v4152_v58 = vsel %vm4138_vm6, %v4149_v41, %v4151_v18  ;;  %v4181_v19 = vmul.u32 %v4179_v21, %v4154_v49  ;;  %v4354_v27 = vadd.s32 %v8714_v37, %v8712_v11  ;;  %v8786_v34 = vsel %vm4262_vm10, %v4384_v16, %v4360_v7 }
 0x4ef   : > { %vm4363_vm13 = vcmp.lt.s32.totalorder %v4362_v28, 0  ;;  %v4364_v29 = vsub.s32 0, %v4362_v28  ;;  %v4156_v15 = vand.u32 65535, %v4152_v58  ;;  %v4157_v44 = vshrl.u32 %v4152_v58, 16 }
 0x4f0   : > { %v8790_v32 = vsel %vm4138_vm6, %v4141_v47, %v4143_v48  ;;  %v4184_v57 = vshll.u32 %v4181_v19, 16  ;;  %v3958_v40 = vor.u32 8388608, %v8733_v50  ;;  %v4180_v52 = vmul.u32 %v4178_v63, %v4154_v49 }
 0x4f1   : > { %v4365_v55 = vsel %vm4363_vm13, %v4364_v29, %v4362_v28  ;;  %v4159_v26 = vmul.u32 %v4157_v44, %v4154_v49  ;;  %v4160_v24 = vmul.u32 %v4156_v15, %v4155_v25  ;;  %v3962_v41 = vsel %vm3961_vm11, %v3960_v42, 0 }
 0x4f2   : > { %v4366_v59 = vclz %v4365_v55  ;;  %v4158_v11 = vmul.u32 %v4156_v15, %v4154_v49  ;;  %v4182_v37 = vmul.u32 %v4178_v63, %v4155_v25  ;;  %v4183_v29 = vmul.u32 %v4179_v21, %v4155_v25 }
 0x4f3   : > { %v4162_v62 = vshll.u32 %v4159_v26, 16  ;;  %v4161_v18 = vmul.u32 %v4157_v44, %v4155_v25  ;;  %v4164_v7 = vshll.u32 %v4160_v24, 16  ;;  %vm4188_vm12 = vc.u32 %v4180_v52, %v4184_v57 }
 0x4f4   : > { %v6032_v54 = vadd.s32 4294967294, %v4366_v59  ;;  %v4190_v33 = vadd.s32 %v4184_v57, %v4180_v52  ;;  %v4185_v58 = vshrl.u32 %v4181_v19, 16  ;;  %v4186_v42 = vshll.u32 %v4182_v37, 16 }
 0x4f5   : > { %vm4166_vm14 = vc.u32 %v4158_v11, %v4162_v62  ;;  %v4168_v16 = vadd.s32 %v4162_v62, %v4158_v11  ;;  %v4189_v49 = vsel %vm4188_vm12, 1, %v10813_v5  ;;  %v4163_v44 = vshrl.u32 %v4159_v26, 16 }
 0x4f6   : > { %vm6033_vm15 = vcmp.lt.s32.totalorder %v6032_v54, 0  ;;  %v4167_v59 = vsel %vm4166_vm14, 1, %v10813_v5  ;;  %vm4192_vm3 = vc.u32 %v4190_v33, %v4186_v42  ;;  %v3964_v62 = vand.u32 31, %v3962_v41 }
 0x4f7   : > { %v4369_v20 = vsel %vm6033_vm15, 0, %v6032_v54  ;;  %vm4170_vm2 = vc.u32 %v4168_v16, %v4164_v7  ;;  %v4169_v63 = vadd.s32 %v4167_v59, %v4161_v18  ;;  %v4191_v54 = vadd.s32 %v4189_v49, %v4183_v29 }
 0x4f8   : > { %v4370_v14 = vsub.s32 32, %v4369_v20  ;;  %v4374_v9 = vsub.s32 4294967266, %v4369_v20  ;;  %v4371_v55 = vshll.u32 %v4362_v28, %v4369_v20  ;;  %v4171_v25 = vsel %vm4170_vm2, 1, %v10813_v5 }
 0x4f9   : > { %vm8798_vm4 = vcmp.le.f32.partialorder %v4260_v13, 0.7853982  ;;  %v4173_v57 = vadd.s32 %v4171_v25, %v4169_v63  ;;  %v4193_v52 = vsel %vm4192_vm3, 1, %v10813_v5  ;;  %v4187_v20 = vshrl.u32 %v4182_v37, 16 }
 0x4fa   : > { %v4372_v47 = vshrl.u32 %v4354_v27, %v4370_v14  ;;  %v4375_v48 = vadd.s32 127, %v4374_v9  ;;  %v4165_v27 = vshrl.u32 %v4160_v24, 16  ;;  %v8803_v11 = vadd.s32 %v4190_v33, %v4186_v42 }
 0x4fb   : > { %v4195_v14 = vadd.s32 %v4193_v52, %v4191_v54  ;;  %v8805_v9 = vsub.s32 32, %v3964_v62  ;;  %v4174_v18 = vadd.s32 %v4173_v57, %v4163_v44  ;;  %v3967_v7 = vshll.u32 %v10815_v43, %v3964_v62 }
 0x4fc   : > { %v4373_v15 = vor.u32 %v4372_v47, %v4371_v55  ;;  %v4376_v21 = vshll.u32 %v4375_v48, 23  ;;  %v3970_v24 = vshll.u32 %v10858_v2, %v3964_v62  ;;  %v8819_v42 = vshrl.u32 %v3962_v41, 5 }
 0x4fd   : > { %v4196_v13 = vadd.s32 %v4195_v14, %v4185_v58  ;;  %v3968_v16 = vshrl.u32 %v10858_v2, %v8805_v9  ;;  %v3971_v55 = vshrl.u32 %v10859_v39, %v8805_v9  ;;  %v8813_v33 = vadd.s32 %v4174_v18, %v4165_v27 }
 0x4fe   : > { %v4377_v19 = vor.u32 4788187, %v4376_v21  ;;  %v4380_v29 = vcvt.s32.f32 %v4373_v15  ;;  %v3974_v47 = vshrl.u32 %v10811_v53, %v8805_v9  ;;  %v3977_v48 = vshrl.u32 %v10818_v56, %v8805_v9 }
 0x4ff   : > { %v4197_v59 = vadd.s32 %v4196_v13, %v4187_v20  ;;  %v3973_v58 = vshll.u32 %v10859_v39, %v3964_v62  ;;  %v3976_v49 = vshll.u32 %v10811_v53, %v3964_v62  ;;  %vm4200_vm7 = vc.u32 %v8813_v33, %v8803_v11 }
 0x500   : > { %v4378_v26 = vand.u32 2147483647, %v4377_v19  ;;  %v8825_v21 = vor.u32 %v3968_v16, %v3967_v7  ;;  %v8827_v63 = vor.u32 %v3971_v55, %v3970_v24  ;;  %v3979_v54 = vshll.u32 %v10818_v56, %v3964_v62 }
 0x501   : > { %v4201_v25 = vadd.s32 1, %v4197_v59  ;;  %v3978_v44 = vor.u32 %v3977_v48, %v3976_v49  ;;  %v3980_v41 = vshrl.u32 %v10860_v1, %v8805_v9  ;;  %v4198_v27 = vmul.u32 %v8737_v23, %v8790_v32 }
 0x502   : > { %v4381_v37 = vmul.f32 %v4380_v29, %v4378_v26  ;;  %v8836_v57 = vor.u32 %v3974_v47, %v3973_v58  ;;  %v8840_v52 = vshll.u32 %v3958_v40, 8  ;;  %v4387_v62 = vsel %vm8798_vm4, 0, %v8786_v34 }
 0x503   : > { %v4202_v14 = vsel %vm4200_vm7, %v4201_v25, %v4197_v59  ;;  %v3981_v26 = vor.u32 %v3980_v41, %v3979_v54  ;;  %vm3982_vm9 = vcmp.lt.s32.totalorder %v8819_v42, 1  ;;  %vm3984_vm5 = vcmp.lt.s32.totalorder %v8819_v42, 3 }
 0x504   : > { %v4382_v15 = vxor.u32 2147483648, %v4381_v37  ;;  %v4203_v18 = vadd.s32 %v4202_v14, %v4198_v27  ;;  %v3990_v50 = vsel %vm3982_vm9, %v8825_v21, %v8827_v63  ;;  %v3994_v7 = vsel %vm3982_vm9, %v8827_v63, %v8836_v57 }
 0x505   : > { %v4404_v13 = vadd.s32 3, %v4387_v62  ;;  %6223 = vtanh.f32 %v8780_v30  ;;  %vm3983_vm6 = vcmp.lt.s32.totalorder %v8819_v42, 2  ;;  %v4442_v48 = vadd.f32 %v8777_v38, %v7271_v51 }
 0x506   : > { %v4383_v19 = vsel %vm4262_vm10, %v4382_v15, %v4381_v37  ;;  %vm3985_vm10 = vcmp.lt.s32.totalorder %v8819_v42, 4  ;;  %v4204_v28 = vadd.s32 536870912, %v4203_v18  ;;  %vm4463_vm8 = vcmp.ge.f32.partialorder %v8631_v46, 0.0 }
 0x507   : > { %v4386_v20 = vsel %vm8798_vm4, %v8631_v46, %v4383_v19  ;;  %v3991_v23 = vsel %vm3985_vm10, %v3978_v44, 920167782  ;;  %v3995_v34 = vsel %vm3985_vm10, %v3981_v26, 1326507024  ;;  %v3999_v25 = vand.u32 65535, %v8840_v52 }
 0x508   : > { %v4388_v29 = vmul.f32 %v4386_v20, %v4386_v20  ;;  %v3992_v16 = vsel %vm3984_vm5, %v8836_v57, %v3991_v23  ;;  %v3996_v24 = vsel %vm3984_vm5, %v3978_v44, %v3995_v34  ;;  %v8869_v47 = vshrl.u32 %v4204_v28, 30 }
 0x509   : > { %v8877_v30 = vsel %vm3983_vm6, %v3990_v50, %v3992_v16  ;;  %v3997_v59 = vsel %vm3983_vm6, %v3994_v7, %v3996_v24  ;;  %v4405_v44 = vand.u32 3, %v4404_v13  ;;  %v4000_v54 = vshrl.u32 %v8840_v52, 16 }
 0x50a   : > { %v4389_v32 = vmul.f32 -0.001358992, %v4388_v29  ;;  %v4396_v40 = vmul.f32 -0.00019511016, %v4388_v29  ;;  %v4206_v15 = vshll.u32 %v8869_v47, 30  ;;  %v4001_v41 = vand.u32 65535, %v3997_v59 }
 0x50b   : > { %v4002_v38 = vshrl.u32 %v3997_v59, 16  ;;  %v4024_v14 = vshrl.u32 %v8877_v30, 16  ;;  %v8885_v26 = vpop.eup %6223  ;;  %v8888_v50 = vmul.f32 %v4442_v48, %v8749_v36  ;;  %v4470_v23 = vsel %vm4463_vm8, %v7294_v35, %v7288_v61 }
 0x50c   : > { %v4390_v55 = vadd.f32 0.041655596, %v4389_v32  ;;  %v4397_v37 = vadd.f32 0.008332121, %v4396_v40  ;;  %v4207_v62 = vsub.s32 %v4203_v18, %v4206_v15  ;;  %v8894_v32 = vmul.u32 %v4001_v41, %v4000_v54 }
 0x50d   : > { %v4004_v34 = vmul.u32 %v4002_v38, %v3999_v25  ;;  %vm4403_vm11 = vweird.f32 %v8631_v46  ;;  %vm4406_vm15 = vcmp.lt.s32.totalorder %v4405_v44, 2  ;;  %v4003_v18 = vmul.u32 %v4001_v41, %v3999_v25 }
 0x50e   : > { %v4391_v58 = vmul.f32 %v4390_v55, %v4388_v29  ;;  %v4398_v49 = vmul.f32 %v4397_v37, %v4388_v29  ;;  %vm4208_vm13 = vcmp.lt.s32.totalorder %v4207_v62, 0  ;;  %v4209_v7 = vsub.s32 0, %v4207_v62 }
 0x50f   : > { %v4007_v13 = vshll.u32 %v4004_v34, 16  ;;  %v4023_v36 = vand.u32 65535, %v8877_v30  ;;  %v8898_v37 = vmul.u32 %v4024_v14, %v3999_v25  ;;  %v4006_v59 = vmul.u32 %v4002_v38, %v4000_v54 }
 0x510   : > { %v4392_v19 = vadd.f32 -0.4999988, %v4391_v58  ;;  %v4399_v27 = vadd.f32 -0.16666654, %v4398_v49  ;;  %v4210_v55 = vsel %vm4208_vm13, %v4209_v7, %v4207_v62  ;;  %v4009_v58 = vshll.u32 %v8894_v32, 16 }
 0x511   : > { %v4211_v48 = vclz %v4210_v55  ;;  %vm4011_vm14 = vc.u32 %v4003_v18, %v4007_v13  ;;  %vm4407_vm12 = vcmp.eq.s32.totalorder %v4405_v44, 0  ;;  %vm4410_vm2 = vcmp.eq.s32.totalorder %v4405_v44, 2 }
 0x512   : > { %v4393_v40 = vmul.f32 %v4392_v19, %v4388_v29  ;;  %v4400_v28 = vmul.f32 %v4399_v27, %v4388_v29  ;;  %v4012_v15 = vsel %vm4011_vm14, 1, %v10813_v5  ;;  %v4013_v19 = vadd.s32 %v4007_v13, %v4003_v18 }
 0x513   : > { %v6029_v41 = vadd.s32 4294967294, %v4211_v48  ;;  %v3966_v30 = vshrl.u32 %v10815_v43, %v8805_v9  ;;  %v4027_v7 = vmul.u32 %v4023_v36, %v4000_v54  ;;  %v4029_v13 = vshll.u32 %v8898_v37, 16 }
 0x514   : > { %v4394_v16 = vadd.f32 1.0, %v4393_v40  ;;  %v4401_v24 = vadd.f32 1.0, %v4400_v28  ;;  %v4199_v40 = vadd.s32 %v8803_v11, %v8813_v33  ;;  %v4014_v28 = vadd.s32 %v4012_v15, %v4006_v59 }
 0x515   : > { %vm4015_vm3 = vc.u32 %v4013_v19, %v4009_v58  ;;  %vm6030_vm4 = vcmp.lt.s32.totalorder %v6029_v41, 0  ;;  %v3987_v11 = vsel %vm3985_vm10, %v8836_v57, 2102212464  ;;  %v4008_v59 = vshrl.u32 %v4004_v34, 16 }
 0x516   : > { %v4402_v29 = vmul.f32 %v4401_v24, %v4386_v20  ;;  %v4411_v49 = vxor.u32 2147483648, %v4394_v16  ;;  %v4016_v20 = vsel %vm4015_vm3, 1, %v10813_v5  ;;  %v4214_v55 = vsel %vm6030_vm4, 0, %v6029_v41 }
 0x517   : > { %v4018_v18 = vadd.s32 %v4016_v20, %v4014_v28  ;;  %v4215_v17 = vsub.s32 32, %v4214_v55  ;;  %v4219_v9 = vsub.s32 4294967266, %v4214_v55  ;;  %v4025_v58 = vmul.u32 %v4023_v36, %v3999_v25 }
 0x518   : > { %v4408_v27 = vxor.u32 2147483648, %v4402_v29  ;;  %v4412_v38 = vsel %vm4410_vm2, %v4411_v49, %v4402_v29  ;;  %v4028_v29 = vmul.u32 %v4024_v14, %v4000_v54  ;;  %v4216_v49 = vshll.u32 %v4207_v62, %v4214_v55 }
 0x519   : > { %v4217_v15 = vshrl.u32 %v4199_v40, %v4215_v17  ;;  %v4220_v19 = vadd.s32 127, %v4219_v9  ;;  %v4019_v41 = vadd.s32 %v4018_v18, %v4008_v59  ;;  %v4031_v44 = vshll.u32 %v4027_v7, 16 }
 0x51a   : > { %v4409_v24 = vsel %vm4407_vm12, %v4394_v16, %v4408_v27  ;;  %vm4033_vm7 = vc.u32 %v4025_v58, %v4029_v13  ;;  %v4035_v27 = vadd.s32 %v4029_v13, %v4025_v58  ;;  %v3986_v25 = vsel %vm3982_vm9, %v3966_v30, %v8825_v21 }
 0x51b   : > { %v4413_v48 = vsel %vm4406_vm15, %v4409_v24, %v4412_v38  ;;  %v4218_v38 = vor.u32 %v4217_v15, %v4216_v49  ;;  %v4221_v20 = vshll.u32 %v4220_v19, 23  ;;  %v4034_v57 = vsel %vm4033_vm7, 1, %v10813_v5 }
 0x51c   : > { %v4414_v33 = vsel %vm4403_vm11, nan, %v4413_v48  ;;  %v4477_v24 = vmul.f32 %v4470_v23, %v8631_v46  ;;  %v4036_v54 = vadd.s32 %v4034_v57, %v4028_v29  ;;  %vm4037_vm10 = vc.u32 %v4035_v27, %v4031_v44 }
 0x51d   : > { %v4421_v16 = vmul.f32 %v4414_v33, %v7262_v3  ;;  %v4222_v62 = vor.u32 4788187, %v4221_v20  ;;  %v4010_v14 = vshrl.u32 %v8894_v32, 16  ;;  %v4038_v34 = vsel %vm4037_vm10, 1, %v10813_v5 }
 0x51e   : > { %v3988_v36 = vsel %vm3984_vm5, %v8827_v63, %v3987_v11  ;;  %v4030_v46 = vshrl.u32 %v8898_v37, 16  ;;  %v4040_v23 = vadd.s32 %v4038_v34, %v4036_v54  ;;  %v4225_v30 = vcvt.s32.f32 %v4218_v38 }
 0x51f   : > { %v4428_v28 = vadd.f32 %v4421_v16, %v8729_v12  ;;  %v4229_v12 = vsub.s32 4, %v8869_v47  ;;  %v4223_v21 = vand.u32 2147483647, %v4222_v62  ;;  %v8929_v55 = vadd.s32 %v4019_v41, %v4010_v14 }
 0x520   : > { %v4041_v18 = vadd.s32 %v4040_v23, %v4030_v46  ;;  %vm4107_vm9 = vcmp.lt.s32.totalorder %v8688_v45, 0  ;;  %v4039_v13 = vadd.s32 %v4035_v27, %v4031_v44  ;;  %v3798_v63 = vand.u32 2139095040, %v8723_v22 }
 0x521   : > { %v4456_v17 = vadd.f32 %v8888_v50, %v4428_v28  ;;  %v4032_v50 = vshrl.u32 %v4027_v7, 16  ;;  %v4226_v32 = vmul.f32 %v4225_v30, %v4223_v21  ;;  %v4230_v37 = vsel %vm4107_vm9, %v4229_v12, %v8869_v47 }
 0x522   : > { %v3989_v48 = vsel %vm3983_vm6, %v3986_v25, %v3988_v36  ;;  %v3795_v11 = vand.u32 2147483647, %v8723_v22  ;;  %6225 = vtanh.f32 %v8726_v0  ;;  %vm4045_vm5 = vc.u32 %v8929_v55, %v4039_v13 }
 0x523   : > { %v4484_v40 = vadd.f32 %v4477_v24, %v4456_v17  ;;  %v4042_v9 = vadd.s32 %v4041_v18, %v4032_v50  ;;  %v4227_v7 = vxor.u32 2147483648, %v4226_v32  ;;  %v3799_v33 = vshrl.u32 %v3798_v63, 23 }
 0x524   : > { %6227 = vtanh.f32 %v8688_v45  ;;  %vm4106_vm8 = vcmp.le.f32.partialorder %v4105_v8, 0.7853982  ;;  %v4043_v42 = vmul.u32 %v8840_v52, %v3989_v48  ;;  %v3802_v0 = vand.u32 8388607, %v3795_v11  ;;  %v3204_v52 = vpop.permute.xlu2 %3203 }
 0x525   : > { %6048 = vmatpush.msk.msrb.mxu0 %vm1936_vm1, %v4484_v40  ;;  %6093 = vmatpush.msk.msra.mxu3 %vm1936_vm1, %v4484_v40  ;;  %v4046_v59 = vadd.s32 1, %v4042_v9  ;;  %v4228_v58 = vsel %vm4107_vm9, %v4227_v7, %v4226_v32  ;;  %v4232_v47 = vsel %vm4106_vm8, 0, %v4230_v37  ;;  %v6022_v29 = vadd.s32 4294967169, %v3799_v33 }
 0x526   : > { %v8946_v16 = vsel %vm4106_vm8, %v8688_v45, %v4228_v58  ;;  %v3307_v8 = vmul.f32 0.5, %v8885_v26  ;;  %v4249_v44 = vadd.s32 3, %v4232_v47  ;;  %vm4462_vm6 = vcmp.ge.f32.partialorder %v8688_v45, 0.0 }
 0x527   : > { %v4047_v49 = vsel %vm4045_vm5, %v4046_v59, %v4042_v9  ;;  %v4233_v15 = vmul.f32 %v8946_v16, %v8946_v16  ;;  %v3805_v41 = vadd.s32 1, %v6022_v29  ;;  %v8955_v24 = vadd.f32 %v8627_v10, %v3204_v52 }
 0x528   : > { %v4048_v19 = vadd.s32 %v4047_v49, %v4043_v42  ;;  %v6226_v27 = vpop.eup %6225  ;;  %v4434_v25 = vmul.f32 %v8688_v45, %v7264_v60  ;;  %v3803_v54 = vor.u32 8388608, %v3802_v0  ;;  %6229 = vtanh.f32 %v8691_v4 }
 0x529   : > { %v4234_v28 = vmul.f32 -0.001358992, %v4233_v15  ;;  %v4241_v38 = vmul.f32 -0.00019511016, %v4233_v15  ;;  %vm3806_vm13 = vcmp.gt.s32.totalorder %v3805_v41, 0  ;;  %v3314_v34 = vadd.f32 0.5, %v3307_v8 }
 0x52a   : > { %v4049_v20 = vadd.s32 536870912, %v4048_v19  ;;  %v6228_v57 = vpop.eup %6227  ;;  %v3807_v17 = vsel %vm3806_vm13, %v3805_v41, 0  ;;  %v4250_v12 = vand.u32 3, %v4249_v44  ;;  %v4469_v36 = vsel %vm4462_vm6, %v7294_v35, %v7288_v61 }
 0x52b   : > { %v4235_v62 = vadd.f32 0.041655596, %v4234_v28  ;;  %v4242_v26 = vadd.f32 0.008332121, %v4241_v38  ;;  %v3809_v10 = vand.u32 31, %v3807_v17  ;;  %v8967_v46 = vmul.f32 %v6228_v57, %v7260_v31 }
 0x52c   : > { %v8960_v14 = vshrl.u32 %v4049_v20, 30  ;;  %v4441_v30 = vadd.f32 %v4434_v25, %v7271_v51  ;;  %v8971_v50 = vmul.f32 0.5, %v6226_v27  ;;  %v8975_v32 = vshll.u32 %v3803_v54, 8 }
 0x52d   : > { %v4236_v23 = vmul.f32 %v4235_v62, %v4233_v15  ;;  %v4243_v40 = vmul.f32 %v4242_v26, %v4233_v15  ;;  %v8973_v18 = vsub.s32 32, %v3809_v10  ;;  %v8978_v48 = vmul.f32 %v4469_v36, %v8688_v45 }
 0x52e   : > { %v4051_v21 = vshll.u32 %v8960_v14, 30  ;;  %vm4252_vm11 = vcmp.eq.s32.totalorder %v4250_v12, 0  ;;  %vm4255_vm15 = vcmp.eq.s32.totalorder %v4250_v12, 2  ;;  %v8982_v7 = vmul.f32 %v4441_v30, %v3314_v34  ;;  %v8985_v59 = vpop.eup %6229 }
 0x52f   : > { %v4237_v63 = vadd.f32 -0.4999988, %v4236_v23  ;;  %v4244_v37 = vadd.f32 -0.16666654, %v4243_v40  ;;  %v4044_v33 = vadd.s32 %v4039_v13, %v8929_v55  ;;  %vm4251_vm14 = vcmp.lt.s32.totalorder %v4250_v12, 2 }
 0x530   : > { %v8980_v9 = vsub.s32 %v4048_v19, %v4051_v21  ;;  %vm4248_vm2 = vweird.f32 %v8688_v45  ;;  %v8990_v29 = vshrl.u32 %v3807_v17, 5  ;;  %v3812_v49 = vshll.u32 %v10815_v43, %v3809_v10 }
 0x531   : > { %v4238_v58 = vmul.f32 %v4237_v63, %v4233_v15  ;;  %v4245_v47 = vmul.f32 %v4244_v37, %v4233_v15  ;;  %v3813_v0 = vshrl.u32 %v10858_v2, %v8973_v18  ;;  %v8996_v55 = vand.u32 65535, %v8975_v32 }
 0x532   : > { %vm4053_vm12 = vcmp.lt.s32.totalorder %v8980_v9, 0  ;;  %v4054_v42 = vsub.s32 0, %v8980_v9  ;;  %v3816_v41 = vshrl.u32 %v10859_v39, %v8973_v18  ;;  %v3815_v44 = vshll.u32 %v10858_v2, %v3809_v10 }
 0x533   : > { %v4239_v13 = vadd.f32 1.0, %v4238_v58  ;;  %v4246_v19 = vadd.f32 1.0, %v4245_v47  ;;  %v3819_v27 = vshrl.u32 %v10811_v53, %v8973_v18  ;;  %v3822_v52 = vshrl.u32 %v10818_v56, %v8973_v18 }
 0x534   : > { %v4055_v15 = vsel %vm4053_vm12, %v4054_v42, %v8980_v9  ;;  %v3821_v20 = vshll.u32 %v10811_v53, %v3809_v10  ;;  %v3825_v57 = vshrl.u32 %v10860_v1, %v8973_v18  ;;  %v3814_v54 = vor.u32 %v3813_v0, %v3812_v49 }
 0x535   : > { %v4056_v8 = vclz %v4055_v15  ;;  %v4247_v28 = vmul.f32 %v4246_v19, %v8946_v16  ;;  %v4256_v38 = vxor.u32 2147483648, %v4239_v13  ;;  %v3818_v17 = vshll.u32 %v10859_v39, %v3809_v10 }
 0x536   : > { %v9012_v62 = vshrl.u32 %v8975_v32, 16  ;;  %vm3952_vm3 = vcmp.lt.s32.totalorder %v8691_v4, 0  ;;  %v9015_v34 = vor.u32 %v3816_v41, %v3815_v44  ;;  %v3823_v36 = vor.u32 %v3822_v52, %v3821_v20 }
 0x537   : > { %v6026_v25 = vadd.s32 4294967294, %v4056_v8  ;;  %v4253_v26 = vxor.u32 2147483648, %v4247_v28  ;;  %v3824_v16 = vshll.u32 %v10818_v56, %v3809_v10  ;;  %v4257_v23 = vsel %vm4255_vm15, %v4256_v38, %v4247_v28 }
 0x538   : > { %v4074_v40 = vsub.s32 4, %v8960_v14  ;;  %v3820_v21 = vor.u32 %v3819_v27, %v3818_v17  ;;  %vm3827_vm7 = vcmp.lt.s32.totalorder %v8990_v29, 1  ;;  %v10891_v47 = vand.u32 2147483647, %v8691_v4 }
 0x539   : > { %vm6027_vm4 = vcmp.lt.s32.totalorder %v6026_v25, 0  ;;  %v4254_v30 = vsel %vm4252_vm11, %v4239_v13, %v4253_v26  ;;  %v3826_v37 = vor.u32 %v3825_v57, %v3824_v16  ;;  %vm3830_vm9 = vcmp.lt.s32.totalorder %v8990_v29, 4 }
 0x53a   : > { %v4059_v63 = vsel %vm6027_vm4, 0, %v6026_v25  ;;  %v4258_v58 = vsel %vm4251_vm14, %v4254_v30, %v4257_v23  ;;  %vm9025_vm10 = vcmp.le.f32.partialorder %v10891_v47, 0.7853982  ;;  %vm3829_vm5 = vcmp.lt.s32.totalorder %v8990_v29, 3 }
 0x53b   : > { %v4060_v10 = vsub.s32 32, %v4059_v63  ;;  %v4064_v49 = vsub.s32 4294967266, %v4059_v63  ;;  %v4259_v0 = vsel %vm4248_vm2, nan, %v4258_v58  ;;  %v3835_v12 = vsel %vm3827_vm7, %v3814_v54, %v9015_v34 }
 0x53c   : > { %v3836_v13 = vsel %vm3830_vm9, %v3823_v36, 920167782  ;;  %v4420_v19 = vmul.f32 %v4259_v0, %v7262_v3  ;;  %v4061_v15 = vshll.u32 %v8980_v9, %v4059_v63  ;;  %vm3828_vm8 = vcmp.lt.s32.totalorder %v8990_v29, 2  ;;  %v3199_v29 = vpop.permute.xlu0 %3198 }
 0x53d   : > { %v4062_v41 = vshrl.u32 %v4044_v33, %v4060_v10  ;;  %v4065_v8 = vadd.s32 127, %v4064_v49  ;;  %v3837_v45 = vsel %vm3829_vm5, %v3820_v21, %v3836_v13  ;;  %v3839_v44 = vsel %vm3827_vm7, %v9015_v34, %v3820_v21 }
 0x53e   : > { %v3840_v27 = vsel %vm3830_vm9, %v3826_v37, 1326507024  ;;  %v4427_v52 = vadd.f32 %v4420_v19, %v8967_v46  ;;  %v3838_v9 = vsel %vm3828_vm8, %v3835_v12, %v3837_v45  ;;  %v3643_v25 = vand.u32 2139095040, %v8955_v24 }
 0x53f   : > { %v4063_v28 = vor.u32 %v4062_v41, %v4061_v15  ;;  %v4066_v38 = vshll.u32 %v4065_v8, 23  ;;  %v3841_v33 = vsel %vm3829_vm5, %v3823_v36, %v3840_v27  ;;  %v3868_v20 = vand.u32 65535, %v3838_v9 }
 0x540   : > { %v3869_v57 = vshrl.u32 %v3838_v9, 16  ;;  %v4455_v17 = vadd.f32 %v8982_v7, %v4427_v52  ;;  %v4075_v16 = vsel %vm3952_vm3, %v4074_v40, %v8960_v14  ;;  %v3842_v46 = vsel %vm3828_vm8, %v3839_v44, %v3841_v33 }
 0x541   : > { %v4067_v26 = vor.u32 4788187, %v4066_v38  ;;  %v3811_v23 = vshrl.u32 %v10815_v43, %v8973_v18  ;;  %v3846_v30 = vand.u32 65535, %v3842_v46  ;;  %v3847_v63 = vshrl.u32 %v3842_v46, 16 }
 0x542   : > { %v3871_v36 = vmul.u32 %v3869_v57, %v8996_v55  ;;  %v4483_v37 = vadd.f32 %v8978_v48, %v4455_v17  ;;  %v4070_v47 = vcvt.s32.f32 %v4063_v28  ;;  %v3872_v7 = vmul.u32 %v3868_v20, %v9012_v62 }
 0x543   : > { %v4068_v58 = vand.u32 2147483647, %v4067_v26  ;;  %v4077_v10 = vsel %vm9025_vm10, 0, %v4075_v16  ;;  %v3831_v14 = vsel %vm3827_vm7, %v3811_v23, %v3814_v54  ;;  %v3849_v40 = vmul.u32 %v3847_v63, %v8996_v55 }
 0x544   : > { %v3850_v18 = vmul.u32 %v3846_v30, %v9012_v62  ;;  %4570 = vmatpush.msrb.mxu0 %v4483_v37  ;;  %6094 = vmatpush.msra.mxu3 %v4483_v37  ;;  %v3832_v48 = vsel %vm3830_vm9, %v3820_v21, 2102212464  ;;  %v3870_v0 = vmul.u32 %v3868_v20, %v8996_v55  ;;  %v3874_v12 = vshll.u32 %v3871_v36, 16 }
 0x545   : > { %v4071_v49 = vmul.f32 %v4070_v47, %v4068_v58  ;;  %v3848_v13 = vmul.u32 %v3846_v30, %v8996_v55  ;;  %v3851_v19 = vmul.u32 %v3847_v63, %v9012_v62  ;;  %v3852_v15 = vshll.u32 %v3849_v40, 16 }
 0x546   : > { %v3873_v54 = vmul.u32 %v3869_v57, %v9012_v62  ;;  %v3876_v8 = vshll.u32 %v3872_v7, 16  ;;  %vm3878_vm6 = vc.u32 %v3870_v0, %v3874_v12  ;;  %v3880_v45 = vadd.s32 %v3874_v12, %v3870_v0 }
 0x547   : > { %v4072_v41 = vxor.u32 2147483648, %v4071_v49  ;;  %v3854_v44 = vshll.u32 %v3850_v18, 16  ;;  %vm3856_vm13 = vc.u32 %v3848_v13, %v3852_v15  ;;  %v3858_v27 = vadd.s32 %v3852_v15, %v3848_v13 }
 0x548   : > { %v3879_v52 = vsel %vm3878_vm6, 1, %v10813_v5  ;;  %v3857_v28 = vsel %vm3856_vm13, 1, %v10813_v5  ;;  %vm3882_vm11 = vc.u32 %v3880_v45, %v3876_v8  ;;  %v3875_v57 = vshrl.u32 %v3871_v36, 16 }
 0x549   : > { %v4073_v21 = vsel %vm3952_vm3, %v4072_v41, %v4071_v49  ;;  %v3881_v55 = vadd.s32 %v3879_v52, %v3873_v54  ;;  %v3859_v38 = vadd.s32 %v3857_v28, %v3851_v19  ;;  %vm3860_vm15 = vc.u32 %v3858_v27, %v3854_v44 }
 0x54a   : > { %v4076_v62 = vsel %vm9025_vm10, %v8691_v4, %v4073_v21  ;;  %v3883_v9 = vsel %vm3882_vm11, 1, %v10813_v5  ;;  %v3861_v20 = vsel %vm3860_vm15, 1, %v10813_v5  ;;  %v3833_v26 = vsel %vm3829_vm5, %v9015_v34, %v3832_v48 }
 0x54b   : > { %v4078_v33 = vmul.f32 %v4076_v62, %v4076_v62  ;;  %v3885_v17 = vadd.s32 %v3883_v9, %v3881_v55  ;;  %v3853_v16 = vshrl.u32 %v3849_v40, 16  ;;  %v3863_v46 = vadd.s32 %v3861_v20, %v3859_v38 }
 0x54c   : > { %v3644_v23 = vshrl.u32 %v3643_v25, 23  ;;  %v3877_v42 = vshrl.u32 %v3872_v7, 16  ;;  %v4094_v58 = vadd.s32 3, %v4077_v10  ;;  %v3855_v47 = vshrl.u32 %v3850_v18, 16 }
 0x54d   : > { %v4079_v30 = vmul.f32 -0.001358992, %v4078_v33  ;;  %v4086_v63 = vmul.f32 -0.00019511016, %v4078_v33  ;;  %v3886_v37 = vadd.s32 %v3885_v17, %v3875_v57  ;;  %v3864_v49 = vadd.s32 %v3863_v46, %v3853_v16 }
 0x54e   : > { %v6019_v0 = vadd.s32 4294967169, %v3644_v23  ;;  %v3834_v36 = vsel %vm3828_vm8, %v3831_v14, %v3833_v26  ;;  %v4433_v34 = vmul.f32 %v8691_v4, %v7264_v60  ;;  %v9095_v25 = vadd.s32 %v3880_v45, %v3876_v8 }
 0x54f   : > { %v4080_v12 = vadd.f32 0.041655596, %v4079_v30  ;;  %v4087_v13 = vadd.f32 0.008332121, %v4086_v63  ;;  %v3887_v19 = vadd.s32 %v3886_v37, %v3877_v42  ;;  %v9093_v40 = vadd.s32 %v3864_v49, %v3855_v47 }
 0x550   : > { %v3650_v48 = vadd.s32 1, %v6019_v0  ;;  %v3640_v18 = vand.u32 2147483647, %v8955_v24  ;;  %v4095_v54 = vand.u32 3, %v4094_v58  ;;  %v3888_v41 = vmul.u32 %v8975_v32, %v3834_v36 }
 0x551   : > { %v4081_v7 = vmul.f32 %v4080_v12, %v4078_v33  ;;  %v4088_v15 = vmul.f32 %v4087_v13, %v4078_v33  ;;  %v3891_v10 = vadd.s32 1, %v3887_v19  ;;  %vm3890_vm14 = vc.u32 %v9093_v40, %v9095_v25 }
 0x552   : > { %vm3651_vm12 = vcmp.gt.s32.totalorder %v3650_v48, 0  ;;  %v9102_v8 = vadd.f32 %v8625_v6, %v3199_v29  ;;  %vm4461_vm2 = vcmp.ge.f32.partialorder %v8691_v4, 0.0  ;;  %v3313_v28 = vadd.f32 0.5, %v8971_v50 }
 0x553   : > { %v4082_v14 = vadd.f32 -0.4999988, %v4081_v7  ;;  %v4089_v44 = vadd.f32 -0.16666654, %v4088_v15  ;;  %v3892_v27 = vsel %vm3890_vm14, %v3891_v10, %v3887_v19  ;;  %v3652_v52 = vsel %vm3651_vm12, %v3650_v48, 0 }
 0x554   : > { %v3893_v45 = vadd.s32 %v3892_v27, %v3888_v41  ;;  %v3654_v21 = vand.u32 31, %v3652_v52  ;;  %v3327_v32 = vmul.f32 %v8985_v59, %v7260_v31  ;;  %vm4093_vm3 = vweird.f32 %v8691_v4 }
 0x555   : > { %v4083_v55 = vmul.f32 %v4082_v14, %v4078_v33  ;;  %v4090_v38 = vmul.f32 %v4089_v44, %v4078_v33  ;;  %v4440_v9 = vadd.f32 %v4433_v34, %v7271_v51  ;;  %v3647_v6 = vand.u32 8388607, %v3640_v18 }
 0x556   : > { %v3894_v20 = vadd.s32 536870912, %v3893_v45  ;;  %v9112_v57 = vsub.s32 32, %v3654_v21  ;;  %vm4096_vm4 = vcmp.lt.s32.totalorder %v4095_v54, 2  ;;  %v4468_v50 = vsel %vm4461_vm2, %v7294_v35, %v7288_v61 }
 0x557   : > { %v4084_v17 = vadd.f32 1.0, %v4083_v55  ;;  %v4091_v26 = vadd.f32 1.0, %v4090_v38  ;;  %vm4097_vm7 = vcmp.eq.s32.totalorder %v4095_v54, 0  ;;  %vm4100_vm10 = vcmp.eq.s32.totalorder %v4095_v54, 2 }
 0x558   : > { %v9116_v59 = vshrl.u32 %v3894_v20, 30  ;;  %v3658_v33 = vshrl.u32 %v10858_v2, %v9112_v57  ;;  %v3661_v23 = vshrl.u32 %v10859_v39, %v9112_v57  ;;  %v3667_v30 = vshrl.u32 %v10818_v56, %v9112_v57 }
 0x559   : > { %v4092_v16 = vmul.f32 %v4091_v26, %v4076_v62  ;;  %v4101_v46 = vxor.u32 2147483648, %v4084_v17  ;;  %v3648_v42 = vor.u32 8388608, %v3647_v6  ;;  %v9125_v37 = vshrl.u32 %v3652_v52, 5 }
 0x55a   : > { %v3896_v63 = vshll.u32 %v9116_v59, 30  ;;  %v3657_v58 = vshll.u32 %v10815_v43, %v3654_v21  ;;  %v3660_v49 = vshll.u32 %v10858_v2, %v3654_v21  ;;  %v3664_v62 = vshrl.u32 %v10811_v53, %v9112_v57 }
 0x55b   : > { %v4098_v47 = vxor.u32 2147483648, %v4092_v16  ;;  %v3666_v0 = vshll.u32 %v10811_v53, %v3654_v21  ;;  %v3663_v36 = vshll.u32 %v10859_v39, %v3654_v21  ;;  %v3670_v19 = vshrl.u32 %v10860_v1, %v9112_v57 }
 0x55c   : > { %v9132_v12 = vsub.s32 %v3893_v45, %v3896_v63  ;;  %v9134_v13 = vor.u32 %v3658_v33, %v3657_v58  ;;  %v4102_v48 = vsel %vm4100_vm10, %v4101_v46, %v4092_v16  ;;  %v9141_v7 = vor.u32 %v3661_v23, %v3660_v49 }
 0x55d   : > { %v4099_v34 = vsel %vm4097_vm7, %v4084_v17, %v4098_v47  ;;  %v3668_v15 = vor.u32 %v3667_v30, %v3666_v0  ;;  %v3669_v29 = vshll.u32 %v10818_v56, %v3654_v21  ;;  %v4447_v44 = vmul.f32 %v4440_v9, %v3313_v28 }
 0x55e   : > { %v4103_v10 = vsel %vm4096_vm4, %v4099_v34, %v4102_v48  ;;  %vm3898_vm9 = vcmp.lt.s32.totalorder %v9132_v12, 0  ;;  %v3899_v41 = vsub.s32 0, %v9132_v12  ;;  %v3665_v27 = vor.u32 %v3664_v62, %v3663_v36 }
 0x55f   : > { %v4104_v14 = vsel %vm4093_vm3, nan, %v4103_v10  ;;  %vm3672_vm5 = vcmp.lt.s32.totalorder %v9125_v37, 1  ;;  %v3671_v55 = vor.u32 %v3670_v19, %v3669_v29  ;;  %vm3675_vm8 = vcmp.lt.s32.totalorder %v9125_v37, 4 }
 0x560   : > { %v4419_v52 = vmul.f32 %v4104_v14, %v7262_v3  ;;  %v3900_v45 = vsel %vm3898_vm9, %v3899_v41, %v9132_v12  ;;  %v4475_v54 = vmul.f32 %v4468_v50, %v8691_v4  ;;  %v3680_v21 = vsel %vm3672_vm5, %v9134_v13, %v9141_v7 }
 0x561   : > { %v3901_v38 = vclz %v3900_v45  ;;  %v3681_v28 = vsel %vm3675_vm8, %v3668_v15, 920167782  ;;  %v3291_v20 = vmul.f32 0.5, %v8723_v22  ;;  %vm3674_vm6 = vcmp.lt.s32.totalorder %v9125_v37, 3 }
 0x562   : > { %v4426_v9 = vadd.f32 %v4419_v52, %v3327_v32  ;;  %v9162_v6 = vshll.u32 %v3648_v42, 8  ;;  %vm3673_vm13 = vcmp.lt.s32.totalorder %v9125_v37, 2  ;;  %v3682_v4 = vsel %vm3674_vm6, %v3665_v27, %v3681_v28 }
 0x563   : > { %v6023_v17 = vadd.s32 4294967294, %v3901_v38  ;;  %v3684_v26 = vsel %vm3672_vm5, %v9141_v7, %v3665_v27  ;;  %v3889_v32 = vadd.s32 %v9095_v25, %v9093_v40  ;;  %v3683_v33 = vsel %vm3673_vm13, %v3680_v21, %v3682_v4 }
 0x564   : > { %v4454_v50 = vadd.f32 %v4447_v44, %v4426_v9  ;;  %v3685_v16 = vsel %vm3675_vm8, %v3671_v55, 1326507024  ;;  %v3713_v23 = vand.u32 65535, %v3683_v33  ;;  %v3714_v30 = vshrl.u32 %v3683_v33, 16 }
 0x565   : > { %vm6024_vm11 = vcmp.lt.s32.totalorder %v6023_v17, 0  ;;  %v3686_v46 = vsel %vm3674_vm6, %v3668_v15, %v3685_v16  ;;  %v3689_v47 = vand.u32 65535, %v9162_v6  ;;  %v3690_v49 = vshrl.u32 %v9162_v6, 16 }
 0x566   : > { %v4482_v63 = vadd.f32 %v4475_v54, %v4454_v50  ;;  %v3904_v42 = vsel %vm6024_vm11, 0, %v6023_v17  ;;  %v3687_v58 = vsel %vm3673_vm13, %v3684_v26, %v3686_v46  ;;  %6231 = vtanh.f32 %v3291_v20 }
 0x567   : > { %v3905_v40 = vsub.s32 32, %v3904_v42  ;;  %v3909_v25 = vsub.s32 4294967266, %v3904_v42  ;;  %v3691_v62 = vand.u32 65535, %v3687_v58  ;;  %v3906_v0 = vshll.u32 %v9132_v12, %v3904_v42 }
 0x568   : > { %4571 = vmatpush.msrb.mxu0 %v4482_v63  ;;  %6095 = vmatpush.msra.mxu3 %v4482_v63  ;;  %v3692_v36 = vshrl.u32 %v3687_v58, 16  ;;  %v3716_v19 = vmul.u32 %v3714_v30, %v3689_v47  ;;  %v3717_v10 = vmul.u32 %v3713_v23, %v3690_v49  ;;  %vm3797_vm15 = vcmp.lt.s32.totalorder %v8723_v22, 0 }
 0x569   : > { %v3907_v34 = vshrl.u32 %v3889_v32, %v3905_v40  ;;  %v3910_v48 = vadd.s32 127, %v3909_v25  ;;  %v3695_v15 = vmul.u32 %v3691_v62, %v3690_v49  ;;  %v3919_v41 = vsub.s32 4, %v9116_v59 }
 0x56a   : > { %v3656_v29 = vshrl.u32 %v10815_v43, %v9112_v57  ;;  %v3694_v14 = vmul.u32 %v3692_v36, %v3689_v47  ;;  %v3719_v44 = vshll.u32 %v3716_v19, 16  ;;  %v3677_v12 = vsel %vm3675_vm8, %v3665_v27, 2102212464 }
 0x56b   : > { %v3908_v52 = vor.u32 %v3907_v34, %v3906_v0  ;;  %v3911_v45 = vshll.u32 %v3910_v48, 23  ;;  %v3715_v55 = vmul.u32 %v3713_v23, %v3689_v47  ;;  %v3693_v54 = vmul.u32 %v3691_v62, %v3689_v47 }
 0x56c   : > { %v3696_v38 = vmul.u32 %v3692_v36, %v3690_v49  ;;  %v3697_v21 = vshll.u32 %v3694_v14, 16  ;;  %v3718_v28 = vmul.u32 %v3714_v30, %v3690_v49  ;;  %v3699_v20 = vshll.u32 %v3695_v15, 16  ;;  %v6232_v4 = vpop.eup %6231 }
 0x56d   : > { %v3912_v9 = vor.u32 4788187, %v3911_v45  ;;  %v3721_v17 = vshll.u32 %v3717_v10, 16  ;;  %vm3723_vm14 = vc.u32 %v3715_v55, %v3719_v44  ;;  %v3725_v50 = vadd.s32 %v3719_v44, %v3715_v55 }
 0x56e   : > { %vm3701_vm12 = vc.u32 %v3693_v54, %v3697_v21  ;;  %v3703_v26 = vadd.s32 %v3697_v21, %v3693_v54  ;;  %v3724_v57 = vsel %vm3723_vm14, 1, %v10813_v5  ;;  %v3915_v33 = vcvt.s32.f32 %v3908_v52 }
 0x56f   : > { %v3913_v32 = vand.u32 2147483647, %v3912_v9  ;;  %v3702_v16 = vsel %vm3701_vm12, 1, %v10813_v5  ;;  %v3726_v27 = vadd.s32 %v3724_v57, %v3718_v28  ;;  %v3676_v46 = vsel %vm3672_vm5, %v3656_v29, %v9134_v13 }
 0x570   : > { %v3704_v23 = vadd.s32 %v3702_v16, %v3696_v38  ;;  %vm3705_vm2 = vc.u32 %v3703_v26, %v3699_v20  ;;  %vm3727_vm3 = vc.u32 %v3725_v50, %v3721_v17  ;;  %v3678_v63 = vsel %vm3674_vm6, %v9141_v7, %v3677_v12 }
 0x571   : > { %v3916_v30 = vmul.f32 %v3915_v33, %v3913_v32  ;;  %v3706_v42 = vsel %vm3705_vm2, 1, %v10813_v5  ;;  %v3728_v58 = vsel %vm3727_vm3, 1, %v10813_v5  ;;  %v3698_v47 = vshrl.u32 %v3694_v14, 16 }
 0x572   : > { %v3708_v40 = vadd.s32 %v3706_v42, %v3704_v23  ;;  %v3720_v25 = vshrl.u32 %v3716_v19, 16  ;;  %v3730_v49 = vadd.s32 %v3728_v58, %v3726_v27  ;;  %v3920_v13 = vsel %vm3797_vm15, %v3919_v41, %v9116_v59 }
 0x573   : > { %v3917_v62 = vxor.u32 2147483648, %v3916_v30  ;;  %v3488_v0 = vand.u32 2139095040, %v9102_v8  ;;  %v3700_v36 = vshrl.u32 %v3695_v15, 16  ;;  %v3722_v48 = vshrl.u32 %v3717_v10, 16 }
 0x574   : > { %v3709_v34 = vadd.s32 %v3708_v40, %v3698_v47  ;;  %v3731_v29 = vadd.s32 %v3730_v49, %v3720_v25  ;;  %vm9205_vm4 = vcmp.le.f32.partialorder %v3795_v11, 0.7853982  ;;  %v3679_v14 = vsel %vm3673_vm13, %v3676_v46, %v3678_v63  ;;  %v3194_v63 = vpop.permute.xlu1 %3193 }
 0x575   : > { %v3918_v19 = vsel %vm3797_vm15, %v3917_v62, %v3916_v30  ;;  %v3489_v44 = vshrl.u32 %v3488_v0, 23  ;;  %v9218_v10 = vadd.s32 %v3725_v50, %v3721_v17  ;;  %v3922_v11 = vsel %vm9205_vm4, 0, %v3920_v13  ;;  %v3267_v50 = vpop.f32.mrf.mxu0 }
 0x576   : > { %v3921_v59 = vsel %vm9205_vm4, %v8723_v22, %v3918_v19  ;;  %v9216_v15 = vadd.s32 %v3709_v34, %v3700_v36  ;;  %v3732_v41 = vadd.s32 %v3731_v29, %v3722_v48  ;;  %6233 = vtanh.f32 %v8723_v22 }
 0x577   : > { %v3923_v52 = vmul.f32 %v3921_v59, %v3921_v59  ;;  %v6016_v45 = vadd.s32 4294967169, %v3489_v44  ;;  %v3485_v12 = vand.u32 2147483647, %v9102_v8  ;;  %v3733_v38 = vmul.u32 %v9162_v6, %v3679_v14 }
 0x578   : > { %vm3735_vm7 = vc.u32 %v9216_v15, %v9218_v10  ;;  %v3736_v37 = vadd.s32 1, %v3732_v41  ;;  %v3305_v28 = vmul.f32 0.5, %v6232_v4  ;;  %v3939_v9 = vadd.s32 3, %v3922_v11 }
 0x579   : > { %v3924_v55 = vmul.f32 -0.001358992, %v3923_v52  ;;  %v3931_v54 = vmul.f32 -0.00019511016, %v3923_v52  ;;  %v3495_v21 = vadd.s32 1, %v6016_v45  ;;  %vm4460_vm10 = vcmp.ge.f32.partialorder %v8723_v22, 0.0 }
 0x57a   : > { %v3737_v20 = vsel %vm3735_vm7, %v3736_v37, %v3732_v41  ;;  %v4432_v32 = vmul.f32 %v8723_v22, %v7264_v60  ;;  %v3290_v33 = vmul.f32 0.5, %v8955_v24  ;;  %v3492_v16 = vand.u32 8388607, %v3485_v12 }
 0x57b   : > { %v3925_v17 = vadd.f32 0.041655596, %v3924_v55  ;;  %v3932_v26 = vadd.f32 0.008332121, %v3931_v54  ;;  %v3738_v57 = vadd.s32 %v3737_v20, %v3733_v38  ;;  %vm3496_vm9 = vcmp.gt.s32.totalorder %v3495_v21, 0 }
 0x57c   : > { %v3497_v6 = vsel %vm3496_vm9, %v3495_v21, 0  ;;  %v4467_v46 = vsel %vm4460_vm10, %v7294_v35, %v7288_v61  ;;  %v6234_v30 = vpop.eup %6233  ;;  %v3312_v42 = vadd.f32 0.5, %v3305_v28  ;;  %v3940_v58 = vand.u32 3, %v3939_v9 }
 0x57d   : > { %v3926_v27 = vmul.f32 %v3925_v17, %v3923_v52  ;;  %v3933_v4 = vmul.f32 %v3932_v26, %v3923_v52  ;;  %v3739_v23 = vadd.s32 536870912, %v3738_v57  ;;  %v3499_v47 = vand.u32 31, %v3497_v6 }
 0x57e   : > { %v9235_v40 = vadd.f32 %v3267_v50, %v3194_v63  ;;  %v4439_v13 = vadd.f32 %v4432_v32, %v7271_v51  ;;  %v9241_v0 = vmul.f32 %v4467_v46, %v8723_v22  ;;  %v3493_v36 = vor.u32 8388608, %v3492_v16 }
 0x57f   : > { %v3927_v25 = vadd.f32 -0.4999988, %v3926_v27  ;;  %v3934_v49 = vadd.f32 -0.16666654, %v3933_v4  ;;  %v9237_v62 = vshrl.u32 %v3739_v23, 30  ;;  %v9243_v34 = vsub.s32 32, %v3499_v47 }
 0x580   : > { %6235 = vtanh.f32 %v3290_v33  ;;  %v3326_v19 = vmul.f32 %v6234_v30, %v7260_v31  ;;  %vm3938_vm5 = vweird.f32 %v8723_v22  ;;  %vm3941_vm8 = vcmp.lt.s32.totalorder %v3940_v58, 2 }
 0x581   : > { %v3928_v48 = vmul.f32 %v3927_v25, %v3923_v52  ;;  %v3935_v29 = vmul.f32 %v3934_v49, %v3923_v52  ;;  %v3741_v7 = vshll.u32 %v9237_v62, 30  ;;  %vm3942_vm6 = vcmp.eq.s32.totalorder %v3940_v58, 0 }
 0x582   : > { %v4446_v14 = vmul.f32 %v4439_v13, %v3312_v42  ;;  %vm3945_vm13 = vcmp.eq.s32.totalorder %v3940_v58, 2  ;;  %v9248_v45 = vshrl.u32 %v3497_v6, 5  ;;  %v3503_v37 = vshrl.u32 %v10858_v2, %v9243_v34 }
 0x583   : > { %v3929_v44 = vadd.f32 1.0, %v3928_v48  ;;  %v3936_v41 = vadd.f32 1.0, %v3935_v29  ;;  %v3742_v11 = vsub.s32 %v3738_v57, %v3741_v7  ;;  %v3506_v52 = vshrl.u32 %v10859_v39, %v9243_v34 }
 0x584   : > { %v9254_v55 = vshll.u32 %v3493_v36, 8  ;;  %v3502_v28 = vshll.u32 %v10815_v43, %v3499_v47  ;;  %v3505_v9 = vshll.u32 %v10858_v2, %v3499_v47  ;;  %v3509_v20 = vshrl.u32 %v10811_v53, %v9243_v34 }
 0x585   : > { %v3937_v54 = vmul.f32 %v3936_v41, %v3921_v59  ;;  %v3946_v38 = vxor.u32 2147483648, %v3929_v44  ;;  %vm3743_vm11 = vcmp.lt.s32.totalorder %v3742_v11, 0  ;;  %v3744_v21 = vsub.s32 0, %v3742_v11 }
 0x586   : > { %v3512_v17 = vshrl.u32 %v10818_v56, %v9243_v34  ;;  %v9262_v26 = vpop.eup %6235  ;;  %v3511_v32 = vshll.u32 %v10811_v53, %v3499_v47  ;;  %v3515_v59 = vshrl.u32 %v10860_v1, %v9243_v34  ;;  %v3504_v16 = vor.u32 %v3503_v37, %v3502_v28 }
 0x587   : > { %v3943_v57 = vxor.u32 2147483648, %v3937_v54  ;;  %v3745_v50 = vsel %vm3743_vm11, %v3744_v21, %v3742_v11  ;;  %v9267_v6 = vor.u32 %v3506_v52, %v3505_v9  ;;  %v3508_v27 = vshll.u32 %v10859_v39, %v3499_v47 }
 0x588   : > { %v3746_v33 = vclz %v3745_v50  ;;  %v3947_v46 = vsel %vm3945_vm13, %v3946_v38, %v3937_v54  ;;  %v3513_v23 = vor.u32 %v3512_v17, %v3511_v32  ;;  %v3514_v30 = vshll.u32 %v10818_v56, %v3499_v47 }
 0x589   : > { %v3944_v4 = vsel %vm3942_vm6, %v3929_v44, %v3943_v57  ;;  %v3734_v42 = vadd.s32 %v9218_v10, %v9216_v15  ;;  %v3534_v49 = vand.u32 65535, %v9254_v55  ;;  %vm3642_vm15 = vcmp.lt.s32.totalorder %v8955_v24, 0 }
 0x58a   : > { %v3948_v63 = vsel %vm3941_vm8, %v3944_v4, %v3947_v46  ;;  %v6020_v25 = vadd.s32 4294967294, %v3746_v33  ;;  %v3510_v36 = vor.u32 %v3509_v20, %v3508_v27  ;;  %v3516_v48 = vor.u32 %v3515_v59, %v3514_v30 }
 0x58b   : > { %v3949_v13 = vsel %vm3938_vm5, nan, %v3948_v63  ;;  %vm3517_vm14 = vcmp.lt.s32.totalorder %v9248_v45, 1  ;;  %v3764_v58 = vsub.s32 4, %v9237_v62  ;;  %vm3520_vm2 = vcmp.lt.s32.totalorder %v9248_v45, 4 }
 0x58c   : > { %v4418_v29 = vmul.f32 %v3949_v13, %v7262_v3  ;;  %vm6021_vm12 = vcmp.lt.s32.totalorder %v6020_v25, 0  ;;  %vm3518_vm3 = vcmp.lt.s32.totalorder %v9248_v45, 2  ;;  %v3525_v22 = vsel %vm3517_vm14, %v3504_v16, %v9267_v6 }
 0x58d   : > { %v3749_v15 = vsel %vm6021_vm12, 0, %v6020_v25  ;;  %v3526_v10 = vsel %vm3520_vm2, %v3513_v23, 920167782  ;;  %vm3519_vm4 = vcmp.lt.s32.totalorder %v9248_v45, 3  ;;  %v3529_v52 = vsel %vm3517_vm14, %v9267_v6, %v3510_v36 }
 0x58e   : > { %v4425_v47 = vadd.f32 %v4418_v29, %v3326_v19  ;;  %v3750_v7 = vsub.s32 32, %v3749_v15  ;;  %v3754_v44 = vsub.s32 4294967266, %v3749_v15  ;;  %v3751_v41 = vshll.u32 %v3742_v11, %v3749_v15 }
 0x58f   : > { %v3527_v37 = vsel %vm3519_vm4, %v3510_v36, %v3526_v10  ;;  %v3530_v54 = vsel %vm3520_vm2, %v3516_v48, 1326507024  ;;  %v3535_v11 = vshrl.u32 %v9254_v55, 16  ;;  %vm9310_vm7 = vcmp.le.f32.partialorder %v3640_v18, 0.7853982 }
 0x590   : > { %v4453_v38 = vadd.f32 %v4446_v14, %v4425_v47  ;;  %v3752_v21 = vshrl.u32 %v3734_v42, %v3750_v7  ;;  %v3755_v28 = vadd.s32 127, %v3754_v44  ;;  %v3528_v19 = vsel %vm3518_vm3, %v3525_v22, %v3527_v37 }
 0x591   : > { %v3531_v9 = vsel %vm3519_vm4, %v3513_v23, %v3530_v54  ;;  %v3558_v20 = vand.u32 65535, %v3528_v19  ;;  %v3559_v17 = vshrl.u32 %v3528_v19, 16  ;;  %v3501_v14 = vshrl.u32 %v10815_v43, %v9243_v34 }
 0x592   : > { %v4481_v57 = vadd.f32 %v9241_v0, %v4453_v38  ;;  %v3753_v50 = vor.u32 %v3752_v21, %v3751_v41  ;;  %v3756_v32 = vshll.u32 %v3755_v28, 23  ;;  %v3532_v59 = vsel %vm3518_vm3, %v3529_v52, %v3531_v9 }
 0x593   : > { %v3536_v33 = vand.u32 65535, %v3532_v59  ;;  %v3537_v27 = vshrl.u32 %v3532_v59, 16  ;;  %v3561_v4 = vmul.u32 %v3559_v17, %v3534_v49  ;;  %v3765_v23 = vsel %vm3642_vm15, %v3764_v58, %v9237_v62 }
 0x594   : > { %4572 = vmatpush.msrb.mxu0 %v4481_v57  ;;  %6096 = vmatpush.msra.mxu3 %v4481_v57  ;;  %v3757_v0 = vor.u32 4788187, %v3756_v32  ;;  %v3562_v30 = vmul.u32 %v3558_v20, %v3535_v11  ;;  %v3521_v34 = vsel %vm3517_vm14, %v3501_v14, %v3504_v16  ;;  %v3522_v63 = vsel %vm3520_vm2, %v3510_v36, 2102212464 }
 0x595   : > { %v3539_v42 = vmul.u32 %v3537_v27, %v3534_v49  ;;  %v3540_v25 = vmul.u32 %v3536_v33, %v3535_v11  ;;  %v3760_v48 = vcvt.s32.f32 %v3753_v50  ;;  %v3560_v18 = vmul.u32 %v3558_v20, %v3534_v49 }
 0x596   : > { %v3758_v13 = vand.u32 2147483647, %v3757_v0  ;;  %v3564_v29 = vshll.u32 %v3561_v4, 16  ;;  %v3538_v15 = vmul.u32 %v3536_v33, %v3534_v49  ;;  %v3541_v22 = vmul.u32 %v3537_v27, %v3535_v11 }
 0x597   : > { %v3542_v10 = vshll.u32 %v3539_v42, 16  ;;  %v3563_v47 = vmul.u32 %v3559_v17, %v3535_v11  ;;  %v3566_v44 = vshll.u32 %v3562_v30, 16  ;;  %v3544_v58 = vshll.u32 %v3540_v25, 16 }
 0x598   : > { %v3761_v7 = vmul.f32 %v3760_v48, %v3758_v13  ;;  %vm3568_vm10 = vc.u32 %v3560_v18, %v3564_v29  ;;  %v3570_v62 = vadd.s32 %v3564_v29, %v3560_v18  ;;  %v3523_v49 = vsel %vm3519_vm4, %v9267_v6, %v3522_v63 }
 0x599   : > { %vm3546_vm9 = vc.u32 %v3538_v15, %v3542_v10  ;;  %v3548_v16 = vadd.s32 %v3542_v10, %v3538_v15  ;;  %v3569_v41 = vsel %vm3568_vm10, 1, %v10813_v5  ;;  %v3565_v19 = vshrl.u32 %v3561_v4, 16 }
 0x59a   : > { %v3762_v36 = vxor.u32 2147483648, %v3761_v7  ;;  %v3547_v37 = vsel %vm3546_vm9, 1, %v10813_v5  ;;  %v3571_v52 = vadd.s32 %v3569_v41, %v3563_v47  ;;  %vm3572_vm5 = vc.u32 %v3570_v62, %v3566_v44 }
 0x59b   : > { %v3549_v54 = vadd.s32 %v3547_v37, %v3541_v22  ;;  %vm3550_vm8 = vc.u32 %v3548_v16, %v3544_v58  ;;  %v3573_v38 = vsel %vm3572_vm5, 1, %v10813_v5  ;;  %6237 = vtanh.f32 %v8955_v24 }
 0x59c   : > { %v3763_v21 = vsel %vm3642_vm15, %v3762_v36, %v3761_v7  ;;  %v3551_v28 = vsel %vm3550_vm8, 1, %v10813_v5  ;;  %v3575_v9 = vadd.s32 %v3573_v38, %v3571_v52  ;;  %v3543_v20 = vshrl.u32 %v3539_v42, 16 }
 0x59d   : > { %v3766_v11 = vsel %vm9310_vm7, %v8955_v24, %v3763_v21  ;;  %v3553_v17 = vadd.s32 %v3551_v28, %v3549_v54  ;;  %v3567_v57 = vshrl.u32 %v3562_v30, 16  ;;  %v3333_v32 = vand.u32 2139095040, %v9235_v40 }
 0x59e   : > { %v3768_v6 = vmul.f32 %v3766_v11, %v3766_v11  ;;  %v3576_v50 = vadd.s32 %v3575_v9, %v3565_v19  ;;  %v3767_v59 = vsel %vm9310_vm7, 0, %v3765_v23  ;;  %v3524_v14 = vsel %vm3518_vm3, %v3521_v34, %v3523_v49 }
 0x59f   : > { %v3545_v33 = vshrl.u32 %v3540_v25, 16  ;;  %v3554_v27 = vadd.s32 %v3553_v17, %v3543_v20  ;;  %v3334_v13 = vshrl.u32 %v3333_v32, 23  ;;  %v9341_v42 = vadd.s32 %v3570_v62, %v3566_v44 }
 0x5a0   : > { %v3769_v4 = vmul.f32 -0.001358992, %v3768_v6  ;;  %v3776_v0 = vmul.f32 -0.00019511016, %v3768_v6  ;;  %v3577_v63 = vadd.s32 %v3576_v50, %v3567_v57  ;;  %v3784_v46 = vadd.s32 3, %v3767_v59 }
 0x5a1   : > { %v9339_v48 = vadd.s32 %v3554_v27, %v3545_v33  ;;  %v6013_v15 = vadd.s32 4294967169, %v3334_v13  ;;  %v6238_v22 = vpop.eup %6237  ;;  %v3578_v23 = vmul.u32 %v9254_v55, %v3524_v14  ;;  %v3304_v47 = vmul.f32 0.5, %v9262_v26 }
 0x5a2   : > { %v3770_v30 = vadd.f32 0.041655596, %v3769_v4  ;;  %v3777_v18 = vadd.f32 0.008332121, %v3776_v0  ;;  %v3581_v29 = vadd.s32 1, %v3577_v63  ;;  %v3785_v58 = vand.u32 3, %v3784_v46 }
 0x5a3   : > { %vm3580_vm6 = vc.u32 %v9339_v48, %v9341_v42  ;;  %v3340_v10 = vadd.s32 1, %v6013_v15  ;;  %v4431_v16 = vmul.f32 %v8955_v24, %v7264_v60  ;;  %vm4459_vm11 = vcmp.ge.f32.partialorder %v8955_v24, 0.0 }
 0x5a4   : > { %v3771_v45 = vmul.f32 %v3770_v30, %v3768_v6  ;;  %v3778_v34 = vmul.f32 %v3777_v18, %v3768_v6  ;;  %v3582_v25 = vsel %vm3580_vm6, %v3581_v29, %v3577_v63  ;;  %v3311_v49 = vadd.f32 0.5, %v3304_v47 }
 0x5a5   : > { %v3583_v7 = vadd.s32 %v3582_v25, %v3578_v23  ;;  %vm3341_vm13 = vcmp.gt.s32.totalorder %v3340_v10, 0  ;;  %v3325_v54 = vmul.f32 %v6238_v22, %v7260_v31  ;;  %v3330_v26 = vand.u32 2147483647, %v9235_v40 }
 0x5a6   : > { %v3772_v44 = vadd.f32 -0.4999988, %v3771_v45  ;;  %v3779_v62 = vadd.f32 -0.16666654, %v3778_v34  ;;  %v3342_v36 = vsel %vm3341_vm13, %v3340_v10, 0  ;;  %vm3783_vm15 = vweird.f32 %v8955_v24 }
 0x5a7   : > { %v3584_v41 = vadd.s32 536870912, %v3583_v7  ;;  %v3344_v52 = vand.u32 31, %v3342_v36  ;;  %vm3786_vm14 = vcmp.lt.s32.totalorder %v3785_v58, 2  ;;  %v4438_v9 = vadd.f32 %v4431_v16, %v7271_v51 }
 0x5a8   : > { %v3773_v55 = vmul.f32 %v3772_v44, %v3768_v6  ;;  %v3780_v37 = vmul.f32 %v3779_v62, %v3768_v6  ;;  %v4466_v20 = vsel %vm4459_vm11, %v7294_v35, %v7288_v61  ;;  %vm3787_vm12 = vcmp.eq.s32.totalorder %v3785_v58, 0 }
 0x5a9   : > { %v9351_v38 = vshrl.u32 %v3584_v41, 30  ;;  %v9355_v19 = vsub.s32 32, %v3344_v52  ;;  %vm3790_vm2 = vcmp.eq.s32.totalorder %v3785_v58, 2  ;;  %v3337_v32 = vand.u32 8388607, %v3330_v26 }
 0x5aa   : > { %v3774_v21 = vadd.f32 1.0, %v3773_v55  ;;  %v3781_v28 = vadd.f32 1.0, %v3780_v37  ;;  %v9367_v27 = vshrl.u32 %v3342_v36, 5  ;;  %v3347_v4 = vshll.u32 %v10815_v43, %v3344_v52 }
 0x5ab   : > { %v3586_v17 = vshll.u32 %v9351_v38, 30  ;;  %v3348_v59 = vshrl.u32 %v10858_v2, %v9355_v19  ;;  %v3351_v14 = vshrl.u32 %v10859_v39, %v9355_v19  ;;  %v3353_v63 = vshll.u32 %v10859_v39, %v3344_v52 }
 0x5ac   : > { %v3782_v6 = vmul.f32 %v3781_v28, %v3766_v11  ;;  %v3791_v57 = vxor.u32 2147483648, %v3774_v21  ;;  %v3350_v11 = vshll.u32 %v10858_v2, %v3344_v52  ;;  %v3354_v13 = vshrl.u32 %v10811_v53, %v9355_v19 }
 0x5ad   : > { %v3587_v50 = vsub.s32 %v3583_v7, %v3586_v17  ;;  %v3356_v29 = vshll.u32 %v10811_v53, %v3344_v52  ;;  %v3357_v15 = vshrl.u32 %v10818_v56, %v9355_v19  ;;  %v9378_v23 = vor.u32 %v3348_v59, %v3347_v4 }
 0x5ae   : > { %v3788_v33 = vxor.u32 2147483648, %v3782_v6  ;;  %v3792_v18 = vsel %vm3790_vm2, %v3791_v57, %v3782_v6  ;;  %v9380_v45 = vor.u32 %v3351_v14, %v3350_v11  ;;  %v3360_v47 = vshrl.u32 %v10860_v1, %v9355_v19 }
 0x5af   : > { %vm3588_vm3 = vcmp.lt.s32.totalorder %v3587_v50, 0  ;;  %v3589_v0 = vsub.s32 0, %v3587_v50  ;;  %v3358_v10 = vor.u32 %v3357_v15, %v3356_v29  ;;  %v3338_v44 = vor.u32 8388608, %v3337_v32 }
 0x5b0   : > { %v3789_v30 = vsel %vm3787_vm12, %v3774_v21, %v3788_v33  ;;  %v9387_v62 = vor.u32 %v3354_v13, %v3353_v63  ;;  %v3359_v58 = vshll.u32 %v10818_v56, %v3344_v52  ;;  %v4445_v16 = vmul.f32 %v4438_v9, %v3311_v49 }
 0x5b1   : > { %v3793_v22 = vsel %vm3786_vm14, %v3789_v30, %v3792_v18  ;;  %v3590_v46 = vsel %vm3588_vm3, %v3589_v0, %v3587_v50  ;;  %v4473_v41 = vmul.f32 %v4466_v20, %v8955_v24  ;;  %vm3362_vm4 = vcmp.lt.s32.totalorder %v9367_v27, 1 }
 0x5b2   : > { %v3794_v34 = vsel %vm3783_vm15, nan, %v3793_v22  ;;  %v3591_v25 = vclz %v3590_v46  ;;  %v3361_v37 = vor.u32 %v3360_v47, %v3359_v58  ;;  %vm3365_vm7 = vcmp.lt.s32.totalorder %v9367_v27, 4 }
 0x5b3   : > { %v4417_v7 = vmul.f32 %v3794_v34, %v7262_v3  ;;  %vm3364_vm9 = vcmp.lt.s32.totalorder %v9367_v27, 3  ;;  %v3370_v21 = vsel %vm3362_vm4, %v9378_v23, %v9380_v45  ;;  %v3371_v52 = vsel %vm3365_vm7, %v3358_v10, 920167782 }
 0x5b4   : > { %v6017_v36 = vadd.s32 4294967294, %v3591_v25  ;;  %v9403_v28 = vshll.u32 %v3338_v44, 8  ;;  %v3579_v9 = vadd.s32 %v9341_v42, %v9339_v48  ;;  %vm3363_vm5 = vcmp.lt.s32.totalorder %v9367_v27, 2 }
 0x5b5   : > { %v4424_v55 = vadd.f32 %v4417_v7, %v3325_v54  ;;  %v3372_v54 = vsel %vm3364_vm9, %v9387_v62, %v3371_v52  ;;  %v3374_v32 = vsel %vm3362_vm4, %v9380_v45, %v9387_v62  ;;  %v3375_v59 = vsel %vm3365_vm7, %v3361_v37, 1326507024 }
 0x5b6   : > { %vm6018_vm10 = vcmp.lt.s32.totalorder %v6017_v36, 0  ;;  %v3373_v57 = vsel %vm3363_vm5, %v3370_v21, %v3372_v54  ;;  %v3376_v48 = vsel %vm3364_vm9, %v3358_v10, %v3375_v59  ;;  %v3379_v11 = vand.u32 65535, %v9403_v28 }
 0x5b7   : > { %v4452_v49 = vadd.f32 %v4445_v16, %v4424_v55  ;;  %v3594_v24 = vsel %vm6018_vm10, 0, %v6017_v36  ;;  %v3377_v42 = vsel %vm3363_vm5, %v3374_v32, %v3376_v48  ;;  %v3403_v0 = vand.u32 65535, %v3373_v57 }
 0x5b8   : > { %v3595_v20 = vsub.s32 32, %v3594_v24  ;;  %v3599_v17 = vsub.s32 4294967266, %v3594_v24  ;;  %v3596_v14 = vshll.u32 %v3587_v50, %v3594_v24  ;;  %v3404_v63 = vshrl.u32 %v3373_v57, 16 }
 0x5b9   : > { %v4480_v6 = vadd.f32 %v4473_v41, %v4452_v49  ;;  %v3381_v18 = vand.u32 65535, %v3377_v42  ;;  %v3382_v29 = vshrl.u32 %v3377_v42, 16  ;;  %v3380_v50 = vshrl.u32 %v9403_v28, 16 }
 0x5ba   : > { %v3597_v33 = vshrl.u32 %v3579_v9, %v3595_v20  ;;  %v3600_v4 = vadd.s32 127, %v3599_v17  ;;  %v3406_v15 = vmul.u32 %v3404_v63, %v3379_v11  ;;  %vm9424_vm8 = vcmp.le.f32.partialorder %v3485_v12, 0.7853982 }
 0x5bb   : > { %4573 = vmatpush.msrb.mxu0 %v4480_v6  ;;  %6097 = vmatpush.msra.mxu3 %v4480_v6  ;;  %vm3487_vm6 = vcmp.lt.s32.totalorder %v9102_v8, 0  ;;  %v3384_v34 = vmul.u32 %v3382_v29, %v3379_v11  ;;  %v3385_v25 = vmul.u32 %v3381_v18, %v3380_v50  ;;  %v3405_v10 = vmul.u32 %v3403_v0, %v3379_v11 }
 0x5bc   : > { %v3598_v13 = vor.u32 %v3597_v33, %v3596_v14  ;;  %v3601_v30 = vshll.u32 %v3600_v4, 23  ;;  %v3407_v47 = vmul.u32 %v3403_v0, %v3380_v50  ;;  %v3409_v7 = vshll.u32 %v3406_v15, 16 }
 0x5bd   : > { %v3383_v16 = vmul.u32 %v3381_v18, %v3379_v11  ;;  %v3387_v41 = vshll.u32 %v3384_v34, 16  ;;  %v3386_v36 = vmul.u32 %v3382_v29, %v3380_v50  ;;  %v3389_v55 = vshll.u32 %v3385_v25, 16 }
 0x5be   : > { %v3602_v46 = vor.u32 4788187, %v3601_v30  ;;  %v3605_v58 = vcvt.s32.f32 %v3598_v13  ;;  %v3408_v37 = vmul.u32 %v3404_v63, %v3380_v50  ;;  %vm3413_vm13 = vc.u32 %v3405_v10, %v3409_v7 }
 0x5bf   : > { %vm3391_vm11 = vc.u32 %v3383_v16, %v3387_v41  ;;  %v3393_v21 = vadd.s32 %v3387_v41, %v3383_v16  ;;  %v3414_v52 = vsel %vm3413_vm13, 1, %v10813_v5  ;;  %v3411_v24 = vshll.u32 %v3407_v47, 16 }
 0x5c0   : > { %v3603_v44 = vand.u32 2147483647, %v3602_v46  ;;  %v3392_v49 = vsel %vm3391_vm11, 1, %v10813_v5  ;;  %v3415_v54 = vadd.s32 %v3409_v7, %v3405_v10  ;;  %v3416_v9 = vadd.s32 %v3414_v52, %v3408_v37 }
 0x5c1   : > { %v3609_v17 = vsub.s32 4, %v9351_v38  ;;  %v3394_v6 = vadd.s32 %v3392_v49, %v3386_v36  ;;  %vm3395_vm15 = vc.u32 %v3393_v21, %v3389_v55  ;;  %v3346_v57 = vshrl.u32 %v10815_v43, %v9355_v19 }
 0x5c2   : > { %v3606_v12 = vmul.f32 %v3605_v58, %v3603_v44  ;;  %v3367_v32 = vsel %vm3365_vm7, %v9387_v62, 2102212464  ;;  %v3396_v59 = vsel %vm3395_vm15, 1, %v10813_v5  ;;  %vm3417_vm14 = vc.u32 %v3415_v54, %v3411_v24 }
 0x5c3   : > { %v3388_v33 = vshrl.u32 %v3384_v34, 16  ;;  %v3398_v4 = vadd.s32 %v3396_v59, %v3394_v6  ;;  %v3418_v48 = vsel %vm3417_vm14, 1, %v10813_v5  ;;  %v3366_v19 = vsel %vm3362_vm4, %v3346_v57, %v9378_v23 }
 0x5c4   : > { %v3607_v20 = vxor.u32 2147483648, %v3606_v12  ;;  %v3410_v11 = vshrl.u32 %v3406_v15, 16  ;;  %v3420_v62 = vadd.s32 %v3418_v48, %v3416_v9  ;;  %v3368_v63 = vsel %vm3364_vm9, %v9380_v45, %v3367_v32 }
 0x5c5   : > { %v3390_v13 = vshrl.u32 %v3385_v25, 16  ;;  %v3399_v30 = vadd.s32 %v3398_v4, %v3388_v33  ;;  %v3289_v18 = vmul.f32 0.5, %v9102_v8  ;;  %v3412_v29 = vshrl.u32 %v3407_v47, 16 }
 0x5c6   : > { %v3608_v14 = vsel %vm3487_vm6, %v3607_v20, %v3606_v12  ;;  %v3421_v50 = vadd.s32 %v3420_v62, %v3410_v11  ;;  %v3419_v7 = vadd.s32 %v3415_v54, %v3411_v24  ;;  %v3610_v23 = vsel %vm3487_vm6, %v3609_v17, %v9351_v38 }
 0x5c7   : > { %v3611_v42 = vsel %vm9424_vm8, %v9102_v8, %v3608_v14  ;;  %v3400_v10 = vadd.s32 %v3399_v30, %v3390_v13  ;;  %v3369_v15 = vsel %vm3363_vm5, %v3366_v19, %v3368_v63  ;;  %6239 = vtanh.f32 %v3289_v18 }
 0x5c8   : > { %v3613_v0 = vmul.f32 %v3611_v42, %v3611_v42  ;;  %v3422_v44 = vadd.s32 %v3421_v50, %v3412_v29  ;;  %v3612_v47 = vsel %vm9424_vm8, 0, %v3610_v23  ;;  %v3423_v36 = vmul.u32 %v9403_v28, %v3369_v15 }
 0x5c9   : > { %vm3425_vm12 = vc.u32 %v3400_v10, %v3419_v7  ;;  %v3629_v21 = vadd.s32 3, %v3612_v47  ;;  %6241 = vtanh.f32 %v9102_v8  ;;  %v4430_v14 = vmul.f32 %v9102_v8, %v7264_v60 }
 0x5ca   : > { %v3614_v46 = vmul.f32 -0.001358992, %v3613_v0  ;;  %v3621_v34 = vmul.f32 -0.00019511016, %v3613_v0  ;;  %v3426_v25 = vadd.s32 1, %v3422_v44  ;;  %vm3628_vm10 = vweird.f32 %v9102_v8 }
 0x5cb   : > { %v3630_v22 = vand.u32 3, %v3629_v21  ;;  %vm4458_vm9 = vcmp.ge.f32.partialorder %v9102_v8, 0.0  ;;  %v4437_v30 = vadd.f32 %v4430_v14, %v7271_v51  ;;  %vm3332_vm8 = vcmp.lt.s32.totalorder %v9235_v40, 0 }
 0x5cc   : > { %v3615_v58 = vadd.f32 0.041655596, %v3614_v46  ;;  %v3622_v45 = vadd.f32 0.008332121, %v3621_v34  ;;  %v3427_v55 = vsel %vm3425_vm12, %v3426_v25, %v3422_v44  ;;  %v4465_v29 = vsel %vm4458_vm9, %v7294_v35, %v7288_v61 }
 0x5cd   : > { %v3428_v38 = vadd.s32 %v3427_v55, %v3423_v36  ;;  %v6240_v24 = vpop.eup %6239  ;;  %vm3631_vm2 = vcmp.lt.s32.totalorder %v3630_v22, 2  ;;  %vm3632_vm3 = vcmp.eq.s32.totalorder %v3630_v22, 0  ;;  %vm3635_vm4 = vcmp.eq.s32.totalorder %v3630_v22, 2 }
 0x5ce   : > { %v3616_v16 = vmul.f32 %v3615_v58, %v3613_v0  ;;  %v3623_v41 = vmul.f32 %v3622_v45, %v3613_v0  ;;  %v3303_v32 = vmul.f32 0.5, %v6240_v24  ;;  %v4472_v15 = vmul.f32 %v4465_v29, %v9102_v8  ;;  %v4504_v8 = vpop.permute.xlu2 %4503 }
 0x5cf   : > { %v3429_v49 = vadd.s32 536870912, %v3428_v38  ;;  %v6242_v33 = vpop.eup %6241  ;;  %v3424_v45 = vadd.s32 %v3419_v7, %v3400_v10  ;;  %vm9473_vm6 = vcmp.le.f32.partialorder %v3330_v26, 0.7853982  ;;  %vm3473_vm14 = vweird.f32 %v9235_v40 }
 0x5d0   : > { %v3617_v37 = vadd.f32 -0.4999988, %v3616_v16  ;;  %v3624_v12 = vadd.f32 -0.16666654, %v3623_v41  ;;  %v3310_v11 = vadd.f32 0.5, %v3303_v32  ;;  %v3324_v63 = vmul.f32 %v6242_v33, %v7260_v31 }
 0x5d1   : > { %v3430_v20 = vshrl.u32 %v3429_v49, 30  ;;  %vm4457_vm12 = vcmp.ge.f32.partialorder %v9235_v40, 0.0 }
 0x5d2   : > { %v3618_v27 = vmul.f32 %v3617_v37, %v3613_v0  ;;  %v3625_v52 = vmul.f32 %v3624_v12, %v3613_v0  ;;  %v4444_v46 = vmul.f32 %v4437_v30, %v3310_v11  ;;  %v4429_v30 = vmul.f32 %v9235_v40, %v7264_v60 }
 0x5d3   : > { %v3431_v57 = vshll.u32 %v3430_v20, 30  ;;  %v3454_v7 = vsub.s32 4, %v3430_v20 }
 0x5d4   : > { %v3619_v54 = vadd.f32 1.0, %v3618_v27  ;;  %v3626_v9 = vadd.f32 1.0, %v3625_v52 }
 0x5d5   : > { %v3432_v59 = vsub.s32 %v3428_v38, %v3431_v57 }
 0x5d6   : > { %v3627_v17 = vmul.f32 %v3626_v9, %v3611_v42  ;;  %v3636_v6 = vxor.u32 2147483648, %v3619_v54 }
 0x5d7   : > { %vm3433_vm7 = vcmp.lt.s32.totalorder %v3432_v59, 0  ;;  %v3434_v19 = vsub.s32 0, %v3432_v59 }
 0x5d8   : > { %v3633_v28 = vxor.u32 2147483648, %v3627_v17  ;;  %v3637_v48 = vsel %vm3635_vm4, %v3636_v6, %v3627_v17  ;;  %v3455_v17 = vsel %vm3332_vm8, %v3454_v7, %v3430_v20 }
 0x5d9   : > { %v3435_v0 = vsel %vm3433_vm7, %v3434_v19, %v3432_v59  ;;  %v3457_v26 = vsel %vm9473_vm6, 0, %v3455_v17 }
 0x5da   : > { %v3634_v4 = vsel %vm3632_vm3, %v3619_v54, %v3633_v28  ;;  %v3436_v18 = vclz %v3435_v0  ;;  %v3288_v54 = vmul.f32 0.5, %v9235_v40  ;;  %v3474_v33 = vadd.s32 3, %v3457_v26 }
 0x5db   : > { %v3638_v42 = vsel %vm3631_vm2, %v3634_v4, %v3637_v48 }
 0x5dc   : > { %v3639_v62 = vsel %vm3628_vm10, nan, %v3638_v42  ;;  %v6014_v34 = vadd.s32 4294967294, %v3436_v18  ;;  %6243 = vtanh.f32 %v3288_v54 }
 0x5dd   : > { %v4416_v13 = vmul.f32 %v3639_v62, %v7262_v3  ;;  %6245 = vtanh.f32 %v9235_v40  ;;  %v3475_v62 = vand.u32 3, %v3474_v33 }
 0x5de   : > { %vm6015_vm5 = vcmp.lt.s32.totalorder %v6014_v34, 0 }
 0x5df   : > { %v4423_v50 = vadd.f32 %v4416_v13, %v3324_v63  ;;  %v3439_v44 = vsel %vm6015_vm5, 0, %v6014_v34  ;;  %vm3477_vm13 = vcmp.eq.s32.totalorder %v3475_v62, 0  ;;  %vm3480_vm11 = vcmp.eq.s32.totalorder %v3475_v62, 2 }
 0x5e0   : > { %v3440_v25 = vsub.s32 32, %v3439_v44  ;;  %v3444_v47 = vsub.s32 4294967266, %v3439_v44  ;;  %v3441_v16 = vshll.u32 %v3432_v59, %v3439_v44  ;;  %vm3476_vm15 = vcmp.lt.s32.totalorder %v3475_v62, 2 }
 0x5e1   : > { %v4451_v23 = vadd.f32 %v4444_v46, %v4423_v50 }
 0x5e2   : > { %v3442_v41 = vshrl.u32 %v3424_v45, %v3440_v25  ;;  %v3445_v36 = vadd.s32 127, %v3444_v47  ;;  %v6244_v19 = vpop.eup %6243  ;;  %v4464_v45 = vsel %vm4457_vm12, %v7294_v35, %v7288_v61 }
 0x5e3   : > { %v4479_v58 = vadd.f32 %v4472_v15, %v4451_v23  ;;  %v3302_v63 = vmul.f32 0.5, %v6244_v19  ;;  %v6246_v18 = vpop.eup %6245 }
 0x5e4   : > { %v3443_v55 = vor.u32 %v3442_v41, %v3441_v16  ;;  %v3446_v37 = vshll.u32 %v3445_v36, 23  ;;  %v3323_v15 = vmul.f32 %v6246_v18, %v7260_v31  ;;  %v4471_v41 = vmul.f32 %v4464_v45, %v9235_v40 }
 0x5e5   : > { %4574 = vmatpush.msrb.mxu0 %v4479_v58  ;;  %6098 = vmatpush.msra.mxu3 %v4479_v58  ;;  %v3309_v46 = vadd.f32 0.5, %v3302_v63  ;;  %v4436_v58 = vadd.f32 %v4429_v30, %v7271_v51 }
 0x5e6   : > { %v3447_v12 = vor.u32 4788187, %v3446_v37  ;;  %v3450_v21 = vcvt.s32.f32 %v3443_v55  ;;  %v6034_v55 = vld [vmem:[%s10795_s7 + $0x70] sm:$0xff]  ;;  %v6035_v37 = vld [vmem:[%s10795_s7 + $0x78] sm:$0xff] }
 0x5e7   : > { %v4443_v47 = vmul.f32 %v4436_v58, %v3309_v46  ;;  %v4514_v58 = vpop.permute.xlu1 %4513 }
 0x5e8   : > { %v3448_v38 = vand.u32 2147483647, %v3447_v12  ;;  %v6036_v12 = vld [vmem:[%s10795_s7 + $0x80] sm:$0xff] }
 0x5ea   : > { %v3451_v27 = vmul.f32 %v3450_v21, %v3448_v38  ;;  %v6038_v38 = vld [vmem:[%s10795_s7 + $0x90] sm:$0xff]  ;;  %v6039_v21 = vld [vmem:[%s10795_s7 + $0x98] sm:$0xff] }
 0x5ec   : > { %v3452_v52 = vxor.u32 2147483648, %v3451_v27 }
 0x5ee   : > { %v3453_v10 = vsel %vm3332_vm8, %v3452_v52, %v3451_v27  ;;  %v6040_v27 = vld [vmem:[%s10795_s7 + $0xa0] sm:$0x3] }
 0x5ef   : > { %v3456_v49 = vsel %vm9473_vm6, %v9235_v40, %v3453_v10  ;;  %v6037_v40 = vld [vmem:[%s10795_s7 + $0x88] sm:$0xff] }
 0x5f0   : > { %v3458_v24 = vmul.f32 %v3456_v49, %v3456_v49 }
 0x5f2   : > { %v3459_v9 = vmul.f32 -0.001358992, %v3458_v24  ;;  %v3466_v22 = vmul.f32 -0.00019511016, %v3458_v24 }
 0x5f4   : > { %v3460_v6 = vadd.f32 0.041655596, %v3459_v9  ;;  %v3467_v57 = vadd.f32 0.008332121, %v3466_v22  ;;  %v4509_v22 = vpop.permute.xlu0 %4508 }
 0x5f6   : > { %v3461_v32 = vmul.f32 %v3460_v6, %v3458_v24  ;;  %v3468_v28 = vmul.f32 %v3467_v57, %v3458_v24 }
 0x5f8   : > { %v3462_v59 = vadd.f32 -0.4999988, %v3461_v32  ;;  %v3469_v14 = vadd.f32 -0.16666654, %v3468_v28 }
 0x5fa   : > { %v3463_v4 = vmul.f32 %v3462_v59, %v3458_v24  ;;  %v3470_v48 = vmul.f32 %v3469_v14, %v3458_v24 }
 0x5fc   : > { %v3464_v11 = vadd.f32 1.0, %v3463_v4  ;;  %v3471_v42 = vadd.f32 1.0, %v3470_v48 }
 0x5fe   : > { %v3472_v20 = vmul.f32 %v3471_v42, %v3456_v49  ;;  %v3481_v0 = vxor.u32 2147483648, %v3464_v11 }
 0x600   : > { %v3478_v13 = vxor.u32 2147483648, %v3472_v20  ;;  %v3482_v50 = vsel %vm3480_vm11, %v3481_v0, %v3472_v20 }
 0x602   : > { %v3479_v29 = vsel %vm3477_vm13, %v3464_v11, %v3478_v13 }
 0x603   : > { %v3483_v34 = vsel %vm3476_vm15, %v3479_v29, %v3482_v50 }
 0x604   : > { %v3484_v23 = vsel %vm3473_vm14, nan, %v3483_v34 }
 0x605   : > { %v4415_v44 = vmul.f32 %v3484_v23, %v7262_v3 }
 0x607   : > { %v4422_v25 = vadd.f32 %v4415_v44, %v3323_v15 }
 0x609   : > { %v4450_v16 = vadd.f32 %v4443_v47, %v4422_v25 }
 0x60b   : > { %v4478_v36 = vadd.f32 %v4471_v41, %v4450_v16 }
 0x60d   : > { %4575 = vmatpush.msrb.mxu0 %v4478_v36  ;;  %6099 = vmatpush.msra.mxu3 %v4478_v36 }
 0x60e   : > { %6049 = vmatmul.msk.f32.vlgmr.msrb.gmra.mxu0 %vm1914_vm0, %v6034_v55  ;;  %6050 = vmatmul.msk.f32.vlgmr.msra.gmra.mxu3 %vm1914_vm0, %v6035_v37 }
 0x616   : > { %6051 = vmatmul.msk.f32.gmra.mxu3 %vm1914_vm0, %v6036_v12 }
 0x61e   : > { %6052 = vmatmul.msk.f32.gmra.mxu3 %vm1914_vm0, %v6037_v40 }
 0x626   : > { %6053 = vmatmul.msk.f32.gmra.mxu3 %vm1914_vm0, %v6038_v38 }
 0x62e   : > { %6054 = vmatmul.msk.f32.gmra.mxu3 %vm1914_vm0, %v6039_v21 }
 0x636   : > { %6055 = vmatmul.msk.f32.gmra.mxu3 %vm1914_vm0, %v6040_v27 }
 0x68b   : > { %v4577_v52 = vpop.f32.mrf.mxu0 }
 0x68c   : > { %v9522_v10 = vadd.f32 %v4577_v52, %v4504_v8 }
 0x68e   : > { %10902 = vst [vmem:[#allocation12_spill] sm:$0xff] %v9522_v10  ;;  %v4643_v7 = vand.u32 2139095040, %v9522_v10  ;;  %v10810_v14 = vand.u32 2147483647, %v9522_v10  ;;  %6247 = vtanh.f32 %v9522_v10 }
 0x690   : > { %v4644_v49 = vshrl.u32 %v4643_v7, 23  ;;  %v4647_v11 = vand.u32 8388607, %v10810_v14 }
 0x691   : > { %v4580_v9 = vpop.f32.mrf.mxu3 }
 0x692   : > { %v6056_v24 = vadd.s32 4294967169, %v4644_v49  ;;  %v9525_v17 = vadd.f32 %v4580_v9, %v4509_v22  ;;  %v4648_v44 = vor.u32 8388608, %v4647_v11 }
 0x694   : > { %v4650_v54 = vadd.s32 1, %v6056_v24  ;;  %10903 = vst [vmem:[#allocation13_spill] sm:$0xff] %v9525_v17  ;;  %v4798_v57 = vand.u32 2139095040, %v9525_v17  ;;  %v9561_v12 = vshll.u32 %v4648_v44, 8 }
 0x696   : > { %vm4651_vm2 = vcmp.gt.s32.totalorder %v4650_v54, 0  ;;  %v4799_v32 = vshrl.u32 %v4798_v57, 23  ;;  %v4689_v8 = vand.u32 65535, %v9561_v12  ;;  %v4690_v7 = vshrl.u32 %v9561_v12, 16 }
 0x697   : > { %v4652_v6 = vsel %vm4651_vm2, %v4650_v54, 0 }
 0x698   : > { %v4654_v26 = vand.u32 31, %v4652_v6  ;;  %v6059_v59 = vadd.s32 4294967169, %v4799_v32  ;;  %v9539_v13 = vshrl.u32 %v4652_v6, 5 }
 0x699   : > { %v4583_v34 = vpop.f32.mrf.mxu3 }
 0x69a   : > { %v4655_v28 = vsub.s32 32, %v4654_v26  ;;  %v4805_v19 = vadd.s32 1, %v6059_v59  ;;  %v4657_v42 = vshll.u32 %v10815_v43, %v4654_v26  ;;  %v4660_v62 = vshll.u32 %v10858_v2, %v4654_v26 }
 0x69b   : > { %v4663_v20 = vshll.u32 %v10859_v39, %v4654_v26  ;;  %v4666_v30 = vshll.u32 %v10811_v53, %v4654_v26  ;;  %v4669_v18 = vshll.u32 %v10818_v56, %v4654_v26  ;;  %vm4672_vm3 = vcmp.lt.s32.totalorder %v9539_v13, 1  ;;  %v4519_v26 = vpop.permute.xlu2 %4518 }
 0x69c   : > { %v4658_v33 = vshrl.u32 %v10858_v2, %v4655_v28  ;;  %v4661_v4 = vshrl.u32 %v10859_v39, %v4655_v28  ;;  %v4664_v48 = vshrl.u32 %v10811_v53, %v4655_v28  ;;  %v4667_v0 = vshrl.u32 %v10818_v56, %v4655_v28 }
 0x69d   : > { %v4670_v63 = vshrl.u32 %v10860_v1, %v4655_v28  ;;  %vm4806_vm0 = vcmp.gt.s32.totalorder %v4805_v19, 0  ;;  %v9544_v45 = vadd.f32 %v4583_v34, %v4514_v58  ;;  %vm4675_vm4 = vcmp.lt.s32.totalorder %v9539_v13, 4 }
 0x69e   : > { %v4659_v29 = vor.u32 %v4658_v33, %v4657_v42  ;;  %v4662_v50 = vor.u32 %v4661_v4, %v4660_v62  ;;  %v4665_v46 = vor.u32 %v4664_v48, %v4663_v20  ;;  %v4668_v23 = vor.u32 %v4667_v0, %v4666_v30 }
 0x69f   : > { %v4671_v15 = vor.u32 %v4670_v63, %v4669_v18  ;;  %v4807_v16 = vsel %vm4806_vm0, %v4805_v19, 0  ;;  %vm4674_vm7 = vcmp.lt.s32.totalorder %v9539_v13, 3  ;;  %vm4673_vm10 = vcmp.lt.s32.totalorder %v9539_v13, 2 }
 0x6a0   : > { %v4680_v25 = vsel %vm4672_vm3, %v4659_v29, %v4662_v50  ;;  %v4684_v47 = vsel %vm4672_vm3, %v4662_v50, %v4665_v46  ;;  %v4681_v41 = vsel %vm4675_vm4, %v4668_v23, 920167782  ;;  %v4953_v21 = vand.u32 2139095040, %v9544_v45 }
 0x6a1   : > { %v4685_v36 = vsel %vm4675_vm4, %v4671_v15, 1326507024  ;;  %v4682_v55 = vsel %vm4674_vm7, %v4665_v46, %v4681_v41  ;;  %v4809_v52 = vand.u32 31, %v4807_v16  ;;  %v4586_v9 = vpop.f32.mrf.mxu3  ;;  %v9570_v57 = vshrl.u32 %v4807_v16, 5 }
 0x6a2   : > { %v4686_v37 = vsel %vm4674_vm7, %v4668_v23, %v4685_v36  ;;  %v4683_v40 = vsel %vm4673_vm10, %v4680_v25, %v4682_v55  ;;  %v4954_v59 = vshrl.u32 %v4953_v21, 23  ;;  %v9574_v48 = vadd.f32 %v4586_v9, %v4519_v26 }
 0x6a3   : > { %v4687_v38 = vsel %vm4673_vm10, %v4684_v47, %v4686_v37  ;;  %v4713_v24 = vand.u32 65535, %v4683_v40  ;;  %v4714_v54 = vshrl.u32 %v4683_v40, 16  ;;  %v9572_v32 = vsub.s32 32, %v4809_v52 }
 0x6a4   : > { %v4691_v27 = vand.u32 65535, %v4687_v38  ;;  %v4692_v49 = vshrl.u32 %v4687_v38, 16  ;;  %10904 = vst [vmem:[#allocation14_spill] sm:$0xff] %v9574_v48  ;;  %v4656_v19 = vshrl.u32 %v10815_v43, %v4655_v28  ;;  %v4677_v63 = vsel %vm4675_vm4, %v4665_v46, 2102212464 }
 0x6a5   : > { %v4716_v11 = vmul.u32 %v4714_v54, %v4689_v8  ;;  %v4717_v42 = vmul.u32 %v4713_v24, %v4690_v7  ;;  %v4715_v18 = vmul.u32 %v4713_v24, %v4689_v8  ;;  %v4718_v44 = vmul.u32 %v4714_v54, %v4690_v7 }
 0x6a6   : > { %v4694_v22 = vmul.u32 %v4692_v49, %v4689_v8  ;;  %v4695_v6 = vmul.u32 %v4691_v27, %v4690_v7  ;;  %v4693_v33 = vmul.u32 %v4691_v27, %v4689_v8  ;;  %v4696_v62 = vmul.u32 %v4692_v49, %v4690_v7 }
 0x6a7   : > { %v4719_v34 = vshll.u32 %v4716_v11, 16  ;;  %v4676_v23 = vsel %vm4672_vm3, %v4656_v19, %v4659_v29  ;;  %v4721_v58 = vshll.u32 %v4717_v42, 16  ;;  %v4678_v47 = vsel %vm4674_vm7, %v4662_v50, %v4677_v63 }
 0x6a8   : > { %v4697_v4 = vshll.u32 %v4694_v22, 16  ;;  %v4699_v20 = vshll.u32 %v4695_v6, 16  ;;  %v4698_v16 = vshrl.u32 %v4694_v22, 16  ;;  %v4700_v36 = vshrl.u32 %v4695_v6, 16 }
 0x6a9   : > { %vm4723_vm8 = vc.u32 %v4715_v18, %v4719_v34  ;;  %v4725_v25 = vadd.s32 %v4719_v34, %v4715_v18  ;;  %v10809_v29 = vand.u32 2147483647, %v9525_v17  ;;  %v4720_v40 = vshrl.u32 %v4716_v11, 16 }
 0x6aa   : > { %vm4701_vm9 = vc.u32 %v4693_v33, %v4697_v4  ;;  %v4703_v0 = vadd.s32 %v4697_v4, %v4693_v33  ;;  %v4724_v41 = vsel %vm4723_vm8, 1, %v10813_v5  ;;  %v4722_v38 = vshrl.u32 %v4717_v42, 16 }
 0x6ab   : > { %v4702_v30 = vsel %vm4701_vm9, 1, %v10813_v5  ;;  %v4726_v55 = vadd.s32 %v4724_v41, %v4718_v44  ;;  %vm4727_vm6 = vc.u32 %v4725_v25, %v4721_v58  ;;  %v4812_v8 = vshll.u32 %v10815_v43, %v4809_v52 }
 0x6ac   : > { %v4704_v15 = vadd.s32 %v4702_v30, %v4696_v62  ;;  %vm4705_vm5 = vc.u32 %v4703_v0, %v4699_v20  ;;  %v4728_v21 = vsel %vm4727_vm6, 1, %v10813_v5  ;;  %v4813_v50 = vshrl.u32 %v10858_v2, %v9572_v32 }
 0x6ad   : > { %v4706_v28 = vsel %vm4705_vm5, 1, %v10813_v5  ;;  %v4730_v27 = vadd.s32 %v4728_v21, %v4726_v55  ;;  %v4816_v7 = vshrl.u32 %v10859_v39, %v9572_v32  ;;  %v4815_v49 = vshll.u32 %v10858_v2, %v4809_v52 }
 0x6ae   : > { %v4708_v46 = vadd.s32 %v4706_v28, %v4704_v15  ;;  %v4819_v24 = vshrl.u32 %v10811_v53, %v9572_v32  ;;  %v4821_v54 = vshll.u32 %v10811_v53, %v4809_v52  ;;  %v4822_v9 = vshrl.u32 %v10818_v56, %v9572_v32 }
 0x6af   : > { %v4731_v6 = vadd.s32 %v4730_v27, %v4720_v40  ;;  %v4824_v26 = vshll.u32 %v10818_v56, %v4809_v52  ;;  %v4825_v33 = vshrl.u32 %v10860_v1, %v9572_v32  ;;  %v9604_v4 = vadd.s32 %v4725_v25, %v4721_v58 }
 0x6b0   : > { %v4709_v37 = vadd.s32 %v4708_v46, %v4698_v16  ;;  %v4802_v19 = vand.u32 8388607, %v10809_v29  ;;  %v4818_v11 = vshll.u32 %v10859_v39, %v4809_v52  ;;  %v4823_v42 = vor.u32 %v4822_v9, %v4821_v54 }
 0x6b1   : > { %v4732_v62 = vadd.s32 %v4731_v6, %v4722_v38  ;;  %v9609_v20 = vor.u32 %v4813_v50, %v4812_v8  ;;  %v9611_v0 = vor.u32 %v4816_v7, %v4815_v49  ;;  %v4826_v63 = vor.u32 %v4825_v33, %v4824_v26  ;;  %v4589_v49 = vpop.f32.mrf.mxu3  ;;  %v4524_v33 = vpop.permute.xlu0 %4523 }
 0x6b2   : > { %v9599_v22 = vadd.s32 %v4709_v37, %v4700_v36  ;;  %v9613_v30 = vor.u32 %v4819_v24, %v4818_v11  ;;  %vm4830_vm13 = vcmp.lt.s32.totalorder %v9570_v57, 4  ;;  %v6062_v18 = vadd.s32 4294967169, %v4954_v59 }
 0x6b3   : > { %v4736_v34 = vadd.s32 1, %v4732_v62  ;;  %v4836_v15 = vsel %vm4830_vm13, %v4823_v42, 920167782  ;;  %v4679_v52 = vsel %vm4673_vm10, %v4676_v23, %v4678_v47  ;;  %vm4827_vm15 = vcmp.lt.s32.totalorder %v9570_v57, 1 }
 0x6b4   : > { %vm4735_vm11 = vc.u32 %v9599_v22, %v9604_v4  ;;  %v4840_v44 = vsel %vm4830_vm13, %v4826_v63, 1326507024  ;;  %v5108_v28 = vand.u32 2139095040, %v9574_v48  ;;  %v4803_v58 = vor.u32 8388608, %v4802_v19 }
 0x6b5   : > { %vm4829_vm14 = vcmp.lt.s32.totalorder %v9570_v57, 3  ;;  %v4835_v59 = vsel %vm4827_vm15, %v9609_v20, %v9611_v0  ;;  %v4737_v25 = vsel %vm4735_vm11, %v4736_v34, %v4732_v62  ;;  %v4839_v23 = vsel %vm4827_vm15, %v9611_v0, %v9613_v30 }
 0x6b6   : > { %v4837_v13 = vsel %vm4829_vm14, %v9613_v30, %v4836_v15  ;;  %v4841_v47 = vsel %vm4829_vm14, %v4823_v42, %v4840_v44  ;;  %v4960_v16 = vadd.s32 1, %v6062_v18  ;;  %v4733_v46 = vmul.u32 %v9561_v12, %v4679_v52 }
 0x6b7   : > { %vm4828_vm12 = vcmp.lt.s32.totalorder %v9570_v57, 2  ;;  %v5109_v37 = vshrl.u32 %v5108_v28, 23  ;;  %v9646_v40 = vshll.u32 %v4803_v58, 8  ;;  %v4598_v27 = vmul.f32 0.5, %v9522_v10 }
 0x6b8   : > { %v4738_v41 = vadd.s32 %v4737_v25, %v4733_v46  ;;  %v4838_v36 = vsel %vm4828_vm12, %v4835_v59, %v4837_v13  ;;  %v4842_v55 = vsel %vm4828_vm12, %v4839_v23, %v4841_v47  ;;  %vm4961_vm2 = vcmp.gt.s32.totalorder %v4960_v16, 0  ;;  %v9672_v25 = vpop.eup %6247 }
 0x6b9   : > { %v4847_v38 = vshrl.u32 %v4842_v55, 16  ;;  %v4869_v21 = vshrl.u32 %v4838_v36, 16  ;;  %v4962_v50 = vsel %vm4961_vm2, %v4960_v16, 0  ;;  %v6065_v12 = vadd.s32 4294967169, %v5109_v37 }
 0x6ba   : > { %v4739_v8 = vadd.s32 536870912, %v4738_v41  ;;  %v4844_v7 = vand.u32 65535, %v9646_v40  ;;  %v4599_v24 = vmul.f32 0.5, %v9525_v17  ;;  %v4600_v54 = vmul.f32 0.5, %v9544_v45 }
 0x6bb   : > { %v4868_v6 = vand.u32 65535, %v4838_v36  ;;  %v4964_v19 = vand.u32 31, %v4962_v50  ;;  %v4601_v11 = vmul.f32 0.5, %v9574_v48  ;;  %6249 = vtanh.f32 %v4598_v27 }
 0x6bc   : > { %v9653_v9 = vmul.u32 %v4847_v38, %v4844_v7  ;;  %v9655_v26 = vmul.u32 %v4869_v21, %v4844_v7  ;;  %v9658_v42 = vshrl.u32 %v4739_v8, 30  ;;  %v5115_v62 = vadd.s32 1, %v6065_v12 }
 0x6bd   : > { %v9660_v63 = vadd.f32 %v4589_v49, %v4524_v33  ;;  %v4845_v18 = vshrl.u32 %v9646_v40, 16  ;;  %v4846_v34 = vand.u32 65535, %v4842_v55  ;;  %6251 = vtanh.f32 %v4599_v24 }
 0x6be   : > { %6253 = vtanh.f32 %v4600_v54  ;;  %v4852_v15 = vshll.u32 %v9653_v9, 16  ;;  %v4874_v44 = vshll.u32 %v9655_v26, 16  ;;  %v9667_v28 = vshrl.u32 %v4962_v50, 5 }
 0x6bf   : > { %v9664_v52 = vmul.u32 %v4868_v6, %v4845_v18  ;;  %v9669_v58 = vsub.s32 32, %v4964_v19  ;;  %6255 = vtanh.f32 %v4601_v11  ;;  %v4741_v59 = vshll.u32 %v9658_v42, 30 }
 0x6c0   : > { %vm5116_vm0 = vcmp.gt.s32.totalorder %v5115_v62, 0  ;;  %v4848_v23 = vmul.u32 %v4846_v34, %v4844_v7  ;;  %v4870_v47 = vmul.u32 %v4868_v6, %v4844_v7  ;;  %v9678_v46 = vmul.f32 0.5, %v9660_v63 }
 0x6c1   : > { %v9675_v16 = vpop.eup %6249  ;;  %v9680_v36 = vmul.u32 %v4846_v34, %v4845_v18  ;;  %v4851_v55 = vmul.u32 %v4847_v38, %v4845_v18  ;;  %v4873_v37 = vmul.u32 %v4869_v21, %v4845_v18  ;;  %v10820_v8 = vshll.u32 %v9664_v52, 16 }
 0x6c2   : > { %vm4856_vm3 = vc.u32 %v4848_v23, %v4852_v15  ;;  %v4858_v27 = vadd.s32 %v4852_v15, %v4848_v23  ;;  %vm4878_vm4 = vc.u32 %v4870_v47, %v4874_v44  ;;  %v9685_v12 = vsub.s32 %v4738_v41, %v4741_v59 }
 0x6c3   : > { %v9683_v50 = vpop.eup %6251  ;;  %v9687_v49 = vadd.s32 %v4874_v44, %v4870_v47  ;;  %v10817_v7 = vand.u32 2147483647, %v9544_v45  ;;  %v4971_v24 = vshrl.u32 %v10859_v39, %v9669_v58  ;;  %v4968_v38 = vshrl.u32 %v10858_v2, %v9669_v58 }
 0x6c4   : > { %v9692_v54 = vpop.eup %6253  ;;  %v4974_v21 = vshrl.u32 %v10811_v53, %v9669_v58  ;;  %v4976_v6 = vshll.u32 %v10811_v53, %v4964_v19  ;;  %v4977_v41 = vshrl.u32 %v10818_v56, %v9669_v58  ;;  %v4857_v11 = vsel %vm4856_vm3, 1, %v10813_v5 }
 0x6c5   : > { %v9701_v33 = vpop.eup %6255  ;;  %v4879_v18 = vsel %vm4878_vm4, 1, %v10813_v5  ;;  %v4970_v34 = vshll.u32 %v10858_v2, %v4964_v19  ;;  %v4973_v15 = vshll.u32 %v10859_v39, %v4964_v19  ;;  %v4967_v44 = vshll.u32 %v10815_v43, %v4964_v19 }
 0x6c6   : > { %v4978_v59 = vor.u32 %v4977_v41, %v4976_v6  ;;  %v4979_v23 = vshll.u32 %v10818_v56, %v4964_v19  ;;  %v4980_v47 = vshrl.u32 %v10860_v1, %v9669_v58  ;;  %v4744_v29 = vsub.s32 0, %v9685_v12 }
 0x6c7   : > { %v4957_v14 = vand.u32 8388607, %v10817_v7  ;;  %v9714_v53 = vor.u32 %v4971_v24, %v4970_v34  ;;  %v9716_v13 = vor.u32 %v4974_v21, %v4973_v15  ;;  %vm4743_vm7 = vcmp.lt.s32.totalorder %v9685_v12, 0 }
 0x6c8   : > { %v4854_v5 = vshll.u32 %v9680_v36, 16  ;;  %v9720_v43 = vor.u32 %v4968_v38, %v4967_v44  ;;  %v4981_v6 = vor.u32 %v4980_v47, %v4979_v23  ;;  %v5117_v19 = vsel %vm5116_vm0, %v5115_v62, 0 }
 0x6c9   : > { %v4859_v41 = vadd.s32 %v4857_v11, %v4851_v55  ;;  %vm4882_vm10 = vc.u32 %v9687_v49, %v10820_v8  ;;  %vm4985_vm9 = vcmp.lt.s32.totalorder %v9667_v28, 4  ;;  %v4881_v24 = vadd.s32 %v4879_v18, %v4873_v37 }
 0x6ca   : > { %vm4860_vm5 = vc.u32 %v4858_v27, %v4854_v5  ;;  %vm4982_vm8 = vcmp.lt.s32.totalorder %v9667_v28, 1  ;;  %v4991_v21 = vsel %vm4985_vm9, %v4978_v59, 920167782  ;;  %v4745_v38 = vsel %vm4743_vm7, %v4744_v29, %v9685_v12 }
 0x6cb   : > { %v4958_v34 = vor.u32 8388608, %v4957_v14  ;;  %vm4984_vm6 = vcmp.lt.s32.totalorder %v9667_v28, 3  ;;  %v4994_v62 = vsel %vm4982_vm8, %v9714_v53, %v9716_v13  ;;  %v10905_v55 = vmov 0  }
 0x6cc   : > { %v4883_v11 = vsel %vm4882_vm10, 1, %v10905_v55  ;;  %v4990_v5 = vsel %vm4982_vm8, %v9720_v43, %v9714_v53  ;;  %v4992_v37 = vsel %vm4984_vm6, %v9716_v13, %v4991_v21  ;;  %v4995_v14 = vsel %vm4985_vm9, %v4981_v6, 1326507024 }
 0x6cd   : > { %6257 = vtanh.f32 %v9525_v17  ;;  %v4861_v29 = vsel %vm4860_vm5, 1, %v10905_v55  ;;  %vm4983_vm11 = vcmp.lt.s32.totalorder %v9667_v28, 2  ;;  %v4996_v27 = vsel %vm4984_vm6, %v4978_v59, %v4995_v14 }
 0x6ce   : > { %v9751_v18 = vand.u32 31, %v5117_v19  ;;  %6259 = vtanh.f32 %v9544_v45  ;;  %v4746_v15 = vclz %v4745_v38  ;;  %v9756_v44 = vsel %vm4983_vm11, %v4994_v62, %v4996_v27 }
 0x6cf   : > { %v10906_v23 = vand.u32 2139095040, %v9660_v63  ;;  %v4885_v6 = vadd.s32 %v4883_v11, %v4881_v24  ;;  %v9762_v21 = vsel %vm4983_vm11, %v4990_v5, %v4992_v37  ;;  %v9764_v7 = vshll.u32 %v4958_v34, 8  ;;  %v4592_v24 = vpop.f32.mrf.mxu3 }
 0x6d0   : > { %v9766_v59 = vshrl.u32 %v5117_v19, 5  ;;  %6261 = vtanh.f32 %v9678_v46  ;;  %v4863_v14 = vadd.s32 %v4861_v29, %v4859_v41  ;;  %v4612_v38 = vmul.f32 0.5, %v9675_v16 }
 0x6d1   : > { %v5264_v47 = vshrl.u32 %v10906_v23, 23  ;;  %6263 = vtanh.f32 %v9574_v48  ;;  %v4875_v62 = vshrl.u32 %v9655_v26, 16  ;;  %v10821_v27 = vshrl.u32 %v9756_v44, 16  ;;  %v4529_v23 = vpop.permute.xlu1 %4528 }
 0x6d2   : > { %v9775_v11 = vmul.f32 %v9672_v25, %v7260_v31  ;;  %v6057_v34 = vadd.s32 4294967294, %v4746_v15  ;;  %v4853_v19 = vshrl.u32 %v9653_v9, 16  ;;  %v9780_v41 = vsub.s32 32, %v9751_v18 }
 0x6d3   : > { %v6258_v46 = vpop.eup %6257  ;;  %v6068_v16 = vadd.s32 4294967169, %v5264_v47  ;;  %v4886_v37 = vadd.s32 %v4885_v6, %v4875_v62  ;;  %v4999_v26 = vand.u32 65535, %v9764_v7  ;;  %v4613_v56 = vmul.f32 0.5, %v9683_v50 }
 0x6d4   : > { %10907 = vst [vmem:[#allocation15_spill] sm:$0xff] %v9775_v11  ;;  %v9783_v29 = vpop.eup %6259  ;;  %v4614_v25 = vmul.f32 0.5, %v9692_v54  ;;  %6265 = vtanh.f32 %v9660_v63  ;;  %v4864_v9 = vadd.s32 %v4863_v14, %v4853_v19  ;;  %v9788_v15 = vadd.f32 %v4592_v24, %v4529_v23 }
 0x6d5   : > { %v10908_v8 = vmov 683565275   ;;  %v4877_v47 = vshrl.u32 %v9664_v52, 16  ;;  %v9795_v6 = vmul.u32 %v10821_v27, %v4999_v26  ;;  %vm6058_vm2 = vcmp.lt.s32.totalorder %v6057_v34, 0 }
 0x6d6   : > { %v4811_v5 = vshrl.u32 %v10908_v8, %v9572_v32  ;;  %v6262_v62 = vpop.eup %6261  ;;  %v4832_v50 = vsel %vm4830_vm13, %v9613_v30, 2102212464  ;;  %v4855_v54 = vshrl.u32 %v9680_v36, 16  ;;  %v10909_v14 = vshrl.u32 %v9762_v21, 16 }
 0x6d7   : > { %v9805_v19 = vpop.eup %6263  ;;  %v9807_v32 = vadd.f32 0.5, %v4612_v38  ;;  %v4887_v23 = vadd.s32 %v4886_v37, %v4877_v47  ;;  %v5001_v27 = vand.u32 65535, %v9756_v44  ;;  %v5023_v35 = vand.u32 65535, %v9762_v21 }
 0x6d8   : > { %v9803_v24 = vmul.u32 %v10909_v14, %v4999_v26  ;;  %v5270_v61 = vadd.s32 1, %v6068_v16  ;;  %v4615_v51 = vmul.f32 0.5, %v9701_v33  ;;  %v4831_v30 = vsel %vm4827_vm15, %v4811_v5, %v9609_v20 }
 0x6d9   : > { %10910 = vst [vmem:[#allocation16_spill] sm:$0xff] %v9807_v32  ;;  %v9815_v36 = vadd.s32 %v4864_v9, %v4855_v54  ;;  %v9817_v14 = vsel %vm6058_vm2, 0, %v6057_v34  ;;  %v4833_v38 = vsel %vm4829_vm14, %v9611_v0, %v4832_v50  ;;  %v5000_v37 = vshrl.u32 %v9764_v7, 16 }
 0x6da   : > { %v5007_v47 = vshll.u32 %v9795_v6, 16  ;;  %v9824_v32 = vpop.eup %6265  ;;  %v5418_v33 = vand.u32 2139095040, %v9788_v15  ;;  %v9827_v16 = vadd.f32 0.5, %v4613_v56  ;;  %v10912_v20 = vshll.u32 %v9664_v52, 16 }
 0x6db   : > { %v5029_v34 = vshll.u32 %v9803_v24, 16  ;;  %v4891_v9 = vadd.s32 1, %v4887_v23  ;;  %v5003_v54 = vmul.u32 %v5001_v27, %v4999_v26  ;;  %v9835_v0 = vmul.u32 %v5001_v27, %v5000_v37 }
 0x6dc   : > { %10911 = vst [vmem:[#allocation17_spill] sm:$0xff] %v9827_v16  ;;  %v9832_v5 = vadd.s32 %v9687_v49, %v10912_v20  ;;  %v9837_v50 = vmul.u32 %v5023_v35, %v5000_v37  ;;  %v4754_v11 = vsub.s32 4294967266, %v9817_v14  ;;  %v4834_v60 = vsel %vm4828_vm12, %v4831_v30, %v4833_v38 }
 0x6dd   : > { %v5025_v56 = vmul.u32 %v5023_v35, %v4999_v26  ;;  %v9844_v52 = vadd.f32 0.5, %v4614_v25  ;;  %v9847_v49 = vmul.f32 %v6258_v46, %v7260_v31  ;;  %vm5011_vm15 = vc.u32 %v5003_v54, %v5007_v47 }
 0x6de   : > { %vm4890_vm13 = vc.u32 %v9815_v36, %v9832_v5  ;;  %v5013_v20 = vadd.s32 %v5007_v47, %v5003_v54  ;;  %vm5271_vm14 = vcmp.gt.s32.totalorder %v5270_v61, 0  ;;  %v5419_v27 = vshrl.u32 %v5418_v33, 23  ;;  %v4595_v47 = vpop.f32.mrf.mxu3 }
 0x6df   : > { %10913 = vst [vmem:[#allocation18_spill] sm:$0xff] %v9844_v52  ;;  %vm5033_vm0 = vc.u32 %v5025_v56, %v5029_v34  ;;  %v9849_v16 = vadd.s32 %v5029_v34, %v5025_v56  ;;  %v4888_v3 = vmul.u32 %v9646_v40, %v4834_v60  ;;  %v4892_v57 = vsel %vm4890_vm13, %v4891_v9, %v4887_v23  ;;  %v4534_v56 = vpop.permute.xlu2 %4533 }
 0x6e0   : > { %10914 = vst [vmem:[#allocation19_spill] sm:$0xff] %v9847_v49  ;;  %v5009_v30 = vshll.u32 %v9835_v0, 16  ;;  %v10833_v38 = vshll.u32 %v9837_v50, 16  ;;  %v4750_v35 = vsub.s32 32, %v9817_v14  ;;  %v4755_v26 = vadd.s32 127, %v4754_v11 }
 0x6e1   : > { %v5012_v46 = vsel %vm5011_vm15, 1, %v10905_v55  ;;  %v5034_v25 = vsel %vm5033_vm0, 1, %v10905_v55  ;;  %v10915_v33 = vshrl.u32 %v9756_v44, 16  ;;  %v10916_v34 = vshrl.u32 %v9762_v21, 16 }
 0x6e2   : > { %vm5015_vm12 = vc.u32 %v5013_v20, %v5009_v30  ;;  %vm5037_vm3 = vc.u32 %v9849_v16, %v10833_v38  ;;  %v5272_v40 = vsel %vm5271_vm14, %v5270_v61, 0  ;;  %v4603_v11 = vmul.f32 0.5, %v9788_v15 }
 0x6e3   : > { %v5006_v54 = vmul.u32 %v10915_v33, %v5000_v37  ;;  %v5028_v60 = vmul.u32 %v10916_v34, %v5000_v37  ;;  %v9866_v23 = vadd.f32 0.5, %v4615_v51  ;;  %v9868_v9 = vadd.s32 %v4892_v57, %v4888_v3 }
 0x6e4   : > { %v4616_v52 = vmul.f32 0.5, %v6262_v62  ;;  %v4734_v44 = vadd.s32 %v9604_v4, %v9599_v22  ;;  %v6071_v37 = vadd.s32 4294967169, %v5419_v27  ;;  %v9872_v30 = vadd.f32 %v4595_v47, %v4534_v56 }
 0x6e5   : > { %10917 = vst [vmem:[#allocation20_spill] sm:$0xff] %v9866_v23  ;;  %v5014_v20 = vadd.s32 %v5012_v46, %v5006_v54  ;;  %v5036_v21 = vadd.s32 %v5034_v25, %v5028_v60  ;;  %v5016_v33 = vsel %vm5015_vm12, 1, %v10905_v55  ;;  %v5038_v61 = vsel %vm5037_vm3, 1, %v10905_v55 }
 0x6e6   : > { %6267 = vtanh.f32 %v9788_v15  ;;  %v9879_v3 = vmul.f32 %v9783_v29, %v7260_v31  ;;  %v4752_v51 = vshrl.u32 %v4734_v44, %v4750_v35  ;;  %v4756_v62 = vshll.u32 %v4755_v26, 23 }
 0x6e7   : > { %v9881_v57 = vshrl.u32 %v5272_v40, 5  ;;  %v9883_v22 = vand.u32 31, %v5272_v40  ;;  %6269 = vtanh.f32 %v4603_v11  ;;  %v4894_v4 = vadd.s32 536870912, %v9868_v9 }
 0x6e8   : > { %10918 = vst [vmem:[#allocation21_spill] sm:$0xff] %v9879_v3  ;;  %v4751_v27 = vshll.u32 %v9685_v12, %v9817_v14  ;;  %v5018_v46 = vadd.s32 %v5016_v33, %v5014_v20  ;;  %v5040_v25 = vadd.s32 %v5038_v61, %v5036_v21  ;;  %v10832_v47 = vand.u32 2147483647, %v9574_v48 }
 0x6e9   : > { %v9889_v54 = vadd.s32 1, %v6071_v37  ;;  %v5573_v29 = vand.u32 2139095040, %v9872_v30  ;;  %v9892_v35 = vadd.f32 0.5, %v4616_v52  ;;  %v4966_v26 = vshrl.u32 %v10908_v8, %v9669_v58 }
 0x6ea   : > { %v4753_v34 = vor.u32 %v4752_v51, %v4751_v27  ;;  %v4757_v60 = vor.u32 4788187, %v4756_v62  ;;  %v5008_v40 = vshrl.u32 %v9795_v6, 16  ;;  %v5030_v11 = vshrl.u32 %v9803_v24, 16 }
 0x6eb   : > { %10919 = vst [vmem:[#allocation22_spill] sm:$0xff] %v9892_v35  ;;  %v9898_v12 = vshrl.u32 %v4894_v4, 30  ;;  %v5126_v14 = vshrl.u32 %v10859_v39, %v9780_v41  ;;  %v10920_v56 = vmov 2102212464   ;;  %v10921_v52 = vmov 920167782  }
 0x6ec   : > { %v5129_v44 = vshrl.u32 %v10920_v56, %v9780_v41  ;;  %v5132_v20 = vshrl.u32 %v10921_v52, %v9780_v41  ;;  %v9906_v21 = vpop.eup %6267  ;;  %v5019_v58 = vadd.s32 %v5018_v46, %v5008_v40  ;;  %v5041_v37 = vadd.s32 %v5040_v25, %v5030_v11 }
 0x6ed   : > { %v5112_v6 = vand.u32 8388607, %v10832_v47  ;;  %v5135_v24 = vshrl.u32 %v10860_v1, %v9780_v41  ;;  %v6270_v33 = vpop.eup %6269  ;;  %v5125_v61 = vshll.u32 %v10858_v2, %v9751_v18  ;;  %v5128_v51 = vshll.u32 %v10859_v39, %v9751_v18 }
 0x6ee   : > { %v5131_v62 = vshll.u32 %v10920_v56, %v9751_v18  ;;  %v5134_v4 = vshll.u32 %v10921_v52, %v9751_v18  ;;  %v4987_v27 = vsel %vm4985_vm9, %v9716_v13, 2102212464  ;;  %v5010_v46 = vshrl.u32 %v9835_v0, 16 }
 0x6ef   : > { %v5032_v25 = vshrl.u32 %v9837_v50, 16  ;;  %v5123_v40 = vshrl.u32 %v10858_v2, %v9780_v41  ;;  %v9927_v11 = vor.u32 %v5126_v14, %v5125_v61  ;;  %v9929_v47 = vor.u32 %v5129_v44, %v5128_v51 }
 0x6f0   : > { %v5133_v38 = vor.u32 %v5132_v20, %v5131_v62  ;;  %v5136_v35 = vor.u32 %v5135_v24, %v5134_v4  ;;  %v4986_v3 = vsel %vm4982_vm8, %v4966_v26, %v9720_v43  ;;  %v5113_v49 = vor.u32 8388608, %v5112_v6 }
 0x6f1   : > { %v5042_v23 = vadd.s32 %v5041_v37, %v5032_v25  ;;  %v5122_v13 = vshll.u32 %v10908_v8, %v9751_v18  ;;  %v4758_v0 = vand.u32 2147483647, %v4757_v60  ;;  %v4896_v48 = vshll.u32 %v9898_v12, 30 }
 0x6f2   : > { %v4988_v14 = vsel %vm4984_vm6, %v9714_v53, %v4987_v27  ;;  %v9940_v44 = vadd.s32 %v5019_v58, %v5010_v46  ;;  %v10922_v20 = vshll.u32 %v9837_v50, 16  ;;  %vm5137_vm4 = vcmp.lt.s32.totalorder %v9766_v59, 1 }
 0x6f3   : > { %v9947_v43 = vor.u32 %v5123_v40, %v5122_v13  ;;  %vm5140_vm7 = vcmp.lt.s32.totalorder %v9766_v59, 4  ;;  %vm5139_vm10 = vcmp.lt.s32.totalorder %v9766_v59, 3  ;;  %v5149_v53 = vsel %vm5137_vm4, %v9927_v11, %v9929_v47 }
 0x6f4   : > { %v9945_v24 = vadd.s32 %v9849_v16, %v10922_v20  ;;  %v5146_v18 = vsel %vm5140_vm7, %v5133_v38, 920167782  ;;  %v5150_v16 = vsel %vm5140_vm7, %v5136_v35, 1326507024  ;;  %v5046_v50 = vadd.s32 1, %v5042_v23 }
 0x6f5   : > { %vm5138_vm9 = vcmp.lt.s32.totalorder %v9766_v59, 2  ;;  %v5151_v26 = vsel %vm5139_vm10, %v5133_v38, %v5150_v16  ;;  %v9963_v60 = vshll.u32 %v5113_v49, 8  ;;  %v9967_v58 = vmul.f32 %v9805_v19, %v7260_v31 }
 0x6f6   : > { %v9970_v37 = vsub.s32 %v9868_v9, %v4896_v48  ;;  %vm5045_vm5 = vc.u32 %v9940_v44, %v9945_v24  ;;  %v5152_v35 = vsel %vm5138_vm9, %v5149_v53, %v5151_v26  ;;  %v4760_v6 = vcvt.s32.f32 %v4753_v34 }
 0x6f7   : > { %10923 = vst [vmem:[#allocation23_spill] sm:$0xff] %v9967_v58  ;;  %v4989_v61 = vsel %vm4983_vm11, %v4986_v3, %v4988_v14  ;;  %v5145_v49 = vsel %vm5137_vm4, %v9947_v43, %v9927_v11  ;;  %v5147_v48 = vsel %vm5139_vm10, %v9929_v47, %v5146_v18  ;;  %vm5426_vm8 = vcmp.gt.s32.totalorder %v9889_v54, 0 }
 0x6f8   : > { %v5574_v19 = vshrl.u32 %v5573_v29, 23  ;;  %v9988_v38 = vmul.f32 %v9824_v32, %v7260_v31  ;;  %v5156_v9 = vand.u32 65535, %v5152_v35  ;;  %vm4642_vm6 = vcmp.lt.s32.totalorder %v9522_v10, 0 }
 0x6f9   : > { %v4761_v28 = vmul.f32 %v4760_v6, %v4758_v0  ;;  %v5047_v3 = vsel %vm5045_vm5, %v5046_v50, %v5042_v23  ;;  %v5154_v34 = vand.u32 65535, %v9963_v60  ;;  %v5157_v51 = vshrl.u32 %v5152_v35, 16 }
 0x6fa   : > { %10924 = vst [vmem:[#allocation24_spill] sm:$0xff] %v9988_v38  ;;  %v4899_v62 = vsub.s32 0, %v9970_v37  ;;  %v5043_v4 = vmul.u32 %v9764_v7, %v4989_v61  ;;  %v5148_v27 = vsel %vm5138_vm9, %v5145_v49, %v5147_v48  ;;  %v5155_v29 = vshrl.u32 %v9963_v60, 16 }
 0x6fb   : > { %v5427_v32 = vsel %vm5426_vm8, %v9889_v54, 0  ;;  %v4604_v46 = vmul.f32 0.5, %v9872_v30  ;;  %vm4898_vm11 = vcmp.lt.s32.totalorder %v9970_v37, 0  ;;  %v5159_v25 = vmul.u32 %v5157_v51, %v5154_v34 }
 0x6fc   : > { %v4617_v23 = vmul.f32 0.5, %v6270_v33  ;;  %6271 = vtanh.f32 %v9872_v30  ;;  %v10001_v40 = vadd.s32 %v5047_v3, %v5043_v4  ;;  %v5160_v13 = vmul.u32 %v5156_v9, %v5155_v29 }
 0x6fd   : > { %v6074_v0 = vadd.s32 4294967169, %v5574_v19  ;;  %v5158_v7 = vmul.u32 %v5156_v9, %v5154_v34  ;;  %v5162_v14 = vshll.u32 %v5159_v25, 16  ;;  %v5179_v20 = vshrl.u32 %v5148_v27, 16 }
 0x6fe   : > { %v10003_v18 = vshrl.u32 %v5427_v32, 5  ;;  %v10007_v54 = vmul.f32 %v9906_v21, %v7260_v31  ;;  %v4762_v53 = vxor.u32 2147483648, %v4761_v28  ;;  %v4900_v16 = vsel %vm4898_vm11, %v4899_v62, %v9970_v37 }
 0x6ff   : > { %v10926_v33 = vand.u32 2147483647, %v9522_v10  ;;  %v5164_v26 = vshll.u32 %v5160_v13, 16  ;;  %vm5166_vm13 = vc.u32 %v5158_v7, %v5162_v14  ;;  %v5168_v35 = vadd.s32 %v5162_v14, %v5158_v7 }
 0x700   : > { %10925 = vst [vmem:[#allocation25_spill] sm:$0xff] %v10007_v54  ;;  %v5178_v6 = vand.u32 65535, %v5148_v27  ;;  %v10016_v61 = vand.u32 31, %v5427_v32  ;;  %6273 = vtanh.f32 %v4604_v46  ;;  %v5049_v49 = vadd.s32 536870912, %v10001_v40 }
 0x701   : > { %vm10012_vm2 = vcmp.le.f32.partialorder %v10926_v33, 0.7853982  ;;  %v5161_v21 = vmul.u32 %v5157_v51, %v5155_v29  ;;  %v5580_v48 = vadd.s32 1, %v6074_v0  ;;  %v5167_v19 = vsel %vm5166_vm13, 1, %v10905_v55 }
 0x702   : > { %vm5170_vm15 = vc.u32 %v5168_v35, %v5164_v26  ;;  %v5181_v9 = vmul.u32 %v5179_v20, %v5154_v34  ;;  %v10020_v3 = vpop.eup %6271  ;;  %v4763_v62 = vsel %vm4642_vm6, %v4762_v53, %v4761_v28  ;;  %v4901_v4 = vclz %v4900_v16 }
 0x703   : > { %10929 = vst [vmem:[#allocation26_spill] sm:$0xff] %v10020_v3  ;;  %v5169_v33 = vadd.s32 %v5167_v19, %v5161_v21  ;;  %v5171_v27 = vsel %vm5170_vm15, 1, %v10905_v55  ;;  %v5121_v32 = vshrl.u32 %v10908_v8, %v9780_v41  ;;  %v5180_v46 = vmul.u32 %v5178_v6, %v5154_v34 }
 0x704   : > { %v5182_v7 = vmul.u32 %v5178_v6, %v5155_v29  ;;  %v5184_v51 = vshll.u32 %v5181_v9, 16  ;;  %v10027_v0 = vshrl.u32 %v5049_v49, 30  ;;  %v5142_v14 = vsel %vm5140_vm7, %v9929_v47, 2102212464 }
 0x705   : > { %v5163_v26 = vshrl.u32 %v5159_v25, 16  ;;  %v5173_v35 = vadd.s32 %v5171_v27, %v5169_v33  ;;  %v5183_v3 = vmul.u32 %v5179_v20, %v5155_v29  ;;  %vm5581_vm0 = vcmp.gt.s32.totalorder %v5580_v48, 0 }
 0x706   : > { %v5186_v28 = vshll.u32 %v5182_v7, 16  ;;  %vm5188_vm14 = vc.u32 %v5180_v46, %v5184_v51  ;;  %v5190_v53 = vadd.s32 %v5184_v51, %v5180_v46  ;;  %v6274_v16 = vpop.eup %6273  ;;  %v5141_v41 = vsel %vm5137_vm4, %v5121_v32, %v9947_v43 }
 0x707   : > { %v5174_v34 = vadd.s32 %v5173_v35, %v5163_v26  ;;  %v5189_v6 = vsel %vm5188_vm14, 1, %v10905_v55  ;;  %v5143_v49 = vsel %vm5139_vm10, %v9927_v11, %v5142_v14  ;;  %v5165_v47 = vshrl.u32 %v5160_v13, 16 }
 0x708   : > { %v5191_v25 = vadd.s32 %v5189_v6, %v5183_v3  ;;  %vm5192_vm12 = vc.u32 %v5190_v53, %v5186_v28  ;;  %v10042_v29 = vsel %vm10012_vm2, %v9522_v10, %v4763_v62  ;;  %v6060_v20 = vadd.s32 4294967294, %v4901_v4 }
 0x709   : > { %v5051_v21 = vshll.u32 %v10027_v0, 30  ;;  %v5193_v43 = vsel %vm5192_vm12, 1, %v10905_v55  ;;  %v10046_v19 = vadd.s32 %v5174_v34, %v5165_v47  ;;  %v5185_v33 = vshrl.u32 %v5181_v9, 16 }
 0x70a   : > { %v5195_v27 = vadd.s32 %v5193_v43, %v5191_v25  ;;  %v10049_v32 = vsub.s32 32, %v9883_v22  ;;  %v5582_v11 = vsel %vm5581_vm0, %v5580_v48, 0  ;;  %v10052_v13 = vmul.f32 0.5, %v6274_v16 }
 0x70b   : > { %v10054_v3 = vadd.f32 0.5, %v4617_v23  ;;  %v5144_v62 = vsel %vm5138_vm9, %v5141_v41, %v5143_v49  ;;  %v5187_v4 = vshrl.u32 %v5182_v7, 16  ;;  %v10058_v46 = vadd.s32 %v5190_v53, %v5186_v28 }
 0x70c   : > { %v5196_v51 = vadd.s32 %v5195_v27, %v5185_v33  ;;  %v10836_v14 = vand.u32 2147483647, %v9660_v63  ;;  %v4764_v9 = vsub.s32 4, %v9658_v42  ;;  %v10064_v26 = vmul.f32 %v10042_v29, %v10042_v29 }
 0x70d   : > { %10930 = vst [vmem:[#allocation27_spill] sm:$0xff] %v10054_v3  ;;  %vm6061_vm3 = vcmp.lt.s32.totalorder %v6060_v20, 0  ;;  %v10067_v48 = vsub.s32 %v10001_v40, %v5051_v21  ;;  %v5198_v59 = vmul.u32 %v9963_v60, %v5144_v62  ;;  %vm5200_vm4 = vc.u32 %v10046_v19, %v10058_v46 }
 0x70e   : > { %v5197_v23 = vadd.s32 %v5196_v51, %v5187_v4  ;;  %v5278_v7 = vshrl.u32 %v10858_v2, %v10049_v32  ;;  %v5281_v35 = vshrl.u32 %v10859_v39, %v10049_v32  ;;  %v5284_v28 = vshrl.u32 %v10920_v56, %v10049_v32 }
 0x70f   : > { %v5286_v53 = vshll.u32 %v10920_v56, %v9883_v22  ;;  %v5287_v40 = vshrl.u32 %v10921_v52, %v10049_v32  ;;  %v5267_v60 = vand.u32 8388607, %v10836_v14  ;;  %v5277_v41 = vshll.u32 %v10908_v8, %v9883_v22 }
 0x710   : > { %v5201_v16 = vadd.s32 1, %v5197_v23  ;;  %v5280_v34 = vshll.u32 %v10858_v2, %v9883_v22  ;;  %v5283_v6 = vshll.u32 %v10859_v39, %v9883_v22  ;;  %v5289_v47 = vshll.u32 %v10921_v52, %v9883_v22 }
 0x711   : > { %v5288_v49 = vor.u32 %v5287_v40, %v5286_v53  ;;  %v5290_v25 = vshrl.u32 %v10860_v1, %v10049_v32  ;;  %v10095_v21 = vsel %vm6061_vm3, 0, %v6060_v20  ;;  %v5054_v43 = vsub.s32 0, %v10067_v48 }
 0x712   : > { %v5202_v33 = vsel %vm5200_vm4, %v5201_v16, %v5197_v23  ;;  %v10101_v27 = vor.u32 %v5278_v7, %v5277_v41  ;;  %v10103_v4 = vor.u32 %v5281_v35, %v5280_v34  ;;  %v10105_v51 = vor.u32 %v5284_v28, %v5283_v6 }
 0x713   : > { %v5203_v62 = vadd.s32 %v5202_v33, %v5198_v59  ;;  %v5291_v22 = vor.u32 %v5290_v25, %v5289_v47  ;;  %v10107_v53 = vshrl.u32 %v5582_v11, 5  ;;  %vm5053_vm7 = vcmp.lt.s32.totalorder %v10067_v48, 0 }
 0x714   : > { %v5268_v20 = vor.u32 8388608, %v5267_v60  ;;  %vm5295_vm10 = vcmp.lt.s32.totalorder %v9881_v57, 4  ;;  %v4765_v40 = vsel %vm4642_vm6, %v4764_v9, %v9658_v42  ;;  %v4769_v23 = vmul.f32 -0.001358992, %v10064_v26 }
 0x715   : > { %v5204_v7 = vadd.s32 536870912, %v5203_v62  ;;  %v5301_v59 = vsel %vm5295_vm10, %v5288_v49, 920167782  ;;  %v4776_v35 = vmul.f32 -0.00019511016, %v10064_v26  ;;  %v4909_v28 = vsub.s32 4294967266, %v10095_v21 }
 0x716   : > { %vm5292_vm9 = vcmp.lt.s32.totalorder %v9881_v57, 1  ;;  %v5305_v16 = vsel %vm5295_vm10, %v5291_v22, 1326507024  ;;  %v5055_v60 = vsel %vm5053_vm7, %v5054_v43, %v10067_v48  ;;  %vm5294_vm5 = vcmp.lt.s32.totalorder %v9881_v57, 3 }
 0x717   : > { %v5300_v42 = vsel %vm5292_vm9, %v10101_v27, %v10103_v4  ;;  %v5304_v9 = vsel %vm5292_vm9, %v10103_v4, %v10105_v51  ;;  %v10132_v41 = vshrl.u32 %v5204_v7, 30  ;;  %v5302_v34 = vsel %vm5294_vm5, %v10105_v51, %v5301_v59 }
 0x718   : > { %v5306_v6 = vsel %vm5294_vm5, %v5288_v49, %v5305_v16  ;;  %v10139_v47 = vshll.u32 %v5268_v20, 8  ;;  %v10141_v25 = vand.u32 31, %v5582_v11  ;;  %vm4797_vm8 = vcmp.lt.s32.totalorder %v9525_v17, 0 }
 0x719   : > { %10931 = vst [vmem:[#allocation28_spill] sm:$0xff] %v10132_v41  ;;  %v4919_v43 = vsub.s32 4, %v9898_v12  ;;  %vm5293_vm6 = vcmp.lt.s32.totalorder %v9881_v57, 2  ;;  %v4770_v33 = vadd.f32 0.041655596, %v4769_v23  ;;  %v4910_v7 = vadd.s32 127, %v4909_v28 }
 0x71a   : > { %v4777_v22 = vadd.f32 0.008332121, %v4776_v35  ;;  %v5307_v14 = vsel %vm5293_vm6, %v5304_v9, %v5306_v6  ;;  %v4767_v59 = vsel %vm10012_vm2, 0, %v4765_v40  ;;  %v4905_v49 = vsub.s32 32, %v10095_v21 }
 0x71b   : > { %v5056_v20 = vclz %v5055_v60  ;;  %v5303_v11 = vsel %vm5293_vm6, %v5300_v42, %v5302_v34  ;;  %v5206_v16 = vshll.u32 %v10132_v41, 30  ;;  %v5309_v31 = vand.u32 65535, %v10139_v47 }
 0x71c   : > { %v5311_v3 = vand.u32 65535, %v5307_v14  ;;  %v5312_v23 = vshrl.u32 %v5307_v14, 16  ;;  %v10156_v35 = vadd.f32 0.5, %v10052_v13  ;;  %v4889_v28 = vadd.s32 %v9832_v5, %v9815_v36 }
 0x71d   : > { %v10163_v50 = vsel %vm4797_vm8, %v4919_v43, %v9898_v12  ;;  %v5310_v40 = vshrl.u32 %v10139_v47, 16  ;;  %v4771_v60 = vmul.f32 %v4770_v33, %v10064_v26  ;;  %v4778_v42 = vmul.f32 %v4777_v22, %v10064_v26 }
 0x71e   : > { %10932 = vst [vmem:[#allocation29_spill] sm:$0xff] %v10156_v35  ;;  %v4911_v9 = vshll.u32 %v4910_v7, 23  ;;  %v5314_v34 = vmul.u32 %v5312_v23, %v5309_v31  ;;  %v10168_v14 = vadd.s32 3, %v4767_v59  ;;  %v10933_v13 = vand.u32 2147483647, %v9525_v17 }
 0x71f   : > { %v5315_v36 = vmul.u32 %v5311_v3, %v5310_v40  ;;  %v5334_v5 = vshrl.u32 %v5303_v11, 16  ;;  %v4907_v12 = vshrl.u32 %v4889_v28, %v4905_v49  ;;  %v6063_v43 = vadd.s32 4294967294, %v5056_v20 }
 0x720   : > { %vm10172_vm11 = vcmp.le.f32.partialorder %v10933_v13, 0.7853982  ;;  %v10176_v35 = vsub.s32 %v5203_v62, %v5206_v16  ;;  %v5317_v54 = vshll.u32 %v5314_v34, 16  ;;  %v4906_v33 = vshll.u32 %v9970_v37, %v10095_v21 }
 0x721   : > { %v4922_v22 = vsel %vm10172_vm11, 0, %v10163_v50  ;;  %v5313_v7 = vmul.u32 %v5311_v3, %v5309_v31  ;;  %v5333_v59 = vand.u32 65535, %v5303_v11  ;;  %v4772_v13 = vadd.f32 -0.4999988, %v4771_v60 }
 0x722   : > { %v4779_v38 = vadd.f32 -0.16666654, %v4778_v42  ;;  %v4912_v58 = vor.u32 4788187, %v4911_v9  ;;  %v5316_v41 = vmul.u32 %v5312_v23, %v5310_v40  ;;  %v5319_v10 = vshll.u32 %v5315_v36, 16 }
 0x723   : > { %vm5321_vm2 = vc.u32 %v5313_v7, %v5317_v54  ;;  %v5323_v49 = vadd.s32 %v5317_v54, %v5313_v7  ;;  %v5336_v20 = vmul.u32 %v5334_v5, %v5309_v31  ;;  %v4908_v62 = vor.u32 %v4907_v12, %v4906_v33 }
 0x724   : > { %vm6064_vm13 = vcmp.lt.s32.totalorder %v6063_v43, 0  ;;  %v5209_v16 = vsub.s32 0, %v10176_v35  ;;  %v5322_v37 = vsel %vm5321_vm2, 1, %v10905_v55  ;;  %vm5208_vm15 = vcmp.lt.s32.totalorder %v10176_v35, 0 }
 0x725   : > { %v5324_v21 = vadd.s32 %v5322_v37, %v5316_v41  ;;  %vm5325_vm14 = vc.u32 %v5323_v49, %v5319_v10  ;;  %v5337_v3 = vmul.u32 %v5333_v59, %v5310_v40  ;;  %v4773_v11 = vmul.f32 %v4772_v13, %v10064_v26 }
 0x726   : > { %v10188_v28 = vmul.f32 %v4779_v38, %v10064_v26  ;;  %v4913_v23 = vand.u32 2147483647, %v4912_v58  ;;  %v5326_v54 = vsel %vm5325_vm14, 1, %v10905_v55  ;;  %v5318_v60 = vshrl.u32 %v5314_v34, 16 }
 0x727   : > { %v5328_v42 = vadd.s32 %v5326_v54, %v5324_v21  ;;  %v5335_v9 = vmul.u32 %v5333_v59, %v5309_v31  ;;  %v5339_v12 = vshll.u32 %v5336_v20, 16  ;;  %v4915_v33 = vcvt.s32.f32 %v4908_v62 }
 0x728   : > { %v10192_v7 = vsel %vm6064_vm13, 0, %v6063_v43  ;;  %v5210_v41 = vsel %vm5208_vm15, %v5209_v16, %v10176_v35  ;;  %v5338_v10 = vmul.u32 %v5334_v5, %v5310_v40  ;;  %v5341_v37 = vshll.u32 %v5337_v3, 16 }
 0x729   : > { %v5329_v49 = vadd.s32 %v5328_v42, %v5318_v60  ;;  %vm5343_vm0 = vc.u32 %v5335_v9, %v5339_v12  ;;  %v5345_v13 = vadd.s32 %v5339_v12, %v5335_v9  ;;  %v10195_v38 = vadd.f32 1.0, %v4773_v11 }
 0x72a   : > { %v5297_v58 = vsel %vm5295_vm10, %v10105_v51, 2102212464  ;;  %v5320_v26 = vshrl.u32 %v5315_v36, 16  ;;  %v5344_v31 = vsel %vm5343_vm0, 1, %v10905_v55  ;;  %v4916_v34 = vmul.f32 %v4915_v33, %v4913_v23 }
 0x72b   : > { %v5276_v43 = vshrl.u32 %v10908_v8, %v10049_v32  ;;  %v5346_v59 = vadd.s32 %v5344_v31, %v5338_v10  ;;  %vm5347_vm12 = vc.u32 %v5345_v13, %v5341_v37  ;;  %v5064_v40 = vsub.s32 4294967266, %v10192_v7 }
 0x72c   : > { %v5211_v5 = vclz %v5210_v41  ;;  %v10204_v62 = vadd.s32 %v5329_v49, %v5320_v26  ;;  %v5348_v16 = vsel %vm5347_vm12, 1, %v10905_v55  ;;  %v5298_v36 = vsel %vm5294_vm5, %v10103_v4, %v5297_v58 }
 0x72d   : > { %v5296_v51 = vsel %vm5292_vm9, %v5276_v43, %v10101_v27  ;;  %v5340_v21 = vshrl.u32 %v5336_v20, 16  ;;  %v5350_v11 = vadd.s32 %v5348_v16, %v5346_v59  ;;  %v5044_v32 = vadd.s32 %v9945_v24, %v9940_v44 }
 0x72e   : > { %v10215_v23 = vadd.s32 %v5345_v13, %v5341_v37  ;;  %v10842_v54 = vand.u32 2147483647, %v9788_v15  ;;  %v10219_v60 = vsub.s32 32, %v10016_v61  ;;  %v4917_v42 = vxor.u32 2147483648, %v4916_v34 }
 0x72f   : > { %v5060_v9 = vsub.s32 32, %v10192_v7  ;;  %v5342_v27 = vshrl.u32 %v5337_v3, 16  ;;  %v5351_v12 = vadd.s32 %v5350_v11, %v5340_v21  ;;  %v5065_v33 = vadd.s32 127, %v5064_v40 }
 0x730   : > { %v6066_v41 = vadd.s32 4294967294, %v5211_v5  ;;  %v5299_v4 = vsel %vm5293_vm6, %v5296_v51, %v5298_v36  ;;  %vm5355_vm3 = vc.u32 %v10204_v62, %v10215_v23  ;;  %v5433_v24 = vshrl.u32 %v10858_v2, %v10219_v60 }
 0x731   : > { %v5352_v44 = vadd.s32 %v5351_v12, %v5342_v27  ;;  %v5441_v20 = vshll.u32 %v10920_v56, %v10016_v61  ;;  %v5442_v10 = vshrl.u32 %v10921_v52, %v10219_v60  ;;  %v5422_v3 = vand.u32 8388607, %v10842_v54 }
 0x732   : > { %v5436_v57 = vshrl.u32 %v10859_v39, %v10219_v60  ;;  %v5439_v49 = vshrl.u32 %v10920_v56, %v10219_v60  ;;  %v5445_v37 = vshrl.u32 %v10860_v1, %v10219_v60  ;;  %v5432_v58 = vshll.u32 %v10908_v8, %v10016_v61 }
 0x733   : > { %v5356_v13 = vadd.s32 1, %v5352_v44  ;;  %v5443_v26 = vor.u32 %v5442_v10, %v5441_v20  ;;  %v5444_v31 = vshll.u32 %v10921_v52, %v10016_v61  ;;  %v5066_v43 = vshll.u32 %v5065_v33, 23 }
 0x734   : > { %v5353_v59 = vmul.u32 %v10139_v47, %v5299_v4  ;;  %v5435_v40 = vshll.u32 %v10858_v2, %v10016_v61  ;;  %v5438_v5 = vshll.u32 %v10859_v39, %v10016_v61  ;;  %vm6067_vm4 = vcmp.lt.s32.totalorder %v6066_v41, 0 }
 0x735   : > { %v5357_v16 = vsel %vm5355_vm3, %v5356_v13, %v5352_v44  ;;  %v10252_v51 = vor.u32 %v5433_v24, %v5432_v58  ;;  %v5446_v36 = vor.u32 %v5445_v37, %v5444_v31  ;;  %vm5450_vm7 = vcmp.lt.s32.totalorder %v10003_v18, 4 }
 0x736   : > { %v5358_v21 = vadd.s32 %v5357_v16, %v5353_v59  ;;  %v10254_v11 = vor.u32 %v5436_v57, %v5435_v40  ;;  %v10256_v27 = vor.u32 %v5439_v49, %v5438_v5  ;;  %v4781_v47 = vadd.f32 1.0, %v10188_v28 }
 0x737   : > { %v5062_v12 = vshrl.u32 %v5044_v32, %v5060_v9  ;;  %v5423_v33 = vor.u32 8388608, %v5422_v3  ;;  %v5456_v61 = vsel %vm5450_vm7, %v5443_v26, 920167782  ;;  %v4918_v4 = vsel %vm4797_vm8, %v4917_v42, %v4916_v34 }
 0x738   : > { %v5061_v44 = vshll.u32 %v10067_v48, %v10192_v7  ;;  %v5067_v24 = vor.u32 4788187, %v5066_v43  ;;  %v5359_v20 = vadd.s32 536870912, %v5358_v21  ;;  %v10267_v10 = vsel %vm6067_vm4, 0, %v6066_v41 }
 0x739   : > { %vm5447_vm10 = vcmp.lt.s32.totalorder %v10003_v18, 1  ;;  %vm5449_vm9 = vcmp.lt.s32.totalorder %v10003_v18, 3  ;;  %v5460_v28 = vsel %vm5450_vm7, %v5446_v36, 1326507024  ;;  %v10289_v42 = vsel %vm10172_vm11, %v9525_v17, %v4918_v4 }
 0x73a   : > { %v10273_v32 = vshrl.u32 %v5359_v20, 30  ;;  %v5455_v34 = vsel %vm5447_vm10, %v10252_v51, %v10254_v11  ;;  %v5457_v48 = vsel %vm5449_vm9, %v10256_v27, %v5456_v61  ;;  %v5459_v7 = vsel %vm5447_vm10, %v10254_v11, %v10256_v27 }
 0x73b   : > { %v5063_v9 = vor.u32 %v5062_v12, %v5061_v44  ;;  %v5461_v41 = vsel %vm5449_vm9, %v5443_v26, %v5460_v28  ;;  %v10293_v3 = vshll.u32 %v5423_v33, 8  ;;  %v10296_v57 = vand.u32 3, %v10168_v14 }
 0x73c   : > { %10936 = vst [vmem:[#allocation30_spill] sm:$0xff] %v10273_v32  ;;  %v4939_v49 = vadd.s32 3, %v4922_v22  ;;  %v5361_v37 = vshll.u32 %v10273_v32, 30  ;;  %vm5448_vm5 = vcmp.lt.s32.totalorder %v10003_v18, 2  ;;  %v5068_v13 = vand.u32 2147483647, %v5067_v24 }
 0x73d   : > { %v5219_v58 = vsub.s32 4294967266, %v10267_v10  ;;  %v5458_v26 = vsel %vm5448_vm5, %v5455_v34, %v5457_v48  ;;  %v5462_v31 = vsel %vm5448_vm5, %v5459_v7, %v5461_v41  ;;  %v10310_v14 = vmul.f32 %v4781_v47, %v10042_v29 }
 0x73e   : > { %v4791_v6 = vxor.u32 2147483648, %v10195_v38  ;;  %v10315_v50 = vmul.f32 %v10289_v42, %v10289_v42  ;;  %v10317_v22 = vsub.s32 %v5358_v21, %v5361_v37  ;;  %v5070_v43 = vcvt.s32.f32 %v5063_v9 }
 0x73f   : > { %v5464_v59 = vand.u32 65535, %v10293_v3  ;;  %v5466_v40 = vand.u32 65535, %v5462_v31  ;;  %v5467_v5 = vshrl.u32 %v5462_v31, 16  ;;  %vm4952_vm8 = vcmp.lt.s32.totalorder %v9544_v45, 0 }
 0x740   : > { %vm5363_vm6 = vcmp.lt.s32.totalorder %v10317_v22, 0  ;;  %v5364_v29 = vsub.s32 0, %v10317_v22  ;;  %v5465_v16 = vshrl.u32 %v10293_v3, 16  ;;  %v5489_v36 = vshrl.u32 %v5458_v26, 16 }
 0x741   : > { %vm4790_vm11 = vcmp.eq.s32.totalorder %v10296_v57, 2  ;;  %v5071_v47 = vmul.f32 %v5070_v43, %v5068_v13  ;;  %v5220_v12 = vadd.s32 127, %v5219_v58  ;;  %v5469_v21 = vmul.u32 %v5467_v5, %v5464_v59 }
 0x742   : > { %v10326_v61 = vand.u32 3, %v4939_v49  ;;  %v5365_v4 = vsel %vm5363_vm6, %v5364_v29, %v10317_v22  ;;  %v5470_v44 = vmul.u32 %v5466_v40, %v5465_v16  ;;  %v10330_v24 = vsel %vm4790_vm11, %v4791_v6, %v10310_v14 }
 0x743   : > { %v5366_v20 = vclz %v5365_v4  ;;  %v5472_v28 = vshll.u32 %v5469_v21, 16  ;;  %v5488_v34 = vand.u32 65535, %v5458_v26  ;;  %v4924_v48 = vmul.f32 -0.001358992, %v10315_v50 }
 0x744   : > { %v4931_v7 = vmul.f32 -0.00019511016, %v10315_v50  ;;  %v5468_v9 = vmul.u32 %v5466_v40, %v5464_v59  ;;  %v5491_v41 = vmul.u32 %v5489_v36, %v5464_v59  ;;  %v5072_v37 = vxor.u32 2147483648, %v5071_v47 }
 0x745   : > { %v5215_v13 = vsub.s32 32, %v10267_v10  ;;  %v5221_v49 = vshll.u32 %v5220_v12, 23  ;;  %v6069_v58 = vadd.s32 4294967294, %v5366_v20  ;;  %v5471_v31 = vmul.u32 %v5467_v5, %v5465_v16 }
 0x746   : > { %v5474_v43 = vshll.u32 %v5470_v44, 16  ;;  %vm5476_vm2 = vc.u32 %v5468_v9, %v5472_v28  ;;  %v5478_v29 = vadd.s32 %v5472_v28, %v5468_v9  ;;  %v5199_v6 = vadd.s32 %v10058_v46, %v10046_v19 }
 0x747   : > { %vm6070_vm13 = vcmp.lt.s32.totalorder %v6069_v58, 0  ;;  %v5477_v26 = vsel %vm5476_vm2, 1, %v10905_v55  ;;  %v5492_v4 = vmul.u32 %v5488_v34, %v5465_v16  ;;  %v10937_v54 = vand.u32 2147483647, %v9544_v45 }
 0x748   : > { %v10344_v33 = vsel %vm6070_vm13, 0, %v6069_v58  ;;  %v5479_v12 = vadd.s32 %v5477_v26, %v5471_v31  ;;  %vm5480_vm14 = vc.u32 %v5478_v29, %v5474_v43  ;;  %v5494_v5 = vshll.u32 %v5491_v41, 16 }
 0x749   : > { %vm10340_vm15 = vcmp.le.f32.partialorder %v10937_v54, 0.7853982  ;;  %v4925_v20 = vadd.f32 0.041655596, %v4924_v48  ;;  %v5073_v28 = vsel %vm4952_vm8, %v5072_v37, %v5071_v47  ;;  %v5217_v19 = vshrl.u32 %v5199_v6, %v5215_v13 }
 0x74a   : > { %v5222_v46 = vor.u32 4788187, %v5221_v49  ;;  %v5216_v9 = vshll.u32 %v10176_v35, %v10267_v10  ;;  %v5431_v54 = vshrl.u32 %v10908_v8, %v10219_v60  ;;  %v5481_v17 = vsel %vm5480_vm14, 1, %v10905_v55 }
 0x74b   : > { %v5490_v32 = vmul.u32 %v5488_v34, %v5464_v59  ;;  %v5374_v58 = vsub.s32 4294967266, %v10344_v33  ;;  %v5452_v48 = vsel %vm5450_vm7, %v10256_v27, 2102212464  ;;  %v5473_v31 = vshrl.u32 %v5469_v21, 16 }
 0x74c   : > { %v5483_v43 = vadd.s32 %v5481_v17, %v5479_v12  ;;  %v5493_v47 = vmul.u32 %v5489_v36, %v5465_v16  ;;  %v5496_v37 = vshll.u32 %v5492_v4, 16  ;;  %v5218_v49 = vor.u32 %v5217_v19, %v5216_v9 }
 0x74d   : > { %vm5498_vm0 = vc.u32 %v5490_v32, %v5494_v5  ;;  %v5500_v13 = vadd.s32 %v5494_v5, %v5490_v32  ;;  %v5223_v35 = vand.u32 2147483647, %v5222_v46  ;;  %v5451_v59 = vsel %vm5447_vm10, %v5431_v54, %v10252_v51 }
 0x74e   : > { %v5484_v10 = vadd.s32 %v5483_v43, %v5473_v31  ;;  %v5499_v60 = vsel %vm5498_vm0, 1, %v10905_v55  ;;  %v5475_v34 = vshrl.u32 %v5470_v44, 16  ;;  %v5375_v6 = vadd.s32 127, %v5374_v58 }
 0x74f   : > { %v5501_v29 = vadd.s32 %v5499_v60, %v5493_v47  ;;  %vm5502_vm12 = vc.u32 %v5500_v13, %v5496_v37  ;;  %v5453_v17 = vsel %vm5449_vm9, %v10254_v11, %v5452_v48  ;;  %v5495_v27 = vshrl.u32 %v5491_v41, 16 }
 0x750   : > { %v5503_v32 = vsel %vm5502_vm12, 1, %v10905_v55  ;;  %v10365_v16 = vadd.s32 %v5484_v10, %v5475_v34  ;;  %v10847_v21 = vand.u32 2147483647, %v9872_v30  ;;  %v10369_v26 = vsub.s32 32, %v10141_v25  ;;  %v10940_v10 = vld [vmem:[#allocation14_spill] sm:$0xff] }
 0x751   : > { %v5505_v36 = vadd.s32 %v5503_v32, %v5501_v29  ;;  %v10372_v51 = vmul.f32 %v4925_v20, %v10315_v50  ;;  %v4932_v44 = vadd.f32 0.008332121, %v4931_v7  ;;  %v10377_v12 = vsel %vm10340_vm15, %v9544_v45, %v5073_v28 }
 0x752   : > { %v5225_v11 = vcvt.s32.f32 %v5218_v49  ;;  %v5354_v41 = vadd.s32 %v10215_v23, %v10204_v62  ;;  %v5497_v5 = vshrl.u32 %v5492_v4, 16  ;;  %v10381_v19 = vadd.s32 %v5500_v13, %v5496_v37 }
 0x753   : > { %v5506_v46 = vadd.s32 %v5505_v36, %v5495_v27  ;;  %v5370_v54 = vsub.s32 32, %v10344_v33  ;;  %v5376_v58 = vshll.u32 %v5375_v6, 23  ;;  %v5454_v7 = vsel %vm5448_vm5, %v5451_v59, %v5453_v17 }
 0x754   : > { %v5226_v9 = vmul.f32 %v5225_v11, %v5223_v35  ;;  %vm5510_vm3 = vc.u32 %v10365_v16, %v10381_v19  ;;  %v5577_v28 = vand.u32 8388607, %v10847_v21  ;;  %v5588_v62 = vshrl.u32 %v10858_v2, %v10369_v26 }
 0x755   : > { %v5507_v20 = vadd.s32 %v5506_v46, %v5497_v5  ;;  %vm4787_vm4 = vcmp.eq.s32.totalorder %v10296_v57, 0  ;;  %v5591_v23 = vshrl.u32 %v10859_v39, %v10369_v26  ;;  %v5594_v4 = vshrl.u32 %v10920_v56, %v10369_v26 }
 0x756   : > { %v5596_v18 = vshll.u32 %v10920_v56, %v10141_v25  ;;  %v5597_v48 = vshrl.u32 %v10921_v52, %v10369_v26  ;;  %v5587_v43 = vshll.u32 %v10908_v8, %v10141_v25  ;;  %v5599_v47 = vshll.u32 %v10921_v52, %v10141_v25 }
 0x757   : > { %v5511_v31 = vadd.s32 1, %v5507_v20  ;;  %v5600_v37 = vshrl.u32 %v10860_v1, %v10369_v26  ;;  %v5508_v13 = vmul.u32 %v10293_v3, %v5454_v7  ;;  %v5590_v49 = vshll.u32 %v10858_v2, %v10141_v25 }
 0x758   : > { %v5593_v56 = vshll.u32 %v10859_v39, %v10141_v25  ;;  %v5598_v35 = vor.u32 %v5597_v48, %v5596_v18  ;;  %vm5107_vm7 = vcmp.lt.s32.totalorder %v10940_v10, 0  ;;  %v5372_v60 = vshrl.u32 %v5354_v41, %v5370_v54 }
 0x759   : > { %v5512_v59 = vsel %vm5510_vm3, %v5511_v31, %v5507_v20  ;;  %v10416_v52 = vor.u32 %v5588_v62, %v5587_v43  ;;  %v5601_v34 = vor.u32 %v5600_v37, %v5599_v47  ;;  %v10418_v29 = vor.u32 %v5591_v23, %v5590_v49 }
 0x75a   : > { %v5513_v1 = vadd.s32 %v5512_v59, %v5508_v13  ;;  %v10420_v3 = vor.u32 %v5594_v4, %v5593_v56  ;;  %vm5605_vm10 = vcmp.lt.s32.totalorder %v10107_v53, 4  ;;  %v5371_v2 = vshll.u32 %v10317_v22, %v10344_v33 }
 0x75b   : > { %v5377_v39 = vor.u32 4788187, %v5376_v58  ;;  %v5578_v25 = vor.u32 8388608, %v5577_v28  ;;  %v5611_v6 = vsel %vm5605_vm10, %v5598_v35, 920167782  ;;  %v4933_v17 = vmul.f32 %v4932_v44, %v10315_v50 }
 0x75c   : > { %v10430_v27 = vmul.f32 %v10377_v12, %v10377_v12  ;;  %v5227_v32 = vxor.u32 2147483648, %v5226_v9  ;;  %v5514_v36 = vadd.s32 536870912, %v5513_v1  ;;  %v5373_v11 = vor.u32 %v5372_v60, %v5371_v2 }
 0x75d   : > { %vm5602_vm9 = vcmp.lt.s32.totalorder %v10107_v53, 1  ;;  %vm5604_vm5 = vcmp.lt.s32.totalorder %v10107_v53, 3  ;;  %v5615_v22 = vsel %vm5605_vm10, %v5601_v34, 1326507024  ;;  %v10941_v46 = vxor.u32 2147483648, %v10310_v14 }
 0x75e   : > { %v10436_v33 = vshrl.u32 %v5514_v36, 30  ;;  %v5610_v44 = vsel %vm5602_vm9, %v10416_v52, %v10418_v29  ;;  %v5612_v41 = vsel %vm5604_vm5, %v10420_v3, %v5611_v6  ;;  %v5614_v5 = vsel %vm5602_vm9, %v10418_v29, %v10420_v3 }
 0x75f   : > { %v10454_v54 = vsel %vm4787_vm4, %v10195_v38, %v10941_v46  ;;  %v5378_v58 = vand.u32 2147483647, %v5377_v39  ;;  %v5616_v7 = vsel %vm5604_vm5, %v5598_v35, %v5615_v22  ;;  %v10458_v20 = vshll.u32 %v5578_v25, 8 }
 0x760   : > { %v5074_v28 = vsub.s32 4, %v10027_v0  ;;  %v10942_v62 = vand.u32 2147483647, %v10940_v10  ;;  %v5516_v14 = vshll.u32 %v10436_v33, 30  ;;  %vm5603_vm11 = vcmp.lt.s32.totalorder %v10107_v53, 2 }
 0x761   : > { %v5086_v38 = vmul.f32 -0.00019511016, %v10430_v27  ;;  %v5380_v4 = vcvt.s32.f32 %v5373_v11  ;;  %v5613_v18 = vsel %vm5603_vm11, %v5610_v44, %v5612_v41  ;;  %v5617_v48 = vsel %vm5603_vm11, %v5614_v5, %v5616_v7 }
 0x762   : > { %vm10463_vm6 = vcmp.le.f32.partialorder %v10942_v62, 0.7853982  ;;  %v10475_v31 = vadd.f32 -0.4999988, %v10372_v51  ;;  %v4934_v43 = vadd.f32 -0.16666654, %v4933_v17  ;;  %v5228_v47 = vsel %vm5107_vm7, %v5227_v32, %v5226_v9 }
 0x763   : > { %v5517_v37 = vsub.s32 %v5513_v1, %v5516_v14  ;;  %v5381_v13 = vmul.f32 %v5380_v4, %v5378_v58  ;;  %v5619_v49 = vand.u32 65535, %v10458_v20  ;;  %v5621_v56 = vand.u32 65535, %v5617_v48 }
 0x764   : > { %v5622_v35 = vshrl.u32 %v5617_v48, 16  ;;  %v5620_v59 = vshrl.u32 %v10458_v20, 16  ;;  %v5644_v34 = vshrl.u32 %v5613_v18, 16  ;;  %v10484_v51 = vsel %vm4952_vm8, %v5074_v28, %v10027_v0 }
 0x765   : > { %vm5518_vm2 = vcmp.lt.s32.totalorder %v5517_v37, 0  ;;  %v5519_v60 = vsub.s32 0, %v5517_v37  ;;  %v5079_v2 = vmul.f32 -0.001358992, %v10430_v27  ;;  %v5087_v39 = vadd.f32 0.008332121, %v5086_v38 }
 0x766   : > { %v5624_v9 = vmul.u32 %v5622_v35, %v5619_v49  ;;  %v10488_v1 = vmul.f32 %v4934_v43, %v10315_v50  ;;  %v10493_v25 = vsel %vm10463_vm6, %v10940_v10, %v5228_v47  ;;  %v5625_v17 = vmul.u32 %v5621_v56, %v5620_v59 }
 0x767   : > { %v5520_v6 = vsel %vm5518_vm2, %v5519_v60, %v5517_v37  ;;  %v5382_v32 = vxor.u32 2147483648, %v5381_v13  ;;  %v5643_v22 = vand.u32 65535, %v5613_v18  ;;  %v10945_v0 = vand.u32 2147483647, %v9660_v63 }
 0x768   : > { %v5521_v36 = vclz %v5520_v6  ;;  %v5627_v11 = vshll.u32 %v5624_v9, 16  ;;  %vm5262_vm13 = vcmp.lt.s32.totalorder %v9660_v63, 0  ;;  %v5623_v41 = vmul.u32 %v5621_v56, %v5619_v49 }
 0x769   : > { %vm10497_vm8 = vcmp.le.f32.partialorder %v10945_v0, 0.7853982  ;;  %v5646_v5 = vmul.u32 %v5644_v34, %v5619_v49  ;;  %v5080_v46 = vadd.f32 0.041655596, %v5079_v2  ;;  %v10503_v58 = vmul.f32 %v5087_v39, %v10430_v27 }
 0x76a   : > { %v10507_v7 = vmul.f32 %v10493_v25, %v10493_v25  ;;  %v6072_v28 = vadd.s32 4294967294, %v5521_v36  ;;  %v5626_v62 = vmul.u32 %v5622_v35, %v5620_v59  ;;  %v5629_v14 = vshll.u32 %v5625_v17, 16 }
 0x76b   : > { %vm5631_vm14 = vc.u32 %v5623_v41, %v5627_v11  ;;  %v5633_v38 = vadd.s32 %v5627_v11, %v5623_v41  ;;  %v5383_v4 = vsel %vm5262_vm13, %v5382_v32, %v5381_v13  ;;  %v5647_v48 = vmul.u32 %v5643_v22, %v5620_v59 }
 0x76c   : > { %vm6073_vm0 = vcmp.lt.s32.totalorder %v6072_v28, 0  ;;  %v5632_v18 = vsel %vm5631_vm14, 1, %v10905_v55  ;;  %v5649_v56 = vshll.u32 %v5646_v5, 16  ;;  %v5241_v60 = vmul.f32 -0.00019511016, %v10507_v7 }
 0x76d   : > { %v5524_v43 = vsel %vm6073_vm0, 0, %v6072_v28  ;;  %v5634_v47 = vadd.s32 %v5632_v18, %v5626_v62  ;;  %vm5635_vm12 = vc.u32 %v5633_v38, %v5629_v14  ;;  %v5509_v2 = vadd.s32 %v10381_v19, %v10365_v16 }
 0x76e   : > { %v5525_v35 = vsub.s32 32, %v5524_v43  ;;  %v5529_v39 = vsub.s32 4294967266, %v5524_v43  ;;  %v10518_v6 = vsel %vm10497_vm8, %v9660_v63, %v5383_v4  ;;  %v5628_v13 = vshrl.u32 %v5624_v9, 16 }
 0x76f   : > { %v5636_v32 = vsel %vm5635_vm12, 1, %v10905_v55  ;;  %v5645_v36 = vmul.u32 %v5643_v22, %v5619_v49  ;;  %v5526_v11 = vshll.u32 %v5517_v37, %v5524_v43  ;;  %v5648_v62 = vmul.u32 %v5644_v34, %v5620_v59 }
 0x770   : > { %v5527_v0 = vshrl.u32 %v5509_v2, %v5525_v35  ;;  %v5530_v41 = vadd.s32 127, %v5529_v39  ;;  %v5638_v28 = vadd.s32 %v5636_v32, %v5634_v47  ;;  %v5651_v14 = vshll.u32 %v5647_v48, 16 }
 0x771   : > { %vm5653_vm3 = vc.u32 %v5645_v36, %v5649_v56  ;;  %v5655_v38 = vadd.s32 %v5649_v56, %v5645_v36  ;;  %v5586_v4 = vshrl.u32 %v10908_v8, %v10369_v26  ;;  %v5607_v49 = vsel %vm5605_vm10, %v10420_v3, 2102212464  ;;  %v10948_v36 = vld [vmem:[#allocation12_spill] sm:$0xff] }
 0x772   : > { %v5528_v16 = vor.u32 %v5527_v0, %v5526_v11  ;;  %v5531_v19 = vshll.u32 %v5530_v41, 23  ;;  %v5639_v18 = vadd.s32 %v5638_v28, %v5628_v13  ;;  %v5654_v21 = vsel %vm5653_vm3, 1, %v10905_v55  ;;  %v10949_v11 = vld [vmem:[#allocation28_spill] sm:$0xff] }
 0x773   : > { %v5656_v37 = vadd.s32 %v5654_v21, %v5648_v62  ;;  %vm5657_vm4 = vc.u32 %v5655_v38, %v5651_v14  ;;  %v10529_v59 = vmul.f32 %v10518_v6, %v10518_v6  ;;  %v5630_v9 = vshrl.u32 %v5625_v17, 16 }
 0x774   : > { %v5532_v34 = vor.u32 4788187, %v5531_v19  ;;  %v5658_v22 = vsel %vm5657_vm4, 1, %v10905_v55  ;;  %v5242_v43 = vadd.f32 0.008332121, %v5241_v60  ;;  %v5606_v47 = vsel %vm5602_vm9, %v5586_v4, %v10416_v52 }
 0x775   : > { %v5650_v8 = vshrl.u32 %v5646_v5, 16  ;;  %v5660_v26 = vadd.s32 %v5658_v22, %v5656_v37  ;;  %vm4786_vm2 = vcmp.lt.s32.totalorder %v10296_v57, 2  ;;  %v5535_v21 = vcvt.s32.f32 %v5528_v16 }
 0x776   : > { %v5533_v3 = vand.u32 2147483647, %v5532_v34  ;;  %v5608_v56 = vsel %vm5604_vm5, %v10418_v29, %v5607_v49  ;;  %v10539_v2 = vadd.s32 %v5639_v18, %v5630_v9  ;;  %v4928_v55 = vmul.f32 %v10475_v31, %v10315_v50 }
 0x777   : > { %v5077_v17 = vsel %vm10340_vm15, 0, %v10484_v51  ;;  %v5652_v52 = vshrl.u32 %v5647_v48, 16  ;;  %v5661_v5 = vadd.s32 %v5660_v26, %v5650_v8  ;;  %v5234_v60 = vmul.f32 -0.001358992, %v10507_v7 }
 0x778   : > { %v5396_v35 = vmul.f32 -0.00019511016, %v10529_v59  ;;  %v5536_v39 = vmul.f32 %v5535_v21, %v5533_v3  ;;  %v10548_v13 = vadd.s32 %v5655_v38, %v5651_v14  ;;  %v4936_v29 = vadd.f32 1.0, %v10488_v1 }
 0x779   : > { %v5081_v32 = vmul.f32 %v5080_v46, %v10430_v27  ;;  %v5609_v50 = vsel %vm5603_vm11, %v5606_v47, %v5608_v56  ;;  %v5662_v31 = vadd.s32 %v5661_v5, %v5652_v52  ;;  %v5089_v40 = vadd.f32 -0.16666654, %v10503_v58  ;;  %v10953_v5 = vld [vmem:[#allocation30_spill] sm:$0xff] }
 0x77a   : > { %v5243_v51 = vmul.f32 %v5242_v43, %v10507_v7  ;;  %v5537_v48 = vxor.u32 2147483648, %v5536_v39  ;;  %vm5665_vm15 = vc.u32 %v10539_v2, %v10548_v13  ;;  %vm4783_vm10 = vweird.f32 %v10948_v36 }
 0x77b   : > { %v5229_v0 = vsub.s32 4, %v10949_v11  ;;  %v10950_v1 = vand.u32 2147483647, %v9788_v15  ;;  %vm5417_vm5 = vcmp.lt.s32.totalorder %v9788_v15, 0  ;;  %v5666_v53 = vadd.s32 1, %v5662_v31 }
 0x77c   : > { %v5235_v58 = vadd.f32 0.041655596, %v5234_v60  ;;  %v5397_v41 = vadd.f32 0.008332121, %v5396_v35  ;;  %v5538_v28 = vsel %vm5417_vm5, %v5537_v48, %v5536_v39  ;;  %v5663_v62 = vmul.u32 %v10458_v20, %v5609_v50 }
 0x77d   : > { %vm10562_vm9 = vcmp.le.f32.partialorder %v10950_v1, 0.7853982  ;;  %v4937_v14 = vmul.f32 %v4936_v29, %v10289_v42  ;;  %v5082_v38 = vadd.f32 -0.4999988, %v5081_v32  ;;  %v5667_v19 = vsel %vm5665_vm15, %v5666_v53, %v5662_v31 }
 0x77e   : > { %v10574_v16 = vsel %vm10562_vm9, %v9788_v15, %v5538_v28  ;;  %v5244_v18 = vadd.f32 -0.16666654, %v5243_v51  ;;  %v5389_v4 = vmul.f32 -0.001358992, %v10529_v59  ;;  %v5668_v37 = vadd.s32 %v5667_v19, %v5663_v62 }
 0x77f   : > { %v10579_v49 = vmul.f32 %v10574_v16, %v10574_v16  ;;  %v4793_v42 = vsel %vm4786_vm2, %v10454_v54, %v10330_v24  ;;  %v4929_v20 = vadd.f32 1.0, %v4928_v55  ;;  %vm4942_vm11 = vcmp.eq.s32.totalorder %v10326_v61, 0 }
 0x780   : > { %v5090_v34 = vmul.f32 %v5089_v40, %v10430_v27  ;;  %vm4941_vm14 = vcmp.lt.s32.totalorder %v10326_v61, 2  ;;  %v5230_v9 = vsel %vm5107_vm7, %v5229_v0, %v10949_v11  ;;  %v5236_v22 = vmul.f32 %v5235_v58, %v10507_v7 }
 0x781   : > { %v5398_v43 = vmul.f32 %v5397_v41, %v10529_v59  ;;  %v5669_v47 = vadd.s32 536870912, %v5668_v37  ;;  %v4943_v8 = vxor.u32 2147483648, %v4937_v14  ;;  %v5083_v57 = vmul.f32 %v5082_v38, %v10430_v27 }
 0x782   : > { %v5094_v24 = vadd.s32 3, %v5077_v17  ;;  %v5551_v54 = vmul.f32 -0.00019511016, %v10579_v49  ;;  %vm4945_vm0 = vcmp.eq.s32.totalorder %v10326_v61, 2  ;;  %v5245_v26 = vmul.f32 %v5244_v18, %v10507_v7  ;;  %v10954_v17 = vld [vmem:[#allocation13_spill] sm:$0xff] }
 0x783   : > { %v5390_v3 = vadd.f32 0.041655596, %v5389_v4  ;;  %v10597_v21 = vshrl.u32 %v5669_v47, 30  ;;  %v4946_v56 = vxor.u32 2147483648, %v4929_v20  ;;  %v5091_v55 = vadd.f32 1.0, %v5090_v34 }
 0x784   : > { %v5232_v52 = vsel %vm10463_vm6, 0, %v5230_v9  ;;  %v5384_v60 = vsub.s32 4, %v10953_v5  ;;  %v10604_v27 = vsel %vm4783_vm10, nan, %v4793_v42  ;;  %vm4938_vm7 = vweird.f32 %v10954_v17 }
 0x785   : > { %v5237_v35 = vadd.f32 -0.4999988, %v5236_v22  ;;  %v5399_v39 = vadd.f32 -0.16666654, %v5398_v43  ;;  %v5671_v29 = vshll.u32 %v10597_v21, 30  ;;  %v4944_v32 = vsel %vm4942_vm11, %v4929_v20, %v4943_v8 }
 0x786   : > { %v5084_v50 = vadd.f32 1.0, %v5083_v57  ;;  %v5095_v31 = vand.u32 3, %v5094_v24  ;;  %v5552_v40 = vadd.f32 0.008332121, %v5551_v54  ;;  %v5246_v23 = vadd.f32 1.0, %v5245_v26 }
 0x787   : > { %v5249_v51 = vadd.s32 3, %v5232_v52  ;;  %v5391_v48 = vmul.f32 %v5390_v3, %v10529_v59  ;;  %v5672_v11 = vsub.s32 %v5668_v37, %v5671_v29  ;;  %v4947_v0 = vsel %vm4945_vm0, %v4946_v56, %v4937_v14 }
 0x788   : > { %v5092_v1 = vmul.f32 %v5091_v55, %v10377_v12  ;;  %v5385_v53 = vsel %vm5262_vm13, %v5384_v60, %v10953_v5  ;;  %v5544_v58 = vmul.f32 -0.001358992, %v10579_v49  ;;  %v5238_v41 = vmul.f32 %v5237_v35, %v10507_v7 }
 0x789   : > { %v5400_v28 = vmul.f32 %v5399_v39, %v10529_v59  ;;  %vm5673_vm6 = vcmp.lt.s32.totalorder %v5672_v11, 0  ;;  %v5674_v62 = vsub.s32 0, %v5672_v11  ;;  %v4948_v38 = vsel %vm4941_vm14, %v4944_v32, %v4947_v0 }
 0x78a   : > { %vm5096_vm12 = vcmp.lt.s32.totalorder %v5095_v31, 2  ;;  %v5101_v19 = vxor.u32 2147483648, %v5084_v50  ;;  %v5539_v14 = vsub.s32 4, %v10436_v33  ;;  %v5553_v12 = vmul.f32 %v5552_v40, %v10579_v49 }
 0x78b   : > { %v5247_v18 = vmul.f32 %v5246_v23, %v10493_v25  ;;  %v5250_v4 = vand.u32 3, %v5249_v51  ;;  %v5392_v37 = vadd.f32 -0.4999988, %v5391_v48  ;;  %v5675_v42 = vsel %vm5673_vm6, %v5674_v62, %v5672_v11 }
 0x78c   : > { %v5098_v20 = vxor.u32 2147483648, %v5092_v1  ;;  %v5387_v7 = vsel %vm10497_vm8, 0, %v5385_v53  ;;  %v5545_v34 = vadd.f32 0.041655596, %v5544_v58  ;;  %v5676_v9 = vclz %v5675_v42 }
 0x78d   : > { %vm5097_vm13 = vcmp.eq.s32.totalorder %v5095_v31, 0  ;;  %vm5100_vm3 = vcmp.eq.s32.totalorder %v5095_v31, 2  ;;  %v5239_v61 = vadd.f32 1.0, %v5238_v41  ;;  %v5401_v22 = vadd.f32 1.0, %v5400_v28 }
 0x78e   : > { %v4949_v43 = vsel %vm4938_vm7, nan, %v4948_v38  ;;  %vm5093_vm4 = vweird.f32 %v9544_v45  ;;  %v5540_v25 = vsel %vm5417_vm5, %v5539_v14, %v10436_v33  ;;  %v5554_v47 = vadd.f32 -0.16666654, %v5553_v12 }
 0x78f   : > { %v6075_v8 = vadd.s32 4294967294, %v5676_v9  ;;  %v5102_v57 = vsel %vm5100_vm3, %v5101_v19, %v5092_v1  ;;  %v5253_v44 = vxor.u32 2147483648, %v5247_v18  ;;  %v5393_v24 = vmul.f32 %v5392_v37, %v10529_v59  ;;  %v10959_v9 = vld [vmem:[#allocation8_spill] sm:$0xff] }
 0x790   : > { %v5404_v54 = vadd.s32 3, %v5387_v7  ;;  %v5099_v26 = vsel %vm5097_vm13, %v5084_v50, %v5098_v20  ;;  %vm5252_vm8 = vcmp.eq.s32.totalorder %v5250_v4, 0  ;;  %v5546_v3 = vmul.f32 %v5545_v34, %v10579_v49 }
 0x791   : > { %vm6076_vm2 = vcmp.lt.s32.totalorder %v6075_v8, 0  ;;  %v5256_v56 = vxor.u32 2147483648, %v5239_v61  ;;  %v5402_v55 = vmul.f32 %v5401_v22, %v10518_v6  ;;  %v5542_v52 = vsel %vm10562_vm9, 0, %v5540_v25 }
 0x792   : > { %v5679_v5 = vsel %vm6076_vm2, 0, %v6075_v8  ;;  %v5555_v33 = vmul.f32 %v5554_v47, %v10579_v49  ;;  %v5664_v60 = vadd.s32 %v10548_v13, %v10539_v2  ;;  %v5103_v39 = vsel %vm5096_vm12, %v5099_v26, %v5102_v57 }
 0x793   : > { %v5680_v35 = vsub.s32 32, %v5679_v5  ;;  %v5684_v59 = vsub.s32 4294967266, %v5679_v5  ;;  %v5254_v29 = vsel %vm5252_vm8, %v5239_v61, %v5253_v44  ;;  %v5394_v32 = vadd.f32 1.0, %v5393_v24 }
 0x794   : > { %v5405_v50 = vand.u32 3, %v5404_v54  ;;  %v5547_v40 = vadd.f32 -0.4999988, %v5546_v3  ;;  %v5681_v23 = vshll.u32 %v5672_v11, %v5679_v5  ;;  %vm5251_vm15 = vcmp.lt.s32.totalorder %v5250_v4, 2  ;;  %v10962_v5 = vld [vmem:[#allocation19_spill] sm:$0xff] }
 0x795   : > { %v5682_v51 = vshrl.u32 %v5664_v60, %v5680_v35  ;;  %v5685_v6 = vadd.s32 127, %v5684_v59  ;;  %vm5255_vm10 = vcmp.eq.s32.totalorder %v5250_v4, 2  ;;  %v5408_v46 = vxor.u32 2147483648, %v5402_v55 }
 0x796   : > { %v5559_v48 = vadd.s32 3, %v5542_v52  ;;  %v5257_v0 = vsel %vm5255_vm10, %v5256_v56, %v5247_v18  ;;  %v5556_v1 = vadd.f32 1.0, %v5555_v33  ;;  %v10644_v2 = vsel %vm5093_vm4, nan, %v5103_v39  ;;  %v10961_v56 = vld [vmem:[#allocation9_spill] sm:$0xff] }
 0x797   : > { %v5683_v53 = vor.u32 %v5682_v51, %v5681_v23  ;;  %v5686_v58 = vshll.u32 %v5685_v6, 23  ;;  %vm5248_vm9 = vweird.f32 %v10940_v10  ;;  %v5258_v13 = vsel %vm5251_vm15, %v5254_v29, %v5257_v0  ;;  %v10964_v23 = vld [vmem:[#allocation17_spill] sm:$0xff]  ;;  %v10965_v6 = vld [vmem:[#allocation18_spill] sm:$0xff] }
 0x798   : > { %v5411_v31 = vxor.u32 2147483648, %v5394_v32  ;;  %vm5403_vm5 = vweird.f32 %v9660_v63  ;;  %vm5407_vm11 = vcmp.eq.s32.totalorder %v5405_v50, 0  ;;  %v5548_v11 = vmul.f32 %v5547_v40, %v10579_v49  ;;  %v10958_v49 = vld [vmem:[#allocation7_spill] sm:$0xff] }
 0x799   : > { %v5687_v41 = vor.u32 4788187, %v5686_v58  ;;  %vm5406_vm14 = vcmp.lt.s32.totalorder %v5405_v50, 2  ;;  %v5409_v28 = vsel %vm5407_vm11, %v5394_v32, %v5408_v46  ;;  %vm5410_vm0 = vcmp.eq.s32.totalorder %v5405_v50, 2  ;;  %v10963_v50 = vld [vmem:[#allocation16_spill] sm:$0xff] }
 0x79a   : > { %v5560_v62 = vand.u32 3, %v5559_v48  ;;  %v5259_v38 = vsel %vm5248_vm9, nan, %v5258_v13  ;;  %v5557_v19 = vmul.f32 %v5556_v1, %v10574_v16  ;;  %v5690_v12 = vcvt.s32.f32 %v5683_v53 }
 0x79b   : > { %v5688_v14 = vand.u32 2147483647, %v5687_v41  ;;  %v5412_v18 = vsel %vm5410_vm0, %v5411_v31, %v5402_v55  ;;  %v10955_v4 = vand.u32 2147483647, %v9872_v30  ;;  %vm5572_vm6 = vcmp.lt.s32.totalorder %v9872_v30, 0  ;;  %v10966_v31 = vld [vmem:[#allocation20_spill] sm:$0xff] }
 0x79c   : > { %v5725_v42 = vmul.f32 %v10604_v27, %v10958_v49  ;;  %v5413_v20 = vsel %vm5406_vm14, %v5409_v28, %v5412_v18  ;;  %v5549_v7 = vadd.f32 1.0, %v5548_v11  ;;  %v5739_v16 = vmul.f32 %v10948_v36, %v10959_v9 }
 0x79d   : > { %vm10652_vm7 = vcmp.le.f32.partialorder %v10955_v4, 0.7853982  ;;  %v5691_v34 = vmul.f32 %v5690_v12, %v5688_v14  ;;  %vm5561_vm12 = vcmp.lt.s32.totalorder %v5560_v62, 2  ;;  %v5726_v61 = vmul.f32 %v4949_v43, %v10958_v49  ;;  %v10960_v43 = vld [vmem:[#allocation15_spill] sm:$0xff] }
 0x79e   : > { %v5740_v22 = vmul.f32 %v10954_v17, %v10959_v9  ;;  %v5741_v25 = vmul.f32 %v9544_v45, %v10959_v9  ;;  %v5563_v47 = vxor.u32 2147483648, %v5557_v19  ;;  %v5742_v27 = vmul.f32 %v10940_v10, %v10959_v9  ;;  %v10968_v14 = vld [vmem:[#allocation11_spill] sm:$0xff] }
 0x79f   : > { %v5692_v8 = vxor.u32 2147483648, %v5691_v34  ;;  %v5743_v57 = vmul.f32 %v9660_v63, %v10959_v9  ;;  %v5414_v44 = vsel %vm5403_vm5, nan, %v5413_v20  ;;  %vm5558_vm13 = vweird.f32 %v9788_v15 }
 0x7a0   : > { %vm5562_vm3 = vcmp.eq.s32.totalorder %v5560_v62, 0  ;;  %vm5565_vm4 = vcmp.eq.s32.totalorder %v5560_v62, 2  ;;  %v5732_v24 = vadd.f32 %v5725_v42, %v10960_v43  ;;  %v5566_v54 = vxor.u32 2147483648, %v5549_v7  ;;  %v10967_v62 = vld [vmem:[#allocation10_spill] sm:$0xff] }
 0x7a1   : > { %v5693_v26 = vsel %vm5572_vm6, %v5692_v8, %v5691_v34  ;;  %v5694_v3 = vsub.s32 4, %v10597_v21  ;;  %v5746_v55 = vadd.f32 %v5739_v16, %v10961_v56  ;;  %v5733_v33 = vadd.f32 %v5726_v61, %v10962_v5  ;;  %v5805_v16 = vpop.permute.xlu0 %5804  ;;  %v10971_v5 = vld [vmem:[#allocation24_spill] sm:$0xff] }
 0x7a2   : > { %v5696_v52 = vsel %vm10652_vm7, %v9872_v30, %v5693_v26  ;;  %v5747_v60 = vadd.f32 %v5740_v22, %v10961_v56  ;;  %v5748_v35 = vadd.f32 %v5741_v25, %v10961_v56  ;;  %v5564_v59 = vsel %vm5562_vm3, %v5549_v7, %v5563_v47  ;;  %v10969_v25 = vld [vmem:[#allocation21_spill] sm:$0xff]  ;;  %v10970_v26 = vld [vmem:[#allocation23_spill] sm:$0xff] }
 0x7a3   : > { %v5698_v39 = vmul.f32 %v5696_v52, %v5696_v52  ;;  %v5749_v29 = vadd.f32 %v5742_v27, %v10961_v56  ;;  %v5750_v32 = vadd.f32 %v5743_v57, %v10961_v56  ;;  %v5753_v40 = vmul.f32 %v5746_v55, %v10963_v50 }
 0x7a4   : > { %v5754_v51 = vmul.f32 %v5747_v60, %v10964_v23  ;;  %v5755_v46 = vmul.f32 %v5748_v35, %v10965_v6  ;;  %vm5767_vm8 = vcmp.ge.f32.partialorder %v10948_v36, 0.0  ;;  %v5567_v48 = vsel %vm5565_vm4, %v5566_v54, %v5557_v19  ;;  %v10972_v35 = vld [vmem:[#allocation22_spill] sm:$0xff] }
 0x7a5   : > { %v5695_v0 = vsel %vm5572_vm6, %v5694_v3, %v10597_v21  ;;  %v5699_v1 = vmul.f32 -0.001358992, %v5698_v39  ;;  %v5706_v53 = vmul.f32 -0.00019511016, %v5698_v39  ;;  %v5568_v58 = vsel %vm5561_vm12, %v5564_v59, %v5567_v48 }
 0x7a6   : > { %v5744_v13 = vmul.f32 %v9788_v15, %v10959_v9  ;;  %v5756_v11 = vmul.f32 %v5749_v29, %v10966_v31  ;;  %vm5768_vm2 = vcmp.ge.f32.partialorder %v10954_v17, 0.0  ;;  %v5727_v19 = vmul.f32 %v10644_v2, %v10958_v49  ;;  %v5815_v31 = vpop.permute.xlu2 %5814 }
 0x7a7   : > { %v5700_v41 = vadd.f32 0.041655596, %v5699_v1  ;;  %v5707_v28 = vadd.f32 0.008332121, %v5706_v53  ;;  %vm5769_vm15 = vcmp.ge.f32.partialorder %v9544_v45, 0.0  ;;  %v5697_v21 = vsel %vm10652_vm7, 0, %v5695_v0  ;;  %v5810_v0 = vpop.permute.xlu1 %5809 }
 0x7a8   : > { %vm5770_vm10 = vcmp.ge.f32.partialorder %v10940_v10, 0.0  ;;  %vm5771_vm9 = vcmp.ge.f32.partialorder %v9660_v63, 0.0  ;;  %v5774_v12 = vsel %vm5767_vm8, %v10968_v14, %v10967_v62  ;;  %v5569_v18 = vsel %vm5558_vm13, nan, %v5568_v58 }
 0x7a9   : > { %v5701_v4 = vmul.f32 %v5700_v41, %v5698_v39  ;;  %v5708_v42 = vmul.f32 %v5707_v28, %v5698_v39  ;;  %v5728_v2 = vmul.f32 %v5259_v38, %v10958_v49  ;;  %v5729_v20 = vmul.f32 %v5414_v44, %v10958_v49  ;;  %v10974_v41 = vld [vmem:[#allocation27_spill] sm:$0xff] }
 0x7aa   : > { %v5751_v37 = vadd.f32 %v5744_v13, %v10961_v56  ;;  %v5775_v7 = vsel %vm5768_vm2, %v10968_v14, %v10967_v62  ;;  %v5776_v34 = vsel %vm5769_vm15, %v10968_v14, %v10967_v62  ;;  %v5734_v47 = vadd.f32 %v5727_v19, %v10969_v25  ;;  %v5820_v19 = vpop.permute.xlu0 %5819 }
 0x7ab   : > { %v5702_v61 = vadd.f32 -0.4999988, %v5701_v4  ;;  %v5709_v22 = vadd.f32 -0.16666654, %v5708_v42  ;;  %v5777_v8 = vsel %vm5770_vm10, %v10968_v14, %v10967_v62  ;;  %v5714_v27 = vadd.s32 3, %v5697_v21 }
 0x7ac   : > { %v5730_v38 = vmul.f32 %v5569_v18, %v10958_v49  ;;  %v5778_v57 = vsel %vm5771_vm9, %v10968_v14, %v10967_v62  ;;  %v5781_v44 = vmul.f32 %v5774_v12, %v10948_v36  ;;  %v5735_v3 = vadd.f32 %v5728_v2, %v10970_v26  ;;  %v10973_v36 = vld [vmem:[#allocation25_spill] sm:$0xff] }
 0x7ad   : > { %v5703_v43 = vmul.f32 %v5702_v61, %v5698_v39  ;;  %v5710_v54 = vmul.f32 %v5709_v22, %v5698_v39  ;;  %v5761_v55 = vadd.f32 %v5754_v51, %v5733_v33  ;;  %v5736_v60 = vadd.f32 %v5729_v20, %v10971_v5 }
 0x7ae   : > { %v5757_v59 = vmul.f32 %v5750_v32, %v10972_v35  ;;  %vm5772_vm5 = vcmp.ge.f32.partialorder %v9788_v15, 0.0  ;;  %v5782_v29 = vmul.f32 %v5775_v7, %v10954_v17  ;;  %v5760_v6 = vadd.f32 %v5753_v40, %v5732_v24  ;;  %v10975_v7 = vld [vmem:[#allocation6_spill] sm:$0xff]  ;;  %v5830_v26 = vpop.permute.xlu2 %5829 }
 0x7af   : > { %v5704_v50 = vadd.f32 1.0, %v5703_v43  ;;  %v5711_v23 = vadd.f32 1.0, %v5710_v54  ;;  %v5762_v48 = vadd.f32 %v5755_v46, %v5734_v47  ;;  %v5715_v1 = vand.u32 3, %v5714_v27 }
 0x7b0   : > { %v5737_v53 = vadd.f32 %v5730_v38, %v10973_v36  ;;  %v5783_v39 = vmul.f32 %v5776_v34, %v9544_v45  ;;  %v5784_v33 = vmul.f32 %v5777_v8, %v10940_v10  ;;  %v5763_v13 = vadd.f32 %v5756_v11, %v5735_v3  ;;  %v10976_v34 = vld [vmem:[#allocation26_spill] sm:$0xff] }
 0x7b1   : > { %v5712_v51 = vmul.f32 %v5711_v23, %v5696_v52  ;;  %v5721_v58 = vxor.u32 2147483648, %v5704_v50  ;;  %v5789_v32 = vadd.f32 %v5782_v29, %v5761_v55  ;;  %v5745_v17 = vmul.f32 %v9872_v30, %v10959_v9 }
 0x7b2   : > { %v5758_v28 = vmul.f32 %v5751_v37, %v10974_v41  ;;  %v5779_v24 = vsel %vm5772_vm5, %v10968_v14, %v10967_v62  ;;  %v5785_v40 = vmul.f32 %v5778_v57, %v9660_v63  ;;  %v5764_v46 = vadd.f32 %v5757_v59, %v5736_v60  ;;  %v5825_v57 = vpop.permute.xlu1 %5824  ;;  %v5835_v60 = vpop.permute.xlu0 %5834 }
 0x7b3   : > { %v5718_v45 = vxor.u32 2147483648, %v5712_v51  ;;  %v5788_v10 = vadd.f32 %v5781_v44, %v5760_v6  ;;  %v5790_v52 = vadd.f32 %v5783_v39, %v5762_v48  ;;  %vm5716_vm11 = vcmp.lt.s32.totalorder %v5715_v1, 2 }
 0x7b4   : > { %vm5717_vm14 = vcmp.eq.s32.totalorder %v5715_v1, 0  ;;  %vm5720_vm0 = vcmp.eq.s32.totalorder %v5715_v1, 2  ;;  %v5765_v11 = vadd.f32 %v5758_v28, %v5737_v53  ;;  %v5791_v12 = vadd.f32 %v5784_v33, %v5763_v13 }
 0x7b5   : > { %v5719_v21 = vsel %vm5717_vm14, %v5704_v50, %v5718_v45  ;;  %v5722_v9 = vsel %vm5720_vm0, %v5721_v58, %v5712_v51  ;;  %v5838_v18 = vmul.f32 %v5810_v0, %v5789_v32  ;;  %vm5713_vm7 = vweird.f32 %v9872_v30 }
 0x7b6   : > { %v5723_v4 = vsel %vm5716_vm11, %v5719_v21, %v5722_v9  ;;  %vm5773_vm6 = vcmp.ge.f32.partialorder %v9872_v30, 0.0  ;;  %v5786_v63 = vmul.f32 %v5779_v24, %v9788_v15  ;;  %v5792_v2 = vadd.f32 %v5785_v40, %v5764_v46  ;;  %v10977_v15 = vld [vmem:[#allocation29_spill] sm:$0xff] }
 0x7b7   : > { %v5724_v42 = vsel %vm5713_vm7, nan, %v5723_v4  ;;  %v5837_v20 = vmul.f32 %v5805_v16, %v5788_v10  ;;  %v5839_v37 = vmul.f32 %v5815_v31, %v5790_v52  ;;  %v4639_v61 = vmul.f32 %v10976_v34, %v10975_v7 }
 0x7b8   : > { %v5731_v22 = vmul.f32 %v5724_v42, %v10958_v49  ;;  %v5752_v25 = vadd.f32 %v5745_v17, %v10961_v56  ;;  %v5780_v47 = vsel %vm5773_vm6, %v10968_v14, %v10967_v62  ;;  %v5793_v8 = vadd.f32 %v5786_v63, %v5765_v11 }
 0x7b9   : > { %v5840_v27 = vmul.f32 %v5820_v19, %v5791_v12  ;;  %v5844_v38 = vadd.f32 %v5838_v18, %v5837_v20  ;;  %v5841_v54 = vmul.f32 %v5825_v57, %v5792_v2  ;;  %v5787_v49 = vmul.f32 %v5780_v47, %v9872_v30 }
 0x7ba   : > { %v5738_v44 = vadd.f32 %v5731_v22, %v4639_v61  ;;  %v5759_v43 = vmul.f32 %v5752_v25, %v10977_v15  ;;  %v5842_v55 = vmul.f32 %v5830_v26, %v5793_v8  ;;  %v5861_v30 = vpop.permute.xlu1 %5860 }
 0x7bb   : > { %v5845_v16 = vadd.f32 %v5844_v38, %v5839_v37  ;;  %v5863_v1 = vperm.slane %v5861_v30, 0 }
 0x7bc   : > { %v5766_v3 = vadd.f32 %v5759_v43, %v5738_v44 }
 0x7bd   : > { %v5846_v56 = vadd.f32 %v5845_v16, %v5840_v27 }
 0x7be   : > { %v5794_v5 = vadd.f32 %v5787_v49, %v5766_v3 }
 0x7bf   : > { %v5847_v62 = vadd.f32 %v5846_v56, %v5841_v54 }
 0x7c0   : > { %v5843_v14 = vmul.f32 %v5835_v60, %v5794_v5 }
 0x7c1   : > { %v5848_v35 = vadd.f32 %v5847_v62, %v5842_v55 }
 0x7c2   : > { %v5849_v59 = vsel %vm1936_vm1, %v5843_v14, 0.0 }
 0x7c3   : > { %v5850_v29 = vadd.f32 %v5849_v59, %v5848_v35 }
 0x7c5   : > { %v5851_v50 = vrot.slane %v5850_v29, 4 }
 0x7c7   : > { %v5852_v23 = vadd.f32 %v5851_v50, %v5850_v29 }
 0x7c9   : > { %v5853_v6 = vrot.slane %v5852_v23, 2 }
 0x7cb   : > { %v5854_v48 = vadd.f32 %v5853_v6, %v5852_v23 }
 0x7cd   : > { %v5855_v0 = vrot.slane %v5854_v48, 1 }
 0x7cf   : > { %v5856_v36 = vadd.f32 %v5855_v0, %v5854_v48 }
 0x7d1   : > { %v5864_v53 = vadd.f32 %v5863_v1, %v5856_v36 }
 0x7d3   : > { %5865 = vst [vmem:[%s378_s25] sm:$0x1] %v5864_v53 }
 0x7d4   : > { %6302 = shalt.err (!%p6299_p3)
}
 0x7d5   : > { %6100 = dma.vmem_to_hbm [thread:$0]  (%p6448_p5), %s5878_s13, 16, %s5880_s14, %s5867_s15  }
 0x7d6 PF: > { %p6106_p4 = scmp.ge.s32.totalorder %s6337_s22, 2  ;;  %s5891_s23 = sand.u32 1, %s6325_s19  }
 0x7d7   : > { %s5892_s12 = scalar_lea.sflag [#allocation4], %s5891_s23 }
 0x7d8   : > { %p6103_p7 = pnand %p6106_p4, %p6452_p6 }
 0x7da   : > { %p6104_p8 = pneg %p6103_p7 }
 0x7dc   : > { %6320 = dma.done.wait (%p6104_p8), %s5892_s12, 16  }
 0x7dd   : > { %6322 = vsyncadd (%p6104_p8), %s5892_s12, 4294967280  ;;  %p23_p9 = scmp.ge.s32.totalorder %s6435_s24, 6   ;;  %s10978_s19 = smov %s6329_s20 }
 0x7de   : > { %s10979_s20 = smov %s6333_s21  ;;  %s10980_s21 = smov %s6446_s27 }
 0x7df   : > { %s10981_s22 = smov %s6435_s24  ;;  %25 = sbr.rel (!%p23_p9) target bundleno = 6 (0x6), region = 103 }
 0x7e4   :  { %5897 = vsyncpa [#allocation4], 1 }
 0x7e5   :  { %5899 = vsyncpa [#allocation4 + $0x1], 1 }

</bundles_post_ra>
